<compile_context>
chip_gen: v7x
topology: tpu7x:2x2x1
jax: 0.10.0
libtpu: 0.0.40
codegen_flags: <defaults>
</compile_context>

<pallas_src>
import functools

import jax
import jax.numpy as jnp
from jax.experimental import pallas as pl
from jax.experimental.pallas import tpu as pltpu


_ROW_ALIGN = 16   # padded row stride multiple (keeps stride and stride//2 8-aligned)


def _round_up(x, m):
    return (x + m - 1) // m * m


def _pad_bytes(shape, itemsize):
    """Rough VMEM footprint (last dim padded to 128 lanes, 2nd-last to 8 sublanes)."""
    dims = list(shape)
    dims[-1] = _round_up(dims[-1], 128)
    if len(dims) >= 2:
        dims[-2] = _round_up(dims[-2], 8)
    n = 1
    for d in dims:
        n *= d
    return n * itemsize


# ----------------------------------------------------------------------------
# Fused encoder-block kernel.
#
# Flattened padded layout of an (H, W, C) image with row stride Wp
# (Wp = round_up(W+2, 16)):
#   flat index p  <->  (row = p // Wp, col = p % Wp) of the zero-padded
#   (H+3, Wp, C) image (1 top halo row, 1 bottom halo row, 1 spare row; col 0
#   left halo, cols W+1..Wp-1 right halo / spare).  Total length (H+3)*Wp.
#
# A 3x3 "same" conv on this layout: out[l] = sum_{dy,dx} flat[l + dy*Wp + dx]
# @ w[dy,dx]; the 3 dx taps are packed along channels so each dy is a single
# MXU matmul with K = 3*C.  Flattened output columns x' >= W are garbage and
# are masked to zero before being scattered back as conv2's padded input.
# ----------------------------------------------------------------------------
def _encoder_block_kernel(x_ref, w1_ref, b1_ref, w2_ref, b2_ref, o_ref,
                          xpk_ref, y1pk_ref, y2_ref, *, H, W, Wp, Whp):
    L = H * Wp                    # flattened conv-output rows (incl. garbage cols)
    LP2 = (H + 2) * Wp            # flattened rows the convs actually read
    Hh, Wh = H // 2, W // 2
    Cin = x_ref.shape[2]
    C = o_ref.shape[3]
    f32 = jnp.float32
    bf16 = jnp.bfloat16

    # ---- pack the 3 dx taps of conv1 along the matmul K dim (bf16) ----------
    # Destination rows [0, LP2) are written in full (aligned start and length),
    # so no zero-fill of the scratch is needed.
    for j in range(3):
        xpk_ref[:, j * Cin:(j + 1) * Cin] = x_ref[0, j:j + LP2, :].astype(bf16)

    # Valid-column mask (flattened cols x' >= W are garbage), built in-kernel.
    colid = jax.lax.broadcasted_iota(jnp.int32, (H, Wp, C), 1).reshape(L, C)
    valid = colid < W

    # ---- conv1: 3 MXU matmuls with K = 3*Cin; bias + ReLU + mask fused ------
    acc1 = jnp.dot(xpk_ref[0:L, :], w1_ref[0], preferred_element_type=f32)
    for dy in (1, 2):
        acc1 = acc1 + jnp.dot(xpk_ref[dy * Wp:dy * Wp + L, :], w1_ref[dy],
                              preferred_element_type=f32)
    y1 = jnp.where(valid, jnp.maximum(acc1 + b1_ref[...], 0.0), 0.0)

    # ---- scatter conv1 output into the padded, dx-packed scratch ------------
    # Zero only the halo strips the scatter never touches; everything else is
    # overwritten by the three shifted copies below.
    y1pk_ref[0:Wp + 8, :] = jnp.zeros((Wp + 8, 3 * C), f32)
    y1pk_ref[L + Wp - 8:LP2, :] = jnp.zeros((Wp + 8, 3 * C), f32)
    for j in range(3):
        y1pk_ref[Wp + 1 - j:Wp + 1 - j + L, j * C:(j + 1) * C] = y1

    # ---- conv2: 3 MXU matmuls with K = 3*C (operands cast to bf16) ----------
    acc2 = jnp.dot(y1pk_ref[0:L, :].astype(bf16), w2_ref[0],
                   preferred_element_type=f32)
    for dy in (1, 2):
        acc2 = acc2 + jnp.dot(y1pk_ref[dy * Wp:dy * Wp + L, :].astype(bf16),
                              w2_ref[dy], preferred_element_type=f32)
    y2_ref[...] = jnp.maximum(acc2 + b2_ref[...], 0.0)

    # ---- fused 2x2 max-pool + write of the next block's padded layout -------
    rs = Wp // 2
    # horizontal pairs via stride-2 reads (garbage cols pair with each other)
    wmax = jnp.maximum(y2_ref[pl.ds(0, L // 2, stride=2), :],
                       y2_ref[pl.ds(1, L // 2, stride=2), :])        # (H*rs, C)
    # vertical pairs: aligned reshape (Wp multiple of 16 -> tile-preserving)
    w3 = wmax.reshape(Hh, Wp, C)
    vmax = jnp.maximum(w3[:, 0:rs, :], w3[:, rs:Wp, :])              # (Hh, rs, C)

    # Output already carries the zero halo the next block consumes.
    o_ref[0, 0:1, :, :] = jnp.zeros((1, Whp, C), f32)                # top halo
    o_ref[0, Hh + 1:Hh + 3, :, :] = jnp.zeros((2, Whp, C), f32)      # bottom halo
    o_ref[0, 1:Hh + 1, 0:1, :] = jnp.zeros((Hh, 1, C), f32)          # left halo
    o_ref[0, 1:Hh + 1, Wh + 1:Whp, :] = jnp.zeros((Hh, Whp - Wh - 1, C), f32)
    o_ref[0, 1:Hh + 1, 1:Wh + 1, :] = vmax[:, 0:Wh, :]               # pooled data


# ----------------------------------------------------------------------------
# One encoder block = one pallas_call.  Input is the flattened padded layout,
# output is the next block's padded layout (as an (N, Hh+3, Whp, C) array).
# ----------------------------------------------------------------------------
def encoder_block(xflat, w1, b1, w2, b2, H, W):
    assert H % 2 == 0 and W % 2 == 0, "MaxPool2d(2) fusion assumes even H, W"
    N, LPin, Cin = xflat.shape
    C = w1.shape[0]
    Wp = _round_up(W + 2, _ROW_ALIGN)
    L = H * Wp
    LP2 = (H + 2) * Wp
    assert LPin == (H + 3) * Wp, (LPin, H, Wp)
    Hh, Wh = H // 2, W // 2
    Whp = _round_up(Wh + 2, _ROW_ALIGN)

    # (Cout, Cin, 3, 3) -> (ky, kx, ci, co) -> (3, 3*Cin, Cout); bf16 MXU operands.
    w1p = jnp.transpose(w1, (2, 3, 1, 0)).reshape(3, 3 * Cin, C).astype(jnp.bfloat16)
    w2p = jnp.transpose(w2, (2, 3, 1, 0)).reshape(3, 3 * C, C).astype(jnp.bfloat16)
    b1r = b1.reshape(1, C)
    b2r = b2.reshape(1, C)

    # Per-block VMEM budget from the actual tile sizes (clamped to [32, 100] MiB).
    vmem = (2 * _pad_bytes((LPin, Cin), 4)            # double-buffered input block
            + 2 * _pad_bytes((Hh + 3, Whp, C), 4)     # double-buffered output block
            + 2 * _pad_bytes((3, 3 * Cin, C), 2)
            + 2 * _pad_bytes((3, 3 * C, C), 2)
            + 4 * _pad_bytes((1, C), 4)
            + _pad_bytes((LP2, 3 * Cin), 2)           # xpk scratch (bf16)
            + _pad_bytes((LP2, 3 * C), 4)             # y1pk scratch (f32)
            + 3 * _pad_bytes((L, C), 4))              # y2 scratch + compiler temps
    vmem_limit = int(min(max(1.5 * vmem + (4 << 20), 32 << 20), 100 << 20))

    kern = functools.partial(_encoder_block_kernel, H=H, W=W, Wp=Wp, Whp=Whp)
    return pl.pallas_call(
        kern,
        out_shape=jax.ShapeDtypeStruct((N, Hh + 3, Whp, C), jnp.float32),
        grid_spec=pltpu.PrefetchScalarGridSpec(
            num_scalar_prefetch=0,
            grid=(N,),
            in_specs=[
                pl.BlockSpec((1, LPin, Cin), lambda n: (n, 0, 0)),
                pl.BlockSpec((3, 3 * Cin, C), lambda n: (0, 0, 0)),
                pl.BlockSpec((1, C), lambda n: (0, 0)),
                pl.BlockSpec((3, 3 * C, C), lambda n: (0, 0, 0)),
                pl.BlockSpec((1, C), lambda n: (0, 0)),
            ],
            out_specs=pl.BlockSpec((1, Hh + 3, Whp, C), lambda n: (n, 0, 0, 0)),
            scratch_shapes=[
                pltpu.VMEM((LP2, 3 * Cin), jnp.bfloat16),   # dx-packed conv1 input
                pltpu.VMEM((LP2, 3 * C), jnp.float32),      # dx-packed conv1 output
                pltpu.VMEM((L, C), jnp.float32),            # conv2 output (pre-pool)
            ],
        ),
        compiler_params=pltpu.CompilerParams(
            dimension_semantics=("parallel",),
            vmem_limit_bytes=vmem_limit,
        ),
    )(xflat, w1p, b1r, w2p, b2r)


# ----------------------------------------------------------------------------
# Encoder forward: list of per-block activations (NCHW, matching PyTorch).
# ----------------------------------------------------------------------------
def _prep_input(x_nchw):
    """NCHW -> flattened zero-padded channels-last layout (done once)."""
    N, Cin, H, W = x_nchw.shape
    Wp = _round_up(W + 2, _ROW_ALIGN)
    x = jnp.transpose(x_nchw, (0, 2, 3, 1))                       # NHWC
    xp = jnp.pad(x, ((0, 0), (1, 2), (1, Wp - W - 1), (0, 0)))    # (N, H+3, Wp, C)
    return xp.reshape(N, (H + 3) * Wp, Cin)


def encoder_forward(x_nchw, params):
    N, _, H, W = x_nchw.shape
    xflat = _prep_input(x_nchw)
    activations = []
    h, w = H, W
    for (cw1, cb1, cw2, cb2) in params:
        out4 = encoder_block(xflat, cw1, cb1, cw2, cb2, h, w)     # (N, h/2+3, Whp, C)
        hh, wh = h // 2, w // 2
        # user-facing activation, cropped back to NCHW (PyTorch convention)
        act = out4[:, 1:hh + 1, 1:wh + 1, :]
        activations.append(jnp.transpose(act, (0, 3, 1, 2)))
        # metadata-only reshape: next block's flattened padded input
        xflat = out4.reshape(N, out4.shape[1] * out4.shape[2], out4.shape[3])
        h, w = hh, wh
    return activations


# ----------------------------------------------------------------------------
# Deterministic parameter init (same shapes nn.Conv2d would create).
# ----------------------------------------------------------------------------
def init_encoder_params(key, num_blocks=4, multiplier=16):
    params = []
    cin, cout = multiplier, 2 * multiplier
    for blk in range(num_blocks):
        key, k1, k2, k3, k4 = jax.random.split(key, 5)
        w1 = jax.random.normal(k1, (cout, cin, 3, 3), jnp.float32) * (2.0 / (cin * 9)) ** 0.5
        b1 = jax.random.normal(k2, (cout,), jnp.float32) * 0.01
        w2 = jax.random.normal(k3, (cout, cout, 3, 3), jnp.float32) * (2.0 / (cout * 9)) ** 0.5
        b2 = jax.random.normal(k4, (cout,), jnp.float32) * 0.01
        params.append((w1, b1, w2, b2))
        if blk < num_blocks - 1:
            cin, cout = cout, cout * 2
    return params


# ----------------------------------------------------------------------------
# Pure-JAX reference (NCHW, like PyTorch) for validation.
# ----------------------------------------------------------------------------
def _ref_conv3x3_relu(x, w, b):
    y = jax.lax.conv_general_dilated(
        x, w, window_strides=(1, 1), padding=((1, 1), (1, 1)),
        dimension_numbers=("NCHW", "OIHW", "NCHW"),
        precision=jax.lax.Precision.HIGHEST)
    return jnp.maximum(y + b[None, :, None, None], 0.0)


def _ref_maxpool(x):
    return jax.lax.reduce_window(x, -jnp.inf, jax.lax.max,
                                 (1, 1, 2, 2), (1, 1, 2, 2), "VALID")


def ref_encoder(x, params):
    acts = []
    for (w1, b1, w2, b2) in params:
        x = _ref_conv3x3_relu(x, w1, b1)
        x = _ref_conv3x3_relu(x, w2, b2)
        x = _ref_maxpool(x)
        acts.append(x)
    return acts


if __name__ == "__main__":
    key = jax.random.PRNGKey(0)
    kx, kp = jax.random.split(key)

    num_blocks, multiplier = 4, 4
    x = jax.random.normal(kx, (2, multiplier, 16, 16), jnp.float32)   # NCHW
    params = init_encoder_params(kp, num_blocks=num_blocks, multiplier=multiplier)

    fwd = jax.jit(encoder_forward)
    acts = jax.block_until_ready(fwd(x, params))

    refs = ref_encoder(x, params)
    for a, r in zip(acts, refs):
        assert a.shape == r.shape, (a.shape, r.shape)
        # bf16 MXU operands vs. a full-f32 HIGHEST reference: check the max
        # deviation relative to the activation scale (structural bugs would be
        # O(scale); bf16 rounding through 8 convs is well under 5%).
        scale = float(jnp.maximum(jnp.max(jnp.abs(r)), 1e-3))
        err = float(jnp.max(jnp.abs(a - r)))
        assert err <= 5e-2 * scale, ("kernel/reference mismatch", err, scale)

    print("KERNEL_OK")
</pallas_src>

<mosaic_0001>
module attributes {stable_mosaic.version = 11 : i64} {
  func.func @_encoder_block_kernel(%arg0: i32, %arg1: memref<1x608x4xf32, #tpu.memory_space<vmem>>, %arg2: memref<3x12x8xbf16, #tpu.memory_space<vmem>>, %arg3: memref<1x8xf32, #tpu.memory_space<vmem>>, %arg4: memref<3x24x8xbf16, #tpu.memory_space<vmem>>, %arg5: memref<1x8xf32, #tpu.memory_space<vmem>>, %arg6: memref<1x11x16x8xf32, #tpu.memory_space<vmem>>, %arg7: memref<576x12xbf16, #tpu.memory_space<vmem>>, %arg8: memref<576x24xf32, #tpu.memory_space<vmem>>, %arg9: memref<512x8xf32, #tpu.memory_space<vmem>>) attributes {dimension_semantics = [#tpu.dimension_semantics<parallel>], iteration_bounds = array<i64: 2>, scalar_prefetch = 0 : i64, scratch_operands = 3 : i64, tpu.core_type = #tpu.core_type<tc>, window_params = [{transform_indices = @transform_0, window_bounds = array<i64: 1, 608, 4>}, {pipeline_mode = #tpu.pipeline_mode<synchronous>, transform_indices = @transform_1, window_bounds = array<i64: 3, 12, 8>}, {pipeline_mode = #tpu.pipeline_mode<synchronous>, transform_indices = @transform_2, window_bounds = array<i64: 1, 8>}, {pipeline_mode = #tpu.pipeline_mode<synchronous>, transform_indices = @transform_3, window_bounds = array<i64: 3, 24, 8>}, {pipeline_mode = #tpu.pipeline_mode<synchronous>, transform_indices = @transform_4, window_bounds = array<i64: 1, 8>}, {transform_indices = @transform_5, window_bounds = array<i64: 1, 11, 16, 8>}]} {
    %c0 = arith.constant 0 : index
    %c0_0 = arith.constant 0 : index
    %c0_1 = arith.constant 0 : index
    %0 = vector.load %arg1[%c0, %c0_0, %c0_1] : memref<1x608x4xf32, #tpu.memory_space<vmem>>, vector<1x576x4xf32>
    %1 = vector.shape_cast %0 : vector<1x576x4xf32> to vector<576x4xf32>
    %2 = arith.truncf %1 : vector<576x4xf32> to vector<576x4xbf16>
    %c0_2 = arith.constant 0 : index
    %c0_3 = arith.constant 0 : index
    %3 = vector.load %arg7[%c0_2, %c0_3] : memref<576x12xbf16, #tpu.memory_space<vmem>>, vector<576x4xbf16>
    tpu.vector_store %arg7[%c0_2, %c0_3], %2 {strides = array<i32>} : memref<576x12xbf16, #tpu.memory_space<vmem>>, vector<576x4xbf16>,
    %c0_4 = arith.constant 0 : index
    %c1 = arith.constant 1 : index
    %c0_5 = arith.constant 0 : index
    %4 = vector.load %arg1[%c0_4, %c1, %c0_5] : memref<1x608x4xf32, #tpu.memory_space<vmem>>, vector<1x576x4xf32>
    %5 = vector.shape_cast %4 : vector<1x576x4xf32> to vector<576x4xf32>
    %6 = arith.truncf %5 : vector<576x4xf32> to vector<576x4xbf16>
    %c0_6 = arith.constant 0 : index
    %c4 = arith.constant 4 : index
    %7 = vector.load %arg7[%c0_6, %c4] : memref<576x12xbf16, #tpu.memory_space<vmem>>, vector<576x4xbf16>
    tpu.vector_store %arg7[%c0_6, %c4], %6 {strides = array<i32>} : memref<576x12xbf16, #tpu.memory_space<vmem>>, vector<576x4xbf16>,
    %c0_7 = arith.constant 0 : index
    %c2 = arith.constant 2 : index
    %c0_8 = arith.constant 0 : index
    %8 = vector.load %arg1[%c0_7, %c2, %c0_8] : memref<1x608x4xf32, #tpu.memory_space<vmem>>, vector<1x576x4xf32>
    %9 = vector.shape_cast %8 : vector<1x576x4xf32> to vector<576x4xf32>
    %10 = arith.truncf %9 : vector<576x4xf32> to vector<576x4xbf16>
    %c0_9 = arith.constant 0 : index
    %c8 = arith.constant 8 : index
    %11 = vector.load %arg7[%c0_9, %c8] : memref<576x12xbf16, #tpu.memory_space<vmem>>, vector<576x4xbf16>
    tpu.vector_store %arg7[%c0_9, %c8], %10 {strides = array<i32>} : memref<576x12xbf16, #tpu.memory_space<vmem>>, vector<576x4xbf16>,
    %12 = tpu.iota {dimensions = array<i32: 1>} : vector<16x32x8xi32>
    %13 = vector.shape_cast %12 : vector<16x32x8xi32> to vector<512x8xi32>
    %c16_i32 = arith.constant 16 : i32
    %14 = vector.broadcast %c16_i32 : i32 to vector<512x8xi32>
    %15 = arith.cmpi slt, %13, %14 : vector<512x8xi32>
    %c0_10 = arith.constant 0 : index
    %c0_11 = arith.constant 0 : index
    %16 = vector.load %arg7[%c0_10, %c0_11] : memref<576x12xbf16, #tpu.memory_space<vmem>>, vector<512x12xbf16>
    %c0_12 = arith.constant 0 : index
    %c0_13 = arith.constant 0 : index
    %c0_14 = arith.constant 0 : index
    %17 = vector.load %arg2[%c0_12, %c0_13, %c0_14] : memref<3x12x8xbf16, #tpu.memory_space<vmem>>, vector<1x12x8xbf16>
    %18 = vector.shape_cast %17 : vector<1x12x8xbf16> to vector<12x8xbf16>
    %cst = arith.constant dense<0.000000e+00> : vector<512x8xf32>
    %19 = tpu.matmul %16, %18, %cst {dimension_numbers = #tpu.dot_dimension_numbers<[1], [0], [0], [1], [0, 0, 1, 1], [], []>} : vector<512x12xbf16>, vector<12x8xbf16>, vector<512x8xf32> -> vector<512x8xf32>
    %c32 = arith.constant 32 : index
    %c0_15 = arith.constant 0 : index
    %20 = vector.load %arg7[%c32, %c0_15] : memref<576x12xbf16, #tpu.memory_space<vmem>>, vector<512x12xbf16>
    %c1_16 = arith.constant 1 : index
    %c0_17 = arith.constant 0 : index
    %c0_18 = arith.constant 0 : index
    %21 = vector.load %arg2[%c1_16, %c0_17, %c0_18] : memref<3x12x8xbf16, #tpu.memory_space<vmem>>, vector<1x12x8xbf16>
    %22 = vector.shape_cast %21 : vector<1x12x8xbf16> to vector<12x8xbf16>
    %cst_19 = arith.constant dense<0.000000e+00> : vector<512x8xf32>
    %23 = tpu.matmul %20, %22, %cst_19 {dimension_numbers = #tpu.dot_dimension_numbers<[1], [0], [0], [1], [0, 0, 1, 1], [], []>} : vector<512x12xbf16>, vector<12x8xbf16>, vector<512x8xf32> -> vector<512x8xf32>
    %24 = arith.addf %19, %23 : vector<512x8xf32>
    %c64 = arith.constant 64 : index
    %c0_20 = arith.constant 0 : index
    %25 = vector.load %arg7[%c64, %c0_20] : memref<576x12xbf16, #tpu.memory_space<vmem>>, vector<512x12xbf16>
    %c2_21 = arith.constant 2 : index
    %c0_22 = arith.constant 0 : index
    %c0_23 = arith.constant 0 : index
    %26 = vector.load %arg2[%c2_21, %c0_22, %c0_23] : memref<3x12x8xbf16, #tpu.memory_space<vmem>>, vector<1x12x8xbf16>
    %27 = vector.shape_cast %26 : vector<1x12x8xbf16> to vector<12x8xbf16>
    %cst_24 = arith.constant dense<0.000000e+00> : vector<512x8xf32>
    %28 = tpu.matmul %25, %27, %cst_24 {dimension_numbers = #tpu.dot_dimension_numbers<[1], [0], [0], [1], [0, 0, 1, 1], [], []>} : vector<512x12xbf16>, vector<12x8xbf16>, vector<512x8xf32> -> vector<512x8xf32>
    %29 = arith.addf %24, %28 : vector<512x8xf32>
    %c0_25 = arith.constant 0 : index
    %c0_26 = arith.constant 0 : index
    %30 = vector.load %arg3[%c0_25, %c0_26] : memref<1x8xf32, #tpu.memory_space<vmem>>, vector<1x8xf32>
    %31 = vector.broadcast %30 : vector<1x8xf32> to vector<512x8xf32>
    %32 = arith.addf %29, %31 : vector<512x8xf32>
    %cst_27 = arith.constant 0.000000e+00 : f32
    %33 = vector.broadcast %cst_27 : f32 to vector<512x8xf32>
    %34 = arith.maximumf %32, %33 : vector<512x8xf32>
    %cst_28 = arith.constant 0.000000e+00 : f32
    %35 = vector.broadcast %cst_28 : f32 to vector<512x8xf32>
    %36 = arith.select %15, %34, %35 : vector<512x8xi1>, vector<512x8xf32>
    %cst_29 = arith.constant 0.000000e+00 : f32
    %37 = vector.broadcast %cst_29 : f32 to vector<40x24xf32>
    %c0_30 = arith.constant 0 : index
    %c0_31 = arith.constant 0 : index
    %38 = vector.load %arg8[%c0_30, %c0_31] : memref<576x24xf32, #tpu.memory_space<vmem>>, vector<40x24xf32>
    tpu.vector_store %arg8[%c0_30, %c0_31], %37 {strides = array<i32>} : memref<576x24xf32, #tpu.memory_space<vmem>>, vector<40x24xf32>,
    %cst_32 = arith.constant 0.000000e+00 : f32
    %39 = vector.broadcast %cst_32 : f32 to vector<40x24xf32>
    %c536 = arith.constant 536 : index
    %c0_33 = arith.constant 0 : index
    %40 = vector.load %arg8[%c536, %c0_33] : memref<576x24xf32, #tpu.memory_space<vmem>>, vector<40x24xf32>
    tpu.vector_store %arg8[%c536, %c0_33], %39 {strides = array<i32>} : memref<576x24xf32, #tpu.memory_space<vmem>>, vector<40x24xf32>,
    %c33 = arith.constant 33 : index
    %c0_34 = arith.constant 0 : index
    %41 = vector.load %arg8[%c33, %c0_34] : memref<576x24xf32, #tpu.memory_space<vmem>>, vector<512x8xf32>
    tpu.vector_store %arg8[%c33, %c0_34], %36 {strides = array<i32>} : memref<576x24xf32, #tpu.memory_space<vmem>>, vector<512x8xf32>,
    %c32_35 = arith.constant 32 : index
    %c8_36 = arith.constant 8 : index
    %42 = vector.load %arg8[%c32_35, %c8_36] : memref<576x24xf32, #tpu.memory_space<vmem>>, vector<512x8xf32>
    tpu.vector_store %arg8[%c32_35, %c8_36], %36 {strides = array<i32>} : memref<576x24xf32, #tpu.memory_space<vmem>>, vector<512x8xf32>,
    %c31 = arith.constant 31 : index
    %c16 = arith.constant 16 : index
    %43 = vector.load %arg8[%c31, %c16] : memref<576x24xf32, #tpu.memory_space<vmem>>, vector<512x8xf32>
    tpu.vector_store %arg8[%c31, %c16], %36 {strides = array<i32>} : memref<576x24xf32, #tpu.memory_space<vmem>>, vector<512x8xf32>,
    %c0_37 = arith.constant 0 : index
    %c0_38 = arith.constant 0 : index
    %44 = vector.load %arg8[%c0_37, %c0_38] : memref<576x24xf32, #tpu.memory_space<vmem>>, vector<512x24xf32>
    %45 = arith.truncf %44 : vector<512x24xf32> to vector<512x24xbf16>
    %c0_39 = arith.constant 0 : index
    %c0_40 = arith.constant 0 : index
    %c0_41 = arith.constant 0 : index
    %46 = vector.load %arg4[%c0_39, %c0_40, %c0_41] : memref<3x24x8xbf16, #tpu.memory_space<vmem>>, vector<1x24x8xbf16>
    %47 = vector.shape_cast %46 : vector<1x24x8xbf16> to vector<24x8xbf16>
    %cst_42 = arith.constant dense<0.000000e+00> : vector<512x8xf32>
    %48 = tpu.matmul %45, %47, %cst_42 {dimension_numbers = #tpu.dot_dimension_numbers<[1], [0], [0], [1], [0, 0, 1, 1], [], []>} : vector<512x24xbf16>, vector<24x8xbf16>, vector<512x8xf32> -> vector<512x8xf32>
    %c32_43 = arith.constant 32 : index
    %c0_44 = arith.constant 0 : index
    %49 = vector.load %arg8[%c32_43, %c0_44] : memref<576x24xf32, #tpu.memory_space<vmem>>, vector<512x24xf32>
    %50 = arith.truncf %49 : vector<512x24xf32> to vector<512x24xbf16>
    %c1_45 = arith.constant 1 : index
    %c0_46 = arith.constant 0 : index
    %c0_47 = arith.constant 0 : index
    %51 = vector.load %arg4[%c1_45, %c0_46, %c0_47] : memref<3x24x8xbf16, #tpu.memory_space<vmem>>, vector<1x24x8xbf16>
    %52 = vector.shape_cast %51 : vector<1x24x8xbf16> to vector<24x8xbf16>
    %cst_48 = arith.constant dense<0.000000e+00> : vector<512x8xf32>
    %53 = tpu.matmul %50, %52, %cst_48 {dimension_numbers = #tpu.dot_dimension_numbers<[1], [0], [0], [1], [0, 0, 1, 1], [], []>} : vector<512x24xbf16>, vector<24x8xbf16>, vector<512x8xf32> -> vector<512x8xf32>
    %54 = arith.addf %48, %53 : vector<512x8xf32>
    %c64_49 = arith.constant 64 : index
    %c0_50 = arith.constant 0 : index
    %55 = vector.load %arg8[%c64_49, %c0_50] : memref<576x24xf32, #tpu.memory_space<vmem>>, vector<512x24xf32>
    %56 = arith.truncf %55 : vector<512x24xf32> to vector<512x24xbf16>
    %c2_51 = arith.constant 2 : index
    %c0_52 = arith.constant 0 : index
    %c0_53 = arith.constant 0 : index
    %57 = vector.load %arg4[%c2_51, %c0_52, %c0_53] : memref<3x24x8xbf16, #tpu.memory_space<vmem>>, vector<1x24x8xbf16>
    %58 = vector.shape_cast %57 : vector<1x24x8xbf16> to vector<24x8xbf16>
    %cst_54 = arith.constant dense<0.000000e+00> : vector<512x8xf32>
    %59 = tpu.matmul %56, %58, %cst_54 {dimension_numbers = #tpu.dot_dimension_numbers<[1], [0], [0], [1], [0, 0, 1, 1], [], []>} : vector<512x24xbf16>, vector<24x8xbf16>, vector<512x8xf32> -> vector<512x8xf32>
    %60 = arith.addf %54, %59 : vector<512x8xf32>
    %c0_55 = arith.constant 0 : index
    %c0_56 = arith.constant 0 : index
    %61 = vector.load %arg5[%c0_55, %c0_56] : memref<1x8xf32, #tpu.memory_space<vmem>>, vector<1x8xf32>
    %62 = vector.broadcast %61 : vector<1x8xf32> to vector<512x8xf32>
    %63 = arith.addf %60, %62 : vector<512x8xf32>
    %cst_57 = arith.constant 0.000000e+00 : f32
    %64 = vector.broadcast %cst_57 : f32 to vector<512x8xf32>
    %65 = arith.maximumf %63, %64 : vector<512x8xf32>
    %c0_58 = arith.constant 0 : index
    %c0_59 = arith.constant 0 : index
    %66 = vector.load %arg9[%c0_58, %c0_59] : memref<512x8xf32, #tpu.memory_space<vmem>>, vector<512x8xf32>
    tpu.vector_store %arg9[%c0_58, %c0_59], %65 {strides = array<i32>} : memref<512x8xf32, #tpu.memory_space<vmem>>, vector<512x8xf32>,
    %c0_60 = arith.constant 0 : index
    %c0_61 = arith.constant 0 : index
    %67 = tpu.strided_load %arg9[%c0_60, %c0_61] {strides = array<i32: 2, 1>} : memref<512x8xf32, #tpu.memory_space<vmem>>, vector<256x8xf32>
    %c1_62 = arith.constant 1 : index
    %c0_63 = arith.constant 0 : index
    %68 = tpu.strided_load %arg9[%c1_62, %c0_63] {strides = array<i32: 2, 1>} : memref<512x8xf32, #tpu.memory_space<vmem>>, vector<256x8xf32>
    %69 = arith.maximumf %67, %68 : vector<256x8xf32>
    %70 = vector.shape_cast %69 : vector<256x8xf32> to vector<8x32x8xf32>
    %71 = vector.extract_strided_slice %70 {offsets = [0, 0, 0], sizes = [8, 16, 8], strides = [1, 1, 1]} : vector<8x32x8xf32> to vector<8x16x8xf32>
    %72 = vector.extract_strided_slice %70 {offsets = [0, 16, 0], sizes = [8, 16, 8], strides = [1, 1, 1]} : vector<8x32x8xf32> to vector<8x16x8xf32>
    %73 = arith.maximumf %71, %72 : vector<8x16x8xf32>
    %cst_64 = arith.constant 0.000000e+00 : f32
    %74 = vector.broadcast %cst_64 : f32 to vector<1x16x8xf32>
    %c0_65 = arith.constant 0 : index
    %c0_66 = arith.constant 0 : index
    %c0_67 = arith.constant 0 : index
    %c0_68 = arith.constant 0 : index
    %75 = vector.load %arg6[%c0_65, %c0_66, %c0_67, %c0_68] : memref<1x11x16x8xf32, #tpu.memory_space<vmem>>, vector<1x1x16x8xf32>
    %76 = vector.shape_cast %75 : vector<1x1x16x8xf32> to vector<1x16x8xf32>
    %77 = vector.shape_cast %74 : vector<1x16x8xf32> to vector<1x1x16x8xf32>
    tpu.vector_store %arg6[%c0_65, %c0_66, %c0_67, %c0_68], %77 {strides = array<i32>} : memref<1x11x16x8xf32, #tpu.memory_space<vmem>>, vector<1x1x16x8xf32>,
    %cst_69 = arith.constant 0.000000e+00 : f32
    %78 = vector.broadcast %cst_69 : f32 to vector<2x16x8xf32>
    %c0_70 = arith.constant 0 : index
    %c9 = arith.constant 9 : index
    %c0_71 = arith.constant 0 : index
    %c0_72 = arith.constant 0 : index
    %79 = vector.load %arg6[%c0_70, %c9, %c0_71, %c0_72] : memref<1x11x16x8xf32, #tpu.memory_space<vmem>>, vector<1x2x16x8xf32>
    %80 = vector.shape_cast %79 : vector<1x2x16x8xf32> to vector<2x16x8xf32>
    %81 = vector.shape_cast %78 : vector<2x16x8xf32> to vector<1x2x16x8xf32>
    tpu.vector_store %arg6[%c0_70, %c9, %c0_71, %c0_72], %81 {strides = array<i32>} : memref<1x11x16x8xf32, #tpu.memory_space<vmem>>, vector<1x2x16x8xf32>,
    %cst_73 = arith.constant 0.000000e+00 : f32
    %82 = vector.broadcast %cst_73 : f32 to vector<8x1x8xf32>
    %c0_74 = arith.constant 0 : index
    %c1_75 = arith.constant 1 : index
    %c0_76 = arith.constant 0 : index
    %c0_77 = arith.constant 0 : index
    %83 = vector.load %arg6[%c0_74, %c1_75, %c0_76, %c0_77] : memref<1x11x16x8xf32, #tpu.memory_space<vmem>>, vector<1x8x1x8xf32>
    %84 = vector.shape_cast %83 : vector<1x8x1x8xf32> to vector<8x1x8xf32>
    %85 = vector.shape_cast %82 : vector<8x1x8xf32> to vector<1x8x1x8xf32>
    tpu.vector_store %arg6[%c0_74, %c1_75, %c0_76, %c0_77], %85 {strides = array<i32>} : memref<1x11x16x8xf32, #tpu.memory_space<vmem>>, vector<1x8x1x8xf32>,
    %cst_78 = arith.constant 0.000000e+00 : f32
    %86 = vector.broadcast %cst_78 : f32 to vector<8x7x8xf32>
    %c0_79 = arith.constant 0 : index
    %c1_80 = arith.constant 1 : index
    %c9_81 = arith.constant 9 : index
    %c0_82 = arith.constant 0 : index
    %87 = vector.load %arg6[%c0_79, %c1_80, %c9_81, %c0_82] : memref<1x11x16x8xf32, #tpu.memory_space<vmem>>, vector<1x8x7x8xf32>
    %88 = vector.shape_cast %87 : vector<1x8x7x8xf32> to vector<8x7x8xf32>
    %89 = vector.shape_cast %86 : vector<8x7x8xf32> to vector<1x8x7x8xf32>
    tpu.vector_store %arg6[%c0_79, %c1_80, %c9_81, %c0_82], %89 {strides = array<i32>} : memref<1x11x16x8xf32, #tpu.memory_space<vmem>>, vector<1x8x7x8xf32>,
    %90 = vector.extract_strided_slice %73 {offsets = [0, 0, 0], sizes = [8, 8, 8], strides = [1, 1, 1]} : vector<8x16x8xf32> to vector<8x8x8xf32>
    %c0_83 = arith.constant 0 : index
    %c1_84 = arith.constant 1 : index
    %c1_85 = arith.constant 1 : index
    %c0_86 = arith.constant 0 : index
    %91 = vector.load %arg6[%c0_83, %c1_84, %c1_85, %c0_86] : memref<1x11x16x8xf32, #tpu.memory_space<vmem>>, vector<1x8x8x8xf32>
    %92 = vector.shape_cast %91 : vector<1x8x8x8xf32> to vector<8x8x8xf32>
    %93 = vector.shape_cast %90 : vector<8x8x8xf32> to vector<1x8x8x8xf32>
    tpu.vector_store %arg6[%c0_83, %c1_84, %c1_85, %c0_86], %93 {strides = array<i32>} : memref<1x11x16x8xf32, #tpu.memory_space<vmem>>, vector<1x8x8x8xf32>,
    return
  }
  func.func @transform_0(%arg0: i32) -> (i32, i32, i32) {
    %c0_i32 = arith.constant 0 : i32
    %c0_i32_0 = arith.constant 0 : i32
    %c0_i32_1 = arith.constant 0 : i32
    return %arg0, %c0_i32, %c0_i32_0 : i32, i32, i32
  }
  func.func @transform_1(%arg0: i32) -> (i32, i32, i32) {
    %c0_i32 = arith.constant 0 : i32
    %c0_i32_0 = arith.constant 0 : i32
    %c0_i32_1 = arith.constant 0 : i32
    %c0_i32_2 = arith.constant 0 : i32
    return %c0_i32, %c0_i32_0, %c0_i32_1 : i32, i32, i32
  }
  func.func @transform_2(%arg0: i32) -> (i32, i32) {
    %c0_i32 = arith.constant 0 : i32
    %c0_i32_0 = arith.constant 0 : i32
    %c0_i32_1 = arith.constant 0 : i32
    return %c0_i32, %c0_i32_0 : i32, i32
  }
  func.func @transform_3(%arg0: i32) -> (i32, i32, i32) {
    %c0_i32 = arith.constant 0 : i32
    %c0_i32_0 = arith.constant 0 : i32
    %c0_i32_1 = arith.constant 0 : i32
    %c0_i32_2 = arith.constant 0 : i32
    return %c0_i32, %c0_i32_0, %c0_i32_1 : i32, i32, i32
  }
  func.func @transform_4(%arg0: i32) -> (i32, i32) {
    %c0_i32 = arith.constant 0 : i32
    %c0_i32_0 = arith.constant 0 : i32
    %c0_i32_1 = arith.constant 0 : i32
    return %c0_i32, %c0_i32_0 : i32, i32
  }
  func.func @transform_5(%arg0: i32) -> (i32, i32, i32, i32) {
    %c0_i32 = arith.constant 0 : i32
    %c0_i32_0 = arith.constant 0 : i32
    %c0_i32_1 = arith.constant 0 : i32
    %c0_i32_2 = arith.constant 0 : i32
    return %arg0, %c0_i32, %c0_i32_0, %c0_i32_1 : i32, i32, i32, i32
  }
}

module attributes {stable_mosaic.version = 11 : i64} {
  func.func @_encoder_block_kernel(%arg0: i32, %arg1: memref<1x176x8xf32, #tpu.memory_space<vmem>>, %arg2: memref<3x24x16xbf16, #tpu.memory_space<vmem>>, %arg3: memref<1x16xf32, #tpu.memory_space<vmem>>, %arg4: memref<3x48x16xbf16, #tpu.memory_space<vmem>>, %arg5: memref<1x16xf32, #tpu.memory_space<vmem>>, %arg6: memref<1x7x16x16xf32, #tpu.memory_space<vmem>>, %arg7: memref<160x24xbf16, #tpu.memory_space<vmem>>, %arg8: memref<160x48xf32, #tpu.memory_space<vmem>>, %arg9: memref<128x16xf32, #tpu.memory_space<vmem>>) attributes {dimension_semantics = [#tpu.dimension_semantics<parallel>], iteration_bounds = array<i64: 2>, scalar_prefetch = 0 : i64, scratch_operands = 3 : i64, tpu.core_type = #tpu.core_type<tc>, window_params = [{transform_indices = @transform_0, window_bounds = array<i64: 1, 176, 8>}, {pipeline_mode = #tpu.pipeline_mode<synchronous>, transform_indices = @transform_1, window_bounds = array<i64: 3, 24, 16>}, {pipeline_mode = #tpu.pipeline_mode<synchronous>, transform_indices = @transform_2, window_bounds = array<i64: 1, 16>}, {pipeline_mode = #tpu.pipeline_mode<synchronous>, transform_indices = @transform_3, window_bounds = array<i64: 3, 48, 16>}, {pipeline_mode = #tpu.pipeline_mode<synchronous>, transform_indices = @transform_4, window_bounds = array<i64: 1, 16>}, {transform_indices = @transform_5, window_bounds = array<i64: 1, 7, 16, 16>}]} {
    %c0 = arith.constant 0 : index
    %c0_0 = arith.constant 0 : index
    %c0_1 = arith.constant 0 : index
    %0 = vector.load %arg1[%c0, %c0_0, %c0_1] : memref<1x176x8xf32, #tpu.memory_space<vmem>>, vector<1x160x8xf32>
    %1 = vector.shape_cast %0 : vector<1x160x8xf32> to vector<160x8xf32>
    %2 = arith.truncf %1 : vector<160x8xf32> to vector<160x8xbf16>
    %c0_2 = arith.constant 0 : index
    %c0_3 = arith.constant 0 : index
    %3 = vector.load %arg7[%c0_2, %c0_3] : memref<160x24xbf16, #tpu.memory_space<vmem>>, vector<160x8xbf16>
    tpu.vector_store %arg7[%c0_2, %c0_3], %2 {strides = array<i32>} : memref<160x24xbf16, #tpu.memory_space<vmem>>, vector<160x8xbf16>,
    %c0_4 = arith.constant 0 : index
    %c1 = arith.constant 1 : index
    %c0_5 = arith.constant 0 : index
    %4 = vector.load %arg1[%c0_4, %c1, %c0_5] : memref<1x176x8xf32, #tpu.memory_space<vmem>>, vector<1x160x8xf32>
    %5 = vector.shape_cast %4 : vector<1x160x8xf32> to vector<160x8xf32>
    %6 = arith.truncf %5 : vector<160x8xf32> to vector<160x8xbf16>
    %c0_6 = arith.constant 0 : index
    %c8 = arith.constant 8 : index
    %7 = vector.load %arg7[%c0_6, %c8] : memref<160x24xbf16, #tpu.memory_space<vmem>>, vector<160x8xbf16>
    tpu.vector_store %arg7[%c0_6, %c8], %6 {strides = array<i32>} : memref<160x24xbf16, #tpu.memory_space<vmem>>, vector<160x8xbf16>,
    %c0_7 = arith.constant 0 : index
    %c2 = arith.constant 2 : index
    %c0_8 = arith.constant 0 : index
    %8 = vector.load %arg1[%c0_7, %c2, %c0_8] : memref<1x176x8xf32, #tpu.memory_space<vmem>>, vector<1x160x8xf32>
    %9 = vector.shape_cast %8 : vector<1x160x8xf32> to vector<160x8xf32>
    %10 = arith.truncf %9 : vector<160x8xf32> to vector<160x8xbf16>
    %c0_9 = arith.constant 0 : index
    %c16 = arith.constant 16 : index
    %11 = vector.load %arg7[%c0_9, %c16] : memref<160x24xbf16, #tpu.memory_space<vmem>>, vector<160x8xbf16>
    tpu.vector_store %arg7[%c0_9, %c16], %10 {strides = array<i32>} : memref<160x24xbf16, #tpu.memory_space<vmem>>, vector<160x8xbf16>,
    %12 = tpu.iota {dimensions = array<i32: 1>} : vector<8x16x16xi32>
    %13 = vector.shape_cast %12 : vector<8x16x16xi32> to vector<128x16xi32>
    %c8_i32 = arith.constant 8 : i32
    %14 = vector.broadcast %c8_i32 : i32 to vector<128x16xi32>
    %15 = arith.cmpi slt, %13, %14 : vector<128x16xi32>
    %c0_10 = arith.constant 0 : index
    %c0_11 = arith.constant 0 : index
    %16 = vector.load %arg7[%c0_10, %c0_11] : memref<160x24xbf16, #tpu.memory_space<vmem>>, vector<128x24xbf16>
    %c0_12 = arith.constant 0 : index
    %c0_13 = arith.constant 0 : index
    %c0_14 = arith.constant 0 : index
    %17 = vector.load %arg2[%c0_12, %c0_13, %c0_14] : memref<3x24x16xbf16, #tpu.memory_space<vmem>>, vector<1x24x16xbf16>
    %18 = vector.shape_cast %17 : vector<1x24x16xbf16> to vector<24x16xbf16>
    %cst = arith.constant dense<0.000000e+00> : vector<128x16xf32>
    %19 = tpu.matmul %16, %18, %cst {dimension_numbers = #tpu.dot_dimension_numbers<[1], [0], [0], [1], [0, 0, 1, 1], [], []>} : vector<128x24xbf16>, vector<24x16xbf16>, vector<128x16xf32> -> vector<128x16xf32>
    %c16_15 = arith.constant 16 : index
    %c0_16 = arith.constant 0 : index
    %20 = vector.load %arg7[%c16_15, %c0_16] : memref<160x24xbf16, #tpu.memory_space<vmem>>, vector<128x24xbf16>
    %c1_17 = arith.constant 1 : index
    %c0_18 = arith.constant 0 : index
    %c0_19 = arith.constant 0 : index
    %21 = vector.load %arg2[%c1_17, %c0_18, %c0_19] : memref<3x24x16xbf16, #tpu.memory_space<vmem>>, vector<1x24x16xbf16>
    %22 = vector.shape_cast %21 : vector<1x24x16xbf16> to vector<24x16xbf16>
    %cst_20 = arith.constant dense<0.000000e+00> : vector<128x16xf32>
    %23 = tpu.matmul %20, %22, %cst_20 {dimension_numbers = #tpu.dot_dimension_numbers<[1], [0], [0], [1], [0, 0, 1, 1], [], []>} : vector<128x24xbf16>, vector<24x16xbf16>, vector<128x16xf32> -> vector<128x16xf32>
    %24 = arith.addf %19, %23 : vector<128x16xf32>
    %c32 = arith.constant 32 : index
    %c0_21 = arith.constant 0 : index
    %25 = vector.load %arg7[%c32, %c0_21] : memref<160x24xbf16, #tpu.memory_space<vmem>>, vector<128x24xbf16>
    %c2_22 = arith.constant 2 : index
    %c0_23 = arith.constant 0 : index
    %c0_24 = arith.constant 0 : index
    %26 = vector.load %arg2[%c2_22, %c0_23, %c0_24] : memref<3x24x16xbf16, #tpu.memory_space<vmem>>, vector<1x24x16xbf16>
    %27 = vector.shape_cast %26 : vector<1x24x16xbf16> to vector<24x16xbf16>
    %cst_25 = arith.constant dense<0.000000e+00> : vector<128x16xf32>
    %28 = tpu.matmul %25, %27, %cst_25 {dimension_numbers = #tpu.dot_dimension_numbers<[1], [0], [0], [1], [0, 0, 1, 1], [], []>} : vector<128x24xbf16>, vector<24x16xbf16>, vector<128x16xf32> -> vector<128x16xf32>
    %29 = arith.addf %24, %28 : vector<128x16xf32>
    %c0_26 = arith.constant 0 : index
    %c0_27 = arith.constant 0 : index
    %30 = vector.load %arg3[%c0_26, %c0_27] : memref<1x16xf32, #tpu.memory_space<vmem>>, vector<1x16xf32>
    %31 = vector.broadcast %30 : vector<1x16xf32> to vector<128x16xf32>
    %32 = arith.addf %29, %31 : vector<128x16xf32>
    %cst_28 = arith.constant 0.000000e+00 : f32
    %33 = vector.broadcast %cst_28 : f32 to vector<128x16xf32>
    %34 = arith.maximumf %32, %33 : vector<128x16xf32>
    %cst_29 = arith.constant 0.000000e+00 : f32
    %35 = vector.broadcast %cst_29 : f32 to vector<128x16xf32>
    %36 = arith.select %15, %34, %35 : vector<128x16xi1>, vector<128x16xf32>
    %cst_30 = arith.constant 0.000000e+00 : f32
    %37 = vector.broadcast %cst_30 : f32 to vector<24x48xf32>
    %c0_31 = arith.constant 0 : index
    %c0_32 = arith.constant 0 : index
    %38 = vector.load %arg8[%c0_31, %c0_32] : memref<160x48xf32, #tpu.memory_space<vmem>>, vector<24x48xf32>
    tpu.vector_store %arg8[%c0_31, %c0_32], %37 {strides = array<i32>} : memref<160x48xf32, #tpu.memory_space<vmem>>, vector<24x48xf32>,
    %cst_33 = arith.constant 0.000000e+00 : f32
    %39 = vector.broadcast %cst_33 : f32 to vector<24x48xf32>
    %c136 = arith.constant 136 : index
    %c0_34 = arith.constant 0 : index
    %40 = vector.load %arg8[%c136, %c0_34] : memref<160x48xf32, #tpu.memory_space<vmem>>, vector<24x48xf32>
    tpu.vector_store %arg8[%c136, %c0_34], %39 {strides = array<i32>} : memref<160x48xf32, #tpu.memory_space<vmem>>, vector<24x48xf32>,
    %c17 = arith.constant 17 : index
    %c0_35 = arith.constant 0 : index
    %41 = vector.load %arg8[%c17, %c0_35] : memref<160x48xf32, #tpu.memory_space<vmem>>, vector<128x16xf32>
    tpu.vector_store %arg8[%c17, %c0_35], %36 {strides = array<i32>} : memref<160x48xf32, #tpu.memory_space<vmem>>, vector<128x16xf32>,
    %c16_36 = arith.constant 16 : index
    %c16_37 = arith.constant 16 : index
    %42 = vector.load %arg8[%c16_36, %c16_37] : memref<160x48xf32, #tpu.memory_space<vmem>>, vector<128x16xf32>
    tpu.vector_store %arg8[%c16_36, %c16_37], %36 {strides = array<i32>} : memref<160x48xf32, #tpu.memory_space<vmem>>, vector<128x16xf32>,
    %c15 = arith.constant 15 : index
    %c32_38 = arith.constant 32 : index
    %43 = vector.load %arg8[%c15, %c32_38] : memref<160x48xf32, #tpu.memory_space<vmem>>, vector<128x16xf32>
    tpu.vector_store %arg8[%c15, %c32_38], %36 {strides = array<i32>} : memref<160x48xf32, #tpu.memory_space<vmem>>, vector<128x16xf32>,
    %c0_39 = arith.constant 0 : index
    %c0_40 = arith.constant 0 : index
    %44 = vector.load %arg8[%c0_39, %c0_40] : memref<160x48xf32, #tpu.memory_space<vmem>>, vector<128x48xf32>
    %45 = arith.truncf %44 : vector<128x48xf32> to vector<128x48xbf16>
    %c0_41 = arith.constant 0 : index
    %c0_42 = arith.constant 0 : index
    %c0_43 = arith.constant 0 : index
    %46 = vector.load %arg4[%c0_41, %c0_42, %c0_43] : memref<3x48x16xbf16, #tpu.memory_space<vmem>>, vector<1x48x16xbf16>
    %47 = vector.shape_cast %46 : vector<1x48x16xbf16> to vector<48x16xbf16>
    %cst_44 = arith.constant dense<0.000000e+00> : vector<128x16xf32>
    %48 = tpu.matmul %45, %47, %cst_44 {dimension_numbers = #tpu.dot_dimension_numbers<[1], [0], [0], [1], [0, 0, 1, 1], [], []>} : vector<128x48xbf16>, vector<48x16xbf16>, vector<128x16xf32> -> vector<128x16xf32>
    %c16_45 = arith.constant 16 : index
    %c0_46 = arith.constant 0 : index
    %49 = vector.load %arg8[%c16_45, %c0_46] : memref<160x48xf32, #tpu.memory_space<vmem>>, vector<128x48xf32>
    %50 = arith.truncf %49 : vector<128x48xf32> to vector<128x48xbf16>
    %c1_47 = arith.constant 1 : index
    %c0_48 = arith.constant 0 : index
    %c0_49 = arith.constant 0 : index
    %51 = vector.load %arg4[%c1_47, %c0_48, %c0_49] : memref<3x48x16xbf16, #tpu.memory_space<vmem>>, vector<1x48x16xbf16>
    %52 = vector.shape_cast %51 : vector<1x48x16xbf16> to vector<48x16xbf16>
    %cst_50 = arith.constant dense<0.000000e+00> : vector<128x16xf32>
    %53 = tpu.matmul %50, %52, %cst_50 {dimension_numbers = #tpu.dot_dimension_numbers<[1], [0], [0], [1], [0, 0, 1, 1], [], []>} : vector<128x48xbf16>, vector<48x16xbf16>, vector<128x16xf32> -> vector<128x16xf32>
    %54 = arith.addf %48, %53 : vector<128x16xf32>
    %c32_51 = arith.constant 32 : index
    %c0_52 = arith.constant 0 : index
    %55 = vector.load %arg8[%c32_51, %c0_52] : memref<160x48xf32, #tpu.memory_space<vmem>>, vector<128x48xf32>
    %56 = arith.truncf %55 : vector<128x48xf32> to vector<128x48xbf16>
    %c2_53 = arith.constant 2 : index
    %c0_54 = arith.constant 0 : index
    %c0_55 = arith.constant 0 : index
    %57 = vector.load %arg4[%c2_53, %c0_54, %c0_55] : memref<3x48x16xbf16, #tpu.memory_space<vmem>>, vector<1x48x16xbf16>
    %58 = vector.shape_cast %57 : vector<1x48x16xbf16> to vector<48x16xbf16>
    %cst_56 = arith.constant dense<0.000000e+00> : vector<128x16xf32>
    %59 = tpu.matmul %56, %58, %cst_56 {dimension_numbers = #tpu.dot_dimension_numbers<[1], [0], [0], [1], [0, 0, 1, 1], [], []>} : vector<128x48xbf16>, vector<48x16xbf16>, vector<128x16xf32> -> vector<128x16xf32>
    %60 = arith.addf %54, %59 : vector<128x16xf32>
    %c0_57 = arith.constant 0 : index
    %c0_58 = arith.constant 0 : index
    %61 = vector.load %arg5[%c0_57, %c0_58] : memref<1x16xf32, #tpu.memory_space<vmem>>, vector<1x16xf32>
    %62 = vector.broadcast %61 : vector<1x16xf32> to vector<128x16xf32>
    %63 = arith.addf %60, %62 : vector<128x16xf32>
    %cst_59 = arith.constant 0.000000e+00 : f32
    %64 = vector.broadcast %cst_59 : f32 to vector<128x16xf32>
    %65 = arith.maximumf %63, %64 : vector<128x16xf32>
    %c0_60 = arith.constant 0 : index
    %c0_61 = arith.constant 0 : index
    %66 = vector.load %arg9[%c0_60, %c0_61] : memref<128x16xf32, #tpu.memory_space<vmem>>, vector<128x16xf32>
    tpu.vector_store %arg9[%c0_60, %c0_61], %65 {strides = array<i32>} : memref<128x16xf32, #tpu.memory_space<vmem>>, vector<128x16xf32>,
    %c0_62 = arith.constant 0 : index
    %c0_63 = arith.constant 0 : index
    %67 = tpu.strided_load %arg9[%c0_62, %c0_63] {strides = array<i32: 2, 1>} : memref<128x16xf32, #tpu.memory_space<vmem>>, vector<64x16xf32>
    %c1_64 = arith.constant 1 : index
    %c0_65 = arith.constant 0 : index
    %68 = tpu.strided_load %arg9[%c1_64, %c0_65] {strides = array<i32: 2, 1>} : memref<128x16xf32, #tpu.memory_space<vmem>>, vector<64x16xf32>
    %69 = arith.maximumf %67, %68 : vector<64x16xf32>
    %70 = vector.shape_cast %69 : vector<64x16xf32> to vector<4x16x16xf32>
    %71 = vector.extract_strided_slice %70 {offsets = [0, 0, 0], sizes = [4, 8, 16], strides = [1, 1, 1]} : vector<4x16x16xf32> to vector<4x8x16xf32>
    %72 = vector.extract_strided_slice %70 {offsets = [0, 8, 0], sizes = [4, 8, 16], strides = [1, 1, 1]} : vector<4x16x16xf32> to vector<4x8x16xf32>
    %73 = arith.maximumf %71, %72 : vector<4x8x16xf32>
    %cst_66 = arith.constant 0.000000e+00 : f32
    %74 = vector.broadcast %cst_66 : f32 to vector<1x16x16xf32>
    %c0_67 = arith.constant 0 : index
    %c0_68 = arith.constant 0 : index
    %c0_69 = arith.constant 0 : index
    %c0_70 = arith.constant 0 : index
    %75 = vector.load %arg6[%c0_67, %c0_68, %c0_69, %c0_70] : memref<1x7x16x16xf32, #tpu.memory_space<vmem>>, vector<1x1x16x16xf32>
    %76 = vector.shape_cast %75 : vector<1x1x16x16xf32> to vector<1x16x16xf32>
    %77 = vector.shape_cast %74 : vector<1x16x16xf32> to vector<1x1x16x16xf32>
    tpu.vector_store %arg6[%c0_67, %c0_68, %c0_69, %c0_70], %77 {strides = array<i32>} : memref<1x7x16x16xf32, #tpu.memory_space<vmem>>, vector<1x1x16x16xf32>,
    %cst_71 = arith.constant 0.000000e+00 : f32
    %78 = vector.broadcast %cst_71 : f32 to vector<2x16x16xf32>
    %c0_72 = arith.constant 0 : index
    %c5 = arith.constant 5 : index
    %c0_73 = arith.constant 0 : index
    %c0_74 = arith.constant 0 : index
    %79 = vector.load %arg6[%c0_72, %c5, %c0_73, %c0_74] : memref<1x7x16x16xf32, #tpu.memory_space<vmem>>, vector<1x2x16x16xf32>
    %80 = vector.shape_cast %79 : vector<1x2x16x16xf32> to vector<2x16x16xf32>
    %81 = vector.shape_cast %78 : vector<2x16x16xf32> to vector<1x2x16x16xf32>
    tpu.vector_store %arg6[%c0_72, %c5, %c0_73, %c0_74], %81 {strides = array<i32>} : memref<1x7x16x16xf32, #tpu.memory_space<vmem>>, vector<1x2x16x16xf32>,
    %cst_75 = arith.constant 0.000000e+00 : f32
    %82 = vector.broadcast %cst_75 : f32 to vector<4x1x16xf32>
    %c0_76 = arith.constant 0 : index
    %c1_77 = arith.constant 1 : index
    %c0_78 = arith.constant 0 : index
    %c0_79 = arith.constant 0 : index
    %83 = vector.load %arg6[%c0_76, %c1_77, %c0_78, %c0_79] : memref<1x7x16x16xf32, #tpu.memory_space<vmem>>, vector<1x4x1x16xf32>
    %84 = vector.shape_cast %83 : vector<1x4x1x16xf32> to vector<4x1x16xf32>
    %85 = vector.shape_cast %82 : vector<4x1x16xf32> to vector<1x4x1x16xf32>
    tpu.vector_store %arg6[%c0_76, %c1_77, %c0_78, %c0_79], %85 {strides = array<i32>} : memref<1x7x16x16xf32, #tpu.memory_space<vmem>>, vector<1x4x1x16xf32>,
    %cst_80 = arith.constant 0.000000e+00 : f32
    %86 = vector.broadcast %cst_80 : f32 to vector<4x11x16xf32>
    %c0_81 = arith.constant 0 : index
    %c1_82 = arith.constant 1 : index
    %c5_83 = arith.constant 5 : index
    %c0_84 = arith.constant 0 : index
    %87 = vector.load %arg6[%c0_81, %c1_82, %c5_83, %c0_84] : memref<1x7x16x16xf32, #tpu.memory_space<vmem>>, vector<1x4x11x16xf32>
    %88 = vector.shape_cast %87 : vector<1x4x11x16xf32> to vector<4x11x16xf32>
    %89 = vector.shape_cast %86 : vector<4x11x16xf32> to vector<1x4x11x16xf32>
    tpu.vector_store %arg6[%c0_81, %c1_82, %c5_83, %c0_84], %89 {strides = array<i32>} : memref<1x7x16x16xf32, #tpu.memory_space<vmem>>, vector<1x4x11x16xf32>,
    %90 = vector.extract_strided_slice %73 {offsets = [0, 0, 0], sizes = [4, 4, 16], strides = [1, 1, 1]} : vector<4x8x16xf32> to vector<4x4x16xf32>
    %c0_85 = arith.constant 0 : index
    %c1_86 = arith.constant 1 : index
    %c1_87 = arith.constant 1 : index
    %c0_88 = arith.constant 0 : index
    %91 = vector.load %arg6[%c0_85, %c1_86, %c1_87, %c0_88] : memref<1x7x16x16xf32, #tpu.memory_space<vmem>>, vector<1x4x4x16xf32>
    %92 = vector.shape_cast %91 : vector<1x4x4x16xf32> to vector<4x4x16xf32>
    %93 = vector.shape_cast %90 : vector<4x4x16xf32> to vector<1x4x4x16xf32>
    tpu.vector_store %arg6[%c0_85, %c1_86, %c1_87, %c0_88], %93 {strides = array<i32>} : memref<1x7x16x16xf32, #tpu.memory_space<vmem>>, vector<1x4x4x16xf32>,
    return
  }
  func.func @transform_0(%arg0: i32) -> (i32, i32, i32) {
    %c0_i32 = arith.constant 0 : i32
    %c0_i32_0 = arith.constant 0 : i32
    %c0_i32_1 = arith.constant 0 : i32
    return %arg0, %c0_i32, %c0_i32_0 : i32, i32, i32
  }
  func.func @transform_1(%arg0: i32) -> (i32, i32, i32) {
    %c0_i32 = arith.constant 0 : i32
    %c0_i32_0 = arith.constant 0 : i32
    %c0_i32_1 = arith.constant 0 : i32
    %c0_i32_2 = arith.constant 0 : i32
    return %c0_i32, %c0_i32_0, %c0_i32_1 : i32, i32, i32
  }
  func.func @transform_2(%arg0: i32) -> (i32, i32) {
    %c0_i32 = arith.constant 0 : i32
    %c0_i32_0 = arith.constant 0 : i32
    %c0_i32_1 = arith.constant 0 : i32
    return %c0_i32, %c0_i32_0 : i32, i32
  }
  func.func @transform_3(%arg0: i32) -> (i32, i32, i32) {
    %c0_i32 = arith.constant 0 : i32
    %c0_i32_0 = arith.constant 0 : i32
    %c0_i32_1 = arith.constant 0 : i32
    %c0_i32_2 = arith.constant 0 : i32
    return %c0_i32, %c0_i32_0, %c0_i32_1 : i32, i32, i32
  }
  func.func @transform_4(%arg0: i32) -> (i32, i32) {
    %c0_i32 = arith.constant 0 : i32
    %c0_i32_0 = arith.constant 0 : i32
    %c0_i32_1 = arith.constant 0 : i32
    return %c0_i32, %c0_i32_0 : i32, i32
  }
  func.func @transform_5(%arg0: i32) -> (i32, i32, i32, i32) {
    %c0_i32 = arith.constant 0 : i32
    %c0_i32_0 = arith.constant 0 : i32
    %c0_i32_1 = arith.constant 0 : i32
    %c0_i32_2 = arith.constant 0 : i32
    return %arg0, %c0_i32, %c0_i32_0, %c0_i32_1 : i32, i32, i32, i32
  }
}

module attributes {stable_mosaic.version = 11 : i64} {
  func.func @_encoder_block_kernel(%arg0: i32, %arg1: memref<1x112x16xf32, #tpu.memory_space<vmem>>, %arg2: memref<3x48x32xbf16, #tpu.memory_space<vmem>>, %arg3: memref<1x32xf32, #tpu.memory_space<vmem>>, %arg4: memref<3x96x32xbf16, #tpu.memory_space<vmem>>, %arg5: memref<1x32xf32, #tpu.memory_space<vmem>>, %arg6: memref<1x5x16x32xf32, #tpu.memory_space<vmem>>, %arg7: memref<96x48xbf16, #tpu.memory_space<vmem>>, %arg8: memref<96x96xf32, #tpu.memory_space<vmem>>, %arg9: memref<64x32xf32, #tpu.memory_space<vmem>>) attributes {dimension_semantics = [#tpu.dimension_semantics<parallel>], iteration_bounds = array<i64: 2>, scalar_prefetch = 0 : i64, scratch_operands = 3 : i64, tpu.core_type = #tpu.core_type<tc>, window_params = [{transform_indices = @transform_0, window_bounds = array<i64: 1, 112, 16>}, {pipeline_mode = #tpu.pipeline_mode<synchronous>, transform_indices = @transform_1, window_bounds = array<i64: 3, 48, 32>}, {pipeline_mode = #tpu.pipeline_mode<synchronous>, transform_indices = @transform_2, window_bounds = array<i64: 1, 32>}, {pipeline_mode = #tpu.pipeline_mode<synchronous>, transform_indices = @transform_3, window_bounds = array<i64: 3, 96, 32>}, {pipeline_mode = #tpu.pipeline_mode<synchronous>, transform_indices = @transform_4, window_bounds = array<i64: 1, 32>}, {transform_indices = @transform_5, window_bounds = array<i64: 1, 5, 16, 32>}]} {
    %c0 = arith.constant 0 : index
    %c0_0 = arith.constant 0 : index
    %c0_1 = arith.constant 0 : index
    %0 = vector.load %arg1[%c0, %c0_0, %c0_1] : memref<1x112x16xf32, #tpu.memory_space<vmem>>, vector<1x96x16xf32>
    %1 = vector.shape_cast %0 : vector<1x96x16xf32> to vector<96x16xf32>
    %2 = arith.truncf %1 : vector<96x16xf32> to vector<96x16xbf16>
    %c0_2 = arith.constant 0 : index
    %c0_3 = arith.constant 0 : index
    %3 = vector.load %arg7[%c0_2, %c0_3] : memref<96x48xbf16, #tpu.memory_space<vmem>>, vector<96x16xbf16>
    tpu.vector_store %arg7[%c0_2, %c0_3], %2 {strides = array<i32>} : memref<96x48xbf16, #tpu.memory_space<vmem>>, vector<96x16xbf16>,
    %c0_4 = arith.constant 0 : index
    %c1 = arith.constant 1 : index
    %c0_5 = arith.constant 0 : index
    %4 = vector.load %arg1[%c0_4, %c1, %c0_5] : memref<1x112x16xf32, #tpu.memory_space<vmem>>, vector<1x96x16xf32>
    %5 = vector.shape_cast %4 : vector<1x96x16xf32> to vector<96x16xf32>
    %6 = arith.truncf %5 : vector<96x16xf32> to vector<96x16xbf16>
    %c0_6 = arith.constant 0 : index
    %c16 = arith.constant 16 : index
    %7 = vector.load %arg7[%c0_6, %c16] : memref<96x48xbf16, #tpu.memory_space<vmem>>, vector<96x16xbf16>
    tpu.vector_store %arg7[%c0_6, %c16], %6 {strides = array<i32>} : memref<96x48xbf16, #tpu.memory_space<vmem>>, vector<96x16xbf16>,
    %c0_7 = arith.constant 0 : index
    %c2 = arith.constant 2 : index
    %c0_8 = arith.constant 0 : index
    %8 = vector.load %arg1[%c0_7, %c2, %c0_8] : memref<1x112x16xf32, #tpu.memory_space<vmem>>, vector<1x96x16xf32>
    %9 = vector.shape_cast %8 : vector<1x96x16xf32> to vector<96x16xf32>
    %10 = arith.truncf %9 : vector<96x16xf32> to vector<96x16xbf16>
    %c0_9 = arith.constant 0 : index
    %c32 = arith.constant 32 : index
    %11 = vector.load %arg7[%c0_9, %c32] : memref<96x48xbf16, #tpu.memory_space<vmem>>, vector<96x16xbf16>
    tpu.vector_store %arg7[%c0_9, %c32], %10 {strides = array<i32>} : memref<96x48xbf16, #tpu.memory_space<vmem>>, vector<96x16xbf16>,
    %12 = tpu.iota {dimensions = array<i32: 1>} : vector<4x16x32xi32>
    %13 = vector.shape_cast %12 : vector<4x16x32xi32> to vector<64x32xi32>
    %c4_i32 = arith.constant 4 : i32
    %14 = vector.broadcast %c4_i32 : i32 to vector<64x32xi32>
    %15 = arith.cmpi slt, %13, %14 : vector<64x32xi32>
    %c0_10 = arith.constant 0 : index
    %c0_11 = arith.constant 0 : index
    %16 = vector.load %arg7[%c0_10, %c0_11] : memref<96x48xbf16, #tpu.memory_space<vmem>>, vector<64x48xbf16>
    %c0_12 = arith.constant 0 : index
    %c0_13 = arith.constant 0 : index
    %c0_14 = arith.constant 0 : index
    %17 = vector.load %arg2[%c0_12, %c0_13, %c0_14] : memref<3x48x32xbf16, #tpu.memory_space<vmem>>, vector<1x48x32xbf16>
    %18 = vector.shape_cast %17 : vector<1x48x32xbf16> to vector<48x32xbf16>
    %cst = arith.constant dense<0.000000e+00> : vector<64x32xf32>
    %19 = tpu.matmul %16, %18, %cst {dimension_numbers = #tpu.dot_dimension_numbers<[1], [0], [0], [1], [0, 0, 1, 1], [], []>} : vector<64x48xbf16>, vector<48x32xbf16>, vector<64x32xf32> -> vector<64x32xf32>
    %c16_15 = arith.constant 16 : index
    %c0_16 = arith.constant 0 : index
    %20 = vector.load %arg7[%c16_15, %c0_16] : memref<96x48xbf16, #tpu.memory_space<vmem>>, vector<64x48xbf16>
    %c1_17 = arith.constant 1 : index
    %c0_18 = arith.constant 0 : index
    %c0_19 = arith.constant 0 : index
    %21 = vector.load %arg2[%c1_17, %c0_18, %c0_19] : memref<3x48x32xbf16, #tpu.memory_space<vmem>>, vector<1x48x32xbf16>
    %22 = vector.shape_cast %21 : vector<1x48x32xbf16> to vector<48x32xbf16>
    %cst_20 = arith.constant dense<0.000000e+00> : vector<64x32xf32>
    %23 = tpu.matmul %20, %22, %cst_20 {dimension_numbers = #tpu.dot_dimension_numbers<[1], [0], [0], [1], [0, 0, 1, 1], [], []>} : vector<64x48xbf16>, vector<48x32xbf16>, vector<64x32xf32> -> vector<64x32xf32>
    %24 = arith.addf %19, %23 : vector<64x32xf32>
    %c32_21 = arith.constant 32 : index
    %c0_22 = arith.constant 0 : index
    %25 = vector.load %arg7[%c32_21, %c0_22] : memref<96x48xbf16, #tpu.memory_space<vmem>>, vector<64x48xbf16>
    %c2_23 = arith.constant 2 : index
    %c0_24 = arith.constant 0 : index
    %c0_25 = arith.constant 0 : index
    %26 = vector.load %arg2[%c2_23, %c0_24, %c0_25] : memref<3x48x32xbf16, #tpu.memory_space<vmem>>, vector<1x48x32xbf16>
    %27 = vector.shape_cast %26 : vector<1x48x32xbf16> to vector<48x32xbf16>
    %cst_26 = arith.constant dense<0.000000e+00> : vector<64x32xf32>
    %28 = tpu.matmul %25, %27, %cst_26 {dimension_numbers = #tpu.dot_dimension_numbers<[1], [0], [0], [1], [0, 0, 1, 1], [], []>} : vector<64x48xbf16>, vector<48x32xbf16>, vector<64x32xf32> -> vector<64x32xf32>
    %29 = arith.addf %24, %28 : vector<64x32xf32>
    %c0_27 = arith.constant 0 : index
    %c0_28 = arith.constant 0 : index
    %30 = vector.load %arg3[%c0_27, %c0_28] : memref<1x32xf32, #tpu.memory_space<vmem>>, vector<1x32xf32>
    %31 = vector.broadcast %30 : vector<1x32xf32> to vector<64x32xf32>
    %32 = arith.addf %29, %31 : vector<64x32xf32>
    %cst_29 = arith.constant 0.000000e+00 : f32
    %33 = vector.broadcast %cst_29 : f32 to vector<64x32xf32>
    %34 = arith.maximumf %32, %33 : vector<64x32xf32>
    %cst_30 = arith.constant 0.000000e+00 : f32
    %35 = vector.broadcast %cst_30 : f32 to vector<64x32xf32>
    %36 = arith.select %15, %34, %35 : vector<64x32xi1>, vector<64x32xf32>
    %cst_31 = arith.constant 0.000000e+00 : f32
    %37 = vector.broadcast %cst_31 : f32 to vector<24x96xf32>
    %c0_32 = arith.constant 0 : index
    %c0_33 = arith.constant 0 : index
    %38 = vector.load %arg8[%c0_32, %c0_33] : memref<96x96xf32, #tpu.memory_space<vmem>>, vector<24x96xf32>
    tpu.vector_store %arg8[%c0_32, %c0_33], %37 {strides = array<i32>} : memref<96x96xf32, #tpu.memory_space<vmem>>, vector<24x96xf32>,
    %cst_34 = arith.constant 0.000000e+00 : f32
    %39 = vector.broadcast %cst_34 : f32 to vector<24x96xf32>
    %c72 = arith.constant 72 : index
    %c0_35 = arith.constant 0 : index
    %40 = vector.load %arg8[%c72, %c0_35] : memref<96x96xf32, #tpu.memory_space<vmem>>, vector<24x96xf32>
    tpu.vector_store %arg8[%c72, %c0_35], %39 {strides = array<i32>} : memref<96x96xf32, #tpu.memory_space<vmem>>, vector<24x96xf32>,
    %c17 = arith.constant 17 : index
    %c0_36 = arith.constant 0 : index
    %41 = vector.load %arg8[%c17, %c0_36] : memref<96x96xf32, #tpu.memory_space<vmem>>, vector<64x32xf32>
    tpu.vector_store %arg8[%c17, %c0_36], %36 {strides = array<i32>} : memref<96x96xf32, #tpu.memory_space<vmem>>, vector<64x32xf32>,
    %c16_37 = arith.constant 16 : index
    %c32_38 = arith.constant 32 : index
    %42 = vector.load %arg8[%c16_37, %c32_38] : memref<96x96xf32, #tpu.memory_space<vmem>>, vector<64x32xf32>
    tpu.vector_store %arg8[%c16_37, %c32_38], %36 {strides = array<i32>} : memref<96x96xf32, #tpu.memory_space<vmem>>, vector<64x32xf32>,
    %c15 = arith.constant 15 : index
    %c64 = arith.constant 64 : index
    %43 = vector.load %arg8[%c15, %c64] : memref<96x96xf32, #tpu.memory_space<vmem>>, vector<64x32xf32>
    tpu.vector_store %arg8[%c15, %c64], %36 {strides = array<i32>} : memref<96x96xf32, #tpu.memory_space<vmem>>, vector<64x32xf32>,
    %c0_39 = arith.constant 0 : index
    %c0_40 = arith.constant 0 : index
    %44 = vector.load %arg8[%c0_39, %c0_40] : memref<96x96xf32, #tpu.memory_space<vmem>>, vector<64x96xf32>
    %45 = arith.truncf %44 : vector<64x96xf32> to vector<64x96xbf16>
    %c0_41 = arith.constant 0 : index
    %c0_42 = arith.constant 0 : index
    %c0_43 = arith.constant 0 : index
    %46 = vector.load %arg4[%c0_41, %c0_42, %c0_43] : memref<3x96x32xbf16, #tpu.memory_space<vmem>>, vector<1x96x32xbf16>
    %47 = vector.shape_cast %46 : vector<1x96x32xbf16> to vector<96x32xbf16>
    %cst_44 = arith.constant dense<0.000000e+00> : vector<64x32xf32>
    %48 = tpu.matmul %45, %47, %cst_44 {dimension_numbers = #tpu.dot_dimension_numbers<[1], [0], [0], [1], [0, 0, 1, 1], [], []>} : vector<64x96xbf16>, vector<96x32xbf16>, vector<64x32xf32> -> vector<64x32xf32>
    %c16_45 = arith.constant 16 : index
    %c0_46 = arith.constant 0 : index
    %49 = vector.load %arg8[%c16_45, %c0_46] : memref<96x96xf32, #tpu.memory_space<vmem>>, vector<64x96xf32>
    %50 = arith.truncf %49 : vector<64x96xf32> to vector<64x96xbf16>
    %c1_47 = arith.constant 1 : index
    %c0_48 = arith.constant 0 : index
    %c0_49 = arith.constant 0 : index
    %51 = vector.load %arg4[%c1_47, %c0_48, %c0_49] : memref<3x96x32xbf16, #tpu.memory_space<vmem>>, vector<1x96x32xbf16>
    %52 = vector.shape_cast %51 : vector<1x96x32xbf16> to vector<96x32xbf16>
    %cst_50 = arith.constant dense<0.000000e+00> : vector<64x32xf32>
    %53 = tpu.matmul %50, %52, %cst_50 {dimension_numbers = #tpu.dot_dimension_numbers<[1], [0], [0], [1], [0, 0, 1, 1], [], []>} : vector<64x96xbf16>, vector<96x32xbf16>, vector<64x32xf32> -> vector<64x32xf32>
    %54 = arith.addf %48, %53 : vector<64x32xf32>
    %c32_51 = arith.constant 32 : index
    %c0_52 = arith.constant 0 : index
    %55 = vector.load %arg8[%c32_51, %c0_52] : memref<96x96xf32, #tpu.memory_space<vmem>>, vector<64x96xf32>
    %56 = arith.truncf %55 : vector<64x96xf32> to vector<64x96xbf16>
    %c2_53 = arith.constant 2 : index
    %c0_54 = arith.constant 0 : index
    %c0_55 = arith.constant 0 : index
    %57 = vector.load %arg4[%c2_53, %c0_54, %c0_55] : memref<3x96x32xbf16, #tpu.memory_space<vmem>>, vector<1x96x32xbf16>
    %58 = vector.shape_cast %57 : vector<1x96x32xbf16> to vector<96x32xbf16>
    %cst_56 = arith.constant dense<0.000000e+00> : vector<64x32xf32>
    %59 = tpu.matmul %56, %58, %cst_56 {dimension_numbers = #tpu.dot_dimension_numbers<[1], [0], [0], [1], [0, 0, 1, 1], [], []>} : vector<64x96xbf16>, vector<96x32xbf16>, vector<64x32xf32> -> vector<64x32xf32>
    %60 = arith.addf %54, %59 : vector<64x32xf32>
    %c0_57 = arith.constant 0 : index
    %c0_58 = arith.constant 0 : index
    %61 = vector.load %arg5[%c0_57, %c0_58] : memref<1x32xf32, #tpu.memory_space<vmem>>, vector<1x32xf32>
    %62 = vector.broadcast %61 : vector<1x32xf32> to vector<64x32xf32>
    %63 = arith.addf %60, %62 : vector<64x32xf32>
    %cst_59 = arith.constant 0.000000e+00 : f32
    %64 = vector.broadcast %cst_59 : f32 to vector<64x32xf32>
    %65 = arith.maximumf %63, %64 : vector<64x32xf32>
    %c0_60 = arith.constant 0 : index
    %c0_61 = arith.constant 0 : index
    %66 = vector.load %arg9[%c0_60, %c0_61] : memref<64x32xf32, #tpu.memory_space<vmem>>, vector<64x32xf32>
    tpu.vector_store %arg9[%c0_60, %c0_61], %65 {strides = array<i32>} : memref<64x32xf32, #tpu.memory_space<vmem>>, vector<64x32xf32>,
    %c0_62 = arith.constant 0 : index
    %c0_63 = arith.constant 0 : index
    %67 = tpu.strided_load %arg9[%c0_62, %c0_63] {strides = array<i32: 2, 1>} : memref<64x32xf32, #tpu.memory_space<vmem>>, vector<32x32xf32>
    %c1_64 = arith.constant 1 : index
    %c0_65 = arith.constant 0 : index
    %68 = tpu.strided_load %arg9[%c1_64, %c0_65] {strides = array<i32: 2, 1>} : memref<64x32xf32, #tpu.memory_space<vmem>>, vector<32x32xf32>
    %69 = arith.maximumf %67, %68 : vector<32x32xf32>
    %70 = vector.shape_cast %69 : vector<32x32xf32> to vector<2x16x32xf32>
    %71 = vector.extract_strided_slice %70 {offsets = [0, 0, 0], sizes = [2, 8, 32], strides = [1, 1, 1]} : vector<2x16x32xf32> to vector<2x8x32xf32>
    %72 = vector.extract_strided_slice %70 {offsets = [0, 8, 0], sizes = [2, 8, 32], strides = [1, 1, 1]} : vector<2x16x32xf32> to vector<2x8x32xf32>
    %73 = arith.maximumf %71, %72 : vector<2x8x32xf32>
    %cst_66 = arith.constant 0.000000e+00 : f32
    %74 = vector.broadcast %cst_66 : f32 to vector<1x16x32xf32>
    %c0_67 = arith.constant 0 : index
    %c0_68 = arith.constant 0 : index
    %c0_69 = arith.constant 0 : index
    %c0_70 = arith.constant 0 : index
    %75 = vector.load %arg6[%c0_67, %c0_68, %c0_69, %c0_70] : memref<1x5x16x32xf32, #tpu.memory_space<vmem>>, vector<1x1x16x32xf32>
    %76 = vector.shape_cast %75 : vector<1x1x16x32xf32> to vector<1x16x32xf32>
    %77 = vector.shape_cast %74 : vector<1x16x32xf32> to vector<1x1x16x32xf32>
    tpu.vector_store %arg6[%c0_67, %c0_68, %c0_69, %c0_70], %77 {strides = array<i32>} : memref<1x5x16x32xf32, #tpu.memory_space<vmem>>, vector<1x1x16x32xf32>,
    %cst_71 = arith.constant 0.000000e+00 : f32
    %78 = vector.broadcast %cst_71 : f32 to vector<2x16x32xf32>
    %c0_72 = arith.constant 0 : index
    %c3 = arith.constant 3 : index
    %c0_73 = arith.constant 0 : index
    %c0_74 = arith.constant 0 : index
    %79 = vector.load %arg6[%c0_72, %c3, %c0_73, %c0_74] : memref<1x5x16x32xf32, #tpu.memory_space<vmem>>, vector<1x2x16x32xf32>
    %80 = vector.shape_cast %79 : vector<1x2x16x32xf32> to vector<2x16x32xf32>
    %81 = vector.shape_cast %78 : vector<2x16x32xf32> to vector<1x2x16x32xf32>
    tpu.vector_store %arg6[%c0_72, %c3, %c0_73, %c0_74], %81 {strides = array<i32>} : memref<1x5x16x32xf32, #tpu.memory_space<vmem>>, vector<1x2x16x32xf32>,
    %cst_75 = arith.constant 0.000000e+00 : f32
    %82 = vector.broadcast %cst_75 : f32 to vector<2x1x32xf32>
    %c0_76 = arith.constant 0 : index
    %c1_77 = arith.constant 1 : index
    %c0_78 = arith.constant 0 : index
    %c0_79 = arith.constant 0 : index
    %83 = vector.load %arg6[%c0_76, %c1_77, %c0_78, %c0_79] : memref<1x5x16x32xf32, #tpu.memory_space<vmem>>, vector<1x2x1x32xf32>
    %84 = vector.shape_cast %83 : vector<1x2x1x32xf32> to vector<2x1x32xf32>
    %85 = vector.shape_cast %82 : vector<2x1x32xf32> to vector<1x2x1x32xf32>
    tpu.vector_store %arg6[%c0_76, %c1_77, %c0_78, %c0_79], %85 {strides = array<i32>} : memref<1x5x16x32xf32, #tpu.memory_space<vmem>>, vector<1x2x1x32xf32>,
    %cst_80 = arith.constant 0.000000e+00 : f32
    %86 = vector.broadcast %cst_80 : f32 to vector<2x13x32xf32>
    %c0_81 = arith.constant 0 : index
    %c1_82 = arith.constant 1 : index
    %c3_83 = arith.constant 3 : index
    %c0_84 = arith.constant 0 : index
    %87 = vector.load %arg6[%c0_81, %c1_82, %c3_83, %c0_84] : memref<1x5x16x32xf32, #tpu.memory_space<vmem>>, vector<1x2x13x32xf32>
    %88 = vector.shape_cast %87 : vector<1x2x13x32xf32> to vector<2x13x32xf32>
    %89 = vector.shape_cast %86 : vector<2x13x32xf32> to vector<1x2x13x32xf32>
    tpu.vector_store %arg6[%c0_81, %c1_82, %c3_83, %c0_84], %89 {strides = array<i32>} : memref<1x5x16x32xf32, #tpu.memory_space<vmem>>, vector<1x2x13x32xf32>,
    %90 = vector.extract_strided_slice %73 {offsets = [0, 0, 0], sizes = [2, 2, 32], strides = [1, 1, 1]} : vector<2x8x32xf32> to vector<2x2x32xf32>
    %c0_85 = arith.constant 0 : index
    %c1_86 = arith.constant 1 : index
    %c1_87 = arith.constant 1 : index
    %c0_88 = arith.constant 0 : index
    %91 = vector.load %arg6[%c0_85, %c1_86, %c1_87, %c0_88] : memref<1x5x16x32xf32, #tpu.memory_space<vmem>>, vector<1x2x2x32xf32>
    %92 = vector.shape_cast %91 : vector<1x2x2x32xf32> to vector<2x2x32xf32>
    %93 = vector.shape_cast %90 : vector<2x2x32xf32> to vector<1x2x2x32xf32>
    tpu.vector_store %arg6[%c0_85, %c1_86, %c1_87, %c0_88], %93 {strides = array<i32>} : memref<1x5x16x32xf32, #tpu.memory_space<vmem>>, vector<1x2x2x32xf32>,
    return
  }
  func.func @transform_0(%arg0: i32) -> (i32, i32, i32) {
    %c0_i32 = arith.constant 0 : i32
    %c0_i32_0 = arith.constant 0 : i32
    %c0_i32_1 = arith.constant 0 : i32
    return %arg0, %c0_i32, %c0_i32_0 : i32, i32, i32
  }
  func.func @transform_1(%arg0: i32) -> (i32, i32, i32) {
    %c0_i32 = arith.constant 0 : i32
    %c0_i32_0 = arith.constant 0 : i32
    %c0_i32_1 = arith.constant 0 : i32
    %c0_i32_2 = arith.constant 0 : i32
    return %c0_i32, %c0_i32_0, %c0_i32_1 : i32, i32, i32
  }
  func.func @transform_2(%arg0: i32) -> (i32, i32) {
    %c0_i32 = arith.constant 0 : i32
    %c0_i32_0 = arith.constant 0 : i32
    %c0_i32_1 = arith.constant 0 : i32
    return %c0_i32, %c0_i32_0 : i32, i32
  }
  func.func @transform_3(%arg0: i32) -> (i32, i32, i32) {
    %c0_i32 = arith.constant 0 : i32
    %c0_i32_0 = arith.constant 0 : i32
    %c0_i32_1 = arith.constant 0 : i32
    %c0_i32_2 = arith.constant 0 : i32
    return %c0_i32, %c0_i32_0, %c0_i32_1 : i32, i32, i32
  }
  func.func @transform_4(%arg0: i32) -> (i32, i32) {
    %c0_i32 = arith.constant 0 : i32
    %c0_i32_0 = arith.constant 0 : i32
    %c0_i32_1 = arith.constant 0 : i32
    return %c0_i32, %c0_i32_0 : i32, i32
  }
  func.func @transform_5(%arg0: i32) -> (i32, i32, i32, i32) {
    %c0_i32 = arith.constant 0 : i32
    %c0_i32_0 = arith.constant 0 : i32
    %c0_i32_1 = arith.constant 0 : i32
    %c0_i32_2 = arith.constant 0 : i32
    return %arg0, %c0_i32, %c0_i32_0, %c0_i32_1 : i32, i32, i32, i32
  }
}

module attributes {stable_mosaic.version = 11 : i64} {
  func.func @_encoder_block_kernel(%arg0: i32, %arg1: memref<1x80x32xf32, #tpu.memory_space<vmem>>, %arg2: memref<3x96x64xbf16, #tpu.memory_space<vmem>>, %arg3: memref<1x64xf32, #tpu.memory_space<vmem>>, %arg4: memref<3x192x64xbf16, #tpu.memory_space<vmem>>, %arg5: memref<1x64xf32, #tpu.memory_space<vmem>>, %arg6: memref<1x4x16x64xf32, #tpu.memory_space<vmem>>, %arg7: memref<64x96xbf16, #tpu.memory_space<vmem>>, %arg8: memref<64x192xf32, #tpu.memory_space<vmem>>, %arg9: memref<32x64xf32, #tpu.memory_space<vmem>>) attributes {dimension_semantics = [#tpu.dimension_semantics<parallel>], iteration_bounds = array<i64: 2>, scalar_prefetch = 0 : i64, scratch_operands = 3 : i64, tpu.core_type = #tpu.core_type<tc>, window_params = [{transform_indices = @transform_0, window_bounds = array<i64: 1, 80, 32>}, {pipeline_mode = #tpu.pipeline_mode<synchronous>, transform_indices = @transform_1, window_bounds = array<i64: 3, 96, 64>}, {pipeline_mode = #tpu.pipeline_mode<synchronous>, transform_indices = @transform_2, window_bounds = array<i64: 1, 64>}, {pipeline_mode = #tpu.pipeline_mode<synchronous>, transform_indices = @transform_3, window_bounds = array<i64: 3, 192, 64>}, {pipeline_mode = #tpu.pipeline_mode<synchronous>, transform_indices = @transform_4, window_bounds = array<i64: 1, 64>}, {transform_indices = @transform_5, window_bounds = array<i64: 1, 4, 16, 64>}]} {
    %c0 = arith.constant 0 : index
    %c0_0 = arith.constant 0 : index
    %c0_1 = arith.constant 0 : index
    %0 = vector.load %arg1[%c0, %c0_0, %c0_1] : memref<1x80x32xf32, #tpu.memory_space<vmem>>, vector<1x64x32xf32>
    %1 = vector.shape_cast %0 : vector<1x64x32xf32> to vector<64x32xf32>
    %2 = arith.truncf %1 : vector<64x32xf32> to vector<64x32xbf16>
    %c0_2 = arith.constant 0 : index
    %c0_3 = arith.constant 0 : index
    %3 = vector.load %arg7[%c0_2, %c0_3] : memref<64x96xbf16, #tpu.memory_space<vmem>>, vector<64x32xbf16>
    tpu.vector_store %arg7[%c0_2, %c0_3], %2 {strides = array<i32>} : memref<64x96xbf16, #tpu.memory_space<vmem>>, vector<64x32xbf16>,
    %c0_4 = arith.constant 0 : index
    %c1 = arith.constant 1 : index
    %c0_5 = arith.constant 0 : index
    %4 = vector.load %arg1[%c0_4, %c1, %c0_5] : memref<1x80x32xf32, #tpu.memory_space<vmem>>, vector<1x64x32xf32>
    %5 = vector.shape_cast %4 : vector<1x64x32xf32> to vector<64x32xf32>
    %6 = arith.truncf %5 : vector<64x32xf32> to vector<64x32xbf16>
    %c0_6 = arith.constant 0 : index
    %c32 = arith.constant 32 : index
    %7 = vector.load %arg7[%c0_6, %c32] : memref<64x96xbf16, #tpu.memory_space<vmem>>, vector<64x32xbf16>
    tpu.vector_store %arg7[%c0_6, %c32], %6 {strides = array<i32>} : memref<64x96xbf16, #tpu.memory_space<vmem>>, vector<64x32xbf16>,
    %c0_7 = arith.constant 0 : index
    %c2 = arith.constant 2 : index
    %c0_8 = arith.constant 0 : index
    %8 = vector.load %arg1[%c0_7, %c2, %c0_8] : memref<1x80x32xf32, #tpu.memory_space<vmem>>, vector<1x64x32xf32>
    %9 = vector.shape_cast %8 : vector<1x64x32xf32> to vector<64x32xf32>
    %10 = arith.truncf %9 : vector<64x32xf32> to vector<64x32xbf16>
    %c0_9 = arith.constant 0 : index
    %c64 = arith.constant 64 : index
    %11 = vector.load %arg7[%c0_9, %c64] : memref<64x96xbf16, #tpu.memory_space<vmem>>, vector<64x32xbf16>
    tpu.vector_store %arg7[%c0_9, %c64], %10 {strides = array<i32>} : memref<64x96xbf16, #tpu.memory_space<vmem>>, vector<64x32xbf16>,
    %12 = tpu.iota {dimensions = array<i32: 1>} : vector<2x16x64xi32>
    %13 = vector.shape_cast %12 : vector<2x16x64xi32> to vector<32x64xi32>
    %c2_i32 = arith.constant 2 : i32
    %14 = vector.broadcast %c2_i32 : i32 to vector<32x64xi32>
    %15 = arith.cmpi slt, %13, %14 : vector<32x64xi32>
    %c0_10 = arith.constant 0 : index
    %c0_11 = arith.constant 0 : index
    %16 = vector.load %arg7[%c0_10, %c0_11] : memref<64x96xbf16, #tpu.memory_space<vmem>>, vector<32x96xbf16>
    %c0_12 = arith.constant 0 : index
    %c0_13 = arith.constant 0 : index
    %c0_14 = arith.constant 0 : index
    %17 = vector.load %arg2[%c0_12, %c0_13, %c0_14] : memref<3x96x64xbf16, #tpu.memory_space<vmem>>, vector<1x96x64xbf16>
    %18 = vector.shape_cast %17 : vector<1x96x64xbf16> to vector<96x64xbf16>
    %cst = arith.constant dense<0.000000e+00> : vector<32x64xf32>
    %19 = tpu.matmul %16, %18, %cst {dimension_numbers = #tpu.dot_dimension_numbers<[1], [0], [0], [1], [0, 0, 1, 1], [], []>} : vector<32x96xbf16>, vector<96x64xbf16>, vector<32x64xf32> -> vector<32x64xf32>
    %c16 = arith.constant 16 : index
    %c0_15 = arith.constant 0 : index
    %20 = vector.load %arg7[%c16, %c0_15] : memref<64x96xbf16, #tpu.memory_space<vmem>>, vector<32x96xbf16>
    %c1_16 = arith.constant 1 : index
    %c0_17 = arith.constant 0 : index
    %c0_18 = arith.constant 0 : index
    %21 = vector.load %arg2[%c1_16, %c0_17, %c0_18] : memref<3x96x64xbf16, #tpu.memory_space<vmem>>, vector<1x96x64xbf16>
    %22 = vector.shape_cast %21 : vector<1x96x64xbf16> to vector<96x64xbf16>
    %cst_19 = arith.constant dense<0.000000e+00> : vector<32x64xf32>
    %23 = tpu.matmul %20, %22, %cst_19 {dimension_numbers = #tpu.dot_dimension_numbers<[1], [0], [0], [1], [0, 0, 1, 1], [], []>} : vector<32x96xbf16>, vector<96x64xbf16>, vector<32x64xf32> -> vector<32x64xf32>
    %24 = arith.addf %19, %23 : vector<32x64xf32>
    %c32_20 = arith.constant 32 : index
    %c0_21 = arith.constant 0 : index
    %25 = vector.load %arg7[%c32_20, %c0_21] : memref<64x96xbf16, #tpu.memory_space<vmem>>, vector<32x96xbf16>
    %c2_22 = arith.constant 2 : index
    %c0_23 = arith.constant 0 : index
    %c0_24 = arith.constant 0 : index
    %26 = vector.load %arg2[%c2_22, %c0_23, %c0_24] : memref<3x96x64xbf16, #tpu.memory_space<vmem>>, vector<1x96x64xbf16>
    %27 = vector.shape_cast %26 : vector<1x96x64xbf16> to vector<96x64xbf16>
    %cst_25 = arith.constant dense<0.000000e+00> : vector<32x64xf32>
    %28 = tpu.matmul %25, %27, %cst_25 {dimension_numbers = #tpu.dot_dimension_numbers<[1], [0], [0], [1], [0, 0, 1, 1], [], []>} : vector<32x96xbf16>, vector<96x64xbf16>, vector<32x64xf32> -> vector<32x64xf32>
    %29 = arith.addf %24, %28 : vector<32x64xf32>
    %c0_26 = arith.constant 0 : index
    %c0_27 = arith.constant 0 : index
    %30 = vector.load %arg3[%c0_26, %c0_27] : memref<1x64xf32, #tpu.memory_space<vmem>>, vector<1x64xf32>
    %31 = vector.broadcast %30 : vector<1x64xf32> to vector<32x64xf32>
    %32 = arith.addf %29, %31 : vector<32x64xf32>
    %cst_28 = arith.constant 0.000000e+00 : f32
    %33 = vector.broadcast %cst_28 : f32 to vector<32x64xf32>
    %34 = arith.maximumf %32, %33 : vector<32x64xf32>
    %cst_29 = arith.constant 0.000000e+00 : f32
    %35 = vector.broadcast %cst_29 : f32 to vector<32x64xf32>
    %36 = arith.select %15, %34, %35 : vector<32x64xi1>, vector<32x64xf32>
    %cst_30 = arith.constant 0.000000e+00 : f32
    %37 = vector.broadcast %cst_30 : f32 to vector<24x192xf32>
    %c0_31 = arith.constant 0 : index
    %c0_32 = arith.constant 0 : index
    %38 = vector.load %arg8[%c0_31, %c0_32] : memref<64x192xf32, #tpu.memory_space<vmem>>, vector<24x192xf32>
    tpu.vector_store %arg8[%c0_31, %c0_32], %37 {strides = array<i32>} : memref<64x192xf32, #tpu.memory_space<vmem>>, vector<24x192xf32>,
    %cst_33 = arith.constant 0.000000e+00 : f32
    %39 = vector.broadcast %cst_33 : f32 to vector<24x192xf32>
    %c40 = arith.constant 40 : index
    %c0_34 = arith.constant 0 : index
    %40 = vector.load %arg8[%c40, %c0_34] : memref<64x192xf32, #tpu.memory_space<vmem>>, vector<24x192xf32>
    tpu.vector_store %arg8[%c40, %c0_34], %39 {strides = array<i32>} : memref<64x192xf32, #tpu.memory_space<vmem>>, vector<24x192xf32>,
    %c17 = arith.constant 17 : index
    %c0_35 = arith.constant 0 : index
    %41 = vector.load %arg8[%c17, %c0_35] : memref<64x192xf32, #tpu.memory_space<vmem>>, vector<32x64xf32>
    tpu.vector_store %arg8[%c17, %c0_35], %36 {strides = array<i32>} : memref<64x192xf32, #tpu.memory_space<vmem>>, vector<32x64xf32>,
    %c16_36 = arith.constant 16 : index
    %c64_37 = arith.constant 64 : index
    %42 = vector.load %arg8[%c16_36, %c64_37] : memref<64x192xf32, #tpu.memory_space<vmem>>, vector<32x64xf32>
    tpu.vector_store %arg8[%c16_36, %c64_37], %36 {strides = array<i32>} : memref<64x192xf32, #tpu.memory_space<vmem>>, vector<32x64xf32>,
    %c15 = arith.constant 15 : index
    %c128 = arith.constant 128 : index
    %43 = vector.load %arg8[%c15, %c128] : memref<64x192xf32, #tpu.memory_space<vmem>>, vector<32x64xf32>
    tpu.vector_store %arg8[%c15, %c128], %36 {strides = array<i32>} : memref<64x192xf32, #tpu.memory_space<vmem>>, vector<32x64xf32>,
    %c0_38 = arith.constant 0 : index
    %c0_39 = arith.constant 0 : index
    %44 = vector.load %arg8[%c0_38, %c0_39] : memref<64x192xf32, #tpu.memory_space<vmem>>, vector<32x192xf32>
    %45 = arith.truncf %44 : vector<32x192xf32> to vector<32x192xbf16>
    %c0_40 = arith.constant 0 : index
    %c0_41 = arith.constant 0 : index
    %c0_42 = arith.constant 0 : index
    %46 = vector.load %arg4[%c0_40, %c0_41, %c0_42] : memref<3x192x64xbf16, #tpu.memory_space<vmem>>, vector<1x192x64xbf16>
    %47 = vector.shape_cast %46 : vector<1x192x64xbf16> to vector<192x64xbf16>
    %cst_43 = arith.constant dense<0.000000e+00> : vector<32x64xf32>
    %48 = tpu.matmul %45, %47, %cst_43 {dimension_numbers = #tpu.dot_dimension_numbers<[1], [0], [0], [1], [0, 0, 1, 1], [], []>} : vector<32x192xbf16>, vector<192x64xbf16>, vector<32x64xf32> -> vector<32x64xf32>
    %c16_44 = arith.constant 16 : index
    %c0_45 = arith.constant 0 : index
    %49 = vector.load %arg8[%c16_44, %c0_45] : memref<64x192xf32, #tpu.memory_space<vmem>>, vector<32x192xf32>
    %50 = arith.truncf %49 : vector<32x192xf32> to vector<32x192xbf16>
    %c1_46 = arith.constant 1 : index
    %c0_47 = arith.constant 0 : index
    %c0_48 = arith.constant 0 : index
    %51 = vector.load %arg4[%c1_46, %c0_47, %c0_48] : memref<3x192x64xbf16, #tpu.memory_space<vmem>>, vector<1x192x64xbf16>
    %52 = vector.shape_cast %51 : vector<1x192x64xbf16> to vector<192x64xbf16>
    %cst_49 = arith.constant dense<0.000000e+00> : vector<32x64xf32>
    %53 = tpu.matmul %50, %52, %cst_49 {dimension_numbers = #tpu.dot_dimension_numbers<[1], [0], [0], [1], [0, 0, 1, 1], [], []>} : vector<32x192xbf16>, vector<192x64xbf16>, vector<32x64xf32> -> vector<32x64xf32>
    %54 = arith.addf %48, %53 : vector<32x64xf32>
    %c32_50 = arith.constant 32 : index
    %c0_51 = arith.constant 0 : index
    %55 = vector.load %arg8[%c32_50, %c0_51] : memref<64x192xf32, #tpu.memory_space<vmem>>, vector<32x192xf32>
    %56 = arith.truncf %55 : vector<32x192xf32> to vector<32x192xbf16>
    %c2_52 = arith.constant 2 : index
    %c0_53 = arith.constant 0 : index
    %c0_54 = arith.constant 0 : index
    %57 = vector.load %arg4[%c2_52, %c0_53, %c0_54] : memref<3x192x64xbf16, #tpu.memory_space<vmem>>, vector<1x192x64xbf16>
    %58 = vector.shape_cast %57 : vector<1x192x64xbf16> to vector<192x64xbf16>
    %cst_55 = arith.constant dense<0.000000e+00> : vector<32x64xf32>
    %59 = tpu.matmul %56, %58, %cst_55 {dimension_numbers = #tpu.dot_dimension_numbers<[1], [0], [0], [1], [0, 0, 1, 1], [], []>} : vector<32x192xbf16>, vector<192x64xbf16>, vector<32x64xf32> -> vector<32x64xf32>
    %60 = arith.addf %54, %59 : vector<32x64xf32>
    %c0_56 = arith.constant 0 : index
    %c0_57 = arith.constant 0 : index
    %61 = vector.load %arg5[%c0_56, %c0_57] : memref<1x64xf32, #tpu.memory_space<vmem>>, vector<1x64xf32>
    %62 = vector.broadcast %61 : vector<1x64xf32> to vector<32x64xf32>
    %63 = arith.addf %60, %62 : vector<32x64xf32>
    %cst_58 = arith.constant 0.000000e+00 : f32
    %64 = vector.broadcast %cst_58 : f32 to vector<32x64xf32>
    %65 = arith.maximumf %63, %64 : vector<32x64xf32>
    %c0_59 = arith.constant 0 : index
    %c0_60 = arith.constant 0 : index
    %66 = vector.load %arg9[%c0_59, %c0_60] : memref<32x64xf32, #tpu.memory_space<vmem>>, vector<32x64xf32>
    tpu.vector_store %arg9[%c0_59, %c0_60], %65 {strides = array<i32>} : memref<32x64xf32, #tpu.memory_space<vmem>>, vector<32x64xf32>,
    %c0_61 = arith.constant 0 : index
    %c0_62 = arith.constant 0 : index
    %67 = tpu.strided_load %arg9[%c0_61, %c0_62] {strides = array<i32: 2, 1>} : memref<32x64xf32, #tpu.memory_space<vmem>>, vector<16x64xf32>
    %c1_63 = arith.constant 1 : index
    %c0_64 = arith.constant 0 : index
    %68 = tpu.strided_load %arg9[%c1_63, %c0_64] {strides = array<i32: 2, 1>} : memref<32x64xf32, #tpu.memory_space<vmem>>, vector<16x64xf32>
    %69 = arith.maximumf %67, %68 : vector<16x64xf32>
    %70 = vector.shape_cast %69 : vector<16x64xf32> to vector<1x16x64xf32>
    %71 = vector.extract_strided_slice %70 {offsets = [0, 0, 0], sizes = [1, 8, 64], strides = [1, 1, 1]} : vector<1x16x64xf32> to vector<1x8x64xf32>
    %72 = vector.extract_strided_slice %70 {offsets = [0, 8, 0], sizes = [1, 8, 64], strides = [1, 1, 1]} : vector<1x16x64xf32> to vector<1x8x64xf32>
    %73 = arith.maximumf %71, %72 : vector<1x8x64xf32>
    %cst_65 = arith.constant 0.000000e+00 : f32
    %74 = vector.broadcast %cst_65 : f32 to vector<1x16x64xf32>
    %c0_66 = arith.constant 0 : index
    %c0_67 = arith.constant 0 : index
    %c0_68 = arith.constant 0 : index
    %c0_69 = arith.constant 0 : index
    %75 = vector.load %arg6[%c0_66, %c0_67, %c0_68, %c0_69] : memref<1x4x16x64xf32, #tpu.memory_space<vmem>>, vector<1x1x16x64xf32>
    %76 = vector.shape_cast %75 : vector<1x1x16x64xf32> to vector<1x16x64xf32>
    %77 = vector.shape_cast %74 : vector<1x16x64xf32> to vector<1x1x16x64xf32>
    tpu.vector_store %arg6[%c0_66, %c0_67, %c0_68, %c0_69], %77 {strides = array<i32>} : memref<1x4x16x64xf32, #tpu.memory_space<vmem>>, vector<1x1x16x64xf32>,
    %cst_70 = arith.constant 0.000000e+00 : f32
    %78 = vector.broadcast %cst_70 : f32 to vector<2x16x64xf32>
    %c0_71 = arith.constant 0 : index
    %c2_72 = arith.constant 2 : index
    %c0_73 = arith.constant 0 : index
    %c0_74 = arith.constant 0 : index
    %79 = vector.load %arg6[%c0_71, %c2_72, %c0_73, %c0_74] : memref<1x4x16x64xf32, #tpu.memory_space<vmem>>, vector<1x2x16x64xf32>
    %80 = vector.shape_cast %79 : vector<1x2x16x64xf32> to vector<2x16x64xf32>
    %81 = vector.shape_cast %78 : vector<2x16x64xf32> to vector<1x2x16x64xf32>
    tpu.vector_store %arg6[%c0_71, %c2_72, %c0_73, %c0_74], %81 {strides = array<i32>} : memref<1x4x16x64xf32, #tpu.memory_space<vmem>>, vector<1x2x16x64xf32>,
    %cst_75 = arith.constant 0.000000e+00 : f32
    %82 = vector.broadcast %cst_75 : f32 to vector<1x1x64xf32>
    %c0_76 = arith.constant 0 : index
    %c1_77 = arith.constant 1 : index
    %c0_78 = arith.constant 0 : index
    %c0_79 = arith.constant 0 : index
    %83 = vector.load %arg6[%c0_76, %c1_77, %c0_78, %c0_79] : memref<1x4x16x64xf32, #tpu.memory_space<vmem>>, vector<1x1x1x64xf32>
    %84 = vector.shape_cast %83 : vector<1x1x1x64xf32> to vector<1x1x64xf32>
    %85 = vector.shape_cast %82 : vector<1x1x64xf32> to vector<1x1x1x64xf32>
    tpu.vector_store %arg6[%c0_76, %c1_77, %c0_78, %c0_79], %85 {strides = array<i32>} : memref<1x4x16x64xf32, #tpu.memory_space<vmem>>, vector<1x1x1x64xf32>,
    %cst_80 = arith.constant 0.000000e+00 : f32
    %86 = vector.broadcast %cst_80 : f32 to vector<1x14x64xf32>
    %c0_81 = arith.constant 0 : index
    %c1_82 = arith.constant 1 : index
    %c2_83 = arith.constant 2 : index
    %c0_84 = arith.constant 0 : index
    %87 = vector.load %arg6[%c0_81, %c1_82, %c2_83, %c0_84] : memref<1x4x16x64xf32, #tpu.memory_space<vmem>>, vector<1x1x14x64xf32>
    %88 = vector.shape_cast %87 : vector<1x1x14x64xf32> to vector<1x14x64xf32>
    %89 = vector.shape_cast %86 : vector<1x14x64xf32> to vector<1x1x14x64xf32>
    tpu.vector_store %arg6[%c0_81, %c1_82, %c2_83, %c0_84], %89 {strides = array<i32>} : memref<1x4x16x64xf32, #tpu.memory_space<vmem>>, vector<1x1x14x64xf32>,
    %90 = vector.extract_strided_slice %73 {offsets = [0, 0, 0], sizes = [1, 1, 64], strides = [1, 1, 1]} : vector<1x8x64xf32> to vector<1x1x64xf32>
    %c0_85 = arith.constant 0 : index
    %c1_86 = arith.constant 1 : index
    %c1_87 = arith.constant 1 : index
    %c0_88 = arith.constant 0 : index
    %91 = vector.load %arg6[%c0_85, %c1_86, %c1_87, %c0_88] : memref<1x4x16x64xf32, #tpu.memory_space<vmem>>, vector<1x1x1x64xf32>
    %92 = vector.shape_cast %91 : vector<1x1x1x64xf32> to vector<1x1x64xf32>
    %93 = vector.shape_cast %90 : vector<1x1x64xf32> to vector<1x1x1x64xf32>
    tpu.vector_store %arg6[%c0_85, %c1_86, %c1_87, %c0_88], %93 {strides = array<i32>} : memref<1x4x16x64xf32, #tpu.memory_space<vmem>>, vector<1x1x1x64xf32>,
    return
  }
  func.func @transform_0(%arg0: i32) -> (i32, i32, i32) {
    %c0_i32 = arith.constant 0 : i32
    %c0_i32_0 = arith.constant 0 : i32
    %c0_i32_1 = arith.constant 0 : i32
    return %arg0, %c0_i32, %c0_i32_0 : i32, i32, i32
  }
  func.func @transform_1(%arg0: i32) -> (i32, i32, i32) {
    %c0_i32 = arith.constant 0 : i32
    %c0_i32_0 = arith.constant 0 : i32
    %c0_i32_1 = arith.constant 0 : i32
    %c0_i32_2 = arith.constant 0 : i32
    return %c0_i32, %c0_i32_0, %c0_i32_1 : i32, i32, i32
  }
  func.func @transform_2(%arg0: i32) -> (i32, i32) {
    %c0_i32 = arith.constant 0 : i32
    %c0_i32_0 = arith.constant 0 : i32
    %c0_i32_1 = arith.constant 0 : i32
    return %c0_i32, %c0_i32_0 : i32, i32
  }
  func.func @transform_3(%arg0: i32) -> (i32, i32, i32) {
    %c0_i32 = arith.constant 0 : i32
    %c0_i32_0 = arith.constant 0 : i32
    %c0_i32_1 = arith.constant 0 : i32
    %c0_i32_2 = arith.constant 0 : i32
    return %c0_i32, %c0_i32_0, %c0_i32_1 : i32, i32, i32
  }
  func.func @transform_4(%arg0: i32) -> (i32, i32) {
    %c0_i32 = arith.constant 0 : i32
    %c0_i32_0 = arith.constant 0 : i32
    %c0_i32_1 = arith.constant 0 : i32
    return %c0_i32, %c0_i32_0 : i32, i32
  }
  func.func @transform_5(%arg0: i32) -> (i32, i32, i32, i32) {
    %c0_i32 = arith.constant 0 : i32
    %c0_i32_0 = arith.constant 0 : i32
    %c0_i32_1 = arith.constant 0 : i32
    %c0_i32_2 = arith.constant 0 : i32
    return %arg0, %c0_i32, %c0_i32_0, %c0_i32_1 : i32, i32, i32, i32
  }
}

</mosaic_0001>

<bundles_post_ra>
// kernel: encoder_forward.6
= control target key start
LH: loop header
LB: loop body
LE: loop exit
PB: predicated region body
PF: predicated region fallthrough
CT: control target
= control target key end

     0   :  { %s1690_s18 = smov 0   ;;  %s2013_s0 = inlined_call_operand.vmem [shape: f32[2,112,16], index: 0, kind: input, shape index: {}]   ;;  %s2014_s1 = inlined_call_operand.vmem [shape: bf16[3,48,32], index: 1, kind: input, shape index: {}]   ;;  %s2015_s2 = inlined_call_operand.vmem [shape: f32[1,32], index: 2, kind: input, shape index: {}]   ;;  %s2016_s3 = inlined_call_operand.vmem [shape: bf16[3,96,32], index: 3, kind: input, shape index: {}]   ;;  %s2017_s4 = inlined_call_operand.vmem [shape: f32[1,32], index: 4, kind: input, shape index: {}]   ;;  %s2018_s5 = inlined_call_operand.vmem [shape: f32[2,5,16,32], index: 5, kind: output, shape index: {}]  }
   0x1 LB: > { %s1318_s19 = sadd.s32 4294967295, %s1654_s18   ;;  %p1322_p0 = scmp.ge.s32.totalorder %s1654_s18, 1  ;;  %s1654_s18 = sphi %s1690_s18, %s15_s18  }
   0x2   : > { %p187_p1 = scmp.lt.s32.totalorder %s1654_s18, 3 }
   0x4   : > { %p188_p2 = pnand %p1322_p0, %p187_p1 }
   0x5   : > { %p215_p3 = scmp.lt.s32.totalorder (!%p188_p2), %s1318_s19, 1  ;;  %v1621_v0 = vld [vmem:[%s2014_s1 + $0x18] sm:$0xff] (!%p188_p2)   ;;  %v1622_v1 = vld [vmem:[%s2014_s1 + $0x20] sm:$0xff] (!%p188_p2)   ;;  %v1623_v2 = vld [vmem:[%s2014_s1 + $0x28] sm:$0xff] (!%p188_p2)   ;;  %s1656_s30 = smov (!%p188_p2), 16   ;;  %vm244_vm0 = vcmask (!%p188_p2), 130048  }
   0x6   : > { %191 = sbr.rel (%p188_p2) target bundleno = 782 (0x30e), region = 40  ;;  %1479 = vmatprep.subr.bf16.mxu0 (!%p188_p2), %v1621_v0  ;;  %s1657_s6 = smov (!%p188_p2), 32   ;;  %v1748_v38 = vld [vmem:[%s2014_s1 + $0x30] sm:$0xff] (!%p188_p2)   ;;  %v1625_v41 = vld [vmem:[%s2014_s1] sm:$0xff] (!%p188_p2)   ;;  %v1626_v47 = vld [vmem:[%s2014_s1 + $0x8] sm:$0xff] (!%p188_p2)   ;;  %vm293_vm1 = vcmask (!%p188_p2), 261248  }
   0x7   : > { %1480 = vmatpush3.bf16.msra.mxu0 (!%p188_p2), %v1621_v0  ;;  %1493 = vmatprep.subr.bf16.mxu1 (!%p188_p2), %v1625_v41  ;;  %v1628_v51 = vld [vmem:[%s2014_s1 + $0x10] sm:$0xff] (!%p188_p2)   ;;  %vm342_vm2 = vcmask (!%p188_p2), 392448   ;;  %vm390_vm3 = vcmask (!%p188_p2), 392192   ;;  %vm706_vm4 = vcmask (!%p188_p2), 261120   ;;  %vm699_vm5 = vcmask (!%p188_p2), 785408   ;;  %s1659_s17 = smov (!%p188_p2), 64  }
   0x8   : > { %1481 = vmatprep.subr.bf16.mxu0 (!%p188_p2), %v1622_v1  ;;  %1494 = vmatpush3.bf16.msra.mxu1 (!%p188_p2), %v1625_v41  ;;  %vm747_vm7 = vcmask (!%p188_p2), 523520   ;;  %vm780_vm8 = vcmask (!%p188_p2), 785920   ;;  %vm1252_vm9 = vcmask (!%p188_p2), 253952   ;;  %vm1256_vm10 = vcmask (!%p188_p2), 258048  }
   0x9   : > { %1495 = vmatprep.subr.bf16.mxu1 (!%p188_p2), %v1626_v47  ;;  %vm1260_vm11 = vcmask (!%p188_p2), 254976  }
   0xb   : > { %1482 = vmatpush3.bf16.msra.mxu0 (!%p188_p2), %v1622_v1 }
   0xc   : > { %1483 = vmatprep.subr.bf16.mxu0 (!%p188_p2), %v1623_v2  ;;  %1496 = vmatpush3.bf16.msra.mxu1 (!%p188_p2), %v1626_v47 }
   0xd   : > { %s2020_s19 = smov (!%p215_p3, %s1318_s19), 1  ;;  %1497 = vmatprep.subr.bf16.mxu1 %v1628_v51 }
   0xe   : > { %s1597_s24 = smul.u32 112, %s2020_s19 }
   0xf   : > { %1484 = vmatpush3.bf16.msra.mxu0 %v1623_v2  ;;  %s1598_s13 = smul.u32 80, %s2020_s19 }
  0x10   : > { %s1713_s29 = scalar_lea.vmem %s2013_s0, %s1597_s24  ;;  %1507 = vmatprep.subr.bf16.mxu0 %v1748_v38  ;;  %1498 = vmatpush3.bf16.msra.mxu1 %v1628_v51 }
  0x11   : > { %v253_v3 = vld [vmem:[%s1713_s29 + $0x11] sm:$0xff]  ;;  %v254_v4 = vld [vmem:[%s1713_s29 + $0x19] sm:$0xff]  ;;  %v255_v8 = vld [vmem:[%s1713_s29 + $0x21] sm:$0xff]  ;;  %s1963_s16 = scalar_lea.vmem %s2018_s5, %s1598_s13 }
  0x12   : > { %v302_v5 = vld [vmem:[%s1713_s29 + $0x12] sm:$0xff]  ;;  %v264_v6 = vpack.c.bf16 %v254_v4, %v253_v3  ;;  %v303_v7 = vld [vmem:[%s1713_s29 + $0x1a] sm:$0xff]  ;;  %v256_v9 = vld [vmem:[%s1713_s29 + $0x29] sm:$0xff] }
  0x13   : > { %v313_v10 = vpack.c.bf16 %v303_v7, %v302_v5  ;;  %v304_v11 = vld [vmem:[%s1713_s29 + $0x22] sm:$0xff]  ;;  %v305_v12 = vld [vmem:[%s1713_s29 + $0x2a] sm:$0xff]  ;;  %v265_v13 = vpack.c.bf16 %v256_v9, %v255_v8  ;;  %v258_v16 = vld [vmem:[%s1713_s29 + $0x39] sm:$0xff] }
  0x14   : > { %277 = vrot.lane.b32.xlu0 %v264_v6, %s1656_s30  ;;  %v314_v14 = vpack.c.bf16 %v305_v12, %v304_v11  ;;  %v257_v15 = vld [vmem:[%s1713_s29 + $0x31] sm:$0xff]  ;;  %v259_v17 = vld [vmem:[%s1713_s29 + $0x41] sm:$0xff]  ;;  %v260_v18 = vld [vmem:[%s1713_s29 + $0x49] sm:$0xff] }
  0x15   : > { %326 = vrot.lane.b32.xlu1 %v313_v10, %s1657_s6  ;;  %v306_v19 = vld [vmem:[%s1713_s29 + $0x32] sm:$0xff]  ;;  %v266_v20 = vpack.c.bf16 %v258_v16, %v257_v15  ;;  %v307_v21 = vld [vmem:[%s1713_s29 + $0x3a] sm:$0xff]  ;;  %v308_v22 = vld [vmem:[%s1713_s29 + $0x42] sm:$0xff]  ;;  %v267_v24 = vpack.c.bf16 %v260_v18, %v259_v17  ;;  %v1658_v17 = vmov 0.0  }
  0x16   : > { %v309_v23 = vld [vmem:[%s1713_s29 + $0x4a] sm:$0xff]  ;;  %v229_v26 = vld [vmem:[%s1713_s29 + $0x18] sm:$0xff]  ;;  %v230_v27 = vld [vmem:[%s1713_s29 + $0x20] sm:$0xff]  ;;  %v315_v39 = vpack.c.bf16 %v307_v21, %v306_v19  ;;  %708 = vst.msk [vmem:[#allocation3 + $0x19] sm:$0xff] %vm706_vm4, %v1658_v17 }
  0x17   : > { %v228_v25 = vld [vmem:[%s1713_s29 + $0x10] sm:$0xff]  ;;  %v231_v29 = vld [vmem:[%s1713_s29 + $0x28] sm:$0xff]  ;;  %v233_v31 = vld [vmem:[%s1713_s29 + $0x38] sm:$0xff]  ;;  %v316_v44 = vpack.c.bf16 %v309_v23, %v308_v22  ;;  %710 = vst.msk [vmem:[#allocation3 + $0x29] sm:$0xff] %vm706_vm4, %v1658_v17 }
  0x18   : > { %279 = vrot.lane.b32.xlu0 %v265_v13, %s1656_s30  ;;  %v239_v28 = vpack.c.bf16 %v229_v26, %v228_v25  ;;  %v232_v30 = vld [vmem:[%s1713_s29 + $0x30] sm:$0xff]  ;;  %v251_v32 = vld [vmem:[%s1713_s29 + $0x1] sm:$0xff]  ;;  %v240_v34 = vpack.c.bf16 %v231_v29, %v230_v27  ;;  %v262_v50 = vld [vmem:[%s1713_s29 + $0x59] sm:$0xff]  ;;  %712 = vst.msk [vmem:[#allocation3 + $0x39] sm:$0xff] %vm706_vm4, %v1658_v17  ;;  %v349_v29 = vlaneseq }
  0x19   : > { %328 = vrot.lane.b32.xlu1 %v314_v14, %s1657_s6  ;;  %v252_v33 = vld [vmem:[%s1713_s29 + $0x9] sm:$0xff]  ;;  %v241_v35 = vpack.c.bf16 %v233_v31, %v232_v30  ;;  %v234_v36 = vld [vmem:[%s1713_s29 + $0x40] sm:$0xff]  ;;  %v261_v49 = vld [vmem:[%s1713_s29 + $0x51] sm:$0xff]  ;;  %702 = vst.msk [vmem:[#allocation3 + $0x10] sm:$0xff] %vm699_vm5, %v1658_v17 }
  0x1a   : > { %v235_v37 = vld [vmem:[%s1713_s29 + $0x48] sm:$0xff]  ;;  %246 = vst.msk [vmem:[#allocation2 + $0x8] sm:$0xff] %vm244_vm0, %v239_v28  ;;  %v226_v42 = vld [vmem:[%s1713_s29] sm:$0xff]  ;;  %247 = vst.msk [vmem:[#allocation2 + $0x10] sm:$0xff] %vm244_vm0, %v240_v34  ;;  %v263_v53 = vpack.c.bf16 %v252_v33, %v251_v32  ;;  %v268_v59 = vpack.c.bf16 %v262_v50, %v261_v49 }
  0x1b   : > { %v242_v40 = vpack.c.bf16 %v235_v37, %v234_v36  ;;  %v227_v43 = vld [vmem:[%s1713_s29 + $0x8] sm:$0xff]  ;;  %248 = vst.msk [vmem:[#allocation2 + $0x18] sm:$0xff] %vm244_vm0, %v241_v35  ;;  %v236_v52 = vld [vmem:[%s1713_s29 + $0x50] sm:$0xff]  ;;  %v311_v55 = vld [vmem:[%s1713_s29 + $0x5a] sm:$0xff] }
  0x1c   : > { %281 = vrot.lane.b32.xlu0 %v266_v20, %s1656_s30  ;;  %v300_v45 = vld [vmem:[%s1713_s29 + $0x2] sm:$0xff]  ;;  %v238_v46 = vpack.c.bf16 %v227_v43, %v226_v42  ;;  %v301_v48 = vld [vmem:[%s1713_s29 + $0xa] sm:$0xff]  ;;  %v310_v54 = vld [vmem:[%s1713_s29 + $0x52] sm:$0xff]  ;;  %700 = vst.msk [vmem:[#allocation3] sm:$0xff] %vm699_vm5, %v1658_v17 }
  0x1d   : > { %283 = vrot.lane.b32.xlu1 %v267_v24, %s1656_s30  ;;  %249 = vst.msk [vmem:[#allocation2 + $0x20] sm:$0xff] %vm244_vm0, %v242_v40  ;;  %v237_v56 = vld [vmem:[%s1713_s29 + $0x58] sm:$0xff]  ;;  %v312_v57 = vpack.c.bf16 %v301_v48, %v300_v45  ;;  %v317_v60 = vpack.c.bf16 %v311_v55, %v310_v54  ;;  %v1629_v9 = vld [vmem:[%s2014_s1 + $0x40] sm:$0xff]   ;;  %v1631_v19 = vld [vmem:[%s2016_s3 + $0x8] sm:$0xff]   ;;  %v1855_v40 = vshrl.u32 %v349_v29, 7 }
  0x1e   : > { %245 = vst.msk [vmem:[#allocation2] sm:$0xff] %vm244_vm0, %v238_v46  ;;  %v243_v58 = vpack.c.bf16 %v237_v56, %v236_v52  ;;  %v1627_v5 = vld [vmem:[%s2014_s1 + $0x38] sm:$0xff]   ;;  %v1630_v18 = vld [vmem:[%s2016_s3] sm:$0xff]   ;;  %v1632_v27 = vld [vmem:[%s2016_s3 + $0x10] sm:$0xff]  }
  0x1f   : > { %701 = vst.msk [vmem:[#allocation3 + $0x8] sm:$0xff] %vm699_vm5, %v1658_v17  ;;  %703 = vst.msk [vmem:[#allocation3 + $0x48] sm:$0xff] %vm699_vm5, %v1658_v17  ;;  %1541 = vmatprep.subr.bf16.mxu1 %v1630_v18  ;;  %v1633_v33 = vld [vmem:[%s2016_s3 + $0x18] sm:$0xff]   ;;  %v1634_v36 = vld [vmem:[%s2016_s3 + $0x30] sm:$0xff]   ;;  %vm352_vm6 = vcmp.lt.s32.totalorder %v1855_v40, 4 }
  0x20   : > { %330 = vrot.lane.b32.xlu0 %v315_v39, %s1657_s6  ;;  %250 = vst.msk [vmem:[#allocation2 + $0x28] sm:$0xff] %vm244_vm0, %v243_v58  ;;  %v1358_v39 = vld [vmem:[%s2015_s2] ss:$0 sm:$0xff]  ;;  %v1636_v48 = vld [vmem:[%s2016_s3 + $0x38] sm:$0xff]   ;;  %v1637_v55 = vld [vmem:[%s2016_s3 + $0x28] sm:$0xff]  }
  0x21   : > { %332 = vrot.lane.b32.xlu1 %v316_v44, %s1657_s6  ;;  %704 = vst.msk [vmem:[#allocation3 + $0x50] sm:$0xff] %vm699_vm5, %v1658_v17  ;;  %705 = vst.msk [vmem:[#allocation3 + $0x58] sm:$0xff] %vm699_vm5, %v1658_v17  ;;  %v1635_v45 = vld [vmem:[%s2016_s3 + $0x20] sm:$0xff]  }
  0x22   : > { %714 = vst.msk [vmem:[#allocation3 + $0x49] sm:$0xff] %vm706_vm4, %v1658_v17  ;;  %1244 = vst.msk [vmem:[%s1963_s16] sm:$0xff] %vm706_vm4, %v1658_v17 }
  0x23   : > { %1245 = vst.msk [vmem:[%s1963_s16 + $0x8] sm:$0xff] %vm706_vm4, %v1658_v17  ;;  %1414 = vst.msk [vmem:[%s1963_s16 + $0x30] sm:$0xff] %vm706_vm4, %v1658_v17 }
  0x24   : > { %275 = vrot.lane.b32.xlu0 %v263_v53, %s1656_s30  ;;  %1415 = vst.msk [vmem:[%s1963_s16 + $0x38] sm:$0xff] %vm706_vm4, %v1658_v17  ;;  %1416 = vst.msk [vmem:[%s1963_s16 + $0x40] sm:$0xff] %vm706_vm4, %v1658_v17 }
  0x25   : > { %324 = vrot.lane.b32.xlu1 %v312_v57, %s1657_s6  ;;  %1417 = vst.msk [vmem:[%s1963_s16 + $0x48] sm:$0xff] %vm706_vm4, %v1658_v17  ;;  %1420 = vst.msk [vmem:[%s1963_s16 + $0x13] sm:$0xff] %vm706_vm4, %v1658_v17 }
  0x26   : > { %1422 = vst.msk [vmem:[%s1963_s16 + $0x23] sm:$0xff] %vm706_vm4, %v1658_v17 }
  0x27   : > { %1418 = vst.msk [vmem:[%s1963_s16 + $0x10] sm:$0x1] %vm1252_vm9, %v1658_v17  ;;  %1419 = vst.msk [vmem:[%s1963_s16 + $0x20] sm:$0x1] %vm1252_vm9, %v1658_v17 }
  0x28   : > { %285 = vrot.lane.b32.xlu0 %v268_v59, %s1656_s30  ;;  %v1638_v59 = vld [vmem:[%s2016_s3 + $0x40] sm:$0xff]   ;;  %1421 = vst.msk [vmem:[%s1963_s16 + $0x1b] sm:$0x1f] %vm1256_vm10, %v1658_v17  ;;  %1423 = vst.msk [vmem:[%s1963_s16 + $0x2b] sm:$0x1f] %vm1256_vm10, %v1658_v17 }
  0x29   : > { %334 = vrot.lane.b32.xlu1 %v317_v60, %s1657_s6 }
  0x2d   : > { %725 = vrot.lane.b32.xlu1 %v1658_v17, %s1657_s6 }
  0x86   : > { %v278_v61 = vpop.permute.xlu0 %277 }
  0x87   : > { %295 = vst.msk [vmem:[#allocation2 + $0x8] sm:$0xff] %vm293_vm1, %v278_v61  ;;  %v327_v62 = vpop.permute.xlu1 %326 }
  0x88   : > { %344 = vst.msk [vmem:[#allocation2 + $0x8] sm:$0xff] %vm342_vm2, %v327_v62 }
  0x8a   : > { %v280_v63 = vpop.permute.xlu0 %279 }
  0x8b   : > { %296 = vst.msk [vmem:[#allocation2 + $0x10] sm:$0xff] %vm293_vm1, %v280_v63  ;;  %v329_v0 = vpop.permute.xlu1 %328 }
  0x8c   : > { %345 = vst.msk [vmem:[#allocation2 + $0x10] sm:$0xff] %vm342_vm2, %v329_v0 }
  0x8e   : > { %v282_v1 = vpop.permute.xlu0 %281 }
  0x8f   : > { %297 = vst.msk [vmem:[#allocation2 + $0x18] sm:$0xff] %vm293_vm1, %v282_v1  ;;  %v284_v2 = vpop.permute.xlu1 %283  ;;  %v355_v3 = vld [vmem:[#allocation2 + $0x8] sm:$0xff] }
  0x90   : > { %298 = vst.msk [vmem:[#allocation2 + $0x20] sm:$0xff] %vm293_vm1, %v284_v2  ;;  %1485 = vmatprep.mubr.msk.bf16.mxu0 %vm390_vm3, %v355_v3 }
  0x92   : > { %v331_v4 = vpop.permute.xlu0 %330 }
  0x93   : > { %346 = vst.msk [vmem:[#allocation2 + $0x18] sm:$0xff] %vm342_vm2, %v331_v4  ;;  %v333_v6 = vpop.permute.xlu1 %332  ;;  %v356_v7 = vld [vmem:[#allocation2 + $0x10] sm:$0xff]  ;;  %v1882_v4 = vld [vmem:[%s2016_s3 + $0x60] sm:$0xff]  }
  0x94   : > { %347 = vst.msk [vmem:[#allocation2 + $0x20] sm:$0xff] %vm342_vm2, %v333_v6  ;;  %1486 = vmatmul.mubr.msk.bf16.vlgmr.msra.gmra.mrb[0].mxu0 %vm390_vm3, %v356_v7 }
  0x95   : > { %1508 = vmatpush3.bf16.msra.mxu0 %v1748_v38 }
  0x96   : > { %v276_v8 = vpop.permute.xlu0 %275  ;;  %1509 = vmatprep.subr.bf16.mxu0 %v1627_v5 }
  0x97   : > { %294 = vst.msk [vmem:[#allocation2] sm:$0xff] %vm293_vm1, %v276_v8  ;;  %v325_v10 = vpop.permute.xlu1 %324 }
  0x98   : > { %343 = vst.msk [vmem:[#allocation2] sm:$0xff] %vm342_vm2, %v325_v10 }
  0x99   : > { %1510 = vmatpush3.bf16.msra.mxu0 %v1627_v5 }
  0x9a   : > { %v357_v11 = vld [vmem:[#allocation2 + $0x18] sm:$0xff]  ;;  %1511 = vmatprep.subr.bf16.mxu0 %v1629_v9  ;;  %v286_v12 = vpop.permute.xlu0 %285 }
  0x9b   : > { %1489 = vmatprep.mubr.msk.bf16.mxu0 %vm390_vm3, %v357_v11  ;;  %v364_v13 = vld [vmem:[#allocation2 + $0x20] sm:$0xff]  ;;  %299 = vst.msk [vmem:[#allocation2 + $0x28] sm:$0xff] %vm293_vm1, %v286_v12  ;;  %v335_v14 = vpop.permute.xlu1 %334  ;;  %v1642_v12 = vld [vmem:[%s2016_s3 + $0x50] sm:$0xff]  }
  0x9c   : > { %1490 = vmatmul.mubr.msk.bf16.gmra.mrb[4].mxu0 %vm390_vm3, %v364_v13  ;;  %348 = vst.msk [vmem:[#allocation2 + $0x28] sm:$0xff] %vm342_vm2, %v335_v14  ;;  %v1644_v14 = vld [vmem:[%s2016_s3 + $0x58] sm:$0xff]  }
  0x9d   : > { %1513 = vmatprep.mubr.msk.bf16.mxu0 %vm390_vm3, %v356_v7  ;;  %1512 = vmatpush3.bf16.msra.mxu0 %v1629_v9 }
  0x9e   : > { %1521 = vmatprep.subr.bf16.mxu0 %v1634_v36 }
  0x9f   : > { %v354_v15 = vld [vmem:[#allocation2] sm:$0xff]  ;;  %v726_v1 = vpop.permute.xlu1 %725 }
  0xa0   : > { %1499 = vmatprep.mubr.msk.bf16.mxu1 %vm390_vm3, %v354_v15 }
  0xa1   : > { %1500 = vmatmul.mubr.msk.bf16.vlgmr.msra.gmra.mrb[0].mxu1 %vm390_vm3, %v355_v3 }
  0xa2   : > { %1503 = vmatprep.mubr.msk.bf16.mxu1 %vm390_vm3, %v356_v7  ;;  %1542 = vmatpush3.bf16.msra.mxu1 %v1630_v18  ;;  %v1640_v7 = vld [vmem:[%s2016_s3 + $0x48] sm:$0xff]  }
  0xa3   : > { %v557_v16 = vld [vmem:[#allocation2 + $0x28] sm:$0xff]  ;;  %1543 = vmatprep.subr.bf16.mxu1 %v1631_v19 }
  0xa4   : > { %1514 = vmatmul.mubr.msk.bf16.vlgmr.msra.gmra.mrb[8].mxu0 %vm390_vm3, %v357_v11 }
  0xa5   : > { %1517 = vmatprep.mubr.msk.bf16.mxu0 %vm390_vm3, %v364_v13  ;;  %1522 = vmatpush3.bf16.msra.mxu0 %v1634_v36  ;;  %v1641_v36 = vld [vmem:[%s2016_s3 + $0x68] sm:$0xff]  }
  0xa6   : > { %1544 = vmatpush3.bf16.msra.mxu1 %v1631_v19  ;;  %1523 = vmatprep.subr.bf16.mxu0 %v1636_v48 }
  0xa7   : > { %1545 = vmatprep.subr.bf16.mxu1 %v1632_v27 }
  0xa9   : > { %1504 = vmatmul.mubr.msk.bf16.gmra.mrb[4].mxu1 %vm390_vm3, %v357_v11  ;;  %1524 = vmatpush3.bf16.msra.mxu0 %v1636_v48  ;;  %v1646_v48 = vld [vmem:[%s2016_s3 + $0x80] sm:$0xff]  }
  0xaa   : > { %1546 = vmatpush3.bf16.msra.mxu1 %v1632_v27  ;;  %1525 = vmatprep.subr.bf16.mxu0 %v1638_v59 }
  0xab   : > { %1547 = vmatprep.subr.bf16.mxu1 %v1633_v33 }
  0xac   : > { %1518 = vmatmul.mubr.msk.bf16.gmra.mrb[12].mxu0 %vm390_vm3, %v557_v16 }
  0xad   : > { %1526 = vmatpush3.bf16.msra.mxu0 %v1638_v59 }
  0xae   : > { %1548 = vmatpush3.bf16.msra.mxu1 %v1633_v33  ;;  %1527 = vmatprep.subr.bf16.mxu0 %v1640_v7 }
  0xaf   : > { %1549 = vmatprep.subr.bf16.mxu1 %v1635_v45 }
  0xb1   : > { %1528 = vmatpush3.bf16.msra.mxu0 %v1640_v7 }
  0xb2   : > { %1550 = vmatpush3.bf16.msra.mxu1 %v1635_v45  ;;  %1529 = vmatprep.subr.bf16.mxu0 %v1642_v12 }
  0xb3   : > { %1551 = vmatprep.subr.bf16.mxu1 %v1637_v55 }
  0xb5   : > { %1530 = vmatpush3.bf16.msra.mxu0 %v1642_v12 }
  0xb6   : > { %1552 = vmatpush3.bf16.msra.mxu1 %v1637_v55  ;;  %1531 = vmatprep.subr.bf16.mxu0 %v1644_v14 }
  0xb7   : > { %1561 = vmatprep.subr.bf16.mxu1 %v1882_v4 }
  0xb9   : > { %1532 = vmatpush3.bf16.msra.mxu0 %v1644_v14 }
 0x167   : > { %v1487_v20 = vpop.f32.mrb[0].mxu0 }
 0x168   : > { %v437_v21 = vpop.f32.mrb[1].mxu0 }
 0x169   : > { %v1488_v22 = vpop.f32.mrb[2].mxu0 }
 0x16a   : > { %v440_v23 = vpop.f32.mrb[3].mxu0  ;;  %v789_v22 = vld [vmem:[#allocation3] sm:$0xff] }
 0x16f   : > { %v1491_v24 = vpop.f32.mrb[4].mxu0 }
 0x170   : > { %v453_v25 = vpop.f32.mrb[5].mxu0 }
 0x171   : > { %v1492_v26 = vpop.f32.mrb[6].mxu0 }
 0x172   : > { %v456_v28 = vpop.f32.mrb[7].mxu0 }
 0x174   : > { %v1501_v30 = vpop.f32.mrb[0].mxu1 }
 0x175   : > { %v532_v31 = vadd.f32 %v1501_v30, %v1487_v20  ;;  %v523_v32 = vpop.f32.mrb[1].mxu1 }
 0x176   : > { %v524_v34 = vadd.f32 %v523_v32, %v437_v21  ;;  %v1502_v35 = vpop.f32.mrb[2].mxu1 }
 0x177   : > { %v526_v37 = vpop.f32.mrb[3].mxu1  ;;  %v1515_v38 = vpop.f32.mrb[8].mxu0 }
 0x178   : > { %v662_v41 = vadd.f32 %v1515_v38, %v532_v31  ;;  %v629_v42 = vpop.f32.mrb[9].mxu0  ;;  %v1643_v38 = vld [vmem:[%s2016_s3 + $0x70] sm:$0xff]  }
 0x179   : > { %v660_v43 = vadd.f32 %v629_v42, %v524_v34  ;;  %v1516_v44 = vpop.f32.mrb[10].mxu0 }
 0x17a   : > { %v677_v46 = vadd.f32 %v1358_v39, %v662_v41  ;;  %v632_v47 = vpop.f32.mrb[11].mxu0  ;;  %v1645_v41 = vld [vmem:[%s2016_s3 + $0x78] sm:$0xff]  }
 0x17b   : > { %v675_v49 = vadd.f32 %v1358_v39, %v660_v43 }
 0x17c   : > { %v685_v50 = vmax.f32 %v677_v46, 0.0  ;;  %v1505_v51 = vpop.f32.mrb[4].mxu1 }
 0x17d   : > { %v683_v52 = vmax.f32 %v675_v49, 0.0  ;;  %v548_v53 = vadd.f32 %v1505_v51, %v1491_v24  ;;  %v539_v54 = vpop.f32.mrb[5].mxu1  ;;  %v1647_v49 = vld [vmem:[%s2016_s3 + $0x88] sm:$0xff]  }
 0x17e   : > { %v540_v56 = vadd.f32 %v539_v54, %v453_v25  ;;  %v1506_v57 = vpop.f32.mrb[6].mxu1  ;;  %v693_v58 = vsel %vm352_vm6, %v685_v50, 0.0  ;;  %v1053_v54 = vld [vmem:[#allocation3 + $0x58] sm:$0xff] }
 0x17f   : > { %v1519_v60 = vpop.f32.mrb[12].mxu0  ;;  %727 = vrot.lane.b32.xlu0 %v693_v58, %s1657_s6  ;;  %709 = vst.msk [vmem:[#allocation3 + $0x21] sm:$0xff] %vm706_vm4, %v693_v58  ;;  %v542_v61 = vpop.f32.mrb[7].mxu1  ;;  %v691_v62 = vsel %vm352_vm6, %v683_v52, 0.0 }
 0x180   : > { %v666_v63 = vadd.f32 %v1519_v60, %v548_v53  ;;  %v645_v0 = vpop.f32.mrb[13].mxu0  ;;  %756 = vrot.lane.b32.xlu1 %v691_v62, %s1659_s17  ;;  %707 = vst.msk [vmem:[#allocation3 + $0x11] sm:$0xff] %vm706_vm4, %v691_v62  ;;  %v1052_v53 = vld [vmem:[#allocation3 + $0x50] sm:$0xff] }
 0x181   : > { %v664_v2 = vadd.f32 %v645_v0, %v540_v56  ;;  %v1520_v3 = vpop.f32.mrb[14].mxu0  ;;  %749 = vst.msk [vmem:[#allocation3 + $0x18] sm:$0xff] %vm747_vm7, %v726_v1  ;;  %v1057_v55 = vpack.c.bf16 %v1053_v54, %v1052_v53  ;;  %v1413_v1 = vld [vmem:[%s2017_s4] ss:$0 sm:$0xff] }
 0x182   : > { %v681_v5 = vadd.f32 %v1358_v39, %v666_v63  ;;  %v648_v6 = vpop.f32.mrb[15].mxu0 }
 0x183   : > { %v679_v8 = vadd.f32 %v1358_v39, %v664_v2  ;;  %723 = vrot.lane.b32.xlu0 %v691_v62, %s1657_s6 }
 0x184   : > { %v689_v9 = vmax.f32 %v681_v5, 0.0  ;;  %760 = vrot.lane.b32.xlu1 %v693_v58, %s1659_s17 }
 0x185   : > { %v687_v10 = vmax.f32 %v679_v8, 0.0 }
 0x186   : > { %v697_v11 = vsel %vm352_vm6, %v689_v9, 0.0 }
 0x187   : > { %758 = vrot.lane.b32.xlu0 %v1658_v17, %s1659_s17  ;;  %v695_v13 = vsel %vm352_vm6, %v687_v10, 0.0  ;;  %713 = vst.msk [vmem:[#allocation3 + $0x41] sm:$0xff] %vm706_vm4, %v697_v11 }
 0x188   : > { %1617 = vrot.lane.b32.xlu1 %v1658_v17, %s1659_s17  ;;  %711 = vst.msk [vmem:[#allocation3 + $0x31] sm:$0xff] %vm706_vm4, %v695_v13 }
 0x18b   : > { %1612 = vrot.lane.b32.xlu0 %v1658_v17, %s1657_s6 }
 0x18c   : > { %731 = vrot.lane.b32.xlu1 %v695_v13, %s1657_s6 }
 0x18f   : > { %735 = vrot.lane.b32.xlu0 %v697_v11, %s1657_s6 }
 0x190   : > { %768 = vrot.lane.b32.xlu1 %v697_v11, %s1659_s17 }
 0x193   : > { %764 = vrot.lane.b32.xlu0 %v695_v13, %s1659_s17 }
 0x194   : > { %770 = vrot.lane.b32.xlu1 %v1658_v17, %s1659_s17 }
 0x197   : > { %737 = vrot.lane.b32.xlu0 %v1658_v17, %s1657_s6 }
 0x1f1   : > { %v728_v15 = vpop.permute.xlu0 %727 }
 0x1f2   : > { %750 = vst.msk [vmem:[#allocation3 + $0x20] sm:$0xff] %vm747_vm7, %v728_v15  ;;  %v757_v16 = vpop.permute.xlu1 %756 }
 0x1f5   : > { %v724_v18 = vpop.permute.xlu0 %723 }
 0x1f6   : > { %748 = vst.msk [vmem:[#allocation3 + $0x10] sm:$0xff] %vm747_vm7, %v724_v18  ;;  %v761_v19 = vpop.permute.xlu1 %760 }
 0x1f7   : > { %781 = vst.msk [vmem:[#allocation3 + $0xf] sm:$0xff] %vm780_vm8, %v757_v16  ;;  %783 = vst.msk [vmem:[#allocation3 + $0x1f] sm:$0xff] %vm780_vm8, %v761_v19 }
 0x1f9   : > { %v759_v20 = vpop.permute.xlu0 %758 }
 0x1fa   : > { %782 = vst.msk [vmem:[#allocation3 + $0x17] sm:$0xff] %vm780_vm8, %v759_v20  ;;  %v1618_v21 = vpop.permute.xlu1 %1617 }
 0x1fb   : > { %v1620_v23 = vunpack.i.h.bf16 %v1618_v21  ;;  %v1619_v24 = vunpack.i.l.bf16 %v1618_v21 }
 0x1fd   : > { %v1613_v25 = vpop.permute.xlu0 %1612 }
 0x1fe   : > { %v1615_v26 = vunpack.i.h.bf16 %v1613_v25  ;;  %v1614_v27 = vunpack.i.l.bf16 %v1613_v25  ;;  %v732_v28 = vpop.permute.xlu1 %731  ;;  %v790_v29 = vld [vmem:[#allocation3 + $0x8] sm:$0xff] }
 0x1ff   : > { %752 = vst.msk [vmem:[#allocation3 + $0x30] sm:$0xff] %vm747_vm7, %v732_v28  ;;  %v797_v30 = vpack.c.bf16 %v790_v29, %v789_v22 }
 0x200   : > { %753 = vst.msk [vmem:[#allocation3 + $0x38] sm:$0xff] %vm747_vm7, %v1615_v26  ;;  %751 = vst.msk [vmem:[#allocation3 + $0x28] sm:$0xff] %vm747_vm7, %v1614_v27 }
 0x201   : > { %786 = vst.msk [vmem:[#allocation3 + $0x37] sm:$0xff] %vm780_vm8, %v1620_v23  ;;  %784 = vst.msk [vmem:[#allocation3 + $0x27] sm:$0xff] %vm780_vm8, %v1619_v24  ;;  %v736_v31 = vpop.permute.xlu0 %735  ;;  %1553 = vmatprep.mubr.msk.bf16.mxu1 %vm699_vm5, %v797_v30  ;;  %v791_v32 = vld [vmem:[#allocation3 + $0x10] sm:$0xff]  ;;  %v792_v33 = vld [vmem:[#allocation3 + $0x18] sm:$0xff] }
 0x202   : > { %754 = vst.msk [vmem:[#allocation3 + $0x40] sm:$0xff] %vm747_vm7, %v736_v31  ;;  %v769_v34 = vpop.permute.xlu1 %768  ;;  %v798_v35 = vpack.c.bf16 %v792_v33, %v791_v32 }
 0x203   : > { %787 = vst.msk [vmem:[#allocation3 + $0x3f] sm:$0xff] %vm780_vm8, %v769_v34 }
 0x204   : > { %1533 = vmatprep.mubr.msk.bf16.mxu0 %vm699_vm5, %v798_v35  ;;  %1554 = vmatmul.mubr.msk.bf16.vlgmr.msra.gmra.mrb[8].mxu1 %vm699_vm5, %v798_v35 }
 0x205   : > { %1562 = vmatpush3.bf16.msra.mxu1 %v1882_v4  ;;  %v765_v37 = vpop.permute.xlu0 %764 }
 0x206   : > { %785 = vst.msk [vmem:[#allocation3 + $0x2f] sm:$0xff] %vm780_vm8, %v765_v37  ;;  %1563 = vmatprep.subr.bf16.mxu1 %v1641_v36  ;;  %v771_v39 = vpop.permute.xlu1 %770 }
 0x208   : > { %v793_v42 = vld [vmem:[#allocation3 + $0x20] sm:$0xff] }
 0x209   : > { %1564 = vmatpush3.bf16.msra.mxu1 %v1641_v36  ;;  %v738_v40 = vpop.permute.xlu0 %737 }
 0x20a   : > { %755 = vst.msk [vmem:[#allocation3 + $0x48] sm:$0xff] %vm747_vm7, %v738_v40  ;;  %1565 = vmatprep.subr.bf16.mxu1 %v1643_v38  ;;  %v796_v45 = vld [vmem:[#allocation3 + $0x38] sm:$0xff] }
 0x20b   : > { %788 = vst.msk [vmem:[#allocation3 + $0x47] sm:$0xff] %vm780_vm8, %v771_v39 }
 0x20d   : > { %1566 = vmatpush3.bf16.msra.mxu1 %v1643_v38  ;;  %v794_v43 = vld [vmem:[#allocation3 + $0x28] sm:$0xff]  ;;  %v795_v44 = vld [vmem:[#allocation3 + $0x30] sm:$0xff] }
 0x20e   : > { %1567 = vmatprep.subr.bf16.mxu1 %v1645_v41  ;;  %v799_v46 = vpack.c.bf16 %v794_v43, %v793_v42  ;;  %v800_v47 = vpack.c.bf16 %v796_v45, %v795_v44 }
 0x210   : > { %1534 = vmatmul.mubr.msk.bf16.vlgmr.msra.gmra.mrb[16].mxu0 %vm699_vm5, %v799_v46  ;;  %1557 = vmatprep.mubr.msk.bf16.mxu1 %vm699_vm5, %v799_v46 }
 0x211   : > { %1568 = vmatpush3.bf16.msra.mxu1 %v1645_v41  ;;  %1537 = vmatprep.mubr.msk.bf16.mxu0 %vm699_vm5, %v800_v47 }
 0x212   : > { %1558 = vmatmul.mubr.msk.bf16.gmra.mrb[12].mxu1 %vm699_vm5, %v800_v47  ;;  %1569 = vmatprep.subr.bf16.mxu1 %v1646_v48  ;;  %v813_v50 = vld [vmem:[#allocation3 + $0x40] sm:$0xff]  ;;  %v814_v51 = vld [vmem:[#allocation3 + $0x48] sm:$0xff] }
 0x213   : > { %1573 = vmatprep.mubr.msk.bf16.mxu1 %vm699_vm5, %v799_v46  ;;  %v815_v52 = vpack.c.bf16 %v814_v51, %v813_v50 }
 0x215   : > { %1570 = vmatpush3.bf16.msra.mxu1 %v1646_v48 }
 0x216   : > { %1571 = vmatprep.subr.bf16.mxu1 %v1647_v49 }
 0x218   : > { %1538 = vmatmul.mubr.msk.bf16.gmra.mrb[20].mxu0 %vm699_vm5, %v815_v52 }
 0x219   : > { %1572 = vmatpush3.bf16.msra.mxu1 %v1647_v49 }
 0x21c   : > { %1574 = vmatmul.mubr.msk.bf16.vlgmr.msra.gmra.mrb[8].mxu1 %vm699_vm5, %v800_v47 }
 0x21d   : > { %1577 = vmatprep.mubr.msk.bf16.mxu1 %vm699_vm5, %v815_v52 }
 0x224   : > { %1578 = vmatmul.mubr.msk.bf16.gmra.mrb[12].mxu1 %vm699_vm5, %v1057_v55 }
 0x2e3   : > { %v1535_v56 = vpop.f32.mrb[16].mxu0 }
 0x2e4   : > { %v911_v57 = vpop.f32.mrb[17].mxu0 }
 0x2e5   : > { %v1536_v58 = vpop.f32.mrb[18].mxu0 }
 0x2e6   : > { %v914_v59 = vpop.f32.mrb[19].mxu0 }
 0x2eb   : > { %v1539_v60 = vpop.f32.mrb[20].mxu0 }
 0x2ec   : > { %v927_v61 = vpop.f32.mrb[21].mxu0 }
 0x2ed   : > { %v1540_v62 = vpop.f32.mrb[22].mxu0 }
 0x2ee   : > { %v930_v63 = vpop.f32.mrb[23].mxu0 }
 0x2ef   : > { %v1575_v0 = vpop.f32.mrb[8].mxu1 }
 0x2f0   : > { %v1581_v2 = vadd.f32 %v1575_v0, %v1535_v56  ;;  %v1153_v3 = vpop.f32.mrb[9].mxu1 }
 0x2f1   : > { %v1582_v4 = vadd.f32 %v1153_v3, %v911_v57  ;;  %v1576_v5 = vpop.f32.mrb[10].mxu1 }
 0x2f2   : > { %v1201_v6 = vadd.f32 %v1581_v2, %v1413_v1  ;;  %v1583_v7 = vadd.f32 %v1576_v5, %v1536_v58  ;;  %v1156_v17 = vpop.f32.mrb[11].mxu1 }
 0x2f3   : > { %v1199_v8 = vadd.f32 %v1582_v4, %v1413_v1  ;;  %v1584_v9 = vadd.f32 %v1156_v17, %v914_v59 }
 0x2f4   : > { %v1209_v10 = vmax.f32 %v1201_v6, 0.0  ;;  %v1202_v11 = vadd.f32 %v1583_v7, %v1413_v1 }
 0x2f5   : > { %v1207_v12 = vmax.f32 %v1199_v8, 0.0  ;;  %v1200_v13 = vadd.f32 %v1584_v9, %v1413_v1 }
 0x2f6   : > { %1217 = vst.msk [vmem:[#allocation4 + $0x10] sm:$0xff] %vm706_vm4, %v1209_v10  ;;  %v1210_v14 = vmax.f32 %v1202_v11, 0.0 }
 0x2f7   : > { %1215 = vst.msk [vmem:[#allocation4] sm:$0xff] %vm706_vm4, %v1207_v12  ;;  %v1208_v15 = vmax.f32 %v1200_v13, 0.0  ;;  %v1579_v16 = vpop.f32.mrb[12].mxu1 }
 0x2f8   : > { %1218 = vst.msk [vmem:[#allocation4 + $0x18] sm:$0xff] %vm706_vm4, %v1210_v14  ;;  %v1585_v18 = vadd.f32 %v1579_v16, %v1539_v60  ;;  %v1169_v19 = vpop.f32.mrb[13].mxu1 }
 0x2f9   : > { %1216 = vst.msk [vmem:[#allocation4 + $0x8] sm:$0xff] %vm706_vm4, %v1208_v15  ;;  %v1586_v20 = vadd.f32 %v1169_v19, %v927_v61  ;;  %v1580_v21 = vpop.f32.mrb[14].mxu1 }
 0x2fa   : > { %v1205_v22 = vadd.f32 %v1585_v18, %v1413_v1  ;;  %v1587_v23 = vadd.f32 %v1580_v21, %v1540_v62  ;;  %v1172_v24 = vpop.f32.mrb[15].mxu1 }
 0x2fb   : > { %v1203_v25 = vadd.f32 %v1586_v20, %v1413_v1  ;;  %v1588_v26 = vadd.f32 %v1172_v24, %v930_v63 }
 0x2fc   : > { %v1213_v27 = vmax.f32 %v1205_v22, 0.0  ;;  %v1206_v28 = vadd.f32 %v1587_v23, %v1413_v1 }
 0x2fd   : > { %v1211_v29 = vmax.f32 %v1203_v25, 0.0  ;;  %v1204_v30 = vadd.f32 %v1588_v26, %v1413_v1 }
 0x2fe   : > { %1221 = vst.msk [vmem:[#allocation4 + $0x30] sm:$0xff] %vm706_vm4, %v1213_v27  ;;  %v1214_v31 = vmax.f32 %v1206_v28, 0.0 }
 0x2ff   : > { %v1225_v32 = vld [vmem:[#allocation4 + $0x10] ss:$2 sm:$0xff]  ;;  %v1233_v33 = vld [vmem:[#allocation4 + $0x11] ss:$2 sm:$0xff]  ;;  %1219 = vst.msk [vmem:[#allocation4 + $0x20] sm:$0xff] %vm706_vm4, %v1211_v29  ;;  %v1212_v34 = vmax.f32 %v1204_v30, 0.0 }
 0x300   : > { %v1239_v35 = vmax.f32 %v1225_v32, %v1233_v33  ;;  %v1223_v36 = vld [vmem:[#allocation4] ss:$2 sm:$0xff]  ;;  %v1231_v37 = vld [vmem:[#allocation4 + $0x1] ss:$2 sm:$0xff]  ;;  %1222 = vst.msk [vmem:[#allocation4 + $0x38] sm:$0xff] %vm706_vm4, %v1214_v31 }
 0x301   : > { %v1238_v38 = vmax.f32 %v1223_v36, %v1231_v37  ;;  %1220 = vst.msk [vmem:[#allocation4 + $0x28] sm:$0xff] %vm706_vm4, %v1212_v34 }
 0x303   : > { %v1242_v39 = vmax.f32 %v1238_v38, %v1239_v35 }
 0x305   : > { %1424 = vst.msk [vmem:[%s1963_s16 + $0x11] sm:$0x3] %vm1260_vm11, %v1242_v39 }
 0x307   : > { %v1229_v40 = vld [vmem:[#allocation4 + $0x30] ss:$2 sm:$0xff]  ;;  %v1237_v41 = vld [vmem:[#allocation4 + $0x31] ss:$2 sm:$0xff] }
 0x308   : > { %v1241_v42 = vmax.f32 %v1229_v40, %v1237_v41  ;;  %v1227_v43 = vld [vmem:[#allocation4 + $0x20] ss:$2 sm:$0xff]  ;;  %v1235_v44 = vld [vmem:[#allocation4 + $0x21] ss:$2 sm:$0xff] }
 0x309   : > { %v1240_v45 = vmax.f32 %v1227_v43, %v1235_v44 }
 0x30b   : > { %v1243_v46 = vmax.f32 %v1240_v45, %v1241_v42 }
 0x30d   : > { %1425 = vst.msk [vmem:[%s1963_s16 + $0x21] sm:$0x3] %vm1260_vm11, %v1243_v46 }
 0x30e PF: > { %s15_s18 = sadd.s32 1, %s1654_s18  }
 0x30f   : > { %p12_p4 = scmp.ge.s32.totalorder %s15_s18, 4  }
 0x311   :  { %14 = sbr.rel (!%p12_p4) target bundleno = 1 (0x1), region = 83 }

// kernel: encoder_forward.5
= control target key start
LH: loop header
LB: loop body
LE: loop exit
PB: predicated region body
PF: predicated region fallthrough
CT: control target
= control target key end

     0   :  { %s2183_s18 = smov 0   ;;  %s2660_s0 = inlined_call_operand.vmem [shape: f32[2,176,8], index: 0, kind: input, shape index: {}]   ;;  %s2661_s1 = inlined_call_operand.vmem [shape: bf16[3,24,16], index: 1, kind: input, shape index: {}]   ;;  %s2662_s2 = inlined_call_operand.vmem [shape: f32[1,16], index: 2, kind: input, shape index: {}]   ;;  %s2663_s3 = inlined_call_operand.vmem [shape: bf16[3,48,16], index: 3, kind: input, shape index: {}]   ;;  %s2664_s4 = inlined_call_operand.vmem [shape: f32[1,16], index: 4, kind: input, shape index: {}]   ;;  %s2665_s5 = inlined_call_operand.vmem [shape: f32[2,7,16,16], index: 5, kind: output, shape index: {}]  }
   0x1 LB: > { %s1746_s19 = sadd.s32 4294967295, %s2147_s18   ;;  %p1750_p0 = scmp.ge.s32.totalorder %s2147_s18, 1  ;;  %s2147_s18 = sphi %s2183_s18, %s15_s18  }
   0x2   : > { %p187_p1 = scmp.lt.s32.totalorder %s2147_s18, 3 }
   0x4   : > { %p188_p2 = pnand %p1750_p0, %p187_p1 }
   0x5   : > { %p215_p3 = scmp.lt.s32.totalorder (!%p188_p2), %s1746_s19, 1  ;;  %v2126_v0 = vld [vmem:[%s2661_s1 + $0xc] sm:$0xff] (!%p188_p2)   ;;  %v2127_v1 = vld [vmem:[%s2661_s1 + $0x14] ss:$0 sps:$4 sm:$0xff] (!%p188_p2)   ;;  %vm484_vm0 = vcmask (!%p188_p2), 1043456   ;;  %s2149_s28 = smov (!%p188_p2), 8  }
   0x6   : > { %191 = sbr.rel (%p188_p2) target bundleno = 823 (0x337), region = 40  ;;  %1921 = vmatprep.subr.bf16.mxu0 (!%p188_p2), %v2126_v0  ;;  %v486_v2 = vsel (!%p188_p2), %vm484_vm0, %v2127_v1, 0  ;;  %s2150_s29 = smov (!%p188_p2), 16   ;;  %vm256_vm1 = vcmask (!%p188_p2), 64512   ;;  %v2251_v49 = vld [vmem:[%s2661_s1 + $0x18] sm:$0xff] (!%p188_p2)   ;;  %vm337_vm2 = vcmask (!%p188_p2), 130112  }
   0x7   : > { %1922 = vmatpush3.bf16.msra.mxu0 (!%p188_p2), %v2126_v0  ;;  %vm418_vm3 = vcmask (!%p188_p2), 195712   ;;  %vm459_vm4 = vcmask (!%p188_p2), 195584   ;;  %s2152_s13 = smov (!%p188_p2), 32   ;;  %vm913_vm5 = vcmask (!%p188_p2), 392192   ;;  %vm920_vm6 = vcmask (!%p188_p2), 130048  }
   0x8   : > { %2079 = vmatprep.subr.msk.bf16.mxu0 (!%p188_p2), %vm484_vm0, %v2127_v1  ;;  %vm1001_vm7 = vcmask (!%p188_p2), 261248   ;;  %vm1066_vm8 = vcmask (!%p188_p2), 392448   ;;  %vm1672_vm9 = vcmask (!%p188_p2), 122880   ;;  %vm1678_vm10 = vcmask (!%p188_p2), 124928  }
   0x9   : > { %vm1686_vm11 = vcmask (!%p188_p2), 125952  }
   0xb   : > { %1924 = vmatpush3.bf16.msra.mxu0 (!%p188_p2), %v486_v2 }
   0xc   : > { %1961 = vmatprep.subr.bf16.mxu0 (!%p188_p2), %v2251_v49 }
   0xd   : > { %s2667_s19 = smov (!%p215_p3, %s1746_s19), 1 }
   0xe   : > { %s2082_s22 = smul.u32 176, %s2667_s19 }
   0xf   : > { %s2083_s11 = smul.u32 112, %s2667_s19 }
  0x10   : > { %s2203_s27 = scalar_lea.vmem %s2660_s0, %s2082_s22 }
  0x11   : > { %v269_v3 = vld [vmem:[%s2203_s27 + $0x11] sm:$0xff]  ;;  %v270_v4 = vld [vmem:[%s2203_s27 + $0x19] sm:$0xff]  ;;  %v271_v8 = vld [vmem:[%s2203_s27 + $0x21] sm:$0xff]  ;;  %s2549_s14 = scalar_lea.vmem %s2665_s5, %s2083_s11 }
  0x12   : > { %v350_v5 = vld [vmem:[%s2203_s27 + $0x12] sm:$0xff]  ;;  %v288_v6 = vpack.c.bf16 %v270_v4, %v269_v3  ;;  %v351_v7 = vld [vmem:[%s2203_s27 + $0x1a] sm:$0xff]  ;;  %v272_v9 = vld [vmem:[%s2203_s27 + $0x29] sm:$0xff] }
  0x13   : > { %v369_v10 = vpack.c.bf16 %v351_v7, %v350_v5  ;;  %v352_v11 = vld [vmem:[%s2203_s27 + $0x22] sm:$0xff]  ;;  %v353_v12 = vld [vmem:[%s2203_s27 + $0x2a] sm:$0xff]  ;;  %v289_v13 = vpack.c.bf16 %v272_v9, %v271_v8  ;;  %v274_v16 = vld [vmem:[%s2203_s27 + $0x39] sm:$0xff] }
  0x14   : > { %309 = vrot.lane.b32.xlu0 %v288_v6, %s2149_s28  ;;  %v370_v14 = vpack.c.bf16 %v353_v12, %v352_v11  ;;  %v273_v15 = vld [vmem:[%s2203_s27 + $0x31] sm:$0xff]  ;;  %v275_v17 = vld [vmem:[%s2203_s27 + $0x41] sm:$0xff]  ;;  %v276_v18 = vld [vmem:[%s2203_s27 + $0x49] sm:$0xff] }
  0x15   : > { %390 = vrot.lane.b32.xlu1 %v369_v10, %s2150_s29  ;;  %v290_v19 = vpack.c.bf16 %v274_v16, %v273_v15  ;;  %v291_v20 = vpack.c.bf16 %v276_v18, %v275_v17  ;;  %v354_v21 = vld [vmem:[%s2203_s27 + $0x32] sm:$0xff]  ;;  %v355_v22 = vld [vmem:[%s2203_s27 + $0x3a] sm:$0xff]  ;;  %v356_v23 = vld [vmem:[%s2203_s27 + $0x42] sm:$0xff] }
  0x16   : > { %v357_v24 = vld [vmem:[%s2203_s27 + $0x4a] sm:$0xff]  ;;  %v371_v25 = vpack.c.bf16 %v355_v22, %v354_v21  ;;  %v278_v28 = vld [vmem:[%s2203_s27 + $0x59] sm:$0xff]  ;;  %v279_v29 = vld [vmem:[%s2203_s27 + $0x61] sm:$0xff] }
  0x17   : > { %v372_v26 = vpack.c.bf16 %v357_v24, %v356_v23  ;;  %v277_v27 = vld [vmem:[%s2203_s27 + $0x51] sm:$0xff]  ;;  %v280_v30 = vld [vmem:[%s2203_s27 + $0x69] sm:$0xff]  ;;  %v359_v34 = vld [vmem:[%s2203_s27 + $0x5a] sm:$0xff] }
  0x18   : > { %311 = vrot.lane.b32.xlu0 %v289_v13, %s2149_s28  ;;  %v228_v31 = vld [vmem:[%s2203_s27 + $0x10] sm:$0xff]  ;;  %v229_v32 = vld [vmem:[%s2203_s27 + $0x18] sm:$0xff]  ;;  %v230_v36 = vld [vmem:[%s2203_s27 + $0x20] sm:$0xff]  ;;  %v292_v39 = vpack.c.bf16 %v278_v28, %v277_v27  ;;  %v293_v46 = vpack.c.bf16 %v280_v30, %v279_v29 }
  0x19   : > { %392 = vrot.lane.b32.xlu1 %v370_v14, %s2150_s29  ;;  %v358_v33 = vld [vmem:[%s2203_s27 + $0x52] sm:$0xff]  ;;  %v247_v35 = vpack.c.bf16 %v229_v32, %v228_v31  ;;  %v231_v37 = vld [vmem:[%s2203_s27 + $0x28] sm:$0xff]  ;;  %v234_v44 = vld [vmem:[%s2203_s27 + $0x40] sm:$0xff] }
  0x1a   : > { %v232_v38 = vld [vmem:[%s2203_s27 + $0x30] sm:$0xff]  ;;  %v360_v40 = vld [vmem:[%s2203_s27 + $0x62] sm:$0xff]  ;;  %v248_v42 = vpack.c.bf16 %v231_v37, %v230_v36  ;;  %v233_v43 = vld [vmem:[%s2203_s27 + $0x38] sm:$0xff]  ;;  %v373_v62 = vpack.c.bf16 %v359_v34, %v358_v33 }
  0x1b   : > { %v361_v41 = vld [vmem:[%s2203_s27 + $0x6a] sm:$0xff]  ;;  %258 = vst.msk [vmem:[#allocation2 + $0x8] sm:$0xff] %vm256_vm1, %v247_v35  ;;  %v249_v47 = vpack.c.bf16 %v233_v43, %v232_v38  ;;  %v237_v51 = vld [vmem:[%s2203_s27 + $0x58] sm:$0xff]  ;;  %v238_v53 = vld [vmem:[%s2203_s27 + $0x60] sm:$0xff] }
  0x1c   : > { %313 = vrot.lane.b32.xlu0 %v290_v19, %s2149_s28  ;;  %v235_v45 = vld [vmem:[%s2203_s27 + $0x48] sm:$0xff]  ;;  %v236_v50 = vld [vmem:[%s2203_s27 + $0x50] sm:$0xff]  ;;  %259 = vst.msk [vmem:[#allocation2 + $0x10] sm:$0xff] %vm256_vm1, %v248_v42  ;;  %v282_v57 = vld [vmem:[%s2203_s27 + $0x79] sm:$0xff]  ;;  %v374_v4 = vpack.c.bf16 %v361_v41, %v360_v40 }
  0x1d   : > { %315 = vrot.lane.b32.xlu1 %v291_v20, %s2149_s28  ;;  %v250_v48 = vpack.c.bf16 %v235_v45, %v234_v44  ;;  %v251_v52 = vpack.c.bf16 %v237_v51, %v236_v50  ;;  %v239_v54 = vld [vmem:[%s2203_s27 + $0x68] sm:$0xff]  ;;  %v240_v55 = vld [vmem:[%s2203_s27 + $0x70] sm:$0xff]  ;;  %260 = vst.msk [vmem:[#allocation2 + $0x18] sm:$0xff] %vm256_vm1, %v249_v47  ;;  %v241_v59 = vld [vmem:[%s2203_s27 + $0x78] sm:$0xff] }
  0x1e   : > { %v281_v56 = vld [vmem:[%s2203_s27 + $0x71] sm:$0xff]  ;;  %v252_v58 = vpack.c.bf16 %v239_v54, %v238_v53  ;;  %v242_v60 = vld [vmem:[%s2203_s27 + $0x80] sm:$0xff]  ;;  %v243_v61 = vld [vmem:[%s2203_s27 + $0x88] sm:$0xff]  ;;  %v253_v0 = vpack.c.bf16 %v241_v59, %v240_v55 }
  0x1f   : > { %261 = vst.msk [vmem:[#allocation2 + $0x20] sm:$0xff] %vm256_vm1, %v250_v48  ;;  %v283_v63 = vld [vmem:[%s2203_s27 + $0x81] sm:$0xff]  ;;  %262 = vst.msk [vmem:[#allocation2 + $0x28] sm:$0xff] %vm256_vm1, %v251_v52  ;;  %v254_v1 = vpack.c.bf16 %v243_v61, %v242_v60  ;;  %v284_v6 = vld [vmem:[%s2203_s27 + $0x89] sm:$0xff]  ;;  %v294_v10 = vpack.c.bf16 %v282_v57, %v281_v56 }
  0x20   : > { %394 = vrot.lane.b32.xlu0 %v371_v25, %s2150_s29  ;;  %v226_v2 = vld [vmem:[%s2203_s27] sm:$0xff]  ;;  %v227_v3 = vld [vmem:[%s2203_s27 + $0x8] sm:$0xff]  ;;  %263 = vst.msk [vmem:[#allocation2 + $0x30] sm:$0xff] %vm256_vm1, %v252_v58  ;;  %264 = vst.msk [vmem:[#allocation2 + $0x38] sm:$0xff] %vm256_vm1, %v253_v0  ;;  %v295_v12 = vpack.c.bf16 %v284_v6, %v283_v63 }
  0x21   : > { %396 = vrot.lane.b32.xlu1 %v372_v26, %s2150_s29  ;;  %v246_v5 = vpack.c.bf16 %v227_v3, %v226_v2  ;;  %265 = vst.msk [vmem:[#allocation2 + $0x40] sm:$0xff] %vm256_vm1, %v254_v1  ;;  %v362_v7 = vld [vmem:[%s2203_s27 + $0x72] sm:$0xff]  ;;  %v363_v8 = vld [vmem:[%s2203_s27 + $0x7a] sm:$0xff]  ;;  %v364_v11 = vld [vmem:[%s2203_s27 + $0x82] sm:$0xff]  ;;  %v2151_v1 = vmov 0.0  }
  0x22   : > { %v2130_v9 = vld [vmem:[%s2661_s1] sm:$0xff]   ;;  %v365_v13 = vld [vmem:[%s2203_s27 + $0x8a] sm:$0xff]  ;;  %v2131_v14 = vld [vmem:[%s2661_s1 + $0x8] ss:$0 sps:$4 sm:$0xff]   ;;  %v375_v15 = vpack.c.bf16 %v363_v8, %v362_v7  ;;  %916 = vst.msk [vmem:[#allocation3 + $0x10] sm:$0xff] %vm913_vm5, %v2151_v1 }
  0x23   : > { %257 = vst.msk [vmem:[#allocation2] sm:$0xff] %vm256_vm1, %v246_v5  ;;  %1941 = vmatprep.subr.bf16.mxu1 %v2130_v9  ;;  %v376_v16 = vpack.c.bf16 %v365_v13, %v364_v11  ;;  %v267_v17 = vld [vmem:[%s2203_s27 + $0x1] sm:$0xff]  ;;  %v268_v18 = vld [vmem:[%s2203_s27 + $0x9] sm:$0xff]  ;;  %v598_v19 = vsel %vm484_vm0, %v2131_v14, 0  ;;  %v285_v24 = vld [vmem:[%s2203_s27 + $0x91] sm:$0xff] }
  0x24   : > { %317 = vrot.lane.b32.xlu0 %v292_v39, %s2149_s28  ;;  %1942 = vmatpush3.bf16.msra.mxu1 %v2130_v9  ;;  %v348_v20 = vld [vmem:[%s2203_s27 + $0x2] sm:$0xff]  ;;  %v349_v21 = vld [vmem:[%s2203_s27 + $0xa] sm:$0xff]  ;;  %v287_v22 = vpack.c.bf16 %v268_v18, %v267_v17  ;;  %v286_v25 = vld [vmem:[%s2203_s27 + $0x99] sm:$0xff]  ;;  %914 = vst.msk [vmem:[#allocation3] sm:$0xff] %vm913_vm5, %v2151_v1 }
  0x25   : > { %319 = vrot.lane.b32.xlu1 %v293_v46, %s2149_s28  ;;  %2080 = vmatprep.subr.msk.bf16.mxu1 %vm484_vm0, %v2131_v14  ;;  %v368_v23 = vpack.c.bf16 %v349_v21, %v348_v20  ;;  %v366_v26 = vld [vmem:[%s2203_s27 + $0x92] sm:$0xff]  ;;  %v367_v27 = vld [vmem:[%s2203_s27 + $0x9a] sm:$0xff]  ;;  %v296_v28 = vpack.c.bf16 %v286_v25, %v285_v24  ;;  %915 = vst.msk [vmem:[#allocation3 + $0x8] sm:$0xff] %vm913_vm5, %v2151_v1  ;;  %917 = vst.msk [vmem:[#allocation3 + $0x88] sm:$0xff] %vm913_vm5, %v2151_v1 }
  0x26   : > { %v377_v29 = vpack.c.bf16 %v367_v27, %v366_v26  ;;  %v244_v30 = vld [vmem:[%s2203_s27 + $0x90] sm:$0xff]  ;;  %v245_v31 = vld [vmem:[%s2203_s27 + $0x98] sm:$0xff]  ;;  %v2129_v41 = vld [vmem:[%s2661_s1 + $0x20] ss:$0 sps:$4 sm:$0xff]   ;;  %918 = vst.msk [vmem:[#allocation3 + $0x90] sm:$0xff] %vm913_vm5, %v2151_v1 }
  0x27   : > { %v255_v32 = vpack.c.bf16 %v245_v31, %v244_v30  ;;  %v743_v45 = vsel %vm484_vm0, %v2129_v41, 0  ;;  %919 = vst.msk [vmem:[#allocation3 + $0x98] sm:$0xff] %vm913_vm5, %v2151_v1  ;;  %v2132_v2 = vld [vmem:[%s2663_s3] sm:$0xff]   ;;  %v2133_v3 = vld [vmem:[%s2663_s3 + $0x8] sm:$0xff]  }
  0x28   : > { %398 = vrot.lane.b32.xlu0 %v373_v62, %s2150_s29  ;;  %1944 = vmatpush3.bf16.msra.mxu1 %v598_v19  ;;  %922 = vst.msk [vmem:[#allocation3 + $0x19] sm:$0xff] %vm920_vm6, %v2151_v1  ;;  %924 = vst.msk [vmem:[#allocation3 + $0x29] sm:$0xff] %vm920_vm6, %v2151_v1  ;;  %v2418_v27 = vld [vmem:[%s2662_s2] ss:$0 sm:$0xff] }
  0x29   : > { %400 = vrot.lane.b32.xlu1 %v374_v4, %s2150_s29  ;;  %266 = vst.msk [vmem:[#allocation2 + $0x48] sm:$0xff] %vm256_vm1, %v255_v32  ;;  %2003 = vmatprep.subr.bf16.mxu1 %v2132_v2 }
  0x2a   : > { %926 = vst.msk [vmem:[#allocation3 + $0x39] sm:$0xff] %vm920_vm6, %v2151_v1  ;;  %928 = vst.msk [vmem:[#allocation3 + $0x49] sm:$0xff] %vm920_vm6, %v2151_v1 }
  0x2b   : > { %930 = vst.msk [vmem:[#allocation3 + $0x59] sm:$0xff] %vm920_vm6, %v2151_v1  ;;  %932 = vst.msk [vmem:[#allocation3 + $0x69] sm:$0xff] %vm920_vm6, %v2151_v1 }
  0x2c   : > { %321 = vrot.lane.b32.xlu0 %v294_v10, %s2149_s28  ;;  %934 = vst.msk [vmem:[#allocation3 + $0x79] sm:$0xff] %vm920_vm6, %v2151_v1  ;;  %936 = vst.msk [vmem:[#allocation3 + $0x89] sm:$0xff] %vm920_vm6, %v2151_v1 }
  0x2d   : > { %323 = vrot.lane.b32.xlu1 %v295_v12, %s2149_s28  ;;  %1664 = vst.msk [vmem:[%s2549_s14] sm:$0xff] %vm920_vm6, %v2151_v1  ;;  %1665 = vst.msk [vmem:[%s2549_s14 + $0x8] sm:$0xff] %vm920_vm6, %v2151_v1 }
  0x2e   : > { %1836 = vst.msk [vmem:[%s2549_s14 + $0x50] sm:$0xff] %vm920_vm6, %v2151_v1  ;;  %1837 = vst.msk [vmem:[%s2549_s14 + $0x58] sm:$0xff] %vm920_vm6, %v2151_v1 }
  0x2f   : > { %1838 = vst.msk [vmem:[%s2549_s14 + $0x60] sm:$0xff] %vm920_vm6, %v2151_v1  ;;  %1839 = vst.msk [vmem:[%s2549_s14 + $0x68] sm:$0xff] %vm920_vm6, %v2151_v1 }
  0x30   : > { %402 = vrot.lane.b32.xlu0 %v375_v15, %s2150_s29  ;;  %1844 = vst.msk [vmem:[%s2549_s14 + $0x15] sm:$0xff] %vm920_vm6, %v2151_v1  ;;  %1846 = vst.msk [vmem:[%s2549_s14 + $0x25] sm:$0xff] %vm920_vm6, %v2151_v1 }
  0x31   : > { %404 = vrot.lane.b32.xlu1 %v376_v16, %s2150_s29  ;;  %1848 = vst.msk [vmem:[%s2549_s14 + $0x35] sm:$0xff] %vm920_vm6, %v2151_v1  ;;  %1850 = vst.msk [vmem:[%s2549_s14 + $0x45] sm:$0xff] %vm920_vm6, %v2151_v1 }
  0x32   : > { %1840 = vst.msk [vmem:[%s2549_s14 + $0x10] sm:$0x1] %vm1672_vm9, %v2151_v1  ;;  %1841 = vst.msk [vmem:[%s2549_s14 + $0x20] sm:$0x1] %vm1672_vm9, %v2151_v1 }
  0x33   : > { %1842 = vst.msk [vmem:[%s2549_s14 + $0x30] sm:$0x1] %vm1672_vm9, %v2151_v1  ;;  %1843 = vst.msk [vmem:[%s2549_s14 + $0x40] sm:$0x1] %vm1672_vm9, %v2151_v1 }
  0x34   : > { %307 = vrot.lane.b32.xlu0 %v287_v22, %s2149_s28  ;;  %1845 = vst.msk [vmem:[%s2549_s14 + $0x1d] sm:$0x7] %vm1678_vm10, %v2151_v1  ;;  %1847 = vst.msk [vmem:[%s2549_s14 + $0x2d] sm:$0x7] %vm1678_vm10, %v2151_v1 }
  0x35   : > { %388 = vrot.lane.b32.xlu1 %v368_v23, %s2150_s29  ;;  %1849 = vst.msk [vmem:[%s2549_s14 + $0x3d] sm:$0x7] %vm1678_vm10, %v2151_v1  ;;  %1851 = vst.msk [vmem:[%s2549_s14 + $0x4d] sm:$0x7] %vm1678_vm10, %v2151_v1 }
  0x38   : > { %325 = vrot.lane.b32.xlu0 %v296_v28, %s2149_s28 }
  0x39   : > { %406 = vrot.lane.b32.xlu1 %v377_v29, %s2150_s29 }
  0x3c   : > { %2102 = vrot.lane.b32.xlu0 %v2151_v1, %s2152_s13 }
  0x3d   : > { %2097 = vrot.lane.b32.xlu1 %v2151_v1, %s2150_s29 }
  0x40   : > { %2112 = vrot.lane.b32.xlu0 %v2151_v1, %s2152_s13 }
  0x41   : > { %2107 = vrot.lane.b32.xlu1 %v2151_v1, %s2150_s29 }
  0x44   : > { %1036 = vrot.lane.b32.xlu0 %v2151_v1, %s2152_s13 }
  0x45   : > { %2117 = vrot.lane.b32.xlu1 %v2151_v1, %s2150_s29 }
  0x86   : > { %v310_v33 = vpop.permute.xlu0 %309 }
  0x87   : > { %339 = vst.msk [vmem:[#allocation2 + $0x8] sm:$0xff] %vm337_vm2, %v310_v33  ;;  %v391_v34 = vpop.permute.xlu1 %390 }
  0x88   : > { %420 = vst.msk [vmem:[#allocation2 + $0x8] sm:$0xff] %vm418_vm3, %v391_v34 }
  0x8a   : > { %v312_v35 = vpop.permute.xlu0 %311 }
  0x8b   : > { %340 = vst.msk [vmem:[#allocation2 + $0x10] sm:$0xff] %vm337_vm2, %v312_v35  ;;  %v393_v36 = vpop.permute.xlu1 %392  ;;  %v2134_v35 = vld [vmem:[%s2663_s3 + $0x10] sm:$0xff]  }
  0x8c   : > { %421 = vst.msk [vmem:[#allocation2 + $0x10] sm:$0xff] %vm418_vm3, %v393_v36  ;;  %v2135_v36 = vld [vmem:[%s2663_s3 + $0x18] sm:$0xff]  }
  0x8e   : > { %v314_v37 = vpop.permute.xlu0 %313 }
  0x8f   : > { %341 = vst.msk [vmem:[#allocation2 + $0x18] sm:$0xff] %vm337_vm2, %v314_v37  ;;  %v316_v38 = vpop.permute.xlu1 %315  ;;  %v435_v39 = vld [vmem:[#allocation2 + $0x8] sm:$0xff] }
  0x90   : > { %342 = vst.msk [vmem:[#allocation2 + $0x20] sm:$0xff] %vm337_vm2, %v316_v38  ;;  %1925 = vmatprep.mubr.msk.bf16.mxu0 %vm459_vm4, %v435_v39 }
  0x92   : > { %v395_v40 = vpop.permute.xlu0 %394 }
  0x93   : > { %422 = vst.msk [vmem:[#allocation2 + $0x18] sm:$0xff] %vm418_vm3, %v395_v40  ;;  %v397_v42 = vpop.permute.xlu1 %396  ;;  %v436_v43 = vld [vmem:[#allocation2 + $0x10] sm:$0xff] }
  0x94   : > { %423 = vst.msk [vmem:[#allocation2 + $0x20] sm:$0xff] %vm418_vm3, %v397_v42  ;;  %1926 = vmatmul.mubr.msk.bf16.vlgmr.msra.gmra.mrb[0].mxu0 %vm459_vm4, %v436_v43 }
  0x95   : > { %1962 = vmatpush3.bf16.msra.mxu0 %v2251_v49 }
  0x96   : > { %v318_v44 = vpop.permute.xlu0 %317  ;;  %2081 = vmatprep.subr.msk.bf16.mxu0 %vm484_vm0, %v2129_v41 }
  0x97   : > { %343 = vst.msk [vmem:[#allocation2 + $0x28] sm:$0xff] %vm337_vm2, %v318_v44  ;;  %v320_v46 = vpop.permute.xlu1 %319 }
  0x98   : > { %344 = vst.msk [vmem:[#allocation2 + $0x30] sm:$0xff] %vm337_vm2, %v320_v46 }
  0x99   : > { %1964 = vmatpush3.bf16.msra.mxu0 %v743_v45 }
  0x9a   : > { %v399_v47 = vpop.permute.xlu0 %398  ;;  %v437_v48 = vld [vmem:[#allocation2 + $0x18] sm:$0xff]  ;;  %1981 = vmatprep.subr.bf16.mxu0 %v2135_v36 }
  0x9b   : > { %424 = vst.msk [vmem:[#allocation2 + $0x28] sm:$0xff] %vm418_vm3, %v399_v47  ;;  %v401_v50 = vpop.permute.xlu1 %400  ;;  %1929 = vmatprep.mubr.msk.bf16.mxu0 %vm459_vm4, %v437_v48  ;;  %v438_v51 = vld [vmem:[#allocation2 + $0x20] sm:$0xff] }
  0x9c   : > { %425 = vst.msk [vmem:[#allocation2 + $0x30] sm:$0xff] %vm418_vm3, %v401_v50  ;;  %1930 = vmatmul.mubr.msk.bf16.gmra.mrb[4].mxu0 %vm459_vm4, %v438_v51  ;;  %v2136_v47 = vld [vmem:[%s2663_s3 + $0x20] sm:$0xff]  }
  0x9e   : > { %v322_v49 = vpop.permute.xlu0 %321 }
  0x9f   : > { %345 = vst.msk [vmem:[#allocation2 + $0x38] sm:$0xff] %vm337_vm2, %v322_v49  ;;  %v324_v52 = vpop.permute.xlu1 %323 }
  0xa0   : > { %346 = vst.msk [vmem:[#allocation2 + $0x40] sm:$0xff] %vm337_vm2, %v324_v52 }
  0xa2   : > { %v403_v53 = vpop.permute.xlu0 %402  ;;  %v439_v54 = vld [vmem:[#allocation2 + $0x28] sm:$0xff] }
  0xa3   : > { %426 = vst.msk [vmem:[#allocation2 + $0x38] sm:$0xff] %vm418_vm3, %v403_v53  ;;  %v405_v55 = vpop.permute.xlu1 %404  ;;  %1933 = vmatprep.mubr.msk.bf16.mxu0 %vm459_vm4, %v439_v54  ;;  %v440_v56 = vld [vmem:[#allocation2 + $0x30] sm:$0xff] }
  0xa4   : > { %427 = vst.msk [vmem:[#allocation2 + $0x40] sm:$0xff] %vm418_vm3, %v405_v55  ;;  %1934 = vmatmul.mubr.msk.bf16.gmra.mrb[8].mxu0 %vm459_vm4, %v440_v56 }
  0xa6   : > { %v308_v57 = vpop.permute.xlu0 %307 }
  0xa7   : > { %338 = vst.msk [vmem:[#allocation2] sm:$0xff] %vm337_vm2, %v308_v57  ;;  %v389_v58 = vpop.permute.xlu1 %388  ;;  %v2443_v57 = vld [vmem:[%s2663_s3 + $0x30] sm:$0xff]  }
  0xa8   : > { %419 = vst.msk [vmem:[#allocation2] sm:$0xff] %vm418_vm3, %v389_v58  ;;  %v2138_v58 = vld [vmem:[%s2663_s3 + $0x28] sm:$0xff]  }
  0xaa   : > { %v441_v59 = vld [vmem:[#allocation2 + $0x38] sm:$0xff]  ;;  %v326_v60 = vpop.permute.xlu0 %325 }
  0xab   : > { %1937 = vmatprep.mubr.msk.bf16.mxu0 %vm459_vm4, %v441_v59  ;;  %v445_v61 = vld [vmem:[#allocation2 + $0x40] sm:$0xff]  ;;  %347 = vst.msk [vmem:[#allocation2 + $0x48] sm:$0xff] %vm337_vm2, %v326_v60  ;;  %v407_v62 = vpop.permute.xlu1 %406 }
  0xac   : > { %1938 = vmatmul.mubr.msk.bf16.gmra.mrb[12].mxu0 %vm459_vm4, %v445_v61  ;;  %428 = vst.msk [vmem:[#allocation2 + $0x48] sm:$0xff] %vm418_vm3, %v407_v62 }
  0xad   : > { %1965 = vmatprep.mubr.msk.bf16.mxu0 %vm459_vm4, %v436_v43 }
  0xaf   : > { %v434_v63 = vld [vmem:[#allocation2] sm:$0xff]  ;;  %v2098_v30 = vpop.permute.xlu1 %2097 }
  0xb0   : > { %1945 = vmatprep.mubr.msk.bf16.mxu1 %vm459_vm4, %v434_v63  ;;  %v2100_v38 = vunpack.i.h.bf16 %v2098_v30  ;;  %v2099_v41 = vunpack.i.l.bf16 %v2098_v30 }
  0xb1   : > { %1946 = vmatmul.mubr.msk.bf16.vlgmr.msra.gmra.mrb[0].mxu1 %vm459_vm4, %v435_v39 }
  0xb2   : > { %1949 = vmatprep.mubr.msk.bf16.mxu1 %vm459_vm4, %v436_v43  ;;  %2004 = vmatpush3.bf16.msra.mxu1 %v2132_v2 }
  0xb3   : > { %v704_v0 = vld [vmem:[#allocation2 + $0x48] sm:$0xff]  ;;  %2005 = vmatprep.subr.bf16.mxu1 %v2133_v3  ;;  %v2108_v52 = vpop.permute.xlu1 %2107 }
  0xb4   : > { %1966 = vmatmul.mubr.msk.bf16.vlgmr.msra.gmra.mrb[16].mxu0 %vm459_vm4, %v437_v48  ;;  %v2110_v60 = vunpack.i.h.bf16 %v2108_v52  ;;  %v2109_v63 = vunpack.i.l.bf16 %v2108_v52 }
  0xb5   : > { %1969 = vmatprep.mubr.msk.bf16.mxu0 %vm459_vm4, %v438_v51  ;;  %1982 = vmatpush3.bf16.msra.mxu0 %v2135_v36 }
  0xb6   : > { %2006 = vmatpush3.bf16.msra.mxu1 %v2133_v3  ;;  %1983 = vmatprep.subr.bf16.mxu0 %v2136_v47 }
  0xb7   : > { %2007 = vmatprep.subr.bf16.mxu1 %v2134_v35 }
  0xb9   : > { %1950 = vmatmul.mubr.msk.bf16.gmra.mrb[4].mxu1 %vm459_vm4, %v437_v48  ;;  %1984 = vmatpush3.bf16.msra.mxu0 %v2136_v47 }
  0xba   : > { %1953 = vmatprep.mubr.msk.bf16.mxu1 %vm459_vm4, %v438_v51  ;;  %2008 = vmatpush3.bf16.msra.mxu1 %v2134_v35 }
  0xbb   : > { %2025 = vmatprep.subr.bf16.mxu1 %v2443_v57  ;;  %1985 = vmatprep.subr.bf16.mxu0 %v2138_v58 }
  0xbc   : > { %1970 = vmatmul.mubr.msk.bf16.gmra.mrb[20].mxu0 %vm459_vm4, %v439_v54 }
  0xbd   : > { %1973 = vmatprep.mubr.msk.bf16.mxu0 %vm459_vm4, %v440_v56  ;;  %1986 = vmatpush3.bf16.msra.mxu0 %v2138_v58  ;;  %v2139_v58 = vld [vmem:[%s2663_s3 + $0x38] sm:$0xff]  }
  0xc1   : > { %1954 = vmatmul.mubr.msk.bf16.gmra.mrb[8].mxu1 %vm459_vm4, %v439_v54 }
  0xc2   : > { %1957 = vmatprep.mubr.msk.bf16.mxu1 %vm459_vm4, %v440_v56 }
  0xc4   : > { %1974 = vmatmul.mubr.msk.bf16.gmra.mrb[24].mxu0 %vm459_vm4, %v441_v59 }
  0xc5   : > { %1977 = vmatprep.mubr.msk.bf16.mxu0 %vm459_vm4, %v445_v61 }
  0xc9   : > { %1958 = vmatmul.mubr.msk.bf16.gmra.mrb[12].mxu1 %vm459_vm4, %v441_v59 }
  0xcc   : > { %1978 = vmatmul.mubr.msk.bf16.gmra.mrb[28].mxu0 %vm459_vm4, %v704_v0 }
 0x167   : > { %v1927_v4 = vpop.f32.mrb[0].mxu0 }
 0x168   : > { %v522_v5 = vpop.f32.mrb[1].mxu0 }
 0x169   : > { %v1928_v6 = vpop.f32.mrb[2].mxu0 }
 0x16a   : > { %v525_v7 = vpop.f32.mrb[3].mxu0 }
 0x16f   : > { %v1931_v8 = vpop.f32.mrb[4].mxu0 }
 0x170   : > { %v538_v9 = vpop.f32.mrb[5].mxu0 }
 0x171   : > { %v1932_v10 = vpop.f32.mrb[6].mxu0 }
 0x172   : > { %v541_v11 = vpop.f32.mrb[7].mxu0  ;;  %v2118_v10 = vpop.permute.xlu1 %2117 }
 0x177   : > { %v2407_v12 = vpop.f32.mrb[8].mxu0 }
 0x178   : > { %v2409_v13 = vpop.f32.mrb[9].mxu0 }
 0x179   : > { %v1936_v14 = vpop.f32.mrb[10].mxu0 }
 0x17a   : > { %v557_v15 = vpop.f32.mrb[11].mxu0 }
 0x17f   : > { %v2411_v16 = vpop.f32.mrb[12].mxu0 }
 0x180   : > { %v2413_v17 = vpop.f32.mrb[13].mxu0 }
 0x181   : > { %v1940_v18 = vpop.f32.mrb[14].mxu0 }
 0x182   : > { %v573_v19 = vpop.f32.mrb[15].mxu0  ;;  %v2120_v18 = vunpack.i.h.bf16 %v2118_v10 }
 0x184   : > { %v1947_v20 = vpop.f32.mrb[0].mxu1 }
 0x185   : > { %v643_v21 = vadd.f32 %v1947_v20, %v1927_v4  ;;  %v634_v22 = vpop.f32.mrb[1].mxu1 }
 0x186   : > { %v635_v23 = vadd.f32 %v634_v22, %v522_v5  ;;  %v1948_v24 = vpop.f32.mrb[2].mxu1 }
 0x187   : > { %v637_v25 = vpop.f32.mrb[3].mxu1  ;;  %v1967_v26 = vpop.f32.mrb[16].mxu0 }
 0x188   : > { %v844_v28 = vadd.f32 %v1967_v26, %v643_v21  ;;  %v779_v29 = vpop.f32.mrb[17].mxu0  ;;  %v2119_v21 = vunpack.i.l.bf16 %v2118_v10 }
 0x189   : > { %v842_v31 = vadd.f32 %v779_v29, %v635_v23  ;;  %v1968_v32 = vpop.f32.mrb[18].mxu0 }
 0x18a   : > { %v867_v33 = vadd.f32 %v2418_v27, %v844_v28  ;;  %v782_v34 = vpop.f32.mrb[19].mxu0 }
 0x18b   : > { %v865_v37 = vadd.f32 %v2418_v27, %v842_v31 }
 0x18c   : > { %v883_v39 = vmax.f32 %v867_v33, 0.0  ;;  %v1951_v40 = vpop.f32.mrb[4].mxu1 }
 0x18d   : > { %v881_v42 = vmax.f32 %v865_v37, 0.0  ;;  %v659_v43 = vadd.f32 %v1951_v40, %v1931_v8  ;;  %v650_v44 = vpop.f32.mrb[5].mxu1 }
 0x18e   : > { %923 = vst.msk [vmem:[#allocation3 + $0x21] sm:$0xff] %vm920_vm6, %v883_v39  ;;  %v651_v45 = vadd.f32 %v650_v44, %v538_v9  ;;  %1022 = vrot.lane.b32.xlu1 %v883_v39, %s2152_s13  ;;  %957 = vrot.lane.b32.xlu0 %v883_v39, %s2150_s29  ;;  %v1952_v46 = vpop.f32.mrb[6].mxu1 }
 0x18f   : > { %921 = vst.msk [vmem:[#allocation3 + $0x11] sm:$0xff] %vm920_vm6, %v881_v42  ;;  %v653_v48 = vpop.f32.mrb[7].mxu1  ;;  %v1971_v50 = vpop.f32.mrb[20].mxu0 }
 0x190   : > { %1005 = vst.msk [vmem:[#allocation3 + $0x28] sm:$0xff] %vm1001_vm7, %v2100_v38  ;;  %v848_v51 = vadd.f32 %v1971_v50, %v659_v43  ;;  %v795_v49 = vpop.f32.mrb[21].mxu0  ;;  %1003 = vst.msk [vmem:[#allocation3 + $0x18] sm:$0xff] %vm1001_vm7, %v2099_v41  ;;  %v1083_v48 = vld [vmem:[#allocation3] sm:$0xff] }
 0x191   : > { %v846_v53 = vadd.f32 %v795_v49, %v651_v45  ;;  %v1972_v54 = vpop.f32.mrb[22].mxu0 }
 0x192   : > { %v871_v55 = vadd.f32 %v2418_v27, %v848_v51  ;;  %v798_v56 = vpop.f32.mrb[23].mxu0  ;;  %1018 = vrot.lane.b32.xlu1 %v881_v42, %s2152_s13  ;;  %953 = vrot.lane.b32.xlu0 %v881_v42, %s2150_s29 }
 0x193   : > { %v869_v59 = vadd.f32 %v2418_v27, %v846_v53 }
 0x194   : > { %v887_v61 = vmax.f32 %v871_v55, 0.0  ;;  %v1955_v62 = vpop.f32.mrb[8].mxu1 }
 0x195   : > { %v885_v0 = vmax.f32 %v869_v59, 0.0  ;;  %v675_v2 = vadd.f32 %v1955_v62, %v2407_v12  ;;  %v666_v3 = vpop.f32.mrb[9].mxu1 }
 0x196   : > { %927 = vst.msk [vmem:[#allocation3 + $0x41] sm:$0xff] %vm920_vm6, %v887_v61  ;;  %v667_v4 = vadd.f32 %v666_v3, %v2409_v13  ;;  %v1956_v5 = vpop.f32.mrb[10].mxu1  ;;  %1030 = vrot.lane.b32.xlu1 %v887_v61, %s2152_s13  ;;  %965 = vrot.lane.b32.xlu0 %v887_v61, %s2150_s29  ;;  %v2140_v61 = vld [vmem:[%s2663_s3 + $0x40] sm:$0xff]  }
 0x197   : > { %925 = vst.msk [vmem:[#allocation3 + $0x31] sm:$0xff] %vm920_vm6, %v885_v0  ;;  %v669_v6 = vpop.f32.mrb[11].mxu1  ;;  %v1975_v7 = vpop.f32.mrb[24].mxu0 }
 0x198   : > { %1009 = vst.msk [vmem:[#allocation3 + $0x48] sm:$0xff] %vm1001_vm7, %v2110_v60  ;;  %v852_v8 = vadd.f32 %v1975_v7, %v675_v2  ;;  %v811_v9 = vpop.f32.mrb[25].mxu0  ;;  %1007 = vst.msk [vmem:[#allocation3 + $0x38] sm:$0xff] %vm1001_vm7, %v2109_v63 }
 0x199   : > { %v850_v11 = vadd.f32 %v811_v9, %v667_v4  ;;  %v1976_v12 = vpop.f32.mrb[26].mxu0 }
 0x19a   : > { %v875_v13 = vadd.f32 %v2418_v27, %v852_v8  ;;  %v814_v14 = vpop.f32.mrb[27].mxu0  ;;  %1026 = vrot.lane.b32.xlu1 %v885_v0, %s2152_s13  ;;  %961 = vrot.lane.b32.xlu0 %v885_v0, %s2150_s29 }
 0x19b   : > { %v873_v15 = vadd.f32 %v2418_v27, %v850_v11 }
 0x19c   : > { %v891_v19 = vmax.f32 %v875_v13, 0.0  ;;  %v1959_v20 = vpop.f32.mrb[12].mxu1 }
 0x19d   : > { %v889_v22 = vmax.f32 %v873_v15, 0.0  ;;  %v691_v23 = vadd.f32 %v1959_v20, %v2411_v16  ;;  %v682_v24 = vpop.f32.mrb[13].mxu1 }
 0x19e   : > { %931 = vst.msk [vmem:[#allocation3 + $0x61] sm:$0xff] %vm920_vm6, %v891_v19  ;;  %v683_v25 = vadd.f32 %v682_v24, %v2413_v17  ;;  %v1960_v26 = vpop.f32.mrb[14].mxu1  ;;  %1038 = vrot.lane.b32.xlu1 %v891_v19, %s2152_s13  ;;  %973 = vrot.lane.b32.xlu0 %v891_v19, %s2150_s29 }
 0x19f   : > { %929 = vst.msk [vmem:[#allocation3 + $0x51] sm:$0xff] %vm920_vm6, %v889_v22  ;;  %v685_v28 = vpop.f32.mrb[15].mxu1  ;;  %v1979_v29 = vpop.f32.mrb[28].mxu0 }
 0x1a0   : > { %1013 = vst.msk [vmem:[#allocation3 + $0x68] sm:$0xff] %vm1001_vm7, %v2120_v18  ;;  %v856_v30 = vadd.f32 %v1979_v29, %v691_v23  ;;  %v827_v31 = vpop.f32.mrb[29].mxu0  ;;  %1011 = vst.msk [vmem:[#allocation3 + $0x58] sm:$0xff] %vm1001_vm7, %v2119_v21 }
 0x1a1   : > { %v854_v16 = vadd.f32 %v827_v31, %v683_v25  ;;  %v1980_v32 = vpop.f32.mrb[30].mxu0 }
 0x1a2   : > { %v879_v33 = vadd.f32 %v2418_v27, %v856_v30  ;;  %v830_v17 = vpop.f32.mrb[31].mxu0  ;;  %1034 = vrot.lane.b32.xlu1 %v889_v22, %s2152_s13  ;;  %969 = vrot.lane.b32.xlu0 %v889_v22, %s2150_s29 }
 0x1a3   : > { %v877_v34 = vadd.f32 %v2418_v27, %v854_v16  ;;  %v2103_v27 = vpop.permute.xlu0 %2102  ;;  %v1395_v17 = vld [vmem:[#allocation3 + $0x98] sm:$0xff] }
 0x1a4   : > { %v895_v35 = vmax.f32 %v879_v33, 0.0  ;;  %v2105_v39 = vunpack.i.h.bf16 %v2103_v27  ;;  %v2104_v42 = vunpack.i.l.bf16 %v2103_v27  ;;  %v1394_v33 = vld [vmem:[#allocation3 + $0x90] sm:$0xff] }
 0x1a5   : > { %v893_v36 = vmax.f32 %v877_v34, 0.0  ;;  %v1403_v34 = vpack.c.bf16 %v1395_v17, %v1394_v33 }
 0x1a6   : > { %935 = vst.msk [vmem:[#allocation3 + $0x81] sm:$0xff] %vm920_vm6, %v895_v35  ;;  %979 = vrot.lane.b32.xlu1 %v2151_v1, %s2150_s29  ;;  %981 = vrot.lane.b32.xlu0 %v895_v35, %s2150_s29 }
 0x1a7   : > { %933 = vst.msk [vmem:[#allocation3 + $0x71] sm:$0xff] %vm920_vm6, %v893_v36  ;;  %v2113_v37 = vpop.permute.xlu0 %2112 }
 0x1a8   : > { %v2115_v45 = vunpack.i.h.bf16 %v2113_v37  ;;  %v2114_v50 = vunpack.i.l.bf16 %v2113_v37 }
 0x1aa   : > { %2122 = vrot.lane.b32.xlu1 %v2151_v1, %s2152_s13  ;;  %977 = vrot.lane.b32.xlu0 %v893_v36, %s2150_s29 }
 0x1ab   : > { %v1037_v38 = vpop.permute.xlu0 %1036 }
 0x1ae   : > { %1046 = vrot.lane.b32.xlu1 %v895_v35, %s2152_s13  ;;  %1042 = vrot.lane.b32.xlu0 %v893_v36, %s2152_s13 }
 0x1b2   : > { %983 = vrot.lane.b32.xlu0 %v2151_v1, %s2150_s29  ;;  %1048 = vrot.lane.b32.xlu1 %v2151_v1, %s2152_s13  ;;  %v2606_v1 = vld [vmem:[%s2664_s4] ss:$0 sm:$0xff] }
 0x200   : > { %v1023_v40 = vpop.permute.xlu1 %1022  ;;  %v958_v41 = vpop.permute.xlu0 %957 }
 0x201   : > { %1004 = vst.msk [vmem:[#allocation3 + $0x20] sm:$0xff] %vm1001_vm7, %v958_v41 }
 0x202   : > { %1069 = vst.msk [vmem:[#allocation3 + $0x1f] sm:$0xff] %vm1066_vm8, %v1023_v40  ;;  %1070 = vst.msk [vmem:[#allocation3 + $0x27] sm:$0xff] %vm1066_vm8, %v2105_v39 }
 0x204   : > { %v1019_v43 = vpop.permute.xlu1 %1018  ;;  %v954_v44 = vpop.permute.xlu0 %953 }
 0x205   : > { %1002 = vst.msk [vmem:[#allocation3 + $0x10] sm:$0xff] %vm1001_vm7, %v954_v44 }
 0x206   : > { %1067 = vst.msk [vmem:[#allocation3 + $0xf] sm:$0xff] %vm1066_vm8, %v1019_v43  ;;  %1068 = vst.msk [vmem:[#allocation3 + $0x17] sm:$0xff] %vm1066_vm8, %v2104_v42 }
 0x208   : > { %v1031_v46 = vpop.permute.xlu1 %1030  ;;  %v966_v47 = vpop.permute.xlu0 %965 }
 0x209   : > { %1008 = vst.msk [vmem:[#allocation3 + $0x40] sm:$0xff] %vm1001_vm7, %v966_v47  ;;  %v1087_v0 = vld [vmem:[#allocation3 + $0x20] sm:$0xff] }
 0x20a   : > { %1073 = vst.msk [vmem:[#allocation3 + $0x3f] sm:$0xff] %vm1066_vm8, %v1031_v46  ;;  %1074 = vst.msk [vmem:[#allocation3 + $0x47] sm:$0xff] %vm1066_vm8, %v2115_v45 }
 0x20c   : > { %v1027_v51 = vpop.permute.xlu1 %1026  ;;  %v962_v49 = vpop.permute.xlu0 %961 }
 0x20d   : > { %1006 = vst.msk [vmem:[#allocation3 + $0x30] sm:$0xff] %vm1001_vm7, %v962_v49  ;;  %v1085_v52 = vld [vmem:[#allocation3 + $0x10] sm:$0xff]  ;;  %v1086_v53 = vld [vmem:[#allocation3 + $0x18] sm:$0xff]  ;;  %v1084_v54 = vld [vmem:[#allocation3 + $0x8] sm:$0xff] }
 0x20e   : > { %1071 = vst.msk [vmem:[#allocation3 + $0x2f] sm:$0xff] %vm1066_vm8, %v1027_v51  ;;  %1072 = vst.msk [vmem:[#allocation3 + $0x37] sm:$0xff] %vm1066_vm8, %v2114_v50  ;;  %v1100_v55 = vpack.c.bf16 %v1086_v53, %v1085_v52  ;;  %v1099_v56 = vpack.c.bf16 %v1084_v54, %v1083_v48 }
 0x210   : > { %v1039_v59 = vpop.permute.xlu1 %1038  ;;  %v974_v60 = vpop.permute.xlu0 %973  ;;  %1987 = vmatprep.mubr.msk.bf16.mxu0 %vm913_vm5, %v1100_v55  ;;  %2009 = vmatprep.mubr.msk.bf16.mxu1 %vm913_vm5, %v1099_v56 }
 0x211   : > { %1012 = vst.msk [vmem:[#allocation3 + $0x60] sm:$0xff] %vm1001_vm7, %v974_v60  ;;  %2010 = vmatmul.mubr.msk.bf16.vlgmr.msra.gmra.mrb[16].mxu1 %vm913_vm5, %v1100_v55  ;;  %v1091_v10 = vld [vmem:[#allocation3 + $0x40] sm:$0xff] }
 0x212   : > { %1077 = vst.msk [vmem:[#allocation3 + $0x5f] sm:$0xff] %vm1066_vm8, %v1039_v59  ;;  %2026 = vmatpush3.bf16.msra.mxu1 %v2443_v57 }
 0x213   : > { %2027 = vmatprep.subr.bf16.mxu1 %v2139_v58 }
 0x214   : > { %v1035_v62 = vpop.permute.xlu1 %1034  ;;  %v970_v63 = vpop.permute.xlu0 %969 }
 0x215   : > { %1010 = vst.msk [vmem:[#allocation3 + $0x50] sm:$0xff] %vm1001_vm7, %v970_v63  ;;  %v1088_v2 = vld [vmem:[#allocation3 + $0x28] sm:$0xff]  ;;  %v1089_v3 = vld [vmem:[#allocation3 + $0x30] sm:$0xff]  ;;  %v1090_v4 = vld [vmem:[#allocation3 + $0x38] sm:$0xff] }
 0x216   : > { %1075 = vst.msk [vmem:[#allocation3 + $0x4f] sm:$0xff] %vm1066_vm8, %v1035_v62  ;;  %1076 = vst.msk [vmem:[#allocation3 + $0x57] sm:$0xff] %vm1066_vm8, %v1037_v38  ;;  %v1101_v5 = vpack.c.bf16 %v1088_v2, %v1087_v0  ;;  %v1102_v6 = vpack.c.bf16 %v1090_v4, %v1089_v3  ;;  %2028 = vmatpush3.bf16.msra.mxu1 %v2139_v58 }
 0x217   : > { %2029 = vmatprep.subr.bf16.mxu1 %v2140_v61 }
 0x218   : > { %v980_v57 = vpop.permute.xlu1 %979  ;;  %v982_v7 = vpop.permute.xlu0 %981  ;;  %1988 = vmatmul.mubr.msk.bf16.vlgmr.msra.gmra.mrb[32].mxu0 %vm913_vm5, %v1101_v5  ;;  %2013 = vmatprep.mubr.msk.bf16.mxu1 %vm913_vm5, %v1101_v5 }
 0x219   : > { %1015 = vst.msk [vmem:[#allocation3 + $0x78] sm:$0xff] %vm1001_vm7, %v980_v57  ;;  %1016 = vst.msk [vmem:[#allocation3 + $0x80] sm:$0xff] %vm1001_vm7, %v982_v7  ;;  %1991 = vmatprep.mubr.msk.bf16.mxu0 %vm913_vm5, %v1102_v6  ;;  %2014 = vmatmul.mubr.msk.bf16.gmra.mrb[20].mxu1 %vm913_vm5, %v1102_v6 }
 0x21a   : > { %2030 = vmatpush3.bf16.msra.mxu1 %v2140_v61 }
 0x21c   : > { %v2123_v8 = vpop.permute.xlu1 %2122  ;;  %v978_v9 = vpop.permute.xlu0 %977 }
 0x21d   : > { %v2125_v11 = vunpack.i.h.bf16 %v2123_v8  ;;  %v2124_v12 = vunpack.i.l.bf16 %v2123_v8  ;;  %1014 = vst.msk [vmem:[#allocation3 + $0x70] sm:$0xff] %vm1001_vm7, %v978_v9  ;;  %v1092_v13 = vld [vmem:[#allocation3 + $0x48] sm:$0xff]  ;;  %v1093_v14 = vld [vmem:[#allocation3 + $0x50] sm:$0xff]  ;;  %v1094_v15 = vld [vmem:[#allocation3 + $0x58] sm:$0xff] }
 0x21e   : > { %v1103_v18 = vpack.c.bf16 %v1092_v13, %v1091_v10  ;;  %v1104_v19 = vpack.c.bf16 %v1094_v15, %v1093_v14 }
 0x21f   : > { %1078 = vst.msk [vmem:[#allocation3 + $0x67] sm:$0xff] %vm1066_vm8, %v2124_v12  ;;  %1080 = vst.msk [vmem:[#allocation3 + $0x77] sm:$0xff] %vm1066_vm8, %v2125_v11 }
 0x220   : > { %v1047_v20 = vpop.permute.xlu1 %1046  ;;  %v1043_v21 = vpop.permute.xlu0 %1042  ;;  %1992 = vmatmul.mubr.msk.bf16.gmra.mrb[36].mxu0 %vm913_vm5, %v1103_v18  ;;  %2017 = vmatprep.mubr.msk.bf16.mxu1 %vm913_vm5, %v1103_v18 }
 0x221   : > { %1081 = vst.msk [vmem:[#allocation3 + $0x7f] sm:$0xff] %vm1066_vm8, %v1047_v20  ;;  %1079 = vst.msk [vmem:[#allocation3 + $0x6f] sm:$0xff] %vm1066_vm8, %v1043_v21  ;;  %1995 = vmatprep.mubr.msk.bf16.mxu0 %vm913_vm5, %v1104_v19  ;;  %2018 = vmatmul.mubr.msk.bf16.gmra.mrb[24].mxu1 %vm913_vm5, %v1104_v19 }
 0x224   : > { %v984_v22 = vpop.permute.xlu0 %983  ;;  %v1049_v23 = vpop.permute.xlu1 %1048 }
 0x225   : > { %1017 = vst.msk [vmem:[#allocation3 + $0x88] sm:$0xff] %vm1001_vm7, %v984_v22 }
 0x226   : > { %1082 = vst.msk [vmem:[#allocation3 + $0x87] sm:$0xff] %vm1066_vm8, %v1049_v23  ;;  %v1095_v24 = vld [vmem:[#allocation3 + $0x60] sm:$0xff] }
 0x228   : > { %v1096_v25 = vld [vmem:[#allocation3 + $0x68] sm:$0xff]  ;;  %v1097_v26 = vld [vmem:[#allocation3 + $0x70] sm:$0xff]  ;;  %v1098_v28 = vld [vmem:[#allocation3 + $0x78] sm:$0xff] }
 0x229   : > { %v1105_v29 = vpack.c.bf16 %v1096_v25, %v1095_v24  ;;  %v1106_v30 = vpack.c.bf16 %v1098_v28, %v1097_v26 }
 0x22b   : > { %1996 = vmatmul.mubr.msk.bf16.gmra.mrb[40].mxu0 %vm913_vm5, %v1105_v29  ;;  %2021 = vmatprep.mubr.msk.bf16.mxu1 %vm913_vm5, %v1105_v29 }
 0x22c   : > { %1999 = vmatprep.mubr.msk.bf16.mxu0 %vm913_vm5, %v1106_v30  ;;  %2022 = vmatmul.mubr.msk.bf16.gmra.mrb[28].mxu1 %vm913_vm5, %v1106_v30 }
 0x22d   : > { %2031 = vmatprep.mubr.msk.bf16.mxu1 %vm913_vm5, %v1101_v5  ;;  %v1113_v31 = vld [vmem:[#allocation3 + $0x80] sm:$0xff]  ;;  %v1114_v16 = vld [vmem:[#allocation3 + $0x88] sm:$0xff] }
 0x22e   : > { %v1115_v32 = vpack.c.bf16 %v1114_v16, %v1113_v31 }
 0x233   : > { %2000 = vmatmul.mubr.msk.bf16.gmra.mrb[44].mxu0 %vm913_vm5, %v1115_v32 }
 0x234   : > { %2032 = vmatmul.mubr.msk.bf16.vlgmr.msra.gmra.mrb[16].mxu1 %vm913_vm5, %v1102_v6 }
 0x235   : > { %2035 = vmatprep.mubr.msk.bf16.mxu1 %vm913_vm5, %v1103_v18 }
 0x23c   : > { %2036 = vmatmul.mubr.msk.bf16.gmra.mrb[20].mxu1 %vm913_vm5, %v1104_v19 }
 0x23d   : > { %2039 = vmatprep.mubr.msk.bf16.mxu1 %vm913_vm5, %v1105_v29 }
 0x244   : > { %2040 = vmatmul.mubr.msk.bf16.gmra.mrb[24].mxu1 %vm913_vm5, %v1106_v30 }
 0x245   : > { %2043 = vmatprep.mubr.msk.bf16.mxu1 %vm913_vm5, %v1115_v32 }
 0x24c   : > { %2044 = vmatmul.mubr.msk.bf16.gmra.mrb[28].mxu1 %vm913_vm5, %v1403_v34 }
 0x2eb   : > { %v1989_v35 = vpop.f32.mrb[32].mxu0 }
 0x2ec   : > { %v1199_v36 = vpop.f32.mrb[33].mxu0 }
 0x2ed   : > { %v1990_v27 = vpop.f32.mrb[34].mxu0 }
 0x2ee   : > { %v1202_v37 = vpop.f32.mrb[35].mxu0 }
 0x2f3   : > { %v1993_v38 = vpop.f32.mrb[36].mxu0 }
 0x2f4   : > { %v1215_v39 = vpop.f32.mrb[37].mxu0 }
 0x2f5   : > { %v1994_v40 = vpop.f32.mrb[38].mxu0 }
 0x2f6   : > { %v1218_v41 = vpop.f32.mrb[39].mxu0 }
 0x2fe   : > { %v1997_v42 = vpop.f32.mrb[40].mxu0 }
 0x2ff   : > { %v1231_v43 = vpop.f32.mrb[41].mxu0 }
 0x300   : > { %v1998_v44 = vpop.f32.mrb[42].mxu0 }
 0x301   : > { %v2597_v45 = vpop.f32.mrb[43].mxu0 }
 0x306   : > { %v2599_v46 = vpop.f32.mrb[44].mxu0 }
 0x307   : > { %v2601_v47 = vpop.f32.mrb[45].mxu0  ;;  %v2033_v48 = vpop.f32.mrb[16].mxu1 }
 0x308   : > { %v2047_v50 = vadd.f32 %v2033_v48, %v1989_v35  ;;  %v2608_v51 = vpop.f32.mrb[46].mxu0  ;;  %v1487_v49 = vpop.f32.mrb[17].mxu1 }
 0x309   : > { %v2048_v52 = vadd.f32 %v1487_v49, %v1199_v36  ;;  %v2610_v53 = vpop.f32.mrb[47].mxu0  ;;  %v2034_v54 = vpop.f32.mrb[18].mxu1 }
 0x30a   : > { %v1575_v55 = vadd.f32 %v2047_v50, %v2606_v1  ;;  %v2049_v56 = vadd.f32 %v2034_v54, %v1990_v27  ;;  %v1490_v58 = vpop.f32.mrb[19].mxu1 }
 0x30b   : > { %v1573_v59 = vadd.f32 %v2048_v52, %v2606_v1  ;;  %v2050_v60 = vadd.f32 %v1490_v58, %v1202_v37 }
 0x30c   : > { %v1591_v61 = vmax.f32 %v1575_v55, 0.0  ;;  %v1576_v62 = vadd.f32 %v2049_v56, %v2606_v1 }
 0x30d   : > { %v1589_v63 = vmax.f32 %v1573_v59, 0.0  ;;  %v1574_v0 = vadd.f32 %v2050_v60, %v2606_v1 }
 0x30e   : > { %1607 = vst.msk [vmem:[#allocation4 + $0x10] sm:$0xff] %vm920_vm6, %v1591_v61  ;;  %v1592_v2 = vmax.f32 %v1576_v62, 0.0 }
 0x30f   : > { %1605 = vst.msk [vmem:[#allocation4] sm:$0xff] %vm920_vm6, %v1589_v63  ;;  %v1590_v3 = vmax.f32 %v1574_v0, 0.0  ;;  %v2037_v4 = vpop.f32.mrb[20].mxu1 }
 0x310   : > { %1608 = vst.msk [vmem:[#allocation4 + $0x18] sm:$0xff] %vm920_vm6, %v1592_v2  ;;  %v2051_v5 = vadd.f32 %v2037_v4, %v1993_v38  ;;  %v1503_v6 = vpop.f32.mrb[21].mxu1 }
 0x311   : > { %1606 = vst.msk [vmem:[#allocation4 + $0x8] sm:$0xff] %vm920_vm6, %v1590_v3  ;;  %v2052_v57 = vadd.f32 %v1503_v6, %v1215_v39  ;;  %v2038_v7 = vpop.f32.mrb[22].mxu1 }
 0x312   : > { %v1579_v8 = vadd.f32 %v2051_v5, %v2606_v1  ;;  %v2053_v9 = vadd.f32 %v2038_v7, %v1994_v40  ;;  %v1506_v10 = vpop.f32.mrb[23].mxu1 }
 0x313   : > { %v1577_v11 = vadd.f32 %v2052_v57, %v2606_v1  ;;  %v2054_v12 = vadd.f32 %v1506_v10, %v1218_v41 }
 0x314   : > { %v1595_v13 = vmax.f32 %v1579_v8, 0.0  ;;  %v1580_v14 = vadd.f32 %v2053_v9, %v2606_v1 }
 0x315   : > { %v1593_v15 = vmax.f32 %v1577_v11, 0.0  ;;  %v1578_v18 = vadd.f32 %v2054_v12, %v2606_v1 }
 0x316   : > { %1611 = vst.msk [vmem:[#allocation4 + $0x30] sm:$0xff] %vm920_vm6, %v1595_v13  ;;  %v1596_v19 = vmax.f32 %v1580_v14, 0.0 }
 0x317   : > { %v1623_v20 = vld [vmem:[#allocation4 + $0x10] ss:$2 sm:$0xff]  ;;  %v1639_v21 = vld [vmem:[#allocation4 + $0x11] ss:$2 sm:$0xff]  ;;  %1609 = vst.msk [vmem:[#allocation4 + $0x20] sm:$0xff] %vm920_vm6, %v1593_v15  ;;  %v1594_v22 = vmax.f32 %v1578_v18, 0.0 }
 0x318   : > { %v2041_v23 = vpop.f32.mrb[24].mxu1  ;;  %v1653_v24 = vmax.f32 %v1623_v20, %v1639_v21  ;;  %v1621_v25 = vld [vmem:[#allocation4] ss:$2 sm:$0xff]  ;;  %v1637_v26 = vld [vmem:[#allocation4 + $0x1] ss:$2 sm:$0xff]  ;;  %1612 = vst.msk [vmem:[#allocation4 + $0x38] sm:$0xff] %vm920_vm6, %v1596_v19 }
 0x319   : > { %v2055_v28 = vadd.f32 %v2041_v23, %v1997_v42  ;;  %v1519_v29 = vpop.f32.mrb[25].mxu1  ;;  %v1652_v30 = vmax.f32 %v1621_v25, %v1637_v26  ;;  %1610 = vst.msk [vmem:[#allocation4 + $0x28] sm:$0xff] %vm920_vm6, %v1594_v22 }
 0x31a   : > { %v2056_v31 = vadd.f32 %v1519_v29, %v1231_v43  ;;  %v2042_v16 = vpop.f32.mrb[26].mxu1 }
 0x31b   : > { %v1583_v32 = vadd.f32 %v2055_v28, %v2606_v1  ;;  %v2057_v33 = vadd.f32 %v2042_v16, %v1998_v44  ;;  %v1522_v17 = vpop.f32.mrb[27].mxu1  ;;  %v1660_v34 = vmax.f32 %v1652_v30, %v1653_v24 }
 0x31c   : > { %v1581_v35 = vadd.f32 %v2056_v31, %v2606_v1  ;;  %v2058_v36 = vadd.f32 %v1522_v17, %v2597_v45 }
 0x31d   : > { %v1599_v27 = vmax.f32 %v1583_v32, 0.0  ;;  %v1584_v37 = vadd.f32 %v2057_v33, %v2606_v1  ;;  %1852 = vst.msk [vmem:[%s2549_s14 + $0x11] sm:$0xf] %vm1686_vm11, %v1660_v34 }
 0x31e   : > { %v1597_v38 = vmax.f32 %v1581_v35, 0.0  ;;  %v1582_v39 = vadd.f32 %v2058_v36, %v2606_v1 }
 0x31f   : > { %1615 = vst.msk [vmem:[#allocation4 + $0x50] sm:$0xff] %vm920_vm6, %v1599_v27  ;;  %v1600_v40 = vmax.f32 %v1584_v37, 0.0  ;;  %v1627_v41 = vld [vmem:[#allocation4 + $0x30] ss:$2 sm:$0xff]  ;;  %v1643_v42 = vld [vmem:[#allocation4 + $0x31] ss:$2 sm:$0xff] }
 0x320   : > { %1613 = vst.msk [vmem:[#allocation4 + $0x40] sm:$0xff] %vm920_vm6, %v1597_v38  ;;  %v1598_v43 = vmax.f32 %v1582_v39, 0.0  ;;  %v2045_v44 = vpop.f32.mrb[28].mxu1  ;;  %v1655_v48 = vmax.f32 %v1627_v41, %v1643_v42  ;;  %v1625_v50 = vld [vmem:[#allocation4 + $0x20] ss:$2 sm:$0xff] }
 0x321   : > { %v1641_v45 = vld [vmem:[#allocation4 + $0x21] ss:$2 sm:$0xff]  ;;  %1616 = vst.msk [vmem:[#allocation4 + $0x58] sm:$0xff] %vm920_vm6, %v1600_v40  ;;  %v2059_v49 = vadd.f32 %v2045_v44, %v2599_v46  ;;  %v1535_v52 = vpop.f32.mrb[29].mxu1 }
 0x322   : > { %v1654_v54 = vmax.f32 %v1625_v50, %v1641_v45  ;;  %1614 = vst.msk [vmem:[#allocation4 + $0x48] sm:$0xff] %vm920_vm6, %v1598_v43  ;;  %v2060_v55 = vadd.f32 %v1535_v52, %v2601_v47  ;;  %v2046_v56 = vpop.f32.mrb[30].mxu1 }
 0x323   : > { %v1587_v58 = vadd.f32 %v2059_v49, %v2606_v1  ;;  %v2061_v59 = vadd.f32 %v2046_v56, %v2608_v51  ;;  %v1538_v60 = vpop.f32.mrb[31].mxu1 }
 0x324   : > { %v1661_v61 = vmax.f32 %v1654_v54, %v1655_v48  ;;  %v1585_v62 = vadd.f32 %v2060_v55, %v2606_v1  ;;  %v2062_v63 = vadd.f32 %v1538_v60, %v2610_v53 }
 0x325   : > { %v1603_v0 = vmax.f32 %v1587_v58, 0.0  ;;  %v1588_v46 = vadd.f32 %v2061_v59, %v2606_v1 }
 0x326   : > { %1853 = vst.msk [vmem:[%s2549_s14 + $0x21] sm:$0xf] %vm1686_vm11, %v1661_v61  ;;  %v1601_v2 = vmax.f32 %v1585_v62, 0.0  ;;  %v1586_v47 = vadd.f32 %v2062_v63, %v2606_v1 }
 0x327   : > { %1619 = vst.msk [vmem:[#allocation4 + $0x70] sm:$0xff] %vm920_vm6, %v1603_v0  ;;  %v1604_v3 = vmax.f32 %v1588_v46, 0.0 }
 0x328   : > { %v1631_v4 = vld [vmem:[#allocation4 + $0x50] ss:$2 sm:$0xff]  ;;  %v1647_v51 = vld [vmem:[#allocation4 + $0x51] ss:$2 sm:$0xff]  ;;  %1617 = vst.msk [vmem:[#allocation4 + $0x60] sm:$0xff] %vm920_vm6, %v1601_v2  ;;  %v1602_v5 = vmax.f32 %v1586_v47, 0.0 }
 0x329   : > { %v1657_v6 = vmax.f32 %v1631_v4, %v1647_v51  ;;  %v1629_v53 = vld [vmem:[#allocation4 + $0x40] ss:$2 sm:$0xff]  ;;  %v1645_v57 = vld [vmem:[#allocation4 + $0x41] ss:$2 sm:$0xff]  ;;  %1620 = vst.msk [vmem:[#allocation4 + $0x78] sm:$0xff] %vm920_vm6, %v1604_v3 }
 0x32a   : > { %v1656_v7 = vmax.f32 %v1629_v53, %v1645_v57  ;;  %1618 = vst.msk [vmem:[#allocation4 + $0x68] sm:$0xff] %vm920_vm6, %v1602_v5 }
 0x32c   : > { %v1662_v8 = vmax.f32 %v1656_v7, %v1657_v6 }
 0x32e   : > { %1854 = vst.msk [vmem:[%s2549_s14 + $0x31] sm:$0xf] %vm1686_vm11, %v1662_v8 }
 0x330   : > { %v1635_v1 = vld [vmem:[#allocation4 + $0x70] ss:$2 sm:$0xff]  ;;  %v1651_v9 = vld [vmem:[#allocation4 + $0x71] ss:$2 sm:$0xff] }
 0x331   : > { %v1659_v10 = vmax.f32 %v1635_v1, %v1651_v9  ;;  %v1633_v11 = vld [vmem:[#allocation4 + $0x60] ss:$2 sm:$0xff]  ;;  %v1649_v12 = vld [vmem:[#allocation4 + $0x61] ss:$2 sm:$0xff] }
 0x332   : > { %v1658_v13 = vmax.f32 %v1633_v11, %v1649_v12 }
 0x334   : > { %v1663_v14 = vmax.f32 %v1658_v13, %v1659_v10 }
 0x336   : > { %1855 = vst.msk [vmem:[%s2549_s14 + $0x41] sm:$0xf] %vm1686_vm11, %v1663_v14 }
 0x337 PF: > { %s15_s18 = sadd.s32 1, %s2147_s18  }
 0x338   : > { %p12_p4 = scmp.ge.s32.totalorder %s15_s18, 4  }
 0x33a   :  { %14 = sbr.rel (!%p12_p4) target bundleno = 1 (0x1), region = 91 }

// kernel: encoder_forward.7
= control target key start
LH: loop header
LB: loop body
LE: loop exit
PB: predicated region body
PF: predicated region fallthrough
CT: control target
= control target key end

     0   :  { %s1649_s18 = smov 0   ;;  %s2020_s0 = inlined_call_operand.vmem [shape: f32[2,80,32], index: 0, kind: input, shape index: {}]   ;;  %s2021_s1 = inlined_call_operand.vmem [shape: bf16[3,96,64], index: 1, kind: input, shape index: {}]   ;;  %s2022_s2 = inlined_call_operand.vmem [shape: f32[1,64], index: 2, kind: input, shape index: {}]   ;;  %s2023_s3 = inlined_call_operand.vmem [shape: bf16[3,192,64], index: 3, kind: input, shape index: {}]   ;;  %s2024_s4 = inlined_call_operand.vmem [shape: f32[1,64], index: 4, kind: input, shape index: {}]   ;;  %s2025_s5 = inlined_call_operand.vmem [shape: f32[2,4,16,64], index: 5, kind: output, shape index: {}]  }
   0x1 LB: > { %s1308_s19 = sadd.s32 4294967295, %s1612_s18   ;;  %p1312_p0 = scmp.ge.s32.totalorder %s1612_s18, 1  ;;  %s1612_s18 = sphi %s1649_s18, %s15_s18  }
   0x2   : > { %p187_p1 = scmp.lt.s32.totalorder %s1612_s18, 3 }
   0x4   : > { %p188_p2 = pnand %p1312_p0, %p187_p1 }
   0x5   : > { %p215_p3 = scmp.lt.s32.totalorder (!%p188_p2), %s1308_s19, 1  ;;  %v1552_v0 = vld [vmem:[%s2021_s1 + $0x30] sm:$0xff] (!%p188_p2)   ;;  %v1553_v1 = vld [vmem:[%s2021_s1 + $0x38] sm:$0xff] (!%p188_p2)   ;;  %v1554_v2 = vld [vmem:[%s2021_s1] sm:$0xff] (!%p188_p2)   ;;  %s1614_s11 = smov (!%p188_p2), 32   ;;  %vm238_vm0 = vcmask (!%p188_p2), 261120  }
   0x6   : > { %191 = sbr.rel (%p188_p2) target bundleno = 806 (0x326), region = 40  ;;  %1491 = vmatprep.subr.bf16.mxu0 (!%p188_p2), %v1552_v0  ;;  %v1555_v3 = vld [vmem:[%s2021_s1 + $0x40] sm:$0xff] (!%p188_p2)   ;;  %1507 = vmatprep.subr.bf16.mxu1 (!%p188_p2), %v1554_v2  ;;  %v1556_v4 = vld [vmem:[%s2021_s1 + $0x8] sm:$0xff] (!%p188_p2)   ;;  %s1615_s12 = smov (!%p188_p2), 64   ;;  %v1558_v27 = vld [vmem:[%s2021_s1 + $0x10] sm:$0xff] (!%p188_p2)   ;;  %v1616_v49 = vmov (!%p188_p2), 0  }
   0x7   : > { %1492 = vmatpush3.bf16.msra.mxu0 (!%p188_p2), %v1552_v0  ;;  %1508 = vmatpush3.bf16.msra.mxu1 (!%p188_p2), %v1554_v2  ;;  %v1557_v15 = vld [vmem:[%s2021_s1 + $0x48] sm:$0xff] (!%p188_p2)   ;;  %v1559_v34 = vld [vmem:[%s2021_s1 + $0x50] sm:$0xff] (!%p188_p2)   ;;  %v1560_v36 = vld [vmem:[%s2021_s1 + $0x18] sm:$0xff] (!%p188_p2)   ;;  %vm271_vm1 = vcmask (!%p188_p2), 523520   ;;  %vm304_vm2 = vcmask (!%p188_p2), 785920   ;;  %vm378_vm3 = vcmask (!%p188_p2), 785408  }
   0x8   : > { %1493 = vmatprep.subr.bf16.mxu0 (!%p188_p2), %v1553_v1  ;;  %1509 = vmatprep.subr.bf16.mxu1 (!%p188_p2), %v1556_v4  ;;  %v1561_v40 = vld [vmem:[%s2021_s1 + $0x58] sm:$0xff] (!%p188_p2)   ;;  %v1562_v42 = vld [vmem:[%s2021_s1 + $0x20] sm:$0xff] (!%p188_p2)   ;;  %v1564_v45 = vld [vmem:[%s2021_s1 + $0x28] sm:$0xff] (!%p188_p2)   ;;  %vm652_vm4 = vcmask (!%p188_p2), 523264   ;;  %vm723_vm5 = vcmask (!%p188_p2), 522240   ;;  %vm686_vm6 = vcmask (!%p188_p2), 516096  }
   0x9   : > { %v1563_v44 = vld [vmem:[%s2021_s1 + $0x60] sm:$0xff] (!%p188_p2)   ;;  %v1565_v57 = vld [vmem:[%s2021_s1 + $0x68] sm:$0xff] (!%p188_p2)   ;;  %v1566_v61 = vld [vmem:[%s2021_s1 + $0x70] sm:$0xff] (!%p188_p2)   ;;  %vm1250_vm7 = vcmask (!%p188_p2), 521216   ;;  %vm705_vm9 = vcmask (!%p188_p2), 1046528   ;;  %vm718_vm10 = vcmask (!%p188_p2), 523271  }
   0xa   : > { %v1567_v63 = vld [vmem:[%s2021_s1 + $0x78] sm:$0xff] (!%p188_p2)   ;;  %v1568_v0 = vld [vmem:[%s2021_s1 + $0x80] sm:$0xff] (!%p188_p2)   ;;  %vm668_vm11 = vcmask (!%p188_p2), 1040384   ;;  %vm681_vm12 = vcmask (!%p188_p2), 523265   ;;  %vm700_vm13 = vcmask (!%p188_p2), 1048064  }
   0xb   : > { %1494 = vmatpush3.bf16.msra.mxu0 (!%p188_p2), %v1553_v1  ;;  %1510 = vmatpush3.bf16.msra.mxu1 (!%p188_p2), %v1556_v4  ;;  %v1569_v1 = vld [vmem:[%s2021_s1 + $0x88] sm:$0xff] (!%p188_p2)  }
   0xc   : > { %1495 = vmatprep.subr.bf16.mxu0 (!%p188_p2), %v1555_v3  ;;  %1511 = vmatprep.subr.bf16.mxu1 (!%p188_p2), %v1558_v27  ;;  %v1571_v4 = vld [vmem:[%s2023_s3 + $0x8] sm:$0xff] (!%p188_p2)  }
   0xd   : > { %s2027_s19 = smov (!%p215_p3, %s1308_s19), 1 }
   0xe   : > { %s1539_s26 = smul.u32 80, %s2027_s19  ;;  %s1466_s21 = sshll.u32 %s2027_s19, 6 }
   0xf   : > { %1496 = vmatpush3.bf16.msra.mxu0 %v1555_v3  ;;  %1512 = vmatpush3.bf16.msra.mxu1 %v1558_v27  ;;  %v1570_v3 = vld [vmem:[%s2023_s3] sm:$0xff]   ;;  %s1851_s24 = scalar_lea.vmem %s2025_s5, %s1466_s21  ;;  %v1591_v27 = vld [vmem:[%s2023_s3 + $0xa8] sm:$0xff]  }
  0x10   : > { %s1678_s8 = scalar_lea.vmem %s2020_s0, %s1539_s26  ;;  %1497 = vmatprep.subr.bf16.mxu0 %v1557_v15  ;;  %1513 = vmatprep.subr.bf16.mxu1 %v1560_v36 }
  0x11   : > { %v245_v5 = vld [vmem:[%s1678_s8 + $0x11] sm:$0xff]  ;;  %v246_v6 = vld [vmem:[%s1678_s8 + $0x19] sm:$0xff]  ;;  %v247_v10 = vld [vmem:[%s1678_s8 + $0x21] sm:$0xff] }
  0x12   : > { %v278_v7 = vld [vmem:[%s1678_s8 + $0x12] sm:$0xff]  ;;  %v252_v8 = vpack.c.bf16 %v246_v6, %v245_v5  ;;  %v279_v9 = vld [vmem:[%s1678_s8 + $0x1a] sm:$0xff]  ;;  %v248_v11 = vld [vmem:[%s1678_s8 + $0x29] sm:$0xff] }
  0x13   : > { %v285_v12 = vpack.c.bf16 %v279_v9, %v278_v7  ;;  %v280_v13 = vld [vmem:[%s1678_s8 + $0x22] sm:$0xff]  ;;  %v281_v14 = vld [vmem:[%s1678_s8 + $0x2a] sm:$0xff]  ;;  %v253_v16 = vpack.c.bf16 %v248_v11, %v247_v10  ;;  %v229_v23 = vld [vmem:[%s1678_s8 + $0x18] sm:$0xff]  ;;  %1498 = vmatpush3.bf16.msra.mxu0 %v1557_v15  ;;  %1514 = vmatpush3.bf16.msra.mxu1 %v1560_v36 }
  0x14   : > { %261 = vrot.lane.b32.xlu0 %v252_v8, %s1614_s11  ;;  %v286_v17 = vpack.c.bf16 %v281_v14, %v280_v13  ;;  %v243_v18 = vld [vmem:[%s1678_s8 + $0x1] sm:$0xff]  ;;  %v244_v19 = vld [vmem:[%s1678_s8 + $0x9] sm:$0xff]  ;;  %v249_v24 = vld [vmem:[%s1678_s8 + $0x31] sm:$0xff]  ;;  %1499 = vmatprep.subr.bf16.mxu0 %v1559_v34 }
  0x15   : > { %294 = vrot.lane.b32.xlu1 %v285_v12, %s1615_s12  ;;  %v276_v20 = vld [vmem:[%s1678_s8 + $0x2] sm:$0xff]  ;;  %v277_v21 = vld [vmem:[%s1678_s8 + $0xa] sm:$0xff]  ;;  %v250_v25 = vld [vmem:[%s1678_s8 + $0x39] sm:$0xff]  ;;  %v251_v30 = vpack.c.bf16 %v244_v19, %v243_v18  ;;  %1515 = vmatprep.subr.bf16.mxu1 %v1562_v42  ;;  %v1617_v12 = vmov 0.0  }
  0x16   : > { %v228_v22 = vld [vmem:[%s1678_s8 + $0x10] sm:$0xff]  ;;  %v230_v28 = vld [vmem:[%s1678_s8 + $0x20] sm:$0xff]  ;;  %v231_v29 = vld [vmem:[%s1678_s8 + $0x28] sm:$0xff]  ;;  %v284_v35 = vpack.c.bf16 %v277_v21, %v276_v20  ;;  %v254_v41 = vpack.c.bf16 %v250_v25, %v249_v24  ;;  %656 = vst [vmem:[#allocation3 + $0x20] sm:$0xff] %v1617_v12  ;;  %v1812_v13 = vrot.slane %v1617_v12, 1 }
  0x17   : > { %v235_v26 = vpack.c.bf16 %v229_v23, %v228_v22  ;;  %v282_v31 = vld [vmem:[%s1678_s8 + $0x32] sm:$0xff]  ;;  %v283_v32 = vld [vmem:[%s1678_s8 + $0x3a] sm:$0xff]  ;;  %v236_v33 = vpack.c.bf16 %v231_v29, %v230_v28  ;;  %v227_v38 = vld [vmem:[%s1678_s8 + $0x8] sm:$0xff]  ;;  %1500 = vmatpush3.bf16.msra.mxu0 %v1559_v34  ;;  %1516 = vmatpush3.bf16.msra.mxu1 %v1562_v42  ;;  %658 = vst [vmem:[#allocation3 + $0x50] sm:$0xff] %v1617_v12 }
  0x18   : > { %263 = vrot.lane.b32.xlu0 %v253_v16, %s1614_s11  ;;  %v226_v37 = vld [vmem:[%s1678_s8] sm:$0xff]  ;;  %v287_v43 = vpack.c.bf16 %v283_v32, %v282_v31  ;;  %1501 = vmatprep.subr.bf16.mxu0 %v1561_v40  ;;  %v232_v46 = vld [vmem:[%s1678_s8 + $0x30] sm:$0xff]  ;;  %v233_v47 = vld [vmem:[%s1678_s8 + $0x38] sm:$0xff]  ;;  %660 = vst [vmem:[#allocation3 + $0x60] sm:$0xff] %v1617_v12 }
  0x19   : > { %296 = vrot.lane.b32.xlu1 %v286_v17, %s1615_s12  ;;  %240 = vst.msk [vmem:[#allocation2 + $0x8] sm:$0xff] %vm238_vm0, %v235_v26  ;;  %241 = vst.msk [vmem:[#allocation2 + $0x10] sm:$0xff] %vm238_vm0, %v236_v33  ;;  %v234_v39 = vpack.c.bf16 %v227_v38, %v226_v37  ;;  %1517 = vmatprep.subr.bf16.mxu1 %v1564_v45  ;;  %v237_v48 = vpack.c.bf16 %v233_v47, %v232_v46  ;;  %v1572_v5 = vld [vmem:[%s2023_s3 + $0x10] sm:$0xff]   ;;  %v1573_v6 = vld [vmem:[%s2023_s3 + $0x18] sm:$0xff]   ;;  %v1842_v17 = vrot.slane %v1617_v12, 7  ;;  %v309_v38 = vlaneseq }
  0x1a   : > { %v1574_v7 = vld [vmem:[%s2023_s3 + $0x20] sm:$0xff]   ;;  %v1575_v8 = vld [vmem:[%s2023_s3 + $0x28] sm:$0xff]   ;;  %v1576_v9 = vld [vmem:[%s2023_s3 + $0x30] sm:$0xff]   ;;  %655 = vst.msk [vmem:[#allocation3 + $0x18] sm:$0xff] %vm652_vm4, %v1617_v12 }
  0x1b   : > { %239 = vst.msk [vmem:[#allocation2] sm:$0xff] %vm238_vm0, %v234_v39  ;;  %1502 = vmatpush3.bf16.msra.mxu0 %v1561_v40  ;;  %242 = vst.msk [vmem:[#allocation2 + $0x18] sm:$0xff] %vm238_vm0, %v237_v48  ;;  %1518 = vmatpush3.bf16.msra.mxu1 %v1564_v45  ;;  %v1577_v10 = vld [vmem:[%s2023_s3 + $0x38] sm:$0xff]   ;;  %v1578_v11 = vld [vmem:[%s2023_s3 + $0x40] sm:$0xff]   ;;  %v310_v42 = vshrl.u32 %v309_v38, 7 }
  0x1c   : > { %259 = vrot.lane.b32.xlu0 %v251_v30, %s1614_s11  ;;  %1523 = vmatprep.subr.bf16.mxu0 %v1563_v44  ;;  %657 = vst.msk [vmem:[#allocation3 + $0x28] sm:$0xff] %vm652_vm4, %v1617_v12  ;;  %659 = vst.msk [vmem:[#allocation3 + $0x58] sm:$0xff] %vm652_vm4, %v1617_v12  ;;  %v1579_v14 = vld [vmem:[%s2023_s3 + $0x48] sm:$0xff]   ;;  %v1580_v15 = vld [vmem:[%s2023_s3 + $0x50] sm:$0xff]  }
  0x1d   : > { %292 = vrot.lane.b32.xlu1 %v284_v35, %s1615_s12  ;;  %870 = vmatprep.subr.bf16.mxu1 %v1616_v49  ;;  %653 = vst.msk [vmem:[#allocation3 + $0x8] sm:$0xff] %vm652_vm4, %v1617_v12  ;;  %661 = vst.msk [vmem:[#allocation3 + $0x68] sm:$0xff] %vm652_vm4, %v1617_v12  ;;  %v1581_v16 = vld [vmem:[%s2023_s3 + $0x58] sm:$0xff]   ;;  %v1582_v18 = vld [vmem:[%s2023_s3 + $0x60] sm:$0xff]   ;;  %vm312_vm8 = vcmp.lt.s32.totalorder %v310_v42, 2 }
  0x1e   : > { %663 = vst.msk [vmem:[#allocation3 + $0x78] sm:$0xff] %vm652_vm4, %v1617_v12  ;;  %v1583_v19 = vld [vmem:[%s2023_s3 + $0x68] sm:$0xff]   ;;  %1240 = vst.msk [vmem:[%s1851_s24] sm:$0xff] %vm652_vm4, %v1617_v12  ;;  %v1584_v20 = vld [vmem:[%s2023_s3 + $0x70] sm:$0xff]  }
  0x1f   : > { %724 = vst.msk [vmem:[#allocation3 + $0x58] sm:$0x7f] %vm723_vm5, %v1812_v13  ;;  %v1585_v21 = vld [vmem:[%s2023_s3 + $0x78] sm:$0xff]   ;;  %v1586_v22 = vld [vmem:[%s2023_s3 + $0x80] sm:$0xff]   ;;  %v1587_v23 = vld [vmem:[%s2023_s3 + $0x88] sm:$0xff]  }
  0x20   : > { %265 = vrot.lane.b32.xlu0 %v254_v41, %s1614_s11  ;;  %687 = vst.msk [vmem:[#allocation3 + $0x60] sm:$0x1] %vm686_vm6, %v1842_v17  ;;  %1460 = vst.msk [vmem:[%s1851_s24 + $0x10] sm:$0x1] %vm686_vm6, %v1617_v12  ;;  %v1588_v24 = vld [vmem:[%s2023_s3 + $0x90] sm:$0xff]   ;;  %v1589_v25 = vld [vmem:[%s2023_s3 + $0x98] sm:$0xff]  }
  0x21   : > { %298 = vrot.lane.b32.xlu1 %v287_v43, %s1615_s12  ;;  %1241 = vst.msk [vmem:[%s1851_s24 + $0x8] sm:$0xff] %vm652_vm4, %v1617_v12  ;;  %1456 = vst.msk [vmem:[%s1851_s24 + $0x20] sm:$0xff] %vm652_vm4, %v1617_v12  ;;  %v1590_v26 = vld [vmem:[%s2023_s3 + $0xa0] sm:$0xff]  }
  0x22   : > { %1457 = vst.msk [vmem:[%s1851_s24 + $0x28] sm:$0xff] %vm652_vm4, %v1617_v12  ;;  %1458 = vst.msk [vmem:[%s1851_s24 + $0x30] sm:$0xff] %vm652_vm4, %v1617_v12  ;;  %v1592_v39 = vld [vmem:[%s2023_s3 + $0xb0] sm:$0xff]   ;;  %v1364_v41 = vld [vmem:[%s2022_s2] ss:$0 sm:$0xff] }
  0x23   : > { %1459 = vst.msk [vmem:[%s1851_s24 + $0x38] sm:$0xff] %vm652_vm4, %v1617_v12  ;;  %1461 = vst.msk [vmem:[%s1851_s24 + $0x12] sm:$0xff] %vm652_vm4, %v1617_v12  ;;  %v1593_v43 = vld [vmem:[%s2023_s3 + $0xb8] sm:$0xff]  }
  0x24   : > { %1462 = vst.msk [vmem:[%s1851_s24 + $0x1a] sm:$0x3f] %vm1250_vm7, %v1617_v12 }
  0x25   : > { %690 = vrot.lane.b32.xlu1 %v1617_v12, %s1615_s12 }
  0x27   : > { %v1047_v38 = vld [vmem:[#allocation3 + $0x60] sm:$0xff] }
  0x29   : > { %694 = vrot.lane.b32.xlu1 %v1617_v12, %s1615_s12 }
  0x86   : > { %v262_v50 = vpop.permute.xlu0 %261 }
  0x87   : > { %273 = vst.msk [vmem:[#allocation2 + $0x8] sm:$0xff] %vm271_vm1, %v262_v50  ;;  %v295_v51 = vpop.permute.xlu1 %294 }
  0x88   : > { %306 = vst.msk [vmem:[#allocation2 + $0x8] sm:$0xff] %vm304_vm2, %v295_v51 }
  0x8a   : > { %v264_v52 = vpop.permute.xlu0 %263 }
  0x8b   : > { %274 = vst.msk [vmem:[#allocation2 + $0x10] sm:$0xff] %vm271_vm1, %v264_v52  ;;  %v297_v53 = vpop.permute.xlu1 %296 }
  0x8c   : > { %307 = vst.msk [vmem:[#allocation2 + $0x10] sm:$0xff] %vm304_vm2, %v297_v53 }
  0x8e   : > { %v260_v54 = vpop.permute.xlu0 %259 }
  0x8f   : > { %272 = vst.msk [vmem:[#allocation2] sm:$0xff] %vm271_vm1, %v260_v54  ;;  %v293_v55 = vpop.permute.xlu1 %292  ;;  %v315_v56 = vld [vmem:[#allocation2 + $0x8] sm:$0xff] }
  0x90   : > { %305 = vst.msk [vmem:[#allocation2] sm:$0xff] %vm304_vm2, %v293_v55  ;;  %1503 = vmatprep.mubr.msk.bf16.mxu0 %vm378_vm3, %v315_v56 }
  0x92   : > { %v266_v58 = vpop.permute.xlu0 %265 }
  0x93   : > { %v328_v59 = vld [vmem:[#allocation2 + $0x10] sm:$0xff]  ;;  %275 = vst.msk [vmem:[#allocation2 + $0x18] sm:$0xff] %vm271_vm1, %v266_v58  ;;  %v299_v60 = vpop.permute.xlu1 %298 }
  0x94   : > { %1504 = vmatmul.mubr.msk.bf16.vlgmr.msra.gmra.mrb[0].mxu0 %vm378_vm3, %v328_v59  ;;  %308 = vst.msk [vmem:[#allocation2 + $0x18] sm:$0xff] %vm304_vm2, %v299_v60 }
  0x95   : > { %1524 = vmatpush3.bf16.msra.mxu0 %v1563_v44  ;;  %1535 = vmatprep.mubr.msk.bf16.mxu0 %vm378_vm3, %v328_v59 }
  0x96   : > { %1525 = vmatprep.subr.bf16.mxu0 %v1565_v57 }
  0x97   : > { %v314_v62 = vld [vmem:[#allocation2] sm:$0xff]  ;;  %v691_v51 = vpop.permute.xlu1 %690 }
  0x98   : > { %1519 = vmatprep.mubr.msk.bf16.mxu1 %vm378_vm3, %v314_v62 }
  0x99   : > { %1526 = vmatpush3.bf16.msra.mxu0 %v1565_v57  ;;  %1520 = vmatmul.mubr.msk.bf16.vlgmr.msra.gmra.mrb[0].mxu1 %vm378_vm3, %v315_v56 }
  0x9a   : > { %1527 = vmatprep.subr.bf16.mxu0 %v1566_v61  ;;  %871 = vmatpush1.bf16.msra.mxu1 %v1582_v18  ;;  %v1594_v18 = vld [vmem:[%s2023_s3 + $0xc0] sm:$0xff]  }
  0x9b   : > { %v523_v2 = vld [vmem:[#allocation2 + $0x18] sm:$0xff]  ;;  %872 = vmatprep.subr.bf16.mxu1 %v1616_v49 }
  0x9d   : > { %1528 = vmatpush3.bf16.msra.mxu0 %v1566_v61  ;;  %v695_v61 = vpop.permute.xlu1 %694 }
  0x9e   : > { %1529 = vmatprep.subr.bf16.mxu0 %v1567_v63  ;;  %873 = vmatpush1.bf16.msra.mxu1 %v1583_v19 }
  0x9f   : > { %874 = vmatprep.subr.bf16.mxu1 %v1616_v49 }
  0xa1   : > { %1530 = vmatpush3.bf16.msra.mxu0 %v1567_v63 }
  0xa2   : > { %1531 = vmatprep.subr.bf16.mxu0 %v1568_v0  ;;  %875 = vmatpush1.bf16.msra.mxu1 %v1584_v20 }
  0xa3   : > { %876 = vmatprep.subr.bf16.mxu1 %v1616_v49 }
  0xa5   : > { %1532 = vmatpush3.bf16.msra.mxu0 %v1568_v0 }
  0xa6   : > { %1533 = vmatprep.subr.bf16.mxu0 %v1569_v1  ;;  %877 = vmatpush1.bf16.msra.mxu1 %v1585_v21  ;;  %v1595_v21 = vld [vmem:[%s2023_s3 + $0xc8] sm:$0xff]  }
  0xa7   : > { %878 = vmatprep.subr.bf16.mxu1 %v1616_v49 }
  0xa9   : > { %1534 = vmatpush3.bf16.msra.mxu0 %v1569_v1 }
  0xaa   : > { %994 = vmatprep.subr.bf16.mxu0 %v1616_v49  ;;  %879 = vmatpush1.bf16.msra.mxu1 %v1586_v22 }
  0xab   : > { %880 = vmatprep.subr.bf16.mxu1 %v1616_v49 }
  0xac   : > { %1536 = vmatmul.mubr.msk.bf16.vlgmr.msra.gmra.mrb[4].mxu0 %vm378_vm3, %v523_v2 }
  0xad   : > { %995 = vmatpush1.bf16.msra.mxu0 %v1570_v3 }
  0xae   : > { %996 = vmatprep.subr.bf16.mxu0 %v1616_v49  ;;  %881 = vmatpush1.bf16.msra.mxu1 %v1587_v23 }
  0xaf   : > { %882 = vmatprep.subr.bf16.mxu1 %v1616_v49 }
  0xb1   : > { %997 = vmatpush1.bf16.msra.mxu0 %v1571_v4  ;;  %v726_v4 = vld [vmem:[#allocation3 + $0x8] sm:$0xff] }
  0xb2   : > { %998 = vmatprep.subr.bf16.mxu0 %v1616_v49  ;;  %883 = vmatpush1.bf16.msra.mxu1 %v1588_v24  ;;  %v1596_v24 = vld [vmem:[%s2023_s3 + $0xd0] sm:$0xff]  }
  0xb3   : > { %884 = vmatprep.subr.bf16.mxu1 %v1616_v49 }
  0xb5   : > { %999 = vmatpush1.bf16.msra.mxu0 %v1572_v5 }
  0xb6   : > { %1000 = vmatprep.subr.bf16.mxu0 %v1616_v49  ;;  %885 = vmatpush1.bf16.msra.mxu1 %v1589_v25 }
  0xb7   : > { %886 = vmatprep.subr.bf16.mxu1 %v1616_v49 }
  0xb9   : > { %1001 = vmatpush1.bf16.msra.mxu0 %v1573_v6 }
  0xba   : > { %1002 = vmatprep.subr.bf16.mxu0 %v1616_v49  ;;  %887 = vmatpush1.bf16.msra.mxu1 %v1590_v26  ;;  %v1597_v26 = vld [vmem:[%s2023_s3 + $0xd8] sm:$0xff]  }
  0xbb   : > { %888 = vmatprep.subr.bf16.mxu1 %v1616_v49 }
  0xbd   : > { %1003 = vmatpush1.bf16.msra.mxu0 %v1574_v7 }
  0xbe   : > { %1004 = vmatprep.subr.bf16.mxu0 %v1616_v49  ;;  %889 = vmatpush1.bf16.msra.mxu1 %v1591_v27  ;;  %v1598_v27 = vld [vmem:[%s2023_s3 + $0xe0] sm:$0xff]  }
  0xbf   : > { %890 = vmatprep.subr.bf16.mxu1 %v1616_v49 }
  0xc1   : > { %1005 = vmatpush1.bf16.msra.mxu0 %v1575_v8 }
  0xc2   : > { %1006 = vmatprep.subr.bf16.mxu0 %v1616_v49  ;;  %891 = vmatpush1.bf16.msra.mxu1 %v1592_v39  ;;  %v1053_v39 = vpack.c.bf16 %v1617_v12, %v1047_v38 }
  0xc3   : > { %892 = vmatprep.subr.bf16.mxu1 %v1616_v49 }
  0xc5   : > { %1007 = vmatpush1.bf16.msra.mxu0 %v1576_v9 }
  0xc6   : > { %1008 = vmatprep.subr.bf16.mxu0 %v1616_v49  ;;  %893 = vmatpush1.bf16.msra.mxu1 %v1593_v43 }
  0xc7   : > { %1158 = vmatprep.subr.bf16.mxu1 %v1616_v49 }
  0xc9   : > { %1009 = vmatpush1.bf16.msra.mxu0 %v1577_v10  ;;  %v1618_v10 = vmov 0.0|0.0  }
  0xca   : > { %1010 = vmatprep.subr.bf16.mxu0 %v1616_v49 }
  0xcd   : > { %1011 = vmatpush1.bf16.msra.mxu0 %v1578_v11 }
  0xce   : > { %1012 = vmatprep.subr.bf16.mxu0 %v1616_v49 }
  0xd1   : > { %1013 = vmatpush1.bf16.msra.mxu0 %v1579_v14 }
  0xd2   : > { %1014 = vmatprep.subr.bf16.mxu0 %v1616_v49 }
  0xd5   : > { %1015 = vmatpush1.bf16.msra.mxu0 %v1580_v15 }
  0xd6   : > { %1016 = vmatprep.subr.bf16.mxu0 %v1616_v49 }
  0xd9   : > { %1017 = vmatpush1.bf16.msra.mxu0 %v1581_v16  ;;  %v764_v16 = vld [vmem:[#allocation3 + $0x58] sm:$0xff] }
 0x167   : > { %v1505_v28 = vpop.f32.mrb[0].mxu0 }
 0x168   : > { %v419_v29 = vpop.f32.mrb[1].mxu0 }
 0x169   : > { %v1506_v30 = vpop.f32.mrb[2].mxu0 }
 0x16a   : > { %v422_v31 = vpop.f32.mrb[3].mxu0  ;;  %v1601_v30 = vld [vmem:[%s2023_s3 + $0xf8] sm:$0xff]  }
 0x16b   : > { %v1602_v31 = vld [vmem:[%s2023_s3 + $0x100] sm:$0xff]  }
 0x16c   : > { %v1521_v32 = vpop.f32.mrb[0].mxu1 }
 0x16d   : > { %v516_v33 = vadd.f32 %v1521_v32, %v1505_v28  ;;  %v507_v34 = vpop.f32.mrb[1].mxu1  ;;  %v1599_v28 = vld [vmem:[%s2023_s3 + $0xe8] sm:$0xff]  }
 0x16e   : > { %v508_v35 = vadd.f32 %v507_v34, %v419_v29  ;;  %v1522_v36 = vpop.f32.mrb[2].mxu1  ;;  %v1600_v29 = vld [vmem:[%s2023_s3 + $0xf0] sm:$0xff]   ;;  %v1603_v32 = vld [vmem:[%s2023_s3 + $0x108] sm:$0xff]   ;;  %v1605_v34 = vld [vmem:[%s2023_s3 + $0x118] sm:$0xff]  }
 0x16f   : > { %v510_v37 = vpop.f32.mrb[3].mxu1  ;;  %v1050_v36 = vld [vmem:[#allocation3 + $0x78] sm:$0xff] }
 0x17f   : > { %v1537_v40 = vpop.f32.mrb[4].mxu0 }
 0x180   : > { %v630_v44 = vadd.f32 %v1537_v40, %v516_v33  ;;  %v613_v45 = vpop.f32.mrb[5].mxu0  ;;  %v1604_v33 = vld [vmem:[%s2023_s3 + $0x110] sm:$0xff]  }
 0x181   : > { %v628_v46 = vadd.f32 %v613_v45, %v508_v35  ;;  %v1538_v47 = vpop.f32.mrb[6].mxu0  ;;  %v1048_v35 = vld [vmem:[#allocation3 + $0x68] sm:$0xff] }
 0x182   : > { %v641_v48 = vadd.f32 %v1364_v41, %v630_v44  ;;  %v616_v50 = vpop.f32.mrb[7].mxu0  ;;  %v1054_v37 = vpack.c.bf16 %v1050_v36, %v1048_v35 }
 0x183   : > { %v639_v52 = vadd.f32 %v1364_v41, %v628_v46 }
 0x184   : > { %v645_v53 = vmax.f32 %v641_v48, 0.0 }
 0x185   : > { %v643_v54 = vmax.f32 %v639_v52, 0.0 }
 0x186   : > { %v649_v55 = vsel %vm312_vm8, %v645_v53, 0.0 }
 0x187   : > { %v647_v56 = vsel %vm312_vm8, %v643_v54, 0.0  ;;  %v672_v57 = vrot.slane %v649_v55, 7  ;;  %v709_v58 = vrot.slane %v649_v55, 1 }
 0x188   : > { %688 = vrot.lane.b32.xlu0 %v647_v56, %s1615_s12  ;;  %v669_v59 = vrot.slane %v647_v56, 7  ;;  %v706_v60 = vrot.slane %v647_v56, 1 }
 0x189   : > { %v710_v62 = vsel %vm705_vm9, %v1812_v13, %v709_v58  ;;  %v712_v63 = vsel %vm705_vm9, %v709_v58, %v1812_v13  ;;  %v675_v0 = vsel %vm668_vm11, %v672_v57, %v1842_v17  ;;  %v673_v1 = vsel %vm668_vm11, %v1842_v17, %v672_v57 }
 0x18a   : > { %v708_v2 = vsel %vm705_vm9, %v706_v60, %v1812_v13  ;;  %719 = vst.msk [vmem:[#allocation3 + $0x18] sm:$0x80] %vm718_vm10, %v706_v60  ;;  %v671_v3 = vsel %vm668_vm11, %v669_v59, %v1842_v17  ;;  %v1455_v60 = vld [vmem:[%s2024_s4] ss:$0 sm:$0xff] }
 0x18b   : > { %721 = vst.msk [vmem:[#allocation3 + $0x38] sm:$0xff] %vm652_vm4, %v710_v62  ;;  %722 = vst.msk [vmem:[#allocation3 + $0x48] sm:$0xff] %vm652_vm4, %v712_v63 }
 0x18c   : > { %682 = vst.msk [vmem:[#allocation3 + $0x20] sm:$0xfe] %vm681_vm12, %v669_v59  ;;  %692 = vrot.lane.b32.xlu0 %v649_v55, %s1615_s12 }
 0x18d   : > { %685 = vst.msk [vmem:[#allocation3 + $0x50] sm:$0xff] %vm652_vm4, %v675_v0  ;;  %684 = vst.msk [vmem:[#allocation3 + $0x40] sm:$0xff] %vm652_vm4, %v673_v1 }
 0x18e   : > { %720 = vst.msk [vmem:[#allocation3 + $0x28] sm:$0xff] %vm652_vm4, %v708_v2  ;;  %683 = vst.msk [vmem:[#allocation3 + $0x30] sm:$0xff] %vm652_vm4, %v671_v3 }
 0x18f   : > { %704 = vst.msk [vmem:[#allocation3 + $0x50] sm:$0xff] %vm700_vm13, %v695_v61  ;;  %702 = vst.msk [vmem:[#allocation3 + $0x30] sm:$0xff] %vm700_vm13, %v691_v51 }
 0x191   : > { %v728_v5 = vld [vmem:[#allocation3 + $0x18] sm:$0xff] }
 0x192   : > { %v732_v6 = vld [vmem:[#allocation3 + $0x38] sm:$0xff]  ;;  %v734_v7 = vpack.c.bf16 %v728_v5, %v726_v4  ;;  %v762_v15 = vld [vmem:[#allocation3 + $0x48] sm:$0xff] }
 0x193   : > { %v766_v20 = vpack.c.bf16 %v764_v16, %v762_v15 }
 0x194   : > { %1415 = vmatprep.mubr.msk.bf16.mxu0 %vm652_vm4, %v734_v7 }
 0x195   : > { %v730_v8 = vld [vmem:[#allocation3 + $0x28] sm:$0xff]  ;;  %1027 = vmatmul.mubr.bf16.vlgmr.msra.gmra.mrb[8].mxu0 %v1618_v10 }
 0x196   : > { %v736_v9 = vpack.c.bf16 %v732_v6, %v730_v8  ;;  %v731_v14 = vld [vmem:[#allocation3 + $0x30] sm:$0xff] }
 0x197   : > { %v763_v23 = vld [vmem:[#allocation3 + $0x50] sm:$0xff] }
 0x198   : > { %1401 = vmatprep.mubr.msk.bf16.mxu1 %vm652_vm4, %v736_v9  ;;  %1416 = vmatprep.mubr.msk.bf16.mxu0 %vm652_vm4, %v736_v9 }
 0x1fa   : > { %v689_v11 = vpop.permute.xlu0 %688 }
 0x1fb   : > { %701 = vst.msk [vmem:[#allocation3 + $0x20] sm:$0xff] %vm700_vm13, %v689_v11 }
 0x1fe   : > { %v693_v13 = vpop.permute.xlu0 %692 }
 0x1ff   : > { %703 = vst.msk [vmem:[#allocation3 + $0x40] sm:$0xff] %vm700_vm13, %v693_v13 }
 0x202   : > { %v729_v17 = vld [vmem:[#allocation3 + $0x20] sm:$0xff] }
 0x203   : > { %v735_v19 = vpack.c.bf16 %v731_v14, %v729_v17 }
 0x205   : > { %903 = vmatmul.mubr.bf16.vlgmr.msra.gmra.mrb[4].mxu1 %v735_v19  ;;  %1035 = vmatmul.mubr.bf16.gmra.mrb[12].mxu0 %v735_v19 }
 0x206   : > { %1159 = vmatpush1.bf16.msra.mxu1 %v1594_v18  ;;  %1402 = vmatprep.mubr.msk.bf16.mxu1 %vm652_vm4, %v766_v20  ;;  %v761_v22 = vld [vmem:[#allocation3 + $0x40] sm:$0xff] }
 0x207   : > { %1160 = vmatprep.subr.bf16.mxu1 %v1616_v49  ;;  %v765_v25 = vpack.c.bf16 %v763_v23, %v761_v22 }
 0x20a   : > { %1161 = vmatpush1.bf16.msra.mxu1 %v1595_v21 }
 0x20b   : > { %1162 = vmatprep.subr.bf16.mxu1 %v1616_v49 }
 0x20d   : > { %911 = vmatmul.mubr.bf16.gmra.mrb[8].mxu1 %v765_v25 }
 0x20e   : > { %1163 = vmatpush1.bf16.msra.mxu1 %v1596_v24  ;;  %1453 = vmatprep.mubr.msk.bf16.mxu1 %vm652_vm4, %v766_v20 }
 0x20f   : > { %1164 = vmatprep.subr.bf16.mxu1 %v1616_v49 }
 0x212   : > { %1165 = vmatpush1.bf16.msra.mxu1 %v1597_v26 }
 0x213   : > { %1166 = vmatprep.subr.bf16.mxu1 %v1616_v49 }
 0x216   : > { %1167 = vmatpush1.bf16.msra.mxu1 %v1598_v27 }
 0x217   : > { %1168 = vmatprep.subr.bf16.mxu1 %v1616_v49 }
 0x21a   : > { %1169 = vmatpush1.bf16.msra.mxu1 %v1599_v28 }
 0x21b   : > { %1170 = vmatprep.subr.bf16.mxu1 %v1616_v49 }
 0x21e   : > { %1171 = vmatpush1.bf16.msra.mxu1 %v1600_v29 }
 0x21f   : > { %1172 = vmatprep.subr.bf16.mxu1 %v1616_v49 }
 0x222   : > { %1173 = vmatpush1.bf16.msra.mxu1 %v1601_v30 }
 0x223   : > { %1174 = vmatprep.subr.bf16.mxu1 %v1616_v49 }
 0x226   : > { %1175 = vmatpush1.bf16.msra.mxu1 %v1602_v31 }
 0x227   : > { %1176 = vmatprep.subr.bf16.mxu1 %v1616_v49 }
 0x22a   : > { %1177 = vmatpush1.bf16.msra.mxu1 %v1603_v32 }
 0x22b   : > { %1178 = vmatprep.subr.bf16.mxu1 %v1616_v49 }
 0x22e   : > { %1179 = vmatpush1.bf16.msra.mxu1 %v1604_v33 }
 0x22f   : > { %1180 = vmatprep.subr.bf16.mxu1 %v1616_v49 }
 0x232   : > { %1181 = vmatpush1.bf16.msra.mxu1 %v1605_v34 }
 0x235   : > { %1191 = vmatmul.mubr.bf16.vlgmr.msra.gmra.mrb[12].mxu1 %v765_v25 }
 0x236   : > { %1454 = vmatprep.mubr.msk.bf16.mxu1 %vm652_vm4, %v1054_v37 }
 0x23d   : > { %1199 = vmatmul.mubr.bf16.gmra.mrb[16].mxu1 %v1053_v39 }
 0x268   : > { %v1028_v40 = vpop.f32.mrb[8].mxu0 }
 0x269   : > { %v1030_v41 = vpop.f32.mrb[9].mxu0 }
 0x26a   : > { %v1031_v42 = vpop.f32.mrb[10].mxu0 }
 0x26b   : > { %v1033_v43 = vpop.f32.mrb[11].mxu0 }
 0x2d8   : > { %v904_v44 = vpop.f32.mrb[4].mxu1  ;;  %v1036_v45 = vpop.f32.mrb[12].mxu0 }
 0x2d9   : > { %v1029_v46 = vadd.f32 %v1028_v40, %v904_v44  ;;  %v906_v47 = vpop.f32.mrb[5].mxu1  ;;  %v1038_v49 = vpop.f32.mrb[13].mxu0 }
 0x2da   : > { %v907_v48 = vpop.f32.mrb[6].mxu1  ;;  %v1039_v50 = vpop.f32.mrb[14].mxu0 }
 0x2db   : > { %v1032_v51 = vadd.f32 %v1031_v42, %v907_v48  ;;  %v909_v52 = vpop.f32.mrb[7].mxu1  ;;  %v1041_v53 = vpop.f32.mrb[15].mxu0 }
 0x2e0   : > { %v912_v54 = vpop.f32.mrb[8].mxu1 }
 0x2e1   : > { %v1037_v55 = vadd.f32 %v1036_v45, %v912_v54  ;;  %v914_v56 = vpop.f32.mrb[9].mxu1 }
 0x2e2   : > { %v915_v57 = vpop.f32.mrb[10].mxu1 }
 0x2e3   : > { %v1040_v12 = vadd.f32 %v1039_v50, %v915_v57  ;;  %v917_v58 = vpop.f32.mrb[11].mxu1 }
 0x308   : > { %v1192_v59 = vpop.f32.mrb[12].mxu1 }
 0x309   : > { %v1207_v61 = vadd.f32 %v1192_v59, %v1029_v46  ;;  %v1194_v62 = vpop.f32.mrb[13].mxu1 }
 0x30a   : > { %v1195_v63 = vpop.f32.mrb[14].mxu1 }
 0x30b   : > { %v1218_v0 = vadd.f32 %v1455_v60, %v1207_v61  ;;  %v1208_v1 = vadd.f32 %v1195_v63, %v1032_v51  ;;  %v1197_v2 = vpop.f32.mrb[15].mxu1 }
 0x30d   : > { %v1222_v3 = vmax.f32 %v1218_v0, 0.0  ;;  %v1219_v4 = vadd.f32 %v1455_v60, %v1208_v1 }
 0x30f   : > { %1226 = vst.msk [vmem:[#allocation4] sm:$0xff] %vm652_vm4, %v1222_v3  ;;  %v1223_v5 = vmax.f32 %v1219_v4, 0.0 }
 0x310   : > { %v1200_v6 = vpop.f32.mrb[16].mxu1 }
 0x311   : > { %1227 = vst.msk [vmem:[#allocation4 + $0x8] sm:$0xff] %vm652_vm4, %v1223_v5  ;;  %v1209_v7 = vadd.f32 %v1200_v6, %v1037_v55  ;;  %v1202_v8 = vpop.f32.mrb[17].mxu1 }
 0x312   : > { %v1203_v9 = vpop.f32.mrb[18].mxu1 }
 0x313   : > { %v1220_v10 = vadd.f32 %v1455_v60, %v1209_v7  ;;  %v1210_v11 = vadd.f32 %v1203_v9, %v1040_v12  ;;  %v1205_v13 = vpop.f32.mrb[19].mxu1 }
 0x315   : > { %v1224_v14 = vmax.f32 %v1220_v10, 0.0  ;;  %v1221_v15 = vadd.f32 %v1455_v60, %v1210_v11 }
 0x317   : > { %1228 = vst.msk [vmem:[#allocation4 + $0x10] sm:$0xff] %vm652_vm4, %v1224_v14  ;;  %v1225_v16 = vmax.f32 %v1221_v15, 0.0 }
 0x318   : > { %v1230_v17 = vld [vmem:[#allocation4] ss:$2 sm:$0xff]  ;;  %v1234_v18 = vld [vmem:[#allocation4 + $0x1] ss:$2 sm:$0xff] }
 0x319   : > { %1229 = vst.msk [vmem:[#allocation4 + $0x18] sm:$0xff] %vm652_vm4, %v1225_v16  ;;  %v1237_v21 = vmax.f32 %v1230_v17, %v1234_v18 }
 0x320   : > { %v1232_v19 = vld [vmem:[#allocation4 + $0x10] ss:$2 sm:$0xff]  ;;  %v1236_v20 = vld [vmem:[#allocation4 + $0x11] ss:$2 sm:$0xff] }
 0x321   : > { %v1238_v22 = vmax.f32 %v1232_v19, %v1236_v20 }
 0x323   : > { %v1239_v23 = vmax.f32 %v1237_v21, %v1238_v22 }
 0x325   : > { %1463 = vst.msk [vmem:[%s1851_s24 + $0x11] sm:$0x1] %vm686_vm6, %v1239_v23 }
 0x326 PF: > { %s15_s18 = sadd.s32 1, %s1612_s18  }
 0x327   : > { %p12_p4 = scmp.ge.s32.totalorder %s15_s18, 4  }
 0x329   :  { %14 = sbr.rel (!%p12_p4) target bundleno = 1 (0x1), region = 79 }

// kernel: encoder_forward.4
= control target key start
LH: loop header
LB: loop body
LE: loop exit
PB: predicated region body
PF: predicated region fallthrough
CT: control target
= control target key end

     0   :  { %s6002_s18 = smov 0   ;;  %s7817_s0 = inlined_call_operand.vmem [shape: f32[2,608,4], index: 0, kind: input, shape index: {}]   ;;  %s7818_s1 = inlined_call_operand.vmem [shape: bf16[3,12,8], index: 1, kind: input, shape index: {}]   ;;  %s7819_s2 = inlined_call_operand.vmem [shape: f32[1,8], index: 2, kind: input, shape index: {}]   ;;  %s7820_s3 = inlined_call_operand.vmem [shape: bf16[3,24,8], index: 3, kind: input, shape index: {}]   ;;  %s7821_s4 = inlined_call_operand.vmem [shape: f32[1,8], index: 4, kind: input, shape index: {}]   ;;  %s7822_s5 = inlined_call_operand.vmem [shape: f32[2,11,16,8], index: 5, kind: output, shape index: {}]  }
   0x1 LB: > { %s4790_s19 = sadd.s32 4294967295, %s5966_s18   ;;  %p4794_p0 = scmp.ge.s32.totalorder %s5966_s18, 1  ;;  %s5966_s18 = sphi %s6002_s18, %s15_s18  }
   0x2   : > { %p187_p1 = scmp.lt.s32.totalorder %s5966_s18, 3 }
   0x4   : > { %p188_p2 = pnand %p4794_p0, %p187_p1 }
   0x5   : > { %p215_p3 = scmp.lt.s32.totalorder (!%p188_p2), %s4790_s19, 1  ;;  %v5951_v0 = vld [vmem:[%s7818_s1 + $0x8] sm:$0x3f] (!%p188_p2)   ;;  %vm1099_vm0 = vcmask (!%p188_p2), 1045504   ;;  %s5968_s26 = smov (!%p188_p2), 4   ;;  %vm334_vm1 = vcmask (!%p188_p2), 31744  }
   0x6   : > { %191 = sbr.rel (%p188_p2) target bundleno = 1111 (0x457), region = 40  ;;  %5771 = vmatprep.subr.msk.bf16.mxu0 (!%p188_p2), %vm1099_vm0, %v5951_v0  ;;  %v1101_v1 = vsel (!%p188_p2), %vm1099_vm0, %v5951_v0, 0  ;;  %s5969_s27 = smov (!%p188_p2), 8   ;;  %vm623_vm2 = vcmask (!%p188_p2), 64544   ;;  %vm912_vm3 = vcmask (!%p188_p2), 97344   ;;  %vm1002_vm4 = vcmask (!%p188_p2), 97280  }
   0x7   : > { %5242 = vmatpush3.bf16.msra.mxu0 (!%p188_p2), %v1101_v1  ;;  %s5971_s7 = smov (!%p188_p2), 16   ;;  %vm2386_vm5 = vcmask (!%p188_p2), 195584   ;;  %vm2397_vm6 = vcmask (!%p188_p2), 64512   ;;  %vm2718_vm7 = vcmask (!%p188_p2), 130112   ;;  %vm3254_vm8 = vcmask (!%p188_p2), 1043456  }
   0x8   : > { %vm2975_vm9 = vcmask (!%p188_p2), 195712   ;;  %vm4709_vm10 = vcmask (!%p188_p2), 57344   ;;  %vm4718_vm11 = vcmask (!%p188_p2), 63488  }
   0xd   : > { %s7824_s19 = smov (!%p215_p3, %s4790_s19), 1 }
   0xe   : > { %s5777_s20 = smul.u32 608, %s7824_s19 }
   0xf   : > { %s5778_s24 = smul.u32 176, %s7824_s19 }
  0x10   : > { %s6019_s25 = scalar_lea.vmem %s7817_s0, %s5777_s20 }
  0x11   : > { %v375_v2 = vld [vmem:[%s6019_s25 + $0x21] sm:$0xff]  ;;  %v376_v3 = vld [vmem:[%s6019_s25 + $0x29] sm:$0xff]  ;;  %v377_v7 = vld [vmem:[%s6019_s25 + $0x31] sm:$0xff] }
  0x12   : > { %v664_v4 = vld [vmem:[%s6019_s25 + $0x22] sm:$0xff]  ;;  %v445_v5 = vpack.c.bf16 %v376_v3, %v375_v2  ;;  %v665_v6 = vld [vmem:[%s6019_s25 + $0x2a] sm:$0xff]  ;;  %v378_v8 = vld [vmem:[%s6019_s25 + $0x39] sm:$0xff] }
  0x13   : > { %v734_v9 = vpack.c.bf16 %v665_v6, %v664_v4  ;;  %v666_v10 = vld [vmem:[%s6019_s25 + $0x32] sm:$0xff]  ;;  %v667_v11 = vld [vmem:[%s6019_s25 + $0x3a] sm:$0xff]  ;;  %v446_v12 = vpack.c.bf16 %v378_v8, %v377_v7  ;;  %v380_v15 = vld [vmem:[%s6019_s25 + $0x49] sm:$0xff] }
  0x14   : > { %519 = vrot.lane.b32.xlu0 %v445_v5, %s5968_s26  ;;  %v735_v13 = vpack.c.bf16 %v667_v11, %v666_v10  ;;  %v379_v14 = vld [vmem:[%s6019_s25 + $0x41] sm:$0xff]  ;;  %v381_v16 = vld [vmem:[%s6019_s25 + $0x51] sm:$0xff]  ;;  %v382_v17 = vld [vmem:[%s6019_s25 + $0x59] sm:$0xff] }
  0x15   : > { %808 = vrot.lane.b32.xlu1 %v734_v9, %s5969_s27  ;;  %v447_v18 = vpack.c.bf16 %v380_v15, %v379_v14  ;;  %v448_v19 = vpack.c.bf16 %v382_v17, %v381_v16  ;;  %v668_v20 = vld [vmem:[%s6019_s25 + $0x42] sm:$0xff]  ;;  %v669_v21 = vld [vmem:[%s6019_s25 + $0x4a] sm:$0xff]  ;;  %v670_v22 = vld [vmem:[%s6019_s25 + $0x52] sm:$0xff] }
  0x16   : > { %v671_v23 = vld [vmem:[%s6019_s25 + $0x5a] sm:$0xff]  ;;  %v736_v24 = vpack.c.bf16 %v669_v21, %v668_v20  ;;  %v384_v27 = vld [vmem:[%s6019_s25 + $0x69] sm:$0xff]  ;;  %v385_v28 = vld [vmem:[%s6019_s25 + $0x71] sm:$0xff] }
  0x17   : > { %v737_v25 = vpack.c.bf16 %v671_v23, %v670_v22  ;;  %v383_v26 = vld [vmem:[%s6019_s25 + $0x61] sm:$0xff]  ;;  %v386_v29 = vld [vmem:[%s6019_s25 + $0x79] sm:$0xff]  ;;  %v673_v33 = vld [vmem:[%s6019_s25 + $0x6a] sm:$0xff] }
  0x18   : > { %521 = vrot.lane.b32.xlu0 %v446_v12, %s5968_s26  ;;  %v449_v30 = vpack.c.bf16 %v384_v27, %v383_v26  ;;  %v450_v31 = vpack.c.bf16 %v386_v29, %v385_v28  ;;  %v672_v32 = vld [vmem:[%s6019_s25 + $0x62] sm:$0xff]  ;;  %v674_v34 = vld [vmem:[%s6019_s25 + $0x72] sm:$0xff]  ;;  %v675_v35 = vld [vmem:[%s6019_s25 + $0x7a] sm:$0xff] }
  0x19   : > { %810 = vrot.lane.b32.xlu1 %v735_v13, %s5969_s27  ;;  %v738_v36 = vpack.c.bf16 %v673_v33, %v672_v32  ;;  %v739_v37 = vpack.c.bf16 %v675_v35, %v674_v34  ;;  %v387_v38 = vld [vmem:[%s6019_s25 + $0x81] sm:$0xff]  ;;  %v388_v39 = vld [vmem:[%s6019_s25 + $0x89] sm:$0xff]  ;;  %v389_v40 = vld [vmem:[%s6019_s25 + $0x91] sm:$0xff] }
  0x1a   : > { %v390_v41 = vld [vmem:[%s6019_s25 + $0x99] sm:$0xff]  ;;  %v451_v42 = vpack.c.bf16 %v388_v39, %v387_v38  ;;  %v676_v44 = vld [vmem:[%s6019_s25 + $0x82] sm:$0xff]  ;;  %v677_v45 = vld [vmem:[%s6019_s25 + $0x8a] sm:$0xff] }
  0x1b   : > { %v452_v43 = vpack.c.bf16 %v390_v41, %v389_v40  ;;  %v678_v46 = vld [vmem:[%s6019_s25 + $0x92] sm:$0xff]  ;;  %v679_v47 = vld [vmem:[%s6019_s25 + $0x9a] sm:$0xff]  ;;  %v740_v48 = vpack.c.bf16 %v677_v45, %v676_v44  ;;  %v392_v51 = vld [vmem:[%s6019_s25 + $0xa9] sm:$0xff] }
  0x1c   : > { %523 = vrot.lane.b32.xlu0 %v447_v18, %s5968_s26  ;;  %v741_v49 = vpack.c.bf16 %v679_v47, %v678_v46  ;;  %v391_v50 = vld [vmem:[%s6019_s25 + $0xa1] sm:$0xff]  ;;  %v393_v52 = vld [vmem:[%s6019_s25 + $0xb1] sm:$0xff]  ;;  %v394_v53 = vld [vmem:[%s6019_s25 + $0xb9] sm:$0xff] }
  0x1d   : > { %525 = vrot.lane.b32.xlu1 %v448_v19, %s5968_s26  ;;  %v453_v54 = vpack.c.bf16 %v392_v51, %v391_v50  ;;  %v454_v55 = vpack.c.bf16 %v394_v53, %v393_v52  ;;  %v680_v56 = vld [vmem:[%s6019_s25 + $0xa2] sm:$0xff]  ;;  %v681_v57 = vld [vmem:[%s6019_s25 + $0xaa] sm:$0xff]  ;;  %v682_v58 = vld [vmem:[%s6019_s25 + $0xb2] sm:$0xff] }
  0x1e   : > { %v683_v59 = vld [vmem:[%s6019_s25 + $0xba] sm:$0xff]  ;;  %v742_v60 = vpack.c.bf16 %v681_v57, %v680_v56  ;;  %v396_v63 = vld [vmem:[%s6019_s25 + $0xc9] sm:$0xff]  ;;  %v397_v0 = vld [vmem:[%s6019_s25 + $0xd1] sm:$0xff] }
  0x1f   : > { %v743_v61 = vpack.c.bf16 %v683_v59, %v682_v58  ;;  %v395_v62 = vld [vmem:[%s6019_s25 + $0xc1] sm:$0xff]  ;;  %v398_v1 = vld [vmem:[%s6019_s25 + $0xd9] sm:$0xff]  ;;  %v685_v7 = vld [vmem:[%s6019_s25 + $0xca] sm:$0xff] }
  0x20   : > { %812 = vrot.lane.b32.xlu0 %v736_v24, %s5969_s27  ;;  %v230_v2 = vld [vmem:[%s6019_s25 + $0x20] sm:$0xff]  ;;  %v455_v3 = vpack.c.bf16 %v396_v63, %v395_v62  ;;  %v231_v4 = vld [vmem:[%s6019_s25 + $0x28] sm:$0xff]  ;;  %v456_v5 = vpack.c.bf16 %v398_v1, %v397_v0  ;;  %v232_v9 = vld [vmem:[%s6019_s25 + $0x30] sm:$0xff] }
  0x21   : > { %814 = vrot.lane.b32.xlu1 %v737_v25, %s5969_s27  ;;  %v684_v6 = vld [vmem:[%s6019_s25 + $0xc2] sm:$0xff]  ;;  %v300_v8 = vpack.c.bf16 %v231_v4, %v230_v2  ;;  %v686_v10 = vld [vmem:[%s6019_s25 + $0xd2] sm:$0xff]  ;;  %v687_v11 = vld [vmem:[%s6019_s25 + $0xda] sm:$0xff] }
  0x22   : > { %v233_v12 = vld [vmem:[%s6019_s25 + $0x38] sm:$0xff]  ;;  %v234_v14 = vld [vmem:[%s6019_s25 + $0x40] sm:$0xff]  ;;  %v744_v15 = vpack.c.bf16 %v685_v7, %v684_v6  ;;  %v235_v16 = vld [vmem:[%s6019_s25 + $0x48] sm:$0xff]  ;;  %v745_v19 = vpack.c.bf16 %v687_v11, %v686_v10 }
  0x23   : > { %337 = vst.msk [vmem:[#allocation2 + $0x10] sm:$0xff] %vm334_vm1, %v300_v8  ;;  %v301_v13 = vpack.c.bf16 %v233_v12, %v232_v9  ;;  %v236_v17 = vld [vmem:[%s6019_s25 + $0x50] sm:$0xff]  ;;  %v237_v18 = vld [vmem:[%s6019_s25 + $0x58] sm:$0xff]  ;;  %v399_v20 = vld [vmem:[%s6019_s25 + $0xe1] sm:$0xff]  ;;  %v302_v22 = vpack.c.bf16 %v235_v16, %v234_v14 }
  0x24   : > { %527 = vrot.lane.b32.xlu0 %v449_v30, %s5968_s26  ;;  %v400_v21 = vld [vmem:[%s6019_s25 + $0xe9] sm:$0xff]  ;;  %v303_v23 = vpack.c.bf16 %v237_v18, %v236_v17  ;;  %v401_v24 = vld [vmem:[%s6019_s25 + $0xf1] sm:$0xff]  ;;  %v402_v25 = vld [vmem:[%s6019_s25 + $0xf9] sm:$0xff] }
  0x25   : > { %529 = vrot.lane.b32.xlu1 %v450_v31, %s5968_s26  ;;  %338 = vst.msk [vmem:[#allocation2 + $0x18] sm:$0xff] %vm334_vm1, %v301_v13  ;;  %339 = vst.msk [vmem:[#allocation2 + $0x20] sm:$0xff] %vm334_vm1, %v302_v22  ;;  %v6112_v26 = vld [vmem:[%s7818_s1 + $0x10] sm:$0x3f]   ;;  %v457_v27 = vpack.c.bf16 %v400_v21, %v399_v20  ;;  %v238_v28 = vld [vmem:[%s6019_s25 + $0x60] sm:$0xff]  ;;  %v458_v31 = vpack.c.bf16 %v402_v25, %v401_v24 }
  0x26   : > { %340 = vst.msk [vmem:[#allocation2 + $0x28] sm:$0xff] %vm334_vm1, %v303_v23  ;;  %v239_v29 = vld [vmem:[%s6019_s25 + $0x68] sm:$0xff]  ;;  %v240_v30 = vld [vmem:[%s6019_s25 + $0x70] sm:$0xff]  ;;  %5773 = vmatprep.subr.msk.bf16.mxu0 %vm1099_vm0, %v6112_v26  ;;  %v241_v35 = vld [vmem:[%s6019_s25 + $0x78] sm:$0xff] }
  0x27   : > { %v688_v32 = vld [vmem:[%s6019_s25 + $0xe2] sm:$0xff]  ;;  %v689_v33 = vld [vmem:[%s6019_s25 + $0xea] sm:$0xff]  ;;  %v304_v34 = vpack.c.bf16 %v239_v29, %v238_v28  ;;  %v305_v38 = vpack.c.bf16 %v241_v35, %v240_v30  ;;  %v245_v44 = vld [vmem:[%s6019_s25 + $0x98] sm:$0xff] }
  0x28   : > { %816 = vrot.lane.b32.xlu0 %v738_v36, %s5969_s27  ;;  %v690_v36 = vld [vmem:[%s6019_s25 + $0xf2] sm:$0xff]  ;;  %v242_v39 = vld [vmem:[%s6019_s25 + $0x80] sm:$0xff]  ;;  %v6131_v41 = vld [vmem:[%s6019_s25 + $0x109] sm:$0xff]  ;;  %v746_v45 = vpack.c.bf16 %v689_v33, %v688_v32 }
  0x29   : > { %818 = vrot.lane.b32.xlu1 %v739_v37, %s5969_s27  ;;  %v691_v37 = vld [vmem:[%s6019_s25 + $0xfa] sm:$0xff]  ;;  %341 = vst.msk [vmem:[#allocation2 + $0x30] sm:$0xff] %vm334_vm1, %v304_v34  ;;  %v6139_v46 = vld [vmem:[%s6019_s25 + $0x111] sm:$0xff]  ;;  %342 = vst.msk [vmem:[#allocation2 + $0x38] sm:$0xff] %vm334_vm1, %v305_v38 }
  0x2a   : > { %v6128_v40 = vld [vmem:[%s6019_s25 + $0x101] sm:$0xff]  ;;  %v406_v47 = vld [vmem:[%s6019_s25 + $0x119] sm:$0xff]  ;;  %v248_v52 = vld [vmem:[%s6019_s25 + $0xb0] sm:$0xff]  ;;  %v747_v53 = vpack.c.bf16 %v691_v37, %v690_v36 }
  0x2b   : > { %v246_v50 = vld [vmem:[%s6019_s25 + $0xa0] sm:$0xff]  ;;  %v247_v51 = vld [vmem:[%s6019_s25 + $0xa8] sm:$0xff]  ;;  %v257_v4 = vld [vmem:[%s6019_s25 + $0xf8] sm:$0xff]  ;;  %v460_v13 = vpack.c.bf16 %v406_v47, %v6139_v46 }
  0x2c   : > { %531 = vrot.lane.b32.xlu0 %v451_v42, %s5968_s26  ;;  %v243_v42 = vld [vmem:[%s6019_s25 + $0x88] sm:$0xff]  ;;  %v250_v56 = vld [vmem:[%s6019_s25 + $0xc0] sm:$0xff]  ;;  %v694_v6 = vld [vmem:[%s6019_s25 + $0x112] sm:$0xff] }
  0x2d   : > { %533 = vrot.lane.b32.xlu1 %v452_v43, %s5968_s26  ;;  %v244_v43 = vld [vmem:[%s6019_s25 + $0x90] sm:$0xff]  ;;  %v251_v57 = vld [vmem:[%s6019_s25 + $0xc8] sm:$0xff]  ;;  %v254_v62 = vld [vmem:[%s6019_s25 + $0xe0] sm:$0xff] }
  0x2e   : > { %v310_v59 = vpack.c.bf16 %v251_v57, %v250_v56  ;;  %v692_v63 = vld [vmem:[%s6019_s25 + $0x102] sm:$0xff]  ;;  %v693_v0 = vld [vmem:[%s6019_s25 + $0x10a] sm:$0xff]  ;;  %v695_v7 = vld [vmem:[%s6019_s25 + $0x11a] sm:$0xff] }
  0x2f   : > { %v255_v2 = vld [vmem:[%s6019_s25 + $0xe8] sm:$0xff]  ;;  %v258_v10 = vld [vmem:[%s6019_s25 + $0x100] sm:$0xff]  ;;  %v260_v12 = vld [vmem:[%s6019_s25 + $0x110] sm:$0xff]  ;;  %v748_v25 = vpack.c.bf16 %v693_v0, %v692_v63  ;;  %v749_v30 = vpack.c.bf16 %v695_v7, %v694_v6 }
  0x30   : > { %820 = vrot.lane.b32.xlu0 %v740_v48, %s5969_s27  ;;  %v306_v48 = vpack.c.bf16 %v243_v42, %v242_v39  ;;  %347 = vst.msk [vmem:[#allocation2 + $0x60] sm:$0xff] %vm334_vm1, %v310_v59  ;;  %v312_v8 = vpack.c.bf16 %v255_v2, %v254_v62  ;;  %v259_v11 = vld [vmem:[%s6019_s25 + $0x108] sm:$0xff]  ;;  %v262_v16 = vld [vmem:[%s6019_s25 + $0x120] sm:$0xff]  ;;  %v264_v20 = vld [vmem:[%s6019_s25 + $0x130] sm:$0xff] }
  0x31   : > { %822 = vrot.lane.b32.xlu1 %v741_v49, %s5969_s27  ;;  %v307_v49 = vpack.c.bf16 %v245_v44, %v244_v43  ;;  %v314_v14 = vpack.c.bf16 %v259_v11, %v258_v10  ;;  %v263_v17 = vld [vmem:[%s6019_s25 + $0x128] sm:$0xff]  ;;  %v265_v21 = vld [vmem:[%s6019_s25 + $0x138] sm:$0xff]  ;;  %v266_v23 = vld [vmem:[%s6019_s25 + $0x140] sm:$0xff] }
  0x32   : > { %343 = vst.msk [vmem:[#allocation2 + $0x40] sm:$0xff] %vm334_vm1, %v306_v48  ;;  %349 = vst.msk [vmem:[#allocation2 + $0x70] sm:$0xff] %vm334_vm1, %v312_v8  ;;  %v317_v22 = vpack.c.bf16 %v265_v21, %v264_v20  ;;  %v267_v24 = vld [vmem:[%s6019_s25 + $0x148] sm:$0xff]  ;;  %v268_v28 = vld [vmem:[%s6019_s25 + $0x150] sm:$0xff] }
  0x33   : > { %344 = vst.msk [vmem:[#allocation2 + $0x48] sm:$0xff] %vm334_vm1, %v307_v49  ;;  %351 = vst.msk [vmem:[#allocation2 + $0x80] sm:$0xff] %vm334_vm1, %v314_v14  ;;  %v269_v29 = vld [vmem:[%s6019_s25 + $0x158] sm:$0xff]  ;;  %v408_v32 = vld [vmem:[%s6019_s25 + $0x129] sm:$0xff] }
  0x34   : > { %535 = vrot.lane.b32.xlu0 %v453_v54, %s5968_s26  ;;  %v308_v54 = vpack.c.bf16 %v247_v51, %v246_v50  ;;  %354 = vst.msk [vmem:[#allocation2 + $0x98] sm:$0xff] %vm334_vm1, %v317_v22  ;;  %v319_v33 = vpack.c.bf16 %v269_v29, %v268_v28  ;;  %v409_v34 = vld [vmem:[%s6019_s25 + $0x131] sm:$0xff]  ;;  %v410_v35 = vld [vmem:[%s6019_s25 + $0x139] sm:$0xff]  ;;  %v696_v38 = vld [vmem:[%s6019_s25 + $0x122] sm:$0xff] }
  0x35   : > { %537 = vrot.lane.b32.xlu1 %v454_v55, %s5968_s26  ;;  %v249_v55 = vld [vmem:[%s6019_s25 + $0xb8] sm:$0xff]  ;;  %v462_v37 = vpack.c.bf16 %v410_v35, %v409_v34  ;;  %v697_v39 = vld [vmem:[%s6019_s25 + $0x12a] sm:$0xff]  ;;  %v270_v42 = vld [vmem:[%s6019_s25 + $0x160] sm:$0xff] }
  0x36   : > { %v309_v58 = vpack.c.bf16 %v249_v55, %v248_v52  ;;  %345 = vst.msk [vmem:[#allocation2 + $0x50] sm:$0xff] %vm334_vm1, %v308_v54  ;;  %356 = vst.msk [vmem:[#allocation2 + $0xa8] sm:$0xff] %vm334_vm1, %v319_v33  ;;  %v271_v43 = vld [vmem:[%s6019_s25 + $0x168] sm:$0xff]  ;;  %v750_v44 = vpack.c.bf16 %v697_v39, %v696_v38  ;;  %v272_v46 = vld [vmem:[%s6019_s25 + $0x170] sm:$0xff] }
  0x37   : > { %v273_v47 = vld [vmem:[%s6019_s25 + $0x178] sm:$0xff]  ;;  %v411_v49 = vld [vmem:[%s6019_s25 + $0x141] sm:$0xff]  ;;  %v412_v50 = vld [vmem:[%s6019_s25 + $0x149] sm:$0xff] }
  0x38   : > { %824 = vrot.lane.b32.xlu0 %v742_v60, %s5969_s27  ;;  %v252_v60 = vld [vmem:[%s6019_s25 + $0xd0] sm:$0xff]  ;;  %346 = vst.msk [vmem:[#allocation2 + $0x58] sm:$0xff] %vm334_vm1, %v309_v58  ;;  %v321_v51 = vpack.c.bf16 %v273_v47, %v272_v46  ;;  %v463_v54 = vpack.c.bf16 %v412_v50, %v411_v49  ;;  %v700_v56 = vld [vmem:[%s6019_s25 + $0x142] sm:$0xff]  ;;  %v703_v59 = vld [vmem:[%s6019_s25 + $0x15a] sm:$0xff] }
  0x39   : > { %826 = vrot.lane.b32.xlu1 %v743_v61, %s5969_s27  ;;  %v253_v61 = vld [vmem:[%s6019_s25 + $0xd8] sm:$0xff]  ;;  %v701_v57 = vld [vmem:[%s6019_s25 + $0x14a] sm:$0xff]  ;;  %v704_v10 = vld [vmem:[%s6019_s25 + $0x162] sm:$0xff] }
  0x3a   : > { %v311_v1 = vpack.c.bf16 %v253_v61, %v252_v60  ;;  %v413_v52 = vld [vmem:[%s6019_s25 + $0x151] sm:$0xff]  ;;  %358 = vst.msk [vmem:[#allocation2 + $0xb8] sm:$0xff] %vm334_vm1, %v321_v51  ;;  %v274_v60 = vld [vmem:[%s6019_s25 + $0x180] sm:$0xff]  ;;  %v275_v61 = vld [vmem:[%s6019_s25 + $0x188] sm:$0xff]  ;;  %v752_v62 = vpack.c.bf16 %v701_v57, %v700_v56 }
  0x3b   : > { %v702_v58 = vld [vmem:[%s6019_s25 + $0x152] sm:$0xff]  ;;  %v322_v63 = vpack.c.bf16 %v275_v61, %v274_v60  ;;  %v705_v11 = vld [vmem:[%s6019_s25 + $0x16a] sm:$0xff]  ;;  %v278_v14 = vld [vmem:[%s6019_s25 + $0x1a0] sm:$0xff] }
  0x3c   : > { %539 = vrot.lane.b32.xlu0 %v455_v3, %s5968_s26  ;;  %v256_v3 = vld [vmem:[%s6019_s25 + $0xf0] sm:$0xff]  ;;  %348 = vst.msk [vmem:[#allocation2 + $0x68] sm:$0xff] %vm334_vm1, %v311_v1  ;;  %v277_v1 = vld [vmem:[%s6019_s25 + $0x198] sm:$0xff]  ;;  %v753_v2 = vpack.c.bf16 %v703_v59, %v702_v58  ;;  %v419_v21 = vld [vmem:[%s6019_s25 + $0x181] sm:$0xff] }
  0x3d   : > { %541 = vrot.lane.b32.xlu1 %v456_v5, %s5968_s26  ;;  %v459_v5 = vpack.c.bf16 %v6131_v41, %v6128_v40  ;;  %v313_v9 = vpack.c.bf16 %v257_v4, %v256_v3  ;;  %v698_v40 = vld [vmem:[%s6019_s25 + $0x132] sm:$0xff]  ;;  %v699_v41 = vld [vmem:[%s6019_s25 + $0x13a] sm:$0xff]  ;;  %v416_v4 = vld [vmem:[%s6019_s25 + $0x169] sm:$0xff]  ;;  %359 = vst.msk [vmem:[#allocation2 + $0xc0] sm:$0xff] %vm334_vm1, %v322_v63 }
  0x3e   : > { %v751_v48 = vpack.c.bf16 %v699_v41, %v698_v40  ;;  %v276_v0 = vld [vmem:[%s6019_s25 + $0x190] sm:$0xff]  ;;  %v415_v3 = vld [vmem:[%s6019_s25 + $0x161] sm:$0xff]  ;;  %v418_v7 = vld [vmem:[%s6019_s25 + $0x179] sm:$0xff] }
  0x3f   : > { %350 = vst.msk [vmem:[#allocation2 + $0x78] sm:$0xff] %vm334_vm1, %v313_v9  ;;  %v417_v6 = vld [vmem:[%s6019_s25 + $0x171] sm:$0xff]  ;;  %v465_v8 = vpack.c.bf16 %v416_v4, %v415_v3  ;;  %v420_v22 = vld [vmem:[%s6019_s25 + $0x189] sm:$0xff]  ;;  %v282_v33 = vld [vmem:[%s6019_s25 + $0x1c0] sm:$0xff] }
  0x40   : > { %828 = vrot.lane.b32.xlu0 %v744_v15, %s5969_s27  ;;  %v261_v15 = vld [vmem:[%s6019_s25 + $0x118] sm:$0xff]  ;;  %v466_v9 = vpack.c.bf16 %v418_v7, %v417_v6  ;;  %v708_v29 = vld [vmem:[%s6019_s25 + $0x182] sm:$0xff] }
  0x41   : > { %830 = vrot.lane.b32.xlu1 %v745_v19, %s5969_s27  ;;  %v315_v18 = vpack.c.bf16 %v261_v15, %v260_v12  ;;  %v316_v19 = vpack.c.bf16 %v263_v17, %v262_v16  ;;  %v706_v12 = vld [vmem:[%s6019_s25 + $0x172] sm:$0xff]  ;;  %v279_v15 = vld [vmem:[%s6019_s25 + $0x1a8] sm:$0xff]  ;;  %v754_v16 = vpack.c.bf16 %v705_v11, %v704_v10  ;;  %v715_v50 = vld [vmem:[%s6019_s25 + $0x1ba] sm:$0xff] }
  0x42   : > { %v324_v17 = vpack.c.bf16 %v279_v15, %v278_v14  ;;  %v283_v34 = vld [vmem:[%s6019_s25 + $0x1c8] sm:$0xff]  ;;  %v285_v38 = vld [vmem:[%s6019_s25 + $0x1d8] sm:$0xff]  ;;  %v286_v51 = vld [vmem:[%s6019_s25 + $0x1e0] sm:$0xff] }
  0x43   : > { %352 = vst.msk [vmem:[#allocation2 + $0x88] sm:$0xff] %vm334_vm1, %v315_v18  ;;  %353 = vst.msk [vmem:[#allocation2 + $0x90] sm:$0xff] %vm334_vm1, %v316_v19  ;;  %v280_v18 = vld [vmem:[%s6019_s25 + $0x1b0] sm:$0xff]  ;;  %v281_v19 = vld [vmem:[%s6019_s25 + $0x1b8] sm:$0xff] }
  0x44   : > { %543 = vrot.lane.b32.xlu0 %v457_v27, %s5968_s26  ;;  %v318_v27 = vpack.c.bf16 %v267_v24, %v266_v23  ;;  %v325_v23 = vpack.c.bf16 %v281_v19, %v280_v18  ;;  %v421_v24 = vld [vmem:[%s6019_s25 + $0x191] sm:$0xff]  ;;  %361 = vst.msk [vmem:[#allocation2 + $0xd0] sm:$0xff] %vm334_vm1, %v324_v17  ;;  %v423_v40 = vld [vmem:[%s6019_s25 + $0x1a1] sm:$0xff]  ;;  %v424_v41 = vld [vmem:[%s6019_s25 + $0x1a9] sm:$0xff] }
  0x45   : > { %545 = vrot.lane.b32.xlu1 %v458_v31, %s5968_s26  ;;  %v407_v31 = vld [vmem:[%s6019_s25 + $0x121] sm:$0xff]  ;;  %v714_v49 = vld [vmem:[%s6019_s25 + $0x1b2] sm:$0xff]  ;;  %v428_v59 = vld [vmem:[%s6019_s25 + $0x1c9] sm:$0xff] }
  0x46   : > { %355 = vst.msk [vmem:[#allocation2 + $0xa0] sm:$0xff] %vm334_vm1, %v318_v27  ;;  %v461_v36 = vpack.c.bf16 %v408_v32, %v407_v31  ;;  %362 = vst.msk [vmem:[#allocation2 + $0xd8] sm:$0xff] %vm334_vm1, %v325_v23  ;;  %v467_v27 = vpack.c.bf16 %v420_v22, %v419_v21  ;;  %v710_v31 = vld [vmem:[%s6019_s25 + $0x192] sm:$0xff]  ;;  %v711_v32 = vld [vmem:[%s6019_s25 + $0x19a] sm:$0xff]  ;;  %v759_v57 = vpack.c.bf16 %v715_v50, %v714_v49 }
  0x47   : > { %v757_v39 = vpack.c.bf16 %v711_v32, %v710_v31  ;;  %v712_v47 = vld [vmem:[%s6019_s25 + $0x1a2] sm:$0xff]  ;;  %v289_v56 = vld [vmem:[%s6019_s25 + $0x1f8] sm:$0xff] }
  0x48   : > { %832 = vrot.lane.b32.xlu0 %v746_v45, %s5969_s27  ;;  %v320_v45 = vpack.c.bf16 %v271_v43, %v270_v42  ;;  %v425_v43 = vld [vmem:[%s6019_s25 + $0x1b1] sm:$0xff]  ;;  %v427_v58 = vld [vmem:[%s6019_s25 + $0x1c1] sm:$0xff]  ;;  %v436_v32 = vld [vmem:[%s6019_s25 + $0x209] sm:$0xff] }
  0x49   : > { %834 = vrot.lane.b32.xlu1 %v747_v53, %s5969_s27  ;;  %v414_v53 = vld [vmem:[%s6019_s25 + $0x159] sm:$0xff]  ;;  %v429_v61 = vld [vmem:[%s6019_s25 + $0x1d1] sm:$0xff]  ;;  %v471_v63 = vpack.c.bf16 %v428_v59, %v427_v58  ;;  %v291_v6 = vld [vmem:[%s6019_s25 + $0x208] sm:$0xff] }
  0x4a   : > { %357 = vst.msk [vmem:[#allocation2 + $0xb0] sm:$0xff] %vm334_vm1, %v320_v45  ;;  %v464_v55 = vpack.c.bf16 %v414_v53, %v413_v52  ;;  %v469_v45 = vpack.c.bf16 %v424_v41, %v423_v40  ;;  %v287_v52 = vld [vmem:[%s6019_s25 + $0x1e8] sm:$0xff]  ;;  %v718_v3 = vld [vmem:[%s6019_s25 + $0x1d2] sm:$0xff]  ;;  %v719_v4 = vld [vmem:[%s6019_s25 + $0x1da] sm:$0xff] }
  0x4b   : > { %v293_v10 = vld [vmem:[%s6019_s25 + $0x218] sm:$0xff]  ;;  %v761_v11 = vpack.c.bf16 %v719_v4, %v718_v3  ;;  %v720_v19 = vld [vmem:[%s6019_s25 + $0x1e2] sm:$0xff]  ;;  %v725_v41 = vld [vmem:[%s6019_s25 + $0x20a] sm:$0xff] }
  0x4c   : > { %547 = vrot.lane.b32.xlu0 %v459_v5, %s5968_s26  ;;  %v323_v5 = vpack.c.bf16 %v277_v1, %v276_v0  ;;  %v716_v1 = vld [vmem:[%s6019_s25 + $0x1c2] sm:$0xff]  ;;  %v433_v15 = vld [vmem:[%s6019_s25 + $0x1f1] sm:$0xff]  ;;  %v723_v22 = vld [vmem:[%s6019_s25 + $0x1fa] sm:$0xff] }
  0x4d   : > { %549 = vrot.lane.b32.xlu1 %v460_v13, %s5968_s26  ;;  %v707_v13 = vld [vmem:[%s6019_s25 + $0x17a] sm:$0xff]  ;;  %v722_v21 = vld [vmem:[%s6019_s25 + $0x1f2] sm:$0xff]  ;;  %v724_v40 = vld [vmem:[%s6019_s25 + $0x202] sm:$0xff] }
  0x4e   : > { %360 = vst.msk [vmem:[#allocation2 + $0xc8] sm:$0xff] %vm334_vm1, %v323_v5  ;;  %v755_v20 = vpack.c.bf16 %v707_v13, %v706_v12  ;;  %v290_v5 = vld [vmem:[%s6019_s25 + $0x200] sm:$0xff]  ;;  %v432_v13 = vld [vmem:[%s6019_s25 + $0x1e9] sm:$0xff] }
  0x4f   : > { %v431_v12 = vld [vmem:[%s6019_s25 + $0x1e1] sm:$0xff]  ;;  %v372_v49 = vld [vmem:[%s6019_s25 + $0x9] sm:$0xff] }
  0x50   : > { %836 = vrot.lane.b32.xlu0 %v748_v25, %s5969_s27  ;;  %v422_v25 = vld [vmem:[%s6019_s25 + $0x199] sm:$0xff]  ;;  %v473_v17 = vpack.c.bf16 %v432_v13, %v431_v12  ;;  %v435_v31 = vld [vmem:[%s6019_s25 + $0x201] sm:$0xff]  ;;  %v729_v13 = vld [vmem:[%s6019_s25 + $0x22a] sm:$0xff] }
  0x51   : > { %838 = vrot.lane.b32.xlu1 %v749_v30, %s5969_s27  ;;  %v468_v28 = vpack.c.bf16 %v422_v25, %v421_v24  ;;  %v709_v30 = vld [vmem:[%s6019_s25 + $0x18a] sm:$0xff]  ;;  %v226_v23 = vld [vmem:[%s6019_s25] sm:$0xff] }
  0x52   : > { %v756_v35 = vpack.c.bf16 %v709_v30, %v708_v29  ;;  %v227_v24 = vld [vmem:[%s6019_s25 + $0x8] sm:$0xff]  ;;  %v229_v29 = vld [vmem:[%s6019_s25 + $0x18] sm:$0xff]  ;;  %v763_v30 = vpack.c.bf16 %v723_v22, %v722_v21  ;;  %v5953_v50 = vld [vmem:[%s7818_s1] sm:$0x3f]  }
  0x53   : > { %5772 = vmatprep.subr.msk.bf16.mxu1 %vm1099_vm0, %v5953_v50  ;;  %v660_v59 = vld [vmem:[%s6019_s25 + $0x2] sm:$0xff] }
  0x54   : > { %551 = vrot.lane.b32.xlu0 %v461_v36, %s5968_s26  ;;  %v326_v36 = vpack.c.bf16 %v283_v34, %v282_v33  ;;  %v439_v4 = vld [vmem:[%s6019_s25 + $0x221] sm:$0xff] }
  0x55   : > { %553 = vrot.lane.b32.xlu1 %v462_v37, %s5968_s26  ;;  %v284_v37 = vld [vmem:[%s6019_s25 + $0x1d0] sm:$0xff]  ;;  %v728_v12 = vld [vmem:[%s6019_s25 + $0x222] sm:$0xff] }
  0x56   : > { %v327_v42 = vpack.c.bf16 %v285_v38, %v284_v37  ;;  %363 = vst.msk [vmem:[#allocation2 + $0xe0] sm:$0xff] %vm334_vm1, %v326_v36  ;;  %v438_v36 = vld [vmem:[%s6019_s25 + $0x219] sm:$0xff]  ;;  %v475_v38 = vpack.c.bf16 %v436_v32, %v435_v31 }
  0x58   : > { %840 = vrot.lane.b32.xlu0 %v750_v44, %s5969_s27  ;;  %v426_v44 = vld [vmem:[%s6019_s25 + $0x1b9] sm:$0xff]  ;;  %364 = vst.msk [vmem:[#allocation2 + $0xe8] sm:$0xff] %vm334_vm1, %v327_v42 }
  0x59   : > { %842 = vrot.lane.b32.xlu1 %v751_v48, %s5969_s27  ;;  %v470_v46 = vpack.c.bf16 %v426_v44, %v425_v43  ;;  %v713_v48 = vld [vmem:[%s6019_s25 + $0x1aa] sm:$0xff]  ;;  %v726_v43 = vld [vmem:[%s6019_s25 + $0x212] sm:$0xff]  ;;  %v727_v44 = vld [vmem:[%s6019_s25 + $0x21a] sm:$0xff] }
  0x5a   : > { %v758_v53 = vpack.c.bf16 %v713_v48, %v712_v47  ;;  %v765_v47 = vpack.c.bf16 %v727_v44, %v726_v43  ;;  %v371_v48 = vld [vmem:[%s6019_s25 + $0x1] sm:$0xff] }
  0x5c   : > { %555 = vrot.lane.b32.xlu0 %v463_v54, %s5968_s26  ;;  %v328_v54 = vpack.c.bf16 %v287_v52, %v286_v51  ;;  %v373_v52 = vld [vmem:[%s6019_s25 + $0x11] sm:$0xff] }
  0x5d   : > { %557 = vrot.lane.b32.xlu1 %v464_v55, %s5968_s26  ;;  %v288_v55 = vld [vmem:[%s6019_s25 + $0x1f0] sm:$0xff] }
  0x5e   : > { %v329_v60 = vpack.c.bf16 %v289_v56, %v288_v55  ;;  %365 = vst.msk [vmem:[#allocation2 + $0xf0] sm:$0xff] %vm334_vm1, %v328_v54  ;;  %v1404_v56 = vsel %vm1099_vm0, %v5953_v50, 0 }
  0x5f   : > { %5308 = vmatpush3.bf16.msra.mxu1 %v1404_v56 }
  0x60   : > { %844 = vrot.lane.b32.xlu0 %v752_v62, %s5969_s27  ;;  %v430_v62 = vld [vmem:[%s6019_s25 + $0x1d9] sm:$0xff]  ;;  %366 = vst.msk [vmem:[#allocation2 + $0xf8] sm:$0xff] %vm334_vm1, %v329_v60  ;;  %v661_v60 = vld [vmem:[%s6019_s25 + $0xa] sm:$0xff] }
  0x61   : > { %846 = vrot.lane.b32.xlu1 %v753_v2, %s5969_s27  ;;  %v472_v0 = vpack.c.bf16 %v430_v62, %v429_v61  ;;  %v717_v2 = vld [vmem:[%s6019_s25 + $0x1ca] sm:$0xff]  ;;  %v1832_v62 = vsel %vm1099_vm0, %v6112_v26, 0  ;;  %v732_v3 = vpack.c.bf16 %v661_v60, %v660_v59 }
  0x62   : > { %v760_v7 = vpack.c.bf16 %v717_v2, %v716_v1 }
  0x64   : > { %559 = vrot.lane.b32.xlu0 %v465_v8, %s5968_s26  ;;  %v330_v8 = vpack.c.bf16 %v291_v6, %v290_v5  ;;  %v440_v5 = vld [vmem:[%s6019_s25 + $0x229] sm:$0xff] }
  0x65   : > { %561 = vrot.lane.b32.xlu1 %v466_v9, %s5968_s26  ;;  %v292_v9 = vld [vmem:[%s6019_s25 + $0x210] sm:$0xff] }
  0x66   : > { %v331_v14 = vpack.c.bf16 %v293_v10, %v292_v9  ;;  %367 = vst.msk [vmem:[#allocation2 + $0x100] sm:$0xff] %vm334_vm1, %v330_v8  ;;  %v442_v8 = vld [vmem:[%s6019_s25 + $0x239] sm:$0xff]  ;;  %v477_v10 = vpack.c.bf16 %v440_v5, %v439_v4 }
  0x68   : > { %848 = vrot.lane.b32.xlu0 %v754_v16, %s5969_s27  ;;  %v434_v16 = vld [vmem:[%s6019_s25 + $0x1f9] sm:$0xff]  ;;  %368 = vst.msk [vmem:[#allocation2 + $0x108] sm:$0xff] %vm334_vm1, %v331_v14 }
  0x69   : > { %850 = vrot.lane.b32.xlu1 %v755_v20, %s5969_s27  ;;  %v474_v18 = vpack.c.bf16 %v434_v16, %v433_v15  ;;  %v721_v20 = vld [vmem:[%s6019_s25 + $0x1ea] sm:$0xff]  ;;  %v730_v16 = vld [vmem:[%s6019_s25 + $0x232] sm:$0xff] }
  0x6a   : > { %v762_v25 = vpack.c.bf16 %v721_v20, %v720_v19  ;;  %v766_v20 = vpack.c.bf16 %v729_v13, %v728_v12 }
  0x6c   : > { %563 = vrot.lane.b32.xlu0 %v467_v27, %s5968_s26  ;;  %v298_v27 = vpack.c.bf16 %v227_v24, %v226_v23 }
  0x6d   : > { %565 = vrot.lane.b32.xlu1 %v468_v28, %s5968_s26  ;;  %v228_v28 = vld [vmem:[%s6019_s25 + $0x10] sm:$0xff] }
  0x6e   : > { %v299_v33 = vpack.c.bf16 %v229_v29, %v228_v28  ;;  %335 = vst.msk [vmem:[#allocation2] sm:$0xff] %vm334_vm1, %v298_v27 }
  0x70   : > { %852 = vrot.lane.b32.xlu0 %v756_v35, %s5969_s27  ;;  %v437_v35 = vld [vmem:[%s6019_s25 + $0x211] sm:$0xff]  ;;  %336 = vst.msk [vmem:[#allocation2 + $0x8] sm:$0xff] %vm334_vm1, %v299_v33 }
  0x71   : > { %854 = vrot.lane.b32.xlu1 %v757_v39, %s5969_s27  ;;  %v476_v39 = vpack.c.bf16 %v438_v36, %v437_v35 }
  0x74   : > { %567 = vrot.lane.b32.xlu0 %v469_v45, %s5968_s26 }
  0x75   : > { %569 = vrot.lane.b32.xlu1 %v470_v46, %s5968_s26  ;;  %v764_v46 = vpack.c.bf16 %v725_v41, %v724_v40 }
  0x78   : > { %856 = vrot.lane.b32.xlu0 %v758_v53, %s5969_s27  ;;  %v374_v53 = vld [vmem:[%s6019_s25 + $0x19] sm:$0xff] }
  0x79   : > { %858 = vrot.lane.b32.xlu1 %v759_v57, %s5969_s27  ;;  %v443_v57 = vpack.c.bf16 %v372_v49, %v371_v48  ;;  %v444_v58 = vpack.c.bf16 %v374_v53, %v373_v52 }
  0x7c   : > { %571 = vrot.lane.b32.xlu0 %v471_v63, %s5968_s26  ;;  %v662_v63 = vld [vmem:[%s6019_s25 + $0x12] sm:$0xff] }
  0x7d   : > { %573 = vrot.lane.b32.xlu1 %v472_v0, %s5968_s26  ;;  %v663_v0 = vld [vmem:[%s6019_s25 + $0x1a] sm:$0xff] }
  0x7e   : > { %v733_v26 = vpack.c.bf16 %v663_v0, %v662_v63 }
  0x80   : > { %860 = vrot.lane.b32.xlu0 %v760_v7, %s5969_s27  ;;  %v441_v7 = vld [vmem:[%s6019_s25 + $0x231] sm:$0xff] }
  0x81   : > { %862 = vrot.lane.b32.xlu1 %v761_v11, %s5969_s27  ;;  %v478_v11 = vpack.c.bf16 %v442_v8, %v441_v7 }
  0x84   : > { %575 = vrot.lane.b32.xlu0 %v473_v17, %s5968_s26  ;;  %v731_v17 = vld [vmem:[%s6019_s25 + $0x23a] sm:$0xff] }
  0x85   : > { %577 = vrot.lane.b32.xlu1 %v474_v18, %s5968_s26  ;;  %v767_v21 = vpack.c.bf16 %v731_v17, %v730_v16 }
  0x86   : > { %v520_v34 = vpop.permute.xlu0 %519 }
  0x87   : > { %626 = vst.msk [vmem:[#allocation2 + $0x10] sm:$0xff] %vm623_vm2, %v520_v34  ;;  %v809_v37 = vpop.permute.xlu1 %808 }
  0x88   : > { %915 = vst.msk [vmem:[#allocation2 + $0x10] sm:$0xff] %vm912_vm3, %v809_v37  ;;  %864 = vrot.lane.b32.xlu0 %v762_v25, %s5969_s27 }
  0x89   : > { %866 = vrot.lane.b32.xlu1 %v763_v30, %s5969_s27 }
  0x8a   : > { %v522_v42 = vpop.permute.xlu0 %521 }
  0x8b   : > { %627 = vst.msk [vmem:[#allocation2 + $0x18] sm:$0xff] %vm623_vm2, %v522_v42  ;;  %v811_v45 = vpop.permute.xlu1 %810 }
  0x8c   : > { %916 = vst.msk [vmem:[#allocation2 + $0x18] sm:$0xff] %vm912_vm3, %v811_v45  ;;  %579 = vrot.lane.b32.xlu0 %v475_v38, %s5968_s26 }
  0x8d   : > { %581 = vrot.lane.b32.xlu1 %v476_v39, %s5968_s26 }
  0x8e   : > { %v524_v51 = vpop.permute.xlu0 %523 }
  0x8f   : > { %628 = vst.msk [vmem:[#allocation2 + $0x20] sm:$0xff] %vm623_vm2, %v524_v51  ;;  %v526_v54 = vpop.permute.xlu1 %525  ;;  %v6343_v55 = vld [vmem:[#allocation2 + $0x10] sm:$0xff] }
  0x90   : > { %629 = vst.msk [vmem:[#allocation2 + $0x28] sm:$0xff] %vm623_vm2, %v526_v54  ;;  %868 = vrot.lane.b32.xlu0 %v764_v46, %s5969_s27  ;;  %5243 = vmatprep.mubr.msk.bf16.mxu0 %vm1002_vm4, %v6343_v55 }
  0x91   : > { %870 = vrot.lane.b32.xlu1 %v765_v47, %s5969_s27 }
  0x92   : > { %v813_v61 = vpop.permute.xlu0 %812 }
  0x93   : > { %917 = vst.msk [vmem:[#allocation2 + $0x20] sm:$0xff] %vm912_vm3, %v813_v61  ;;  %v815_v1 = vpop.permute.xlu1 %814  ;;  %v6359_v2 = vld [vmem:[#allocation2 + $0x18] sm:$0xff] }
  0x94   : > { %918 = vst.msk [vmem:[#allocation2 + $0x28] sm:$0xff] %vm912_vm3, %v815_v1  ;;  %515 = vrot.lane.b32.xlu0 %v443_v57, %s5968_s26  ;;  %5244 = vmatmul.mubr.msk.bf16.vlgmr.msra.gmra.mrb[0].mxu0 %vm1002_vm4, %v6359_v2 }
  0x95   : > { %517 = vrot.lane.b32.xlu1 %v444_v58, %s5968_s26  ;;  %5374 = vmatpush3.bf16.msra.mxu0 %v1832_v62 }
  0x96   : > { %v528_v6 = vpop.permute.xlu0 %527 }
  0x97   : > { %630 = vst.msk [vmem:[#allocation2 + $0x30] sm:$0xff] %vm623_vm2, %v528_v6  ;;  %v530_v9 = vpop.permute.xlu1 %529 }
  0x98   : > { %631 = vst.msk [vmem:[#allocation2 + $0x38] sm:$0xff] %vm623_vm2, %v530_v9  ;;  %804 = vrot.lane.b32.xlu0 %v732_v3, %s5969_s27 }
  0x99   : > { %806 = vrot.lane.b32.xlu1 %v733_v26, %s5969_s27 }
  0x9a   : > { %v817_v14 = vpop.permute.xlu0 %816  ;;  %v6376_v15 = vld [vmem:[#allocation2 + $0x20] sm:$0xff] }
  0x9b   : > { %919 = vst.msk [vmem:[#allocation2 + $0x30] sm:$0xff] %vm912_vm3, %v817_v14  ;;  %v819_v18 = vpop.permute.xlu1 %818  ;;  %5247 = vmatprep.mubr.msk.bf16.mxu0 %vm1002_vm4, %v6376_v15  ;;  %v6383_v19 = vld [vmem:[#allocation2 + $0x28] sm:$0xff] }
  0x9c   : > { %920 = vst.msk [vmem:[#allocation2 + $0x38] sm:$0xff] %vm912_vm3, %v819_v18  ;;  %5248 = vmatmul.mubr.msk.bf16.gmra.mrb[4].mxu0 %vm1002_vm4, %v6383_v19  ;;  %583 = vrot.lane.b32.xlu0 %v477_v10, %s5968_s26 }
  0x9d   : > { %585 = vrot.lane.b32.xlu1 %v478_v11, %s5968_s26 }
  0x9e   : > { %v532_v22 = vpop.permute.xlu0 %531 }
  0x9f   : > { %632 = vst.msk [vmem:[#allocation2 + $0x40] sm:$0xff] %vm623_vm2, %v532_v22  ;;  %v534_v23 = vpop.permute.xlu1 %533 }
  0xa0   : > { %633 = vst.msk [vmem:[#allocation2 + $0x48] sm:$0xff] %vm623_vm2, %v534_v23  ;;  %872 = vrot.lane.b32.xlu0 %v766_v20, %s5969_s27 }
  0xa1   : > { %874 = vrot.lane.b32.xlu1 %v767_v21, %s5969_s27 }
  0xa2   : > { %v821_v24 = vpop.permute.xlu0 %820  ;;  %v6394_v25 = vld [vmem:[#allocation2 + $0x30] sm:$0xff] }
  0xa3   : > { %921 = vst.msk [vmem:[#allocation2 + $0x40] sm:$0xff] %vm912_vm3, %v821_v24  ;;  %v823_v27 = vpop.permute.xlu1 %822  ;;  %5251 = vmatprep.mubr.msk.bf16.mxu0 %vm1002_vm4, %v6394_v25  ;;  %v6399_v28 = vld [vmem:[#allocation2 + $0x38] sm:$0xff] }
  0xa4   : > { %922 = vst.msk [vmem:[#allocation2 + $0x48] sm:$0xff] %vm912_vm3, %v823_v27  ;;  %5252 = vmatmul.mubr.msk.bf16.gmra.mrb[8].mxu0 %vm1002_vm4, %v6399_v28 }
  0xa6   : > { %v536_v29 = vpop.permute.xlu0 %535 }
  0xa7   : > { %634 = vst.msk [vmem:[#allocation2 + $0x50] sm:$0xff] %vm623_vm2, %v536_v29  ;;  %v538_v30 = vpop.permute.xlu1 %537 }
  0xa8   : > { %635 = vst.msk [vmem:[#allocation2 + $0x58] sm:$0xff] %vm623_vm2, %v538_v30 }
  0xaa   : > { %v825_v31 = vpop.permute.xlu0 %824  ;;  %v6406_v32 = vld [vmem:[#allocation2 + $0x40] sm:$0xff] }
  0xab   : > { %923 = vst.msk [vmem:[#allocation2 + $0x50] sm:$0xff] %vm912_vm3, %v825_v31  ;;  %v827_v33 = vpop.permute.xlu1 %826  ;;  %5255 = vmatprep.mubr.msk.bf16.mxu0 %vm1002_vm4, %v6406_v32  ;;  %v6411_v34 = vld [vmem:[#allocation2 + $0x48] sm:$0xff] }
  0xac   : > { %924 = vst.msk [vmem:[#allocation2 + $0x58] sm:$0xff] %vm912_vm3, %v827_v33  ;;  %5256 = vmatmul.mubr.msk.bf16.gmra.mrb[12].mxu0 %vm1002_vm4, %v6411_v34 }
  0xae   : > { %v540_v35 = vpop.permute.xlu0 %539 }
  0xaf   : > { %636 = vst.msk [vmem:[#allocation2 + $0x60] sm:$0xff] %vm623_vm2, %v540_v35  ;;  %v542_v36 = vpop.permute.xlu1 %541 }
  0xb0   : > { %637 = vst.msk [vmem:[#allocation2 + $0x68] sm:$0xff] %vm623_vm2, %v542_v36 }
  0xb2   : > { %v829_v37 = vpop.permute.xlu0 %828  ;;  %v6418_v38 = vld [vmem:[#allocation2 + $0x50] sm:$0xff] }
  0xb3   : > { %925 = vst.msk [vmem:[#allocation2 + $0x60] sm:$0xff] %vm912_vm3, %v829_v37  ;;  %v831_v39 = vpop.permute.xlu1 %830  ;;  %5259 = vmatprep.mubr.msk.bf16.mxu0 %vm1002_vm4, %v6418_v38  ;;  %v6423_v40 = vld [vmem:[#allocation2 + $0x58] sm:$0xff] }
  0xb4   : > { %926 = vst.msk [vmem:[#allocation2 + $0x68] sm:$0xff] %vm912_vm3, %v831_v39  ;;  %5260 = vmatmul.mubr.msk.bf16.gmra.mrb[16].mxu0 %vm1002_vm4, %v6423_v40 }
  0xb6   : > { %v544_v41 = vpop.permute.xlu0 %543 }
  0xb7   : > { %638 = vst.msk [vmem:[#allocation2 + $0x70] sm:$0xff] %vm623_vm2, %v544_v41  ;;  %v546_v42 = vpop.permute.xlu1 %545  ;;  %v294_v41 = vld [vmem:[%s6019_s25 + $0x220] sm:$0xff] }
  0xb8   : > { %639 = vst.msk [vmem:[#allocation2 + $0x78] sm:$0xff] %vm623_vm2, %v546_v42  ;;  %v295_v42 = vld [vmem:[%s6019_s25 + $0x228] sm:$0xff] }
  0xba   : > { %v833_v43 = vpop.permute.xlu0 %832  ;;  %v6430_v44 = vld [vmem:[#allocation2 + $0x60] sm:$0xff] }
  0xbb   : > { %927 = vst.msk [vmem:[#allocation2 + $0x70] sm:$0xff] %vm912_vm3, %v833_v43  ;;  %v835_v45 = vpop.permute.xlu1 %834  ;;  %5263 = vmatprep.mubr.msk.bf16.mxu0 %vm1002_vm4, %v6430_v44  ;;  %v6435_v46 = vld [vmem:[#allocation2 + $0x68] sm:$0xff]  ;;  %v296_v43 = vld [vmem:[%s6019_s25 + $0x230] sm:$0xff] }
  0xbc   : > { %928 = vst.msk [vmem:[#allocation2 + $0x78] sm:$0xff] %vm912_vm3, %v835_v45  ;;  %5264 = vmatmul.mubr.msk.bf16.gmra.mrb[20].mxu0 %vm1002_vm4, %v6435_v46 }
  0xbe   : > { %v548_v47 = vpop.permute.xlu0 %547 }
  0xbf   : > { %640 = vst.msk [vmem:[#allocation2 + $0x80] sm:$0xff] %vm623_vm2, %v548_v47  ;;  %v550_v48 = vpop.permute.xlu1 %549  ;;  %v332_v47 = vpack.c.bf16 %v295_v42, %v294_v41 }
  0xc0   : > { %641 = vst.msk [vmem:[#allocation2 + $0x88] sm:$0xff] %vm623_vm2, %v550_v48  ;;  %v297_v48 = vld [vmem:[%s6019_s25 + $0x238] sm:$0xff] }
  0xc1   : > { %369 = vst.msk [vmem:[#allocation2 + $0x110] sm:$0xff] %vm334_vm1, %v332_v47 }
  0xc2   : > { %v837_v49 = vpop.permute.xlu0 %836  ;;  %v6442_v50 = vld [vmem:[#allocation2 + $0x70] sm:$0xff] }
  0xc3   : > { %929 = vst.msk [vmem:[#allocation2 + $0x80] sm:$0xff] %vm912_vm3, %v837_v49  ;;  %v839_v51 = vpop.permute.xlu1 %838  ;;  %5267 = vmatprep.mubr.msk.bf16.mxu0 %vm1002_vm4, %v6442_v50  ;;  %v6447_v52 = vld [vmem:[#allocation2 + $0x78] sm:$0xff] }
  0xc4   : > { %930 = vst.msk [vmem:[#allocation2 + $0x88] sm:$0xff] %vm912_vm3, %v839_v51  ;;  %5268 = vmatmul.mubr.msk.bf16.gmra.mrb[24].mxu0 %vm1002_vm4, %v6447_v52  ;;  %v333_v51 = vpack.c.bf16 %v297_v48, %v296_v43 }
  0xc6   : > { %v552_v53 = vpop.permute.xlu0 %551  ;;  %370 = vst.msk [vmem:[#allocation2 + $0x118] sm:$0xff] %vm334_vm1, %v333_v51 }
  0xc7   : > { %642 = vst.msk [vmem:[#allocation2 + $0x90] sm:$0xff] %vm623_vm2, %v552_v53  ;;  %v554_v54 = vpop.permute.xlu1 %553 }
  0xc8   : > { %643 = vst.msk [vmem:[#allocation2 + $0x98] sm:$0xff] %vm623_vm2, %v554_v54 }
  0xca   : > { %v841_v56 = vpop.permute.xlu0 %840  ;;  %v6454_v57 = vld [vmem:[#allocation2 + $0x80] sm:$0xff] }
  0xcb   : > { %931 = vst.msk [vmem:[#allocation2 + $0x90] sm:$0xff] %vm912_vm3, %v841_v56  ;;  %v843_v58 = vpop.permute.xlu1 %842  ;;  %5271 = vmatprep.mubr.msk.bf16.mxu0 %vm1002_vm4, %v6454_v57  ;;  %v6459_v59 = vld [vmem:[#allocation2 + $0x88] sm:$0xff] }
  0xcc   : > { %932 = vst.msk [vmem:[#allocation2 + $0x98] sm:$0xff] %vm912_vm3, %v843_v58  ;;  %5272 = vmatmul.mubr.msk.bf16.gmra.mrb[28].mxu0 %vm1002_vm4, %v6459_v59 }
  0xce   : > { %v556_v60 = vpop.permute.xlu0 %555 }
  0xcf   : > { %644 = vst.msk [vmem:[#allocation2 + $0xa0] sm:$0xff] %vm623_vm2, %v556_v60  ;;  %v558_v61 = vpop.permute.xlu1 %557 }
  0xd0   : > { %645 = vst.msk [vmem:[#allocation2 + $0xa8] sm:$0xff] %vm623_vm2, %v558_v61 }
  0xd2   : > { %v845_v62 = vpop.permute.xlu0 %844  ;;  %v6466_v63 = vld [vmem:[#allocation2 + $0x90] sm:$0xff] }
  0xd3   : > { %933 = vst.msk [vmem:[#allocation2 + $0xa0] sm:$0xff] %vm912_vm3, %v845_v62  ;;  %v847_v0 = vpop.permute.xlu1 %846  ;;  %5275 = vmatprep.mubr.msk.bf16.mxu0 %vm1002_vm4, %v6466_v63  ;;  %v6471_v1 = vld [vmem:[#allocation2 + $0x98] sm:$0xff] }
  0xd4   : > { %934 = vst.msk [vmem:[#allocation2 + $0xa8] sm:$0xff] %vm912_vm3, %v847_v0  ;;  %5276 = vmatmul.mubr.msk.bf16.gmra.mrb[32].mxu0 %vm1002_vm4, %v6471_v1 }
  0xd6   : > { %v560_v3 = vpop.permute.xlu0 %559 }
  0xd7   : > { %646 = vst.msk [vmem:[#allocation2 + $0xb0] sm:$0xff] %vm623_vm2, %v560_v3  ;;  %v562_v26 = vpop.permute.xlu1 %561 }
  0xd8   : > { %647 = vst.msk [vmem:[#allocation2 + $0xb8] sm:$0xff] %vm623_vm2, %v562_v26 }
  0xda   : > { %v849_v4 = vpop.permute.xlu0 %848  ;;  %v6478_v5 = vld [vmem:[#allocation2 + $0xa0] sm:$0xff] }
  0xdb   : > { %935 = vst.msk [vmem:[#allocation2 + $0xb0] sm:$0xff] %vm912_vm3, %v849_v4  ;;  %v851_v6 = vpop.permute.xlu1 %850  ;;  %5279 = vmatprep.mubr.msk.bf16.mxu0 %vm1002_vm4, %v6478_v5  ;;  %v6483_v7 = vld [vmem:[#allocation2 + $0xa8] sm:$0xff] }
  0xdc   : > { %936 = vst.msk [vmem:[#allocation2 + $0xb8] sm:$0xff] %vm912_vm3, %v851_v6  ;;  %5280 = vmatmul.mubr.msk.bf16.gmra.mrb[36].mxu0 %vm1002_vm4, %v6483_v7 }
  0xde   : > { %v564_v8 = vpop.permute.xlu0 %563 }
  0xdf   : > { %648 = vst.msk [vmem:[#allocation2 + $0xc0] sm:$0xff] %vm623_vm2, %v564_v8  ;;  %v566_v9 = vpop.permute.xlu1 %565 }
  0xe0   : > { %649 = vst.msk [vmem:[#allocation2 + $0xc8] sm:$0xff] %vm623_vm2, %v566_v9 }
  0xe2   : > { %v853_v10 = vpop.permute.xlu0 %852  ;;  %v6490_v11 = vld [vmem:[#allocation2 + $0xb0] sm:$0xff] }
  0xe3   : > { %937 = vst.msk [vmem:[#allocation2 + $0xc0] sm:$0xff] %vm912_vm3, %v853_v10  ;;  %v855_v12 = vpop.permute.xlu1 %854  ;;  %5283 = vmatprep.mubr.msk.bf16.mxu0 %vm1002_vm4, %v6490_v11  ;;  %v6495_v13 = vld [vmem:[#allocation2 + $0xb8] sm:$0xff] }
  0xe4   : > { %938 = vst.msk [vmem:[#allocation2 + $0xc8] sm:$0xff] %vm912_vm3, %v855_v12  ;;  %5284 = vmatmul.mubr.msk.bf16.gmra.mrb[40].mxu0 %vm1002_vm4, %v6495_v13 }
  0xe6   : > { %v568_v14 = vpop.permute.xlu0 %567 }
  0xe7   : > { %650 = vst.msk [vmem:[#allocation2 + $0xd0] sm:$0xff] %vm623_vm2, %v568_v14  ;;  %v570_v16 = vpop.permute.xlu1 %569 }
  0xe8   : > { %651 = vst.msk [vmem:[#allocation2 + $0xd8] sm:$0xff] %vm623_vm2, %v570_v16 }
  0xea   : > { %v857_v17 = vpop.permute.xlu0 %856  ;;  %v6502_v18 = vld [vmem:[#allocation2 + $0xc0] sm:$0xff] }
  0xeb   : > { %939 = vst.msk [vmem:[#allocation2 + $0xd0] sm:$0xff] %vm912_vm3, %v857_v17  ;;  %v859_v20 = vpop.permute.xlu1 %858  ;;  %5287 = vmatprep.mubr.msk.bf16.mxu0 %vm1002_vm4, %v6502_v18  ;;  %v6507_v21 = vld [vmem:[#allocation2 + $0xc8] sm:$0xff] }
  0xec   : > { %940 = vst.msk [vmem:[#allocation2 + $0xd8] sm:$0xff] %vm912_vm3, %v859_v20  ;;  %5288 = vmatmul.mubr.msk.bf16.gmra.mrb[44].mxu0 %vm1002_vm4, %v6507_v21 }
  0xee   : > { %v572_v22 = vpop.permute.xlu0 %571 }
  0xef   : > { %652 = vst.msk [vmem:[#allocation2 + $0xe0] sm:$0xff] %vm623_vm2, %v572_v22  ;;  %v574_v23 = vpop.permute.xlu1 %573 }
  0xf0   : > { %653 = vst.msk [vmem:[#allocation2 + $0xe8] sm:$0xff] %vm623_vm2, %v574_v23 }
  0xf2   : > { %v861_v24 = vpop.permute.xlu0 %860  ;;  %v6514_v27 = vld [vmem:[#allocation2 + $0xd0] sm:$0xff] }
  0xf3   : > { %941 = vst.msk [vmem:[#allocation2 + $0xe0] sm:$0xff] %vm912_vm3, %v861_v24  ;;  %v863_v29 = vpop.permute.xlu1 %862  ;;  %5291 = vmatprep.mubr.msk.bf16.mxu0 %vm1002_vm4, %v6514_v27  ;;  %v6519_v30 = vld [vmem:[#allocation2 + $0xd8] sm:$0xff] }
  0xf4   : > { %942 = vst.msk [vmem:[#allocation2 + $0xe8] sm:$0xff] %vm912_vm3, %v863_v29  ;;  %5292 = vmatmul.mubr.msk.bf16.gmra.mrb[48].mxu0 %vm1002_vm4, %v6519_v30 }
  0xf6   : > { %v576_v31 = vpop.permute.xlu0 %575 }
  0xf7   : > { %654 = vst.msk [vmem:[#allocation2 + $0xf0] sm:$0xff] %vm623_vm2, %v576_v31  ;;  %v578_v33 = vpop.permute.xlu1 %577 }
  0xf8   : > { %655 = vst.msk [vmem:[#allocation2 + $0xf8] sm:$0xff] %vm623_vm2, %v578_v33 }
  0xfa   : > { %v865_v35 = vpop.permute.xlu0 %864  ;;  %v6526_v36 = vld [vmem:[#allocation2 + $0xe0] sm:$0xff] }
  0xfb   : > { %943 = vst.msk [vmem:[#allocation2 + $0xf0] sm:$0xff] %vm912_vm3, %v865_v35  ;;  %v867_v37 = vpop.permute.xlu1 %866  ;;  %5295 = vmatprep.mubr.msk.bf16.mxu0 %vm1002_vm4, %v6526_v36  ;;  %v6531_v39 = vld [vmem:[#allocation2 + $0xe8] sm:$0xff] }
  0xfc   : > { %944 = vst.msk [vmem:[#allocation2 + $0xf8] sm:$0xff] %vm912_vm3, %v867_v37  ;;  %5296 = vmatmul.mubr.msk.bf16.gmra.mrb[52].mxu0 %vm1002_vm4, %v6531_v39 }
  0xfe   : > { %v580_v45 = vpop.permute.xlu0 %579 }
  0xff   : > { %656 = vst.msk [vmem:[#allocation2 + $0x100] sm:$0xff] %vm623_vm2, %v580_v45  ;;  %v582_v49 = vpop.permute.xlu1 %581 }
 0x100   : > { %657 = vst.msk [vmem:[#allocation2 + $0x108] sm:$0xff] %vm623_vm2, %v582_v49 }
 0x102   : > { %v869_v53 = vpop.permute.xlu0 %868  ;;  %v6544_v54 = vld [vmem:[#allocation2 + $0xf0] sm:$0xff] }
 0x103   : > { %945 = vst.msk [vmem:[#allocation2 + $0x100] sm:$0xff] %vm912_vm3, %v869_v53  ;;  %v871_v56 = vpop.permute.xlu1 %870  ;;  %5299 = vmatprep.mubr.msk.bf16.mxu0 %vm1002_vm4, %v6544_v54  ;;  %v6549_v58 = vld [vmem:[#allocation2 + $0xf8] sm:$0xff] }
 0x104   : > { %946 = vst.msk [vmem:[#allocation2 + $0x108] sm:$0xff] %vm912_vm3, %v871_v56  ;;  %5300 = vmatmul.mubr.msk.bf16.gmra.mrb[56].mxu0 %vm1002_vm4, %v6549_v58 }
 0x106   : > { %v516_v60 = vpop.permute.xlu0 %515 }
 0x107   : > { %624 = vst.msk [vmem:[#allocation2] sm:$0xff] %vm623_vm2, %v516_v60  ;;  %v518_v61 = vpop.permute.xlu1 %517 }
 0x108   : > { %625 = vst.msk [vmem:[#allocation2 + $0x8] sm:$0xff] %vm623_vm2, %v518_v61 }
 0x10a   : > { %v805_v62 = vpop.permute.xlu0 %804  ;;  %v6556_v0 = vld [vmem:[#allocation2 + $0x100] sm:$0xff] }
 0x10b   : > { %913 = vst.msk [vmem:[#allocation2] sm:$0xff] %vm912_vm3, %v805_v62  ;;  %v807_v3 = vpop.permute.xlu1 %806  ;;  %5303 = vmatprep.mubr.msk.bf16.mxu0 %vm1002_vm4, %v6556_v0  ;;  %v6561_v26 = vld [vmem:[#allocation2 + $0x108] sm:$0xff] }
 0x10c   : > { %914 = vst.msk [vmem:[#allocation2 + $0x8] sm:$0xff] %vm912_vm3, %v807_v3  ;;  %5304 = vmatmul.mubr.msk.bf16.gmra.mrb[60].mxu0 %vm1002_vm4, %v6561_v26  ;;  %v5955_v3 = vld [vmem:[%s7820_s3 + $0x8] ss:$0 sps:$4 sm:$0xff]  }
 0x10d   : > { %5375 = vmatprep.mubr.msk.bf16.mxu0 %vm1002_vm4, %v6376_v15 }
 0x10e   : > { %v584_v4 = vpop.permute.xlu0 %583 }
 0x10f   : > { %658 = vst.msk [vmem:[#allocation2 + $0x110] sm:$0xff] %vm623_vm2, %v584_v4  ;;  %v586_v6 = vpop.permute.xlu1 %585 }
 0x110   : > { %659 = vst.msk [vmem:[#allocation2 + $0x118] sm:$0xff] %vm623_vm2, %v586_v6  ;;  %v3563_v6 = vsel %vm3254_vm8, %v5955_v3, 0 }
 0x112   : > { %v958_v8 = vld [vmem:[#allocation2] sm:$0xff]  ;;  %v873_v9 = vpop.permute.xlu0 %872 }
 0x113   : > { %5309 = vmatprep.mubr.msk.bf16.mxu1 %vm1002_vm4, %v958_v8  ;;  %v959_v10 = vld [vmem:[#allocation2 + $0x8] sm:$0xff]  ;;  %947 = vst.msk [vmem:[#allocation2 + $0x110] sm:$0xff] %vm912_vm3, %v873_v9  ;;  %v875_v12 = vpop.permute.xlu1 %874 }
 0x114   : > { %5310 = vmatmul.mubr.msk.bf16.vlgmr.msra.gmra.mrb[0].mxu1 %vm1002_vm4, %v959_v10  ;;  %5376 = vmatmul.mubr.msk.bf16.vlgmr.msra.gmra.mrb[64].mxu0 %vm1002_vm4, %v6383_v19  ;;  %948 = vst.msk [vmem:[#allocation2 + $0x118] sm:$0xff] %vm912_vm3, %v875_v12 }
 0x115   : > { %5313 = vmatprep.mubr.msk.bf16.mxu1 %vm1002_vm4, %v6343_v55  ;;  %5379 = vmatprep.mubr.msk.bf16.mxu0 %vm1002_vm4, %v6394_v25  ;;  %v5970_v55 = vmov 0.0  }
 0x116   : > { %5792 = vrot.lane.b32.xlu1 %v5970_v55, %s5969_s27  ;;  %5797 = vrot.lane.b32.xlu0 %v5970_v55, %s5971_s7  ;;  %2390 = vst.msk [vmem:[#allocation3 + $0x18] sm:$0xff] %vm2386_vm5, %v5970_v55  ;;  %2391 = vst.msk [vmem:[#allocation3 + $0x20] sm:$0xff] %vm2386_vm5, %v5970_v55 }
 0x117   : > { %2387 = vst.msk [vmem:[#allocation3] sm:$0xff] %vm2386_vm5, %v5970_v55  ;;  %2388 = vst.msk [vmem:[#allocation3 + $0x8] sm:$0xff] %vm2386_vm5, %v5970_v55 }
 0x118   : > { %2389 = vst.msk [vmem:[#allocation3 + $0x10] sm:$0xff] %vm2386_vm5, %v5970_v55  ;;  %2392 = vst.msk [vmem:[#allocation3 + $0x218] sm:$0xff] %vm2386_vm5, %v5970_v55 }
 0x119   : > { %2393 = vst.msk [vmem:[#allocation3 + $0x220] sm:$0xff] %vm2386_vm5, %v5970_v55  ;;  %2394 = vst.msk [vmem:[#allocation3 + $0x228] sm:$0xff] %vm2386_vm5, %v5970_v55 }
 0x11a   : > { %5802 = vrot.lane.b32.xlu1 %v5970_v55, %s5969_s27  ;;  %5807 = vrot.lane.b32.xlu0 %v5970_v55, %s5971_s7  ;;  %2395 = vst.msk [vmem:[#allocation3 + $0x230] sm:$0xff] %vm2386_vm5, %v5970_v55  ;;  %2396 = vst.msk [vmem:[#allocation3 + $0x238] sm:$0xff] %vm2386_vm5, %v5970_v55 }
 0x11b   : > { %2400 = vst.msk [vmem:[#allocation3 + $0x31] sm:$0xff] %vm2397_vm6, %v5970_v55  ;;  %2401 = vst.msk [vmem:[#allocation3 + $0x39] sm:$0xff] %vm2397_vm6, %v5970_v55  ;;  %v1726_v14 = vld [vmem:[#allocation2 + $0x118] sm:$0xff] }
 0x11c   : > { %5314 = vmatmul.mubr.msk.bf16.gmra.mrb[4].mxu1 %vm1002_vm4, %v6359_v2  ;;  %5380 = vmatmul.mubr.msk.bf16.gmra.mrb[68].mxu0 %vm1002_vm4, %v6399_v28  ;;  %2404 = vst.msk [vmem:[#allocation3 + $0x51] sm:$0xff] %vm2397_vm6, %v5970_v55  ;;  %2405 = vst.msk [vmem:[#allocation3 + $0x59] sm:$0xff] %vm2397_vm6, %v5970_v55 }
 0x11d   : > { %5317 = vmatprep.mubr.msk.bf16.mxu1 %vm1002_vm4, %v6376_v15  ;;  %5383 = vmatprep.mubr.msk.bf16.mxu0 %vm1002_vm4, %v6406_v32  ;;  %2408 = vst.msk [vmem:[#allocation3 + $0x71] sm:$0xff] %vm2397_vm6, %v5970_v55  ;;  %2409 = vst.msk [vmem:[#allocation3 + $0x79] sm:$0xff] %vm2397_vm6, %v5970_v55 }
 0x11e   : > { %5812 = vrot.lane.b32.xlu1 %v5970_v55, %s5969_s27  ;;  %5817 = vrot.lane.b32.xlu0 %v5970_v55, %s5971_s7  ;;  %2412 = vst.msk [vmem:[#allocation3 + $0x91] sm:$0xff] %vm2397_vm6, %v5970_v55  ;;  %2413 = vst.msk [vmem:[#allocation3 + $0x99] sm:$0xff] %vm2397_vm6, %v5970_v55 }
 0x11f   : > { %2416 = vst.msk [vmem:[#allocation3 + $0xb1] sm:$0xff] %vm2397_vm6, %v5970_v55  ;;  %2417 = vst.msk [vmem:[#allocation3 + $0xb9] sm:$0xff] %vm2397_vm6, %v5970_v55 }
 0x120   : > { %2420 = vst.msk [vmem:[#allocation3 + $0xd1] sm:$0xff] %vm2397_vm6, %v5970_v55  ;;  %2421 = vst.msk [vmem:[#allocation3 + $0xd9] sm:$0xff] %vm2397_vm6, %v5970_v55 }
 0x121   : > { %2424 = vst.msk [vmem:[#allocation3 + $0xf1] sm:$0xff] %vm2397_vm6, %v5970_v55  ;;  %2425 = vst.msk [vmem:[#allocation3 + $0xf9] sm:$0xff] %vm2397_vm6, %v5970_v55 }
 0x122   : > { %5822 = vrot.lane.b32.xlu1 %v5970_v55, %s5969_s27  ;;  %5827 = vrot.lane.b32.xlu0 %v5970_v55, %s5971_s7  ;;  %2428 = vst.msk [vmem:[#allocation3 + $0x111] sm:$0xff] %vm2397_vm6, %v5970_v55  ;;  %2429 = vst.msk [vmem:[#allocation3 + $0x119] sm:$0xff] %vm2397_vm6, %v5970_v55 }
 0x123   : > { %2432 = vst.msk [vmem:[#allocation3 + $0x131] sm:$0xff] %vm2397_vm6, %v5970_v55  ;;  %2433 = vst.msk [vmem:[#allocation3 + $0x139] sm:$0xff] %vm2397_vm6, %v5970_v55 }
 0x124   : > { %5318 = vmatmul.mubr.msk.bf16.gmra.mrb[8].mxu1 %vm1002_vm4, %v6383_v19  ;;  %5384 = vmatmul.mubr.msk.bf16.gmra.mrb[72].mxu0 %vm1002_vm4, %v6411_v34  ;;  %2436 = vst.msk [vmem:[#allocation3 + $0x151] sm:$0xff] %vm2397_vm6, %v5970_v55  ;;  %2437 = vst.msk [vmem:[#allocation3 + $0x159] sm:$0xff] %vm2397_vm6, %v5970_v55 }
 0x125   : > { %5321 = vmatprep.mubr.msk.bf16.mxu1 %vm1002_vm4, %v6394_v25  ;;  %5387 = vmatprep.mubr.msk.bf16.mxu0 %vm1002_vm4, %v6418_v38  ;;  %2440 = vst.msk [vmem:[#allocation3 + $0x171] sm:$0xff] %vm2397_vm6, %v5970_v55  ;;  %2441 = vst.msk [vmem:[#allocation3 + $0x179] sm:$0xff] %vm2397_vm6, %v5970_v55 }
 0x126   : > { %5832 = vrot.lane.b32.xlu1 %v5970_v55, %s5969_s27  ;;  %5837 = vrot.lane.b32.xlu0 %v5970_v55, %s5971_s7  ;;  %2444 = vst.msk [vmem:[#allocation3 + $0x191] sm:$0xff] %vm2397_vm6, %v5970_v55  ;;  %2445 = vst.msk [vmem:[#allocation3 + $0x199] sm:$0xff] %vm2397_vm6, %v5970_v55 }
 0x127   : > { %2448 = vst.msk [vmem:[#allocation3 + $0x1b1] sm:$0xff] %vm2397_vm6, %v5970_v55  ;;  %2449 = vst.msk [vmem:[#allocation3 + $0x1b9] sm:$0xff] %vm2397_vm6, %v5970_v55 }
 0x128   : > { %2452 = vst.msk [vmem:[#allocation3 + $0x1d1] sm:$0xff] %vm2397_vm6, %v5970_v55  ;;  %2453 = vst.msk [vmem:[#allocation3 + $0x1d9] sm:$0xff] %vm2397_vm6, %v5970_v55 }
 0x129   : > { %2456 = vst.msk [vmem:[#allocation3 + $0x1f1] sm:$0xff] %vm2397_vm6, %v5970_v55  ;;  %2457 = vst.msk [vmem:[#allocation3 + $0x1f9] sm:$0xff] %vm2397_vm6, %v5970_v55 }
 0x12a   : > { %5842 = vrot.lane.b32.xlu1 %v5970_v55, %s5969_s27  ;;  %5847 = vrot.lane.b32.xlu0 %v5970_v55, %s5971_s7  ;;  %2460 = vst.msk [vmem:[#allocation3 + $0x211] sm:$0xff] %vm2397_vm6, %v5970_v55  ;;  %2461 = vst.msk [vmem:[#allocation3 + $0x219] sm:$0xff] %vm2397_vm6, %v5970_v55 }
 0x12c   : > { %5322 = vmatmul.mubr.msk.bf16.gmra.mrb[12].mxu1 %vm1002_vm4, %v6399_v28  ;;  %5388 = vmatmul.mubr.msk.bf16.gmra.mrb[76].mxu0 %vm1002_vm4, %v6423_v40 }
 0x12d   : > { %5325 = vmatprep.mubr.msk.bf16.mxu1 %vm1002_vm4, %v6406_v32  ;;  %5391 = vmatprep.mubr.msk.bf16.mxu0 %vm1002_vm4, %v6430_v44 }
 0x12e   : > { %5852 = vrot.lane.b32.xlu1 %v5970_v55, %s5969_s27  ;;  %5857 = vrot.lane.b32.xlu0 %v5970_v55, %s5971_s7 }
 0x132   : > { %5862 = vrot.lane.b32.xlu1 %v5970_v55, %s5969_s27  ;;  %5867 = vrot.lane.b32.xlu0 %v5970_v55, %s5971_s7 }
 0x134   : > { %5326 = vmatmul.mubr.msk.bf16.gmra.mrb[16].mxu1 %vm1002_vm4, %v6411_v34  ;;  %5392 = vmatmul.mubr.msk.bf16.gmra.mrb[80].mxu0 %vm1002_vm4, %v6435_v46 }
 0x135   : > { %5329 = vmatprep.mubr.msk.bf16.mxu1 %vm1002_vm4, %v6418_v38  ;;  %5395 = vmatprep.mubr.msk.bf16.mxu0 %vm1002_vm4, %v6442_v50 }
 0x136   : > { %5872 = vrot.lane.b32.xlu1 %v5970_v55, %s5969_s27  ;;  %5877 = vrot.lane.b32.xlu0 %v5970_v55, %s5971_s7 }
 0x13a   : > { %5882 = vrot.lane.b32.xlu1 %v5970_v55, %s5969_s27  ;;  %5887 = vrot.lane.b32.xlu0 %v5970_v55, %s5971_s7 }
 0x13c   : > { %5330 = vmatmul.mubr.msk.bf16.gmra.mrb[20].mxu1 %vm1002_vm4, %v6423_v40  ;;  %5396 = vmatmul.mubr.msk.bf16.gmra.mrb[84].mxu0 %vm1002_vm4, %v6447_v52 }
 0x13d   : > { %5333 = vmatprep.mubr.msk.bf16.mxu1 %vm1002_vm4, %v6430_v44  ;;  %5399 = vmatprep.mubr.msk.bf16.mxu0 %vm1002_vm4, %v6454_v57 }
 0x13e   : > { %5892 = vrot.lane.b32.xlu1 %v5970_v55, %s5969_s27  ;;  %5897 = vrot.lane.b32.xlu0 %v5970_v55, %s5971_s7 }
 0x142   : > { %5902 = vrot.lane.b32.xlu1 %v5970_v55, %s5969_s27  ;;  %5907 = vrot.lane.b32.xlu0 %v5970_v55, %s5971_s7 }
 0x144   : > { %5334 = vmatmul.mubr.msk.bf16.gmra.mrb[24].mxu1 %vm1002_vm4, %v6435_v46  ;;  %5400 = vmatmul.mubr.msk.bf16.gmra.mrb[88].mxu0 %vm1002_vm4, %v6459_v59 }
 0x145   : > { %5337 = vmatprep.mubr.msk.bf16.mxu1 %vm1002_vm4, %v6442_v50  ;;  %5403 = vmatprep.mubr.msk.bf16.mxu0 %vm1002_vm4, %v6466_v63  ;;  %v5954_v50 = vld [vmem:[%s7820_s3] sm:$0xff]  }
 0x146   : > { %5912 = vrot.lane.b32.xlu1 %v5970_v55, %s5969_s27  ;;  %5917 = vrot.lane.b32.xlu0 %v5970_v55, %s5971_s7 }
 0x147   : > { %5507 = vmatprep.subr.bf16.mxu1 %v5954_v50 }
 0x148   : > { %5508 = vmatpush3.bf16.msra.mxu1 %v5954_v50 }
 0x149   : > { %5775 = vmatprep.subr.msk.bf16.mxu1 %vm3254_vm8, %v5955_v3 }
 0x14a   : > { %5922 = vrot.lane.b32.xlu1 %v5970_v55, %s5969_s27  ;;  %5927 = vrot.lane.b32.xlu0 %v5970_v55, %s5971_s7 }
 0x14c   : > { %5338 = vmatmul.mubr.msk.bf16.gmra.mrb[28].mxu1 %vm1002_vm4, %v6447_v52  ;;  %5404 = vmatmul.mubr.msk.bf16.gmra.mrb[92].mxu0 %vm1002_vm4, %v6471_v1 }
 0x14d   : > { %5341 = vmatprep.mubr.msk.bf16.mxu1 %vm1002_vm4, %v6454_v57  ;;  %5407 = vmatprep.mubr.msk.bf16.mxu0 %vm1002_vm4, %v6478_v5 }
 0x14e   : > { %5932 = vrot.lane.b32.xlu1 %v5970_v55, %s5969_s27  ;;  %5510 = vmatpush3.bf16.msra.mxu1 %v3563_v6 }
 0x154   : > { %5342 = vmatmul.mubr.msk.bf16.gmra.mrb[32].mxu1 %vm1002_vm4, %v6459_v59  ;;  %5408 = vmatmul.mubr.msk.bf16.gmra.mrb[96].mxu0 %vm1002_vm4, %v6483_v7 }
 0x155   : > { %5345 = vmatprep.mubr.msk.bf16.mxu1 %vm1002_vm4, %v6466_v63  ;;  %5411 = vmatprep.mubr.msk.bf16.mxu0 %vm1002_vm4, %v6490_v11 }
 0x15c   : > { %5346 = vmatmul.mubr.msk.bf16.gmra.mrb[36].mxu1 %vm1002_vm4, %v6471_v1  ;;  %5412 = vmatmul.mubr.msk.bf16.gmra.mrb[100].mxu0 %vm1002_vm4, %v6495_v13 }
 0x15d   : > { %5349 = vmatprep.mubr.msk.bf16.mxu1 %vm1002_vm4, %v6478_v5  ;;  %5415 = vmatprep.mubr.msk.bf16.mxu0 %vm1002_vm4, %v6502_v18  ;;  %v1725_v5 = vld [vmem:[#allocation2 + $0x110] sm:$0xff] }
 0x164   : > { %5350 = vmatmul.mubr.msk.bf16.gmra.mrb[40].mxu1 %vm1002_vm4, %v6483_v7  ;;  %5416 = vmatmul.mubr.msk.bf16.gmra.mrb[104].mxu0 %vm1002_vm4, %v6507_v21 }
 0x165   : > { %5353 = vmatprep.mubr.msk.bf16.mxu1 %vm1002_vm4, %v6490_v11  ;;  %5419 = vmatprep.mubr.msk.bf16.mxu0 %vm1002_vm4, %v6514_v27 }
 0x167   : > { %v5245_v2 = vpop.f32.mrb[0].mxu0 }
 0x168   : > { %v6710_v15 = vpop.f32.mrb[1].mxu0 }
 0x169   : > { %v5246_v19 = vpop.f32.mrb[2].mxu0 }
 0x16a   : > { %v6712_v25 = vpop.f32.mrb[3].mxu0 }
 0x16c   : > { %5354 = vmatmul.mubr.msk.bf16.gmra.mrb[44].mxu1 %vm1002_vm4, %v6495_v13  ;;  %5420 = vmatmul.mubr.msk.bf16.gmra.mrb[108].mxu0 %vm1002_vm4, %v6519_v30 }
 0x16d   : > { %5357 = vmatprep.mubr.msk.bf16.mxu1 %vm1002_vm4, %v6502_v18  ;;  %5423 = vmatprep.mubr.msk.bf16.mxu0 %vm1002_vm4, %v6526_v36 }
 0x16f   : > { %v5249_v28 = vpop.f32.mrb[4].mxu0 }
 0x170   : > { %v6730_v32 = vpop.f32.mrb[5].mxu0 }
 0x171   : > { %v5250_v34 = vpop.f32.mrb[6].mxu0 }
 0x172   : > { %v6816_v38 = vpop.f32.mrb[7].mxu0 }
 0x174   : > { %5358 = vmatmul.mubr.msk.bf16.gmra.mrb[48].mxu1 %vm1002_vm4, %v6507_v21  ;;  %5424 = vmatmul.mubr.msk.bf16.gmra.mrb[112].mxu0 %vm1002_vm4, %v6531_v39 }
 0x175   : > { %5361 = vmatprep.mubr.msk.bf16.mxu1 %vm1002_vm4, %v6514_v27  ;;  %5427 = vmatprep.mubr.msk.bf16.mxu0 %vm1002_vm4, %v6544_v54 }
 0x177   : > { %v5253_v40 = vpop.f32.mrb[8].mxu0 }
 0x178   : > { %v6826_v44 = vpop.f32.mrb[9].mxu0 }
 0x179   : > { %v5254_v46 = vpop.f32.mrb[10].mxu0 }
 0x17a   : > { %v6831_v52 = vpop.f32.mrb[11].mxu0 }
 0x17c   : > { %5362 = vmatmul.mubr.msk.bf16.gmra.mrb[52].mxu1 %vm1002_vm4, %v6519_v30  ;;  %5428 = vmatmul.mubr.msk.bf16.gmra.mrb[116].mxu0 %vm1002_vm4, %v6549_v58 }
 0x17d   : > { %5365 = vmatprep.mubr.msk.bf16.mxu1 %vm1002_vm4, %v6526_v36  ;;  %5431 = vmatprep.mubr.msk.bf16.mxu0 %vm1002_vm4, %v6556_v0 }
 0x17f   : > { %v5257_v57 = vpop.f32.mrb[12].mxu0 }
 0x180   : > { %v6841_v59 = vpop.f32.mrb[13].mxu0 }
 0x181   : > { %v5258_v63 = vpop.f32.mrb[14].mxu0 }
 0x182   : > { %v6843_v1 = vpop.f32.mrb[15].mxu0 }
 0x184   : > { %5366 = vmatmul.mubr.msk.bf16.gmra.mrb[56].mxu1 %vm1002_vm4, %v6531_v39  ;;  %5432 = vmatmul.mubr.msk.bf16.gmra.mrb[120].mxu0 %vm1002_vm4, %v6561_v26 }
 0x185   : > { %5369 = vmatprep.mubr.msk.bf16.mxu1 %vm1002_vm4, %v6544_v54  ;;  %5435 = vmatprep.mubr.msk.bf16.mxu0 %vm1002_vm4, %v1725_v5 }
 0x187   : > { %v5261_v7 = vpop.f32.mrb[16].mxu0 }
 0x188   : > { %v6852_v11 = vpop.f32.mrb[17].mxu0  ;;  %v6873_v37 = vpop.permute.xlu1 %5792 }
 0x189   : > { %v5262_v13 = vpop.f32.mrb[18].mxu0  ;;  %v5795_v41 = vunpack.i.h.bf16 %v6873_v37 }
 0x18a   : > { %v6854_v16 = vpop.f32.mrb[19].mxu0 }
 0x18b   : > { %2722 = vst.msk [vmem:[#allocation3 + $0x38] sm:$0xff] %vm2718_vm7, %v5795_v41 }
 0x18c   : > { %5370 = vmatmul.mubr.msk.bf16.gmra.mrb[60].mxu1 %vm1002_vm4, %v6549_v58  ;;  %5436 = vmatmul.mubr.msk.bf16.gmra.mrb[124].mxu0 %vm1002_vm4, %v1726_v14  ;;  %v6878_v43 = vpop.permute.xlu1 %5802 }
 0x18d   : > { %v5805_v47 = vunpack.i.h.bf16 %v6878_v43 }
 0x18f   : > { %v5265_v17 = vpop.f32.mrb[20].mxu0  ;;  %2726 = vst.msk [vmem:[#allocation3 + $0x58] sm:$0xff] %vm2718_vm7, %v5805_v47 }
 0x190   : > { %v6859_v18 = vpop.f32.mrb[21].mxu0  ;;  %v6884_v49 = vpop.permute.xlu1 %5812 }
 0x191   : > { %v5266_v20 = vpop.f32.mrb[22].mxu0  ;;  %v5815_v53 = vunpack.i.h.bf16 %v6884_v49 }
 0x192   : > { %v6861_v21 = vpop.f32.mrb[23].mxu0 }
 0x193   : > { %2730 = vst.msk [vmem:[#allocation3 + $0x78] sm:$0xff] %vm2718_vm7, %v5815_v53 }
 0x194   : > { %v6891_v56 = vpop.permute.xlu1 %5822 }
 0x195   : > { %v5825_v60 = vunpack.i.h.bf16 %v6891_v56 }
 0x197   : > { %v5269_v22 = vpop.f32.mrb[24].mxu0  ;;  %2734 = vst.msk [vmem:[#allocation3 + $0x98] sm:$0xff] %vm2718_vm7, %v5825_v60 }
 0x198   : > { %v6863_v23 = vpop.f32.mrb[25].mxu0  ;;  %v6896_v62 = vpop.permute.xlu1 %5832 }
 0x199   : > { %v5270_v24 = vpop.f32.mrb[26].mxu0  ;;  %v5835_v26 = vunpack.i.h.bf16 %v6896_v62 }
 0x19a   : > { %v6865_v27 = vpop.f32.mrb[27].mxu0 }
 0x19b   : > { %2738 = vst.msk [vmem:[#allocation3 + $0xb8] sm:$0xff] %vm2718_vm7, %v5835_v26 }
 0x19c   : > { %v6908_v8 = vpop.permute.xlu1 %5842 }
 0x19d   : > { %v5845_v10 = vunpack.i.h.bf16 %v6908_v8 }
 0x19f   : > { %v5273_v29 = vpop.f32.mrb[28].mxu0  ;;  %2742 = vst.msk [vmem:[#allocation3 + $0xd8] sm:$0xff] %vm2718_vm7, %v5845_v10 }
 0x1a0   : > { %v6867_v30 = vpop.f32.mrb[29].mxu0  ;;  %v6913_v2 = vpop.permute.xlu1 %5852 }
 0x1a1   : > { %v5274_v31 = vpop.f32.mrb[30].mxu0  ;;  %v5855_v28 = vunpack.i.h.bf16 %v6913_v2 }
 0x1a2   : > { %v6869_v33 = vpop.f32.mrb[31].mxu0 }
 0x1a3   : > { %2746 = vst.msk [vmem:[#allocation3 + $0xf8] sm:$0xff] %vm2718_vm7, %v5855_v28 }
 0x1a4   : > { %v6920_v40 = vpop.permute.xlu1 %5862 }
 0x1a5   : > { %v5865_v50 = vunpack.i.h.bf16 %v6920_v40 }
 0x1a7   : > { %v5277_v35 = vpop.f32.mrb[32].mxu0  ;;  %2750 = vst.msk [vmem:[#allocation3 + $0x118] sm:$0xff] %vm2718_vm7, %v5865_v50 }
 0x1a8   : > { %v6871_v36 = vpop.f32.mrb[33].mxu0  ;;  %v6925_v63 = vpop.permute.xlu1 %5872 }
 0x1a9   : > { %v5278_v39 = vpop.f32.mrb[34].mxu0  ;;  %v5875_v7 = vunpack.i.h.bf16 %v6925_v63 }
 0x1aa   : > { %v6876_v42 = vpop.f32.mrb[35].mxu0 }
 0x1ab   : > { %2754 = vst.msk [vmem:[#allocation3 + $0x138] sm:$0xff] %vm2718_vm7, %v5875_v7 }
 0x1ac   : > { %v6932_v14 = vpop.permute.xlu1 %5882 }
 0x1ad   : > { %v5885_v20 = vunpack.i.h.bf16 %v6932_v14 }
 0x1af   : > { %v5281_v45 = vpop.f32.mrb[36].mxu0  ;;  %2758 = vst.msk [vmem:[#allocation3 + $0x158] sm:$0xff] %vm2718_vm7, %v5885_v20 }
 0x1b0   : > { %v6882_v48 = vpop.f32.mrb[37].mxu0  ;;  %v6937_v24 = vpop.permute.xlu1 %5892 }
 0x1b1   : > { %v5282_v51 = vpop.f32.mrb[38].mxu0  ;;  %v5895_v31 = vunpack.i.h.bf16 %v6937_v24 }
 0x1b2   : > { %v6888_v54 = vpop.f32.mrb[39].mxu0 }
 0x1b3   : > { %2762 = vst.msk [vmem:[#allocation3 + $0x178] sm:$0xff] %vm2718_vm7, %v5895_v31  ;;  %v6972_v31 = vld [vmem:[%s7819_s2] ss:$0 sm:$0xff] }
 0x1b4   : > { %v6944_v39 = vpop.permute.xlu1 %5902 }
 0x1b5   : > { %v5905_v45 = vunpack.i.h.bf16 %v6944_v39 }
 0x1b7   : > { %v5285_v58 = vpop.f32.mrb[40].mxu0  ;;  %2766 = vst.msk [vmem:[#allocation3 + $0x198] sm:$0xff] %vm2718_vm7, %v5905_v45 }
 0x1b8   : > { %v6894_v61 = vpop.f32.mrb[41].mxu0  ;;  %v6949_v51 = vpop.permute.xlu1 %5912 }
 0x1b9   : > { %v5286_v0 = vpop.f32.mrb[42].mxu0  ;;  %v5915_v58 = vunpack.i.h.bf16 %v6949_v51 }
 0x1ba   : > { %v6903_v4 = vpop.f32.mrb[43].mxu0 }
 0x1bb   : > { %2770 = vst.msk [vmem:[#allocation3 + $0x1b8] sm:$0xff] %vm2718_vm7, %v5915_v58 }
 0x1bc   : > { %v6956_v0 = vpop.permute.xlu1 %5922 }
 0x1bd   : > { %v5925_v26 = vunpack.i.h.bf16 %v6956_v0 }
 0x1bf   : > { %v5289_v9 = vpop.f32.mrb[44].mxu0  ;;  %2774 = vst.msk [vmem:[#allocation3 + $0x1d8] sm:$0xff] %vm2718_vm7, %v5925_v26  ;;  %v3041_v26 = vld [vmem:[#allocation3 + $0x8] sm:$0xff] }
 0x1c0   : > { %v6911_v12 = vpop.f32.mrb[45].mxu0  ;;  %v6961_v9 = vpop.permute.xlu1 %5932 }
 0x1c1   : > { %v5290_v19 = vpop.f32.mrb[46].mxu0 }
 0x1c2   : > { %v6917_v34 = vpop.f32.mrb[47].mxu0  ;;  %v5935_v19 = vunpack.i.h.bf16 %v6961_v9 }
 0x1c4   : > { %2778 = vst.msk [vmem:[#allocation3 + $0x1f8] sm:$0xff] %vm2718_vm7, %v5935_v19 }
 0x1c7   : > { %v5293_v46 = vpop.f32.mrb[48].mxu0 }
 0x1c8   : > { %v6923_v57 = vpop.f32.mrb[49].mxu0 }
 0x1c9   : > { %v5294_v5 = vpop.f32.mrb[50].mxu0 }
 0x1ca   : > { %v6929_v13 = vpop.f32.mrb[51].mxu0 }
 0x1cf   : > { %v5297_v17 = vpop.f32.mrb[52].mxu0 }
 0x1d0   : > { %v6935_v22 = vpop.f32.mrb[53].mxu0 }
 0x1d1   : > { %v5298_v29 = vpop.f32.mrb[54].mxu0 }
 0x1d2   : > { %v6941_v35 = vpop.f32.mrb[55].mxu0 }
 0x1d7   : > { %v5301_v41 = vpop.f32.mrb[56].mxu0 }
 0x1d8   : > { %v6947_v47 = vpop.f32.mrb[57].mxu0 }
 0x1d9   : > { %v5302_v53 = vpop.f32.mrb[58].mxu0 }
 0x1da   : > { %v6953_v60 = vpop.f32.mrb[59].mxu0 }
 0x1df   : > { %v5305_v3 = vpop.f32.mrb[60].mxu0 }
 0x1e0   : > { %v6959_v6 = vpop.f32.mrb[61].mxu0  ;;  %v3040_v3 = vld [vmem:[#allocation3] sm:$0xff] }
 0x1e1   : > { %v5306_v10 = vpop.f32.mrb[62].mxu0 }
 0x1e2   : > { %v6965_v28 = vpop.f32.mrb[63].mxu0  ;;  %v3104_v10 = vpack.c.bf16 %v3041_v26, %v3040_v3 }
 0x1e4   : > { %5511 = vmatprep.mubr.msk.bf16.mxu1 %vm2386_vm5, %v3104_v10  ;;  %v5957_v10 = vld [vmem:[%s7820_s3 + $0x14] ss:$0 sps:$4 sm:$0xff]  }
 0x1e7   : > { %v5311_v46 = vpop.f32.mrb[0].mxu1  ;;  %v5377_v50 = vpop.f32.mrb[64].mxu0 }
 0x1e8   : > { %v1440_v5 = vpop.f32.mrb[1].mxu1  ;;  %v1868_v7 = vpop.f32.mrb[65].mxu0 }
 0x1e9   : > { %v1441_v17 = vadd.f32 %v1440_v5, %v6710_v15  ;;  %v5312_v20 = vpop.f32.mrb[2].mxu1  ;;  %v5378_v29 = vpop.f32.mrb[66].mxu0  ;;  %v5956_v15 = vld [vmem:[%s7820_s3 + $0xc] sm:$0xff]  }
 0x1ea   : > { %v1443_v41 = vpop.f32.mrb[3].mxu1  ;;  %v1871_v45 = vpop.f32.mrb[67].mxu0  ;;  %5439 = vmatprep.subr.bf16.mxu0 %v5956_v15 }
 0x1eb   : > { %v2123_v53 = vadd.f32 %v1868_v7, %v1441_v17  ;;  %v1444_v58 = vadd.f32 %v1443_v41, %v6712_v25  ;;  %v6979_v50 = vpop.permute.xlu0 %5797  ;;  %v5794_v41 = vunpack.i.l.bf16 %v6873_v37  ;;  %5440 = vmatpush3.bf16.msra.mxu0 %v5956_v15  ;;  %v3256_v15 = vsel %vm3254_vm8, %v5957_v10, 0 }
 0x1ec   : > { %v5800_v26 = vunpack.i.h.bf16 %v6979_v50  ;;  %5774 = vmatprep.subr.msk.bf16.mxu0 %vm3254_vm8, %v5957_v10 }
 0x1ed   : > { %v2194_v19 = vadd.f32 %v6972_v31, %v2123_v53  ;;  %v2124_v46 = vadd.f32 %v1871_v45, %v1444_v58 }
 0x1ef   : > { %v2258_v5 = vmax.f32 %v2194_v19, 0.0  ;;  %v2195_v20 = vadd.f32 %v6972_v31, %v2124_v46  ;;  %v5315_v7 = vpop.f32.mrb[4].mxu1  ;;  %v5381_v17 = vpop.f32.mrb[68].mxu0  ;;  %5442 = vmatpush3.bf16.msra.mxu0 %v3256_v15 }
 0x1f0   : > { %v1456_v25 = vpop.f32.mrb[5].mxu1  ;;  %v1884_v29 = vpop.f32.mrb[69].mxu0 }
 0x1f1   : > { %v2259_v45 = vmax.f32 %v2195_v20, 0.0  ;;  %v1457_v53 = vadd.f32 %v1456_v25, %v6730_v32  ;;  %v5316_v58 = vpop.f32.mrb[6].mxu1  ;;  %v5382_v3 = vpop.f32.mrb[70].mxu0  ;;  %2783 = vrot.lane.b32.xlu1 %v2258_v5, %s5971_s7  ;;  %2526 = vrot.lane.b32.xlu0 %v2258_v5, %s5969_s27  ;;  %2398 = vst.msk [vmem:[#allocation3 + $0x21] sm:$0xff] %vm2397_vm6, %v2258_v5 }
 0x1f2   : > { %v1459_v19 = vpop.f32.mrb[7].mxu1  ;;  %v1887_v37 = vpop.f32.mrb[71].mxu0 }
 0x1f3   : > { %v2127_v46 = vadd.f32 %v1884_v29, %v1457_v53  ;;  %v1460_v32 = vadd.f32 %v1459_v19, %v6816_v38  ;;  %2399 = vst.msk [vmem:[#allocation3 + $0x29] sm:$0xff] %vm2397_vm6, %v2259_v45  ;;  %v7004_v38 = vld [vmem:[%s7820_s3 + $0x18] sm:$0xff]   ;;  %v7006_v7 = vpop.permute.xlu0 %5807 }
 0x1f4   : > { %2721 = vst.msk [vmem:[#allocation3 + $0x30] sm:$0xff] %vm2718_vm7, %v5794_v41  ;;  %5575 = vmatprep.subr.bf16.mxu1 %v7004_v38 }
 0x1f5   : > { %v2198_v5 = vadd.f32 %v6972_v31, %v2127_v46  ;;  %v2128_v20 = vadd.f32 %v1887_v37, %v1460_v32  ;;  %2785 = vrot.lane.b32.xlu1 %v2259_v45, %s5971_s7  ;;  %2528 = vrot.lane.b32.xlu0 %v2259_v45, %s5969_s27  ;;  %2979 = vst.msk [vmem:[#allocation3 + $0x37] sm:$0xff] %vm2975_vm9, %v5800_v26  ;;  %v5804_v45 = vunpack.i.l.bf16 %v6878_v43  ;;  %v5810_v37 = vunpack.i.h.bf16 %v7006_v7 }
 0x1f7   : > { %v2262_v17 = vmax.f32 %v2198_v5, 0.0  ;;  %v2199_v25 = vadd.f32 %v6972_v31, %v2128_v20  ;;  %v5319_v29 = vpop.f32.mrb[8].mxu1  ;;  %v5385_v41 = vpop.f32.mrb[72].mxu0 }
 0x1f8   : > { %v1472_v53 = vpop.f32.mrb[9].mxu1  ;;  %v1900_v58 = vpop.f32.mrb[73].mxu0 }
 0x1f9   : > { %v2263_v3 = vmax.f32 %v2199_v25, 0.0  ;;  %v1473_v26 = vadd.f32 %v1472_v53, %v6826_v44  ;;  %v5320_v10 = vpop.f32.mrb[10].mxu1  ;;  %v5386_v19 = vpop.f32.mrb[74].mxu0  ;;  %2791 = vrot.lane.b32.xlu1 %v2262_v17, %s5971_s7  ;;  %2534 = vrot.lane.b32.xlu0 %v2262_v17, %s5969_s27  ;;  %2402 = vst.msk [vmem:[#allocation3 + $0x41] sm:$0xff] %vm2397_vm6, %v2262_v17 }
 0x1fa   : > { %v1475_v46 = vpop.f32.mrb[11].mxu1  ;;  %v1903_v32 = vpop.f32.mrb[75].mxu0 }
 0x1fb   : > { %v2131_v15 = vadd.f32 %v1900_v58, %v1473_v26  ;;  %v1476_v5 = vadd.f32 %v1475_v46, %v6831_v52  ;;  %2403 = vst.msk [vmem:[#allocation3 + $0x49] sm:$0xff] %vm2397_vm6, %v2263_v3  ;;  %v7023_v20 = vpop.permute.xlu0 %5817  ;;  %v5814_v58 = vunpack.i.l.bf16 %v6884_v49 }
 0x1fc   : > { %2725 = vst.msk [vmem:[#allocation3 + $0x50] sm:$0xff] %vm2718_vm7, %v5804_v45 }
 0x1fd   : > { %v2202_v44 = vadd.f32 %v6972_v31, %v2131_v15  ;;  %v2132_v43 = vadd.f32 %v1903_v32, %v1476_v5  ;;  %2793 = vrot.lane.b32.xlu1 %v2263_v3, %s5971_s7  ;;  %2536 = vrot.lane.b32.xlu0 %v2263_v3, %s5969_s27  ;;  %2983 = vst.msk [vmem:[#allocation3 + $0x57] sm:$0xff] %vm2975_vm9, %v5810_v37  ;;  %v5820_v3 = vunpack.i.h.bf16 %v7023_v20 }
 0x1ff   : > { %v2266_v17 = vmax.f32 %v2202_v44, 0.0  ;;  %v2203_v25 = vadd.f32 %v6972_v31, %v2132_v43  ;;  %v5323_v29 = vpop.f32.mrb[12].mxu1  ;;  %v5389_v52 = vpop.f32.mrb[76].mxu0 }
 0x200   : > { %v1488_v41 = vpop.f32.mrb[13].mxu1  ;;  %v1916_v53 = vpop.f32.mrb[77].mxu0  ;;  %v5824_v52 = vunpack.i.l.bf16 %v6891_v56 }
 0x201   : > { %v2267_v45 = vmax.f32 %v2203_v25, 0.0  ;;  %v1489_v26 = vadd.f32 %v1488_v41, %v6841_v59  ;;  %v5324_v10 = vpop.f32.mrb[14].mxu1  ;;  %v5390_v19 = vpop.f32.mrb[78].mxu0  ;;  %2799 = vrot.lane.b32.xlu1 %v2266_v17, %s5971_s7  ;;  %2542 = vrot.lane.b32.xlu0 %v2266_v17, %s5969_s27  ;;  %2406 = vst.msk [vmem:[#allocation3 + $0x61] sm:$0xff] %vm2397_vm6, %v2266_v17 }
 0x202   : > { %v1491_v37 = vpop.f32.mrb[15].mxu1  ;;  %v1919_v46 = vpop.f32.mrb[79].mxu0 }
 0x203   : > { %v2135_v32 = vadd.f32 %v1916_v53, %v1489_v26  ;;  %v1492_v15 = vadd.f32 %v1491_v37, %v6843_v1  ;;  %2407 = vst.msk [vmem:[#allocation3 + $0x69] sm:$0xff] %vm2397_vm6, %v2267_v45  ;;  %v7039_v5 = vpop.permute.xlu0 %5827 }
 0x204   : > { %2729 = vst.msk [vmem:[#allocation3 + $0x70] sm:$0xff] %vm2718_vm7, %v5814_v58 }
 0x205   : > { %v2206_v59 = vadd.f32 %v6972_v31, %v2135_v32  ;;  %v2136_v49 = vadd.f32 %v1919_v46, %v1492_v15  ;;  %2801 = vrot.lane.b32.xlu1 %v2267_v45, %s5971_s7  ;;  %2544 = vrot.lane.b32.xlu0 %v2267_v45, %s5969_s27  ;;  %2987 = vst.msk [vmem:[#allocation3 + $0x77] sm:$0xff] %vm2975_vm9, %v5820_v3  ;;  %v5830_v45 = vunpack.i.h.bf16 %v7039_v5 }
 0x207   : > { %v2270_v44 = vmax.f32 %v2206_v59, 0.0  ;;  %v2207_v43 = vadd.f32 %v6972_v31, %v2136_v49  ;;  %v5327_v17 = vpop.f32.mrb[16].mxu1  ;;  %v5393_v1 = vpop.f32.mrb[80].mxu0 }
 0x208   : > { %v1504_v25 = vpop.f32.mrb[17].mxu1  ;;  %v1932_v29 = vpop.f32.mrb[81].mxu0 }
 0x209   : > { %v2271_v41 = vmax.f32 %v2207_v43, 0.0  ;;  %v1505_v53 = vadd.f32 %v1504_v25, %v6852_v11  ;;  %v5328_v58 = vpop.f32.mrb[18].mxu1  ;;  %v5394_v26 = vpop.f32.mrb[82].mxu0  ;;  %2807 = vrot.lane.b32.xlu1 %v2270_v44, %s5971_s7  ;;  %2550 = vrot.lane.b32.xlu0 %v2270_v44, %s5969_s27  ;;  %2410 = vst.msk [vmem:[#allocation3 + $0x81] sm:$0xff] %vm2397_vm6, %v2270_v44  ;;  %v5834_v43 = vunpack.i.l.bf16 %v6896_v62 }
 0x20a   : > { %v1507_v10 = vpop.f32.mrb[19].mxu1  ;;  %v1935_v19 = vpop.f32.mrb[83].mxu0 }
 0x20b   : > { %v2139_v3 = vadd.f32 %v1932_v29, %v1505_v53  ;;  %v1508_v37 = vadd.f32 %v1507_v10, %v6854_v16  ;;  %2411 = vst.msk [vmem:[#allocation3 + $0x89] sm:$0xff] %vm2397_vm6, %v2271_v41  ;;  %v7055_v46 = vpop.permute.xlu0 %5837 }
 0x20c   : > { %2733 = vst.msk [vmem:[#allocation3 + $0x90] sm:$0xff] %vm2718_vm7, %v5824_v52  ;;  %v5840_v52 = vunpack.i.h.bf16 %v7055_v46 }
 0x20d   : > { %v2210_v11 = vadd.f32 %v6972_v31, %v2139_v3  ;;  %v2140_v56 = vadd.f32 %v1935_v19, %v1508_v37  ;;  %2809 = vrot.lane.b32.xlu1 %v2271_v41, %s5971_s7  ;;  %2552 = vrot.lane.b32.xlu0 %v2271_v41, %s5969_s27  ;;  %2991 = vst.msk [vmem:[#allocation3 + $0x97] sm:$0xff] %vm2975_vm9, %v5830_v45 }
 0x20f   : > { %v2274_v32 = vmax.f32 %v2210_v11, 0.0  ;;  %v2211_v15 = vadd.f32 %v6972_v31, %v2140_v56  ;;  %v5331_v59 = vpop.f32.mrb[20].mxu1  ;;  %v5397_v16 = vpop.f32.mrb[84].mxu0  ;;  %v5844_v56 = vunpack.i.l.bf16 %v6908_v8 }
 0x210   : > { %v1520_v49 = vpop.f32.mrb[21].mxu1  ;;  %v1948_v44 = vpop.f32.mrb[85].mxu0 }
 0x211   : > { %v2275_v17 = vmax.f32 %v2211_v15, 0.0  ;;  %v1521_v1 = vadd.f32 %v1520_v49, %v6859_v18  ;;  %v5332_v25 = vpop.f32.mrb[22].mxu1  ;;  %v5398_v29 = vpop.f32.mrb[86].mxu0  ;;  %2815 = vrot.lane.b32.xlu1 %v2274_v32, %s5971_s7  ;;  %2558 = vrot.lane.b32.xlu0 %v2274_v32, %s5969_s27  ;;  %2414 = vst.msk [vmem:[#allocation3 + $0xa1] sm:$0xff] %vm2397_vm6, %v2274_v32 }
 0x212   : > { %v1523_v41 = vpop.f32.mrb[23].mxu1  ;;  %v1951_v53 = vpop.f32.mrb[87].mxu0 }
 0x213   : > { %v2143_v58 = vadd.f32 %v1948_v44, %v1521_v1  ;;  %v1524_v26 = vadd.f32 %v1523_v41, %v6861_v21  ;;  %2415 = vst.msk [vmem:[#allocation3 + $0xa9] sm:$0xff] %vm2397_vm6, %v2275_v17  ;;  %v7071_v45 = vpop.permute.xlu0 %5847 }
 0x214   : > { %2737 = vst.msk [vmem:[#allocation3 + $0xb0] sm:$0xff] %vm2718_vm7, %v5834_v43  ;;  %v5850_v49 = vunpack.i.h.bf16 %v7071_v45 }
 0x215   : > { %v2214_v18 = vadd.f32 %v6972_v31, %v2143_v58  ;;  %v2144_v62 = vadd.f32 %v1951_v53, %v1524_v26  ;;  %2817 = vrot.lane.b32.xlu1 %v2275_v17, %s5971_s7  ;;  %2560 = vrot.lane.b32.xlu0 %v2275_v17, %s5969_s27  ;;  %2995 = vst.msk [vmem:[#allocation3 + $0xb7] sm:$0xff] %vm2975_vm9, %v5840_v52  ;;  %v5854_v26 = vunpack.i.l.bf16 %v6913_v2 }
 0x217   : > { %v2278_v10 = vmax.f32 %v2214_v18, 0.0  ;;  %v2215_v19 = vadd.f32 %v6972_v31, %v2144_v62  ;;  %v5335_v3 = vpop.f32.mrb[24].mxu1  ;;  %v5401_v21 = vpop.f32.mrb[88].mxu0 }
 0x218   : > { %v1536_v37 = vpop.f32.mrb[25].mxu1  ;;  %v1964_v11 = vpop.f32.mrb[89].mxu0 }
 0x219   : > { %v2279_v32 = vmax.f32 %v2215_v19, 0.0  ;;  %v1537_v15 = vadd.f32 %v1536_v37, %v6863_v23  ;;  %v5336_v59 = vpop.f32.mrb[26].mxu1  ;;  %v5402_v16 = vpop.f32.mrb[90].mxu0  ;;  %2823 = vrot.lane.b32.xlu1 %v2278_v10, %s5971_s7  ;;  %2566 = vrot.lane.b32.xlu0 %v2278_v10, %s5969_s27  ;;  %2418 = vst.msk [vmem:[#allocation3 + $0xc1] sm:$0xff] %vm2397_vm6, %v2278_v10 }
 0x21a   : > { %v1539_v44 = vpop.f32.mrb[27].mxu1  ;;  %v1967_v43 = vpop.f32.mrb[91].mxu0 }
 0x21b   : > { %v2147_v17 = vadd.f32 %v1964_v11, %v1537_v15  ;;  %v1540_v1 = vadd.f32 %v1539_v44, %v6865_v27  ;;  %2419 = vst.msk [vmem:[#allocation3 + $0xc9] sm:$0xff] %vm2397_vm6, %v2279_v32  ;;  %v7087_v25 = vpop.permute.xlu0 %5857 }
 0x21c   : > { %2741 = vst.msk [vmem:[#allocation3 + $0xd0] sm:$0xff] %vm2718_vm7, %v5844_v56  ;;  %v5860_v3 = vunpack.i.h.bf16 %v7087_v25 }
 0x21d   : > { %v2218_v23 = vadd.f32 %v6972_v31, %v2147_v17  ;;  %v2148_v8 = vadd.f32 %v1967_v43, %v1540_v1  ;;  %2825 = vrot.lane.b32.xlu1 %v2279_v32, %s5971_s7  ;;  %2568 = vrot.lane.b32.xlu0 %v2279_v32, %s5969_s27  ;;  %2999 = vst.msk [vmem:[#allocation3 + $0xd7] sm:$0xff] %vm2975_vm9, %v5850_v49  ;;  %v5864_v43 = vunpack.i.l.bf16 %v6920_v40 }
 0x21f   : > { %v2282_v29 = vmax.f32 %v2218_v23, 0.0  ;;  %v2219_v52 = vadd.f32 %v6972_v31, %v2148_v8  ;;  %v5339_v41 = vpop.f32.mrb[28].mxu1  ;;  %v5405_v27 = vpop.f32.mrb[92].mxu0 }
 0x220   : > { %v1552_v53 = vpop.f32.mrb[29].mxu1  ;;  %v1980_v58 = vpop.f32.mrb[93].mxu0 }
 0x221   : > { %v2283_v18 = vmax.f32 %v2219_v52, 0.0  ;;  %v1553_v62 = vadd.f32 %v1552_v53, %v6867_v30  ;;  %v5340_v10 = vpop.f32.mrb[30].mxu1  ;;  %v5406_v19 = vpop.f32.mrb[94].mxu0  ;;  %2831 = vrot.lane.b32.xlu1 %v2282_v29, %s5971_s7  ;;  %2574 = vrot.lane.b32.xlu0 %v2282_v29, %s5969_s27  ;;  %2422 = vst.msk [vmem:[#allocation3 + $0xe1] sm:$0xff] %vm2397_vm6, %v2282_v29 }
 0x222   : > { %v1555_v21 = vpop.f32.mrb[31].mxu1  ;;  %v1983_v37 = vpop.f32.mrb[95].mxu0 }
 0x223   : > { %v2151_v11 = vadd.f32 %v1980_v58, %v1553_v62  ;;  %v1556_v56 = vadd.f32 %v1555_v21, %v6869_v33  ;;  %2423 = vst.msk [vmem:[#allocation3 + $0xe9] sm:$0xff] %vm2397_vm6, %v2283_v18  ;;  %v7103_v32 = vpop.permute.xlu0 %5867 }
 0x224   : > { %2745 = vst.msk [vmem:[#allocation3 + $0xf0] sm:$0xff] %vm2718_vm7, %v5854_v26  ;;  %v5870_v29 = vunpack.i.h.bf16 %v7103_v32 }
 0x225   : > { %v2222_v30 = vadd.f32 %v6972_v31, %v2151_v11  ;;  %v2152_v2 = vadd.f32 %v1983_v37, %v1556_v56  ;;  %2833 = vrot.lane.b32.xlu1 %v2283_v18, %s5971_s7  ;;  %2576 = vrot.lane.b32.xlu0 %v2283_v18, %s5969_s27  ;;  %3003 = vst.msk [vmem:[#allocation3 + $0xf7] sm:$0xff] %vm2975_vm9, %v5860_v3  ;;  %v5874_v3 = vunpack.i.l.bf16 %v6925_v63 }
 0x227   : > { %v2286_v15 = vmax.f32 %v2222_v30, 0.0  ;;  %v2223_v59 = vadd.f32 %v6972_v31, %v2152_v2  ;;  %v5343_v16 = vpop.f32.mrb[32].mxu1  ;;  %v5409_v33 = vpop.f32.mrb[96].mxu0 }
 0x228   : > { %v1568_v49 = vpop.f32.mrb[33].mxu1  ;;  %v1996_v44 = vpop.f32.mrb[97].mxu0 }
 0x229   : > { %v2287_v17 = vmax.f32 %v2223_v59, 0.0  ;;  %v1569_v1 = vadd.f32 %v1568_v49, %v6871_v36  ;;  %v5344_v23 = vpop.f32.mrb[34].mxu1  ;;  %v5410_v8 = vpop.f32.mrb[98].mxu0  ;;  %2839 = vrot.lane.b32.xlu1 %v2286_v15, %s5971_s7  ;;  %2582 = vrot.lane.b32.xlu0 %v2286_v15, %s5969_s27  ;;  %2426 = vst.msk [vmem:[#allocation3 + $0x101] sm:$0xff] %vm2397_vm6, %v2286_v15 }
 0x22a   : > { %v1571_v52 = vpop.f32.mrb[35].mxu1  ;;  %v1999_v41 = vpop.f32.mrb[99].mxu0  ;;  %v5884_v23 = vunpack.i.l.bf16 %v6932_v14 }
 0x22b   : > { %v2155_v27 = vadd.f32 %v1996_v44, %v1569_v1  ;;  %v1572_v53 = vadd.f32 %v1571_v52, %v6876_v42  ;;  %2427 = vst.msk [vmem:[#allocation3 + $0x109] sm:$0xff] %vm2397_vm6, %v2287_v17  ;;  %v7119_v58 = vpop.permute.xlu0 %5877 }
 0x22c   : > { %2749 = vst.msk [vmem:[#allocation3 + $0x110] sm:$0xff] %vm2718_vm7, %v5864_v43  ;;  %v5880_v30 = vunpack.i.h.bf16 %v7119_v58 }
 0x22d   : > { %v2226_v36 = vadd.f32 %v6972_v31, %v2155_v27  ;;  %v2156_v40 = vadd.f32 %v1999_v41, %v1572_v53  ;;  %2841 = vrot.lane.b32.xlu1 %v2287_v17, %s5971_s7  ;;  %2584 = vrot.lane.b32.xlu0 %v2287_v17, %s5969_s27  ;;  %3007 = vst.msk [vmem:[#allocation3 + $0x117] sm:$0xff] %vm2975_vm9, %v5870_v29 }
 0x22f   : > { %v2290_v26 = vmax.f32 %v2226_v36, 0.0  ;;  %v2227_v18 = vadd.f32 %v6972_v31, %v2156_v40  ;;  %v5347_v62 = vpop.f32.mrb[36].mxu1  ;;  %v5413_v42 = vpop.f32.mrb[100].mxu0 }
 0x230   : > { %v1584_v10 = vpop.f32.mrb[37].mxu1  ;;  %v2012_v19 = vpop.f32.mrb[101].mxu0 }
 0x231   : > { %v2291_v21 = vmax.f32 %v2227_v18, 0.0  ;;  %v1585_v37 = vadd.f32 %v1584_v10, %v6882_v48  ;;  %v5348_v11 = vpop.f32.mrb[38].mxu1  ;;  %v5414_v56 = vpop.f32.mrb[102].mxu0  ;;  %2847 = vrot.lane.b32.xlu1 %v2290_v26, %s5971_s7  ;;  %2590 = vrot.lane.b32.xlu0 %v2290_v26, %s5969_s27  ;;  %2430 = vst.msk [vmem:[#allocation3 + $0x121] sm:$0xff] %vm2397_vm6, %v2290_v26 }
 0x232   : > { %v1587_v2 = vpop.f32.mrb[39].mxu1  ;;  %v2015_v15 = vpop.f32.mrb[103].mxu0 }
 0x233   : > { %v2159_v59 = vadd.f32 %v2012_v19, %v1585_v37  ;;  %v1588_v16 = vadd.f32 %v1587_v2, %v6888_v54  ;;  %2431 = vst.msk [vmem:[#allocation3 + $0x129] sm:$0xff] %vm2397_vm6, %v2291_v21  ;;  %v7135_v33 = vpop.permute.xlu0 %5887 }
 0x234   : > { %2753 = vst.msk [vmem:[#allocation3 + $0x130] sm:$0xff] %vm2718_vm7, %v5874_v3  ;;  %v5890_v27 = vunpack.i.h.bf16 %v7135_v33 }
 0x235   : > { %v2230_v48 = vadd.f32 %v6972_v31, %v2159_v59  ;;  %v2160_v63 = vadd.f32 %v2015_v15, %v1588_v16  ;;  %2849 = vrot.lane.b32.xlu1 %v2291_v21, %s5971_s7  ;;  %2592 = vrot.lane.b32.xlu0 %v2291_v21, %s5969_s27  ;;  %3011 = vst.msk [vmem:[#allocation3 + $0x137] sm:$0xff] %vm2975_vm9, %v5880_v30  ;;  %v5894_v21 = vunpack.i.l.bf16 %v6937_v24 }
 0x237   : > { %v2294_v49 = vmax.f32 %v2230_v48, 0.0  ;;  %v2231_v44 = vadd.f32 %v6972_v31, %v2160_v63  ;;  %v5351_v43 = vpop.f32.mrb[40].mxu1  ;;  %v5417_v54 = vpop.f32.mrb[104].mxu0 }
 0x238   : > { %v1600_v17 = vpop.f32.mrb[41].mxu1  ;;  %v2028_v1 = vpop.f32.mrb[105].mxu0 }
 0x239   : > { %v2295_v8 = vmax.f32 %v2231_v44, 0.0  ;;  %v1601_v29 = vadd.f32 %v1600_v17, %v6894_v61  ;;  %v5352_v52 = vpop.f32.mrb[42].mxu1  ;;  %v5418_v41 = vpop.f32.mrb[106].mxu0  ;;  %2855 = vrot.lane.b32.xlu1 %v2294_v49, %s5971_s7  ;;  %2598 = vrot.lane.b32.xlu0 %v2294_v49, %s5969_s27  ;;  %2434 = vst.msk [vmem:[#allocation3 + $0x141] sm:$0xff] %vm2397_vm6, %v2294_v49 }
 0x23a   : > { %v1603_v53 = vpop.f32.mrb[43].mxu1  ;;  %v2031_v36 = vpop.f32.mrb[107].mxu0 }
 0x23b   : > { %v2163_v40 = vadd.f32 %v2028_v1, %v1601_v29  ;;  %v1604_v26 = vadd.f32 %v1603_v53, %v6903_v4  ;;  %2435 = vst.msk [vmem:[#allocation3 + $0x149] sm:$0xff] %vm2397_vm6, %v2295_v8  ;;  %v7151_v18 = vpop.permute.xlu0 %5897  ;;  %v5904_v1 = vunpack.i.l.bf16 %v6944_v39 }
 0x23c   : > { %2757 = vst.msk [vmem:[#allocation3 + $0x150] sm:$0xff] %vm2718_vm7, %v5884_v23  ;;  %v5900_v2 = vunpack.i.h.bf16 %v7151_v18 }
 0x23d   : > { %v2234_v61 = vadd.f32 %v6972_v31, %v2163_v40  ;;  %v2164_v14 = vadd.f32 %v2031_v36, %v1604_v26  ;;  %2857 = vrot.lane.b32.xlu1 %v2295_v8, %s5971_s7  ;;  %2600 = vrot.lane.b32.xlu0 %v2295_v8, %s5969_s27  ;;  %3015 = vst.msk [vmem:[#allocation3 + $0x157] sm:$0xff] %vm2975_vm9, %v5890_v27 }
 0x23f   : > { %v2298_v62 = vmax.f32 %v2234_v61, 0.0  ;;  %v2235_v42 = vadd.f32 %v6972_v31, %v2164_v14  ;;  %v5355_v10 = vpop.f32.mrb[44].mxu1  ;;  %v5421_v4 = vpop.f32.mrb[108].mxu0 }
 0x240   : > { %v1616_v19 = vpop.f32.mrb[45].mxu1  ;;  %v2044_v3 = vpop.f32.mrb[109].mxu0  ;;  %v5914_v4 = vunpack.i.l.bf16 %v6949_v51 }
 0x241   : > { %v2299_v37 = vmax.f32 %v2235_v42, 0.0  ;;  %v1617_v11 = vadd.f32 %v1616_v19, %v6911_v12  ;;  %v5356_v56 = vpop.f32.mrb[46].mxu1  ;;  %v5422_v30 = vpop.f32.mrb[110].mxu0  ;;  %2863 = vrot.lane.b32.xlu1 %v2298_v62, %s5971_s7  ;;  %2606 = vrot.lane.b32.xlu0 %v2298_v62, %s5969_s27  ;;  %2438 = vst.msk [vmem:[#allocation3 + $0x161] sm:$0xff] %vm2397_vm6, %v2298_v62 }
 0x242   : > { %v1619_v15 = vpop.f32.mrb[47].mxu1  ;;  %v2047_v59 = vpop.f32.mrb[111].mxu0 }
 0x243   : > { %v2167_v16 = vadd.f32 %v2044_v3, %v1617_v11  ;;  %v1620_v48 = vadd.f32 %v1619_v15, %v6917_v34  ;;  %2439 = vst.msk [vmem:[#allocation3 + $0x169] sm:$0xff] %vm2397_vm6, %v2299_v37  ;;  %v7167_v63 = vpop.permute.xlu0 %5907 }
 0x244   : > { %2761 = vst.msk [vmem:[#allocation3 + $0x170] sm:$0xff] %vm2718_vm7, %v5894_v21  ;;  %v5910_v41 = vunpack.i.h.bf16 %v7167_v63 }
 0x245   : > { %v2238_v12 = vadd.f32 %v6972_v31, %v2167_v16  ;;  %v2168_v24 = vadd.f32 %v2047_v59, %v1620_v48  ;;  %2865 = vrot.lane.b32.xlu1 %v2299_v37, %s5971_s7  ;;  %2608 = vrot.lane.b32.xlu0 %v2299_v37, %s5969_s27  ;;  %3019 = vst.msk [vmem:[#allocation3 + $0x177] sm:$0xff] %vm2975_vm9, %v5900_v2 }
 0x247   : > { %v2302_v49 = vmax.f32 %v2238_v12, 0.0  ;;  %v2239_v44 = vadd.f32 %v6972_v31, %v2168_v24  ;;  %v5359_v43 = vpop.f32.mrb[48].mxu1  ;;  %v5425_v34 = vpop.f32.mrb[112].mxu0 }
 0x248   : > { %v1632_v54 = vpop.f32.mrb[49].mxu1  ;;  %v2060_v17 = vpop.f32.mrb[113].mxu0 }
 0x249   : > { %v2303_v23 = vmax.f32 %v2239_v44, 0.0  ;;  %v1633_v8 = vadd.f32 %v1632_v54, %v6923_v57  ;;  %v5360_v29 = vpop.f32.mrb[50].mxu1  ;;  %v5426_v52 = vpop.f32.mrb[114].mxu0  ;;  %2871 = vrot.lane.b32.xlu1 %v2302_v49, %s5971_s7  ;;  %2614 = vrot.lane.b32.xlu0 %v2302_v49, %s5969_s27  ;;  %2442 = vst.msk [vmem:[#allocation3 + $0x181] sm:$0xff] %vm2397_vm6, %v2302_v49  ;;  %v5924_v44 = vunpack.i.l.bf16 %v6956_v0 }
 0x24a   : > { %v1635_v27 = vpop.f32.mrb[51].mxu1  ;;  %v2063_v53 = vpop.f32.mrb[115].mxu0 }
 0x24b   : > { %v2171_v36 = vadd.f32 %v2060_v17, %v1633_v8  ;;  %v1636_v40 = vadd.f32 %v1635_v27, %v6929_v13  ;;  %2443 = vst.msk [vmem:[#allocation3 + $0x189] sm:$0xff] %vm2397_vm6, %v2303_v23  ;;  %v7183_v26 = vpop.permute.xlu0 %5917 }
 0x24c   : > { %2765 = vst.msk [vmem:[#allocation3 + $0x190] sm:$0xff] %vm2718_vm7, %v5904_v1  ;;  %v5920_v11 = vunpack.i.h.bf16 %v7183_v26 }
 0x24d   : > { %v2242_v57 = vadd.f32 %v6972_v31, %v2171_v36  ;;  %v2172_v39 = vadd.f32 %v2063_v53, %v1636_v40  ;;  %2873 = vrot.lane.b32.xlu1 %v2303_v23, %s5971_s7  ;;  %2616 = vrot.lane.b32.xlu0 %v2303_v23, %s5969_s27  ;;  %3023 = vst.msk [vmem:[#allocation3 + $0x197] sm:$0xff] %vm2975_vm9, %v5910_v41 }
 0x24f   : > { %v2306_v61 = vmax.f32 %v2242_v57, 0.0  ;;  %v2243_v14 = vadd.f32 %v6972_v31, %v2172_v39  ;;  %v5363_v62 = vpop.f32.mrb[52].mxu1  ;;  %v5429_v13 = vpop.f32.mrb[116].mxu0 }
 0x250   : > { %v1648_v42 = vpop.f32.mrb[53].mxu1  ;;  %v2076_v10 = vpop.f32.mrb[117].mxu0 }
 0x251   : > { %v2307_v19 = vmax.f32 %v2243_v14, 0.0  ;;  %v1649_v3 = vadd.f32 %v1648_v42, %v6935_v22  ;;  %v5364_v21 = vpop.f32.mrb[54].mxu1  ;;  %v5430_v37 = vpop.f32.mrb[118].mxu0  ;;  %2879 = vrot.lane.b32.xlu1 %v2306_v61, %s5971_s7  ;;  %2622 = vrot.lane.b32.xlu0 %v2306_v61, %s5969_s27  ;;  %2446 = vst.msk [vmem:[#allocation3 + $0x1a1] sm:$0xff] %vm2397_vm6, %v2306_v61 }
 0x252   : > { %v1651_v56 = vpop.f32.mrb[55].mxu1  ;;  %v2079_v30 = vpop.f32.mrb[119].mxu0  ;;  %v5799_v21 = vunpack.i.l.bf16 %v6979_v50 }
 0x253   : > { %v2175_v2 = vadd.f32 %v2076_v10, %v1649_v3  ;;  %v1652_v15 = vadd.f32 %v1651_v56, %v6941_v35  ;;  %2447 = vst.msk [vmem:[#allocation3 + $0x1a9] sm:$0xff] %vm2397_vm6, %v2307_v19  ;;  %v7199_v59 = vpop.permute.xlu0 %5927 }
 0x254   : > { %2769 = vst.msk [vmem:[#allocation3 + $0x1b0] sm:$0xff] %vm2718_vm7, %v5914_v4  ;;  %v5930_v1 = vunpack.i.h.bf16 %v7199_v59 }
 0x255   : > { %v2246_v22 = vadd.f32 %v6972_v31, %v2175_v2  ;;  %v2176_v51 = vadd.f32 %v2079_v30, %v1652_v15  ;;  %2881 = vrot.lane.b32.xlu1 %v2307_v19, %s5971_s7  ;;  %2624 = vrot.lane.b32.xlu0 %v2307_v19, %s5969_s27  ;;  %3027 = vst.msk [vmem:[#allocation3 + $0x1b7] sm:$0xff] %vm2975_vm9, %v5920_v11  ;;  %v3042_v2 = vld [vmem:[#allocation3 + $0x10] sm:$0xff] }
 0x257   : > { %v2310_v16 = vmax.f32 %v2246_v22, 0.0  ;;  %v2247_v48 = vadd.f32 %v6972_v31, %v2176_v51  ;;  %v5367_v12 = vpop.f32.mrb[56].mxu1  ;;  %v5433_v35 = vpop.f32.mrb[120].mxu0  ;;  %v5959_v51 = vld [vmem:[%s7820_s3 + $0x20] ss:$0 sps:$4 sm:$0xff]  }
 0x258   : > { %v1664_v24 = vpop.f32.mrb[57].mxu1  ;;  %v2092_v49 = vpop.f32.mrb[121].mxu0 }
 0x259   : > { %v2311_v43 = vmax.f32 %v2247_v48, 0.0  ;;  %v1665_v34 = vadd.f32 %v1664_v24, %v6947_v47  ;;  %v5368_v54 = vpop.f32.mrb[58].mxu1  ;;  %v5434_v17 = vpop.f32.mrb[122].mxu0  ;;  %2887 = vrot.lane.b32.xlu1 %v2310_v16, %s5971_s7  ;;  %2630 = vrot.lane.b32.xlu0 %v2310_v16, %s5969_s27  ;;  %2450 = vst.msk [vmem:[#allocation3 + $0x1c1] sm:$0xff] %vm2397_vm6, %v2310_v16  ;;  %v5809_v16 = vunpack.i.l.bf16 %v7006_v7 }
 0x25a   : > { %v1667_v23 = vpop.f32.mrb[59].mxu1  ;;  %v2095_v8 = vpop.f32.mrb[123].mxu0  ;;  %v5819_v17 = vunpack.i.l.bf16 %v7023_v20 }
 0x25b   : > { %v2179_v29 = vadd.f32 %v2092_v49, %v1665_v34  ;;  %v1668_v52 = vadd.f32 %v1667_v23, %v6953_v60  ;;  %2451 = vst.msk [vmem:[#allocation3 + $0x1c9] sm:$0xff] %vm2397_vm6, %v2311_v43  ;;  %v5934_v60 = vunpack.i.l.bf16 %v6961_v9  ;;  %v4060_v49 = vsel %vm3254_vm8, %v5959_v51, 0 }
 0x25c   : > { %2773 = vst.msk [vmem:[#allocation3 + $0x1d0] sm:$0xff] %vm2718_vm7, %v5924_v44 }
 0x25d   : > { %v2250_v47 = vadd.f32 %v6972_v31, %v2179_v29  ;;  %v2180_v0 = vadd.f32 %v2095_v8, %v1668_v52  ;;  %2889 = vrot.lane.b32.xlu1 %v2311_v43, %s5971_s7  ;;  %2632 = vrot.lane.b32.xlu0 %v2311_v43, %s5969_s27  ;;  %3031 = vst.msk [vmem:[#allocation3 + $0x1d7] sm:$0xff] %vm2975_vm9, %v5930_v1 }
 0x25f   : > { %v2314_v41 = vmax.f32 %v2250_v47, 0.0  ;;  %v2251_v27 = vadd.f32 %v6972_v31, %v2180_v0  ;;  %v5371_v53 = vpop.f32.mrb[60].mxu1  ;;  %v5437_v36 = vpop.f32.mrb[124].mxu0 }
 0x260   : > { %v1680_v40 = vpop.f32.mrb[61].mxu1  ;;  %v2108_v57 = vpop.f32.mrb[125].mxu0  ;;  %v5829_v53 = vunpack.i.l.bf16 %v7039_v5 }
 0x261   : > { %v2315_v39 = vmax.f32 %v2251_v27, 0.0  ;;  %v1681_v61 = vadd.f32 %v1680_v40, %v6959_v6  ;;  %v5372_v14 = vpop.f32.mrb[62].mxu1  ;;  %v5438_v62 = vpop.f32.mrb[126].mxu0  ;;  %2895 = vrot.lane.b32.xlu1 %v2314_v41, %s5971_s7  ;;  %2638 = vrot.lane.b32.xlu0 %v2314_v41, %s5969_s27  ;;  %2454 = vst.msk [vmem:[#allocation3 + $0x1e1] sm:$0xff] %vm2397_vm6, %v2314_v41 }
 0x262   : > { %v1683_v13 = vpop.f32.mrb[63].mxu1  ;;  %v2111_v42 = vpop.f32.mrb[127].mxu0 }
 0x263   : > { %v2183_v10 = vadd.f32 %v2108_v57, %v1681_v61  ;;  %v1684_v4 = vadd.f32 %v1683_v13, %v6965_v28  ;;  %v2784_v19 = vpop.permute.xlu1 %2783  ;;  %v2527_v9 = vpop.permute.xlu0 %2526  ;;  %2455 = vst.msk [vmem:[#allocation3 + $0x1e9] sm:$0xff] %vm2397_vm6, %v2315_v39 }
 0x264   : > { %2719 = vst.msk [vmem:[#allocation3 + $0x20] sm:$0xff] %vm2718_vm7, %v2527_v9  ;;  %2777 = vst.msk [vmem:[#allocation3 + $0x1f0] sm:$0xff] %vm2718_vm7, %v5934_v60 }
 0x265   : > { %v2254_v6 = vadd.f32 %v6972_v31, %v2183_v10  ;;  %v2184_v3 = vadd.f32 %v2111_v42, %v1684_v4  ;;  %2976 = vst.msk [vmem:[#allocation3 + $0x1f] sm:$0xff] %vm2975_vm9, %v2784_v19  ;;  %2897 = vrot.lane.b32.xlu1 %v2315_v39, %s5971_s7  ;;  %2640 = vrot.lane.b32.xlu0 %v2315_v39, %s5969_s27  ;;  %v5839_v42 = vunpack.i.l.bf16 %v7055_v46 }
 0x267   : > { %v2318_v28 = vmax.f32 %v2254_v6, 0.0  ;;  %v2255_v37 = vadd.f32 %v6972_v31, %v2184_v3  ;;  %v2786_v11 = vpop.permute.xlu1 %2785  ;;  %v2529_v56 = vpop.permute.xlu0 %2528 }
 0x268   : > { %2720 = vst.msk [vmem:[#allocation3 + $0x28] sm:$0xff] %vm2718_vm7, %v2529_v56 }
 0x269   : > { %v2319_v30 = vmax.f32 %v2255_v37, 0.0  ;;  %2458 = vst.msk [vmem:[#allocation3 + $0x201] sm:$0xff] %vm2397_vm6, %v2318_v28  ;;  %2903 = vrot.lane.b32.xlu1 %v2318_v28, %s5971_s7  ;;  %2646 = vrot.lane.b32.xlu0 %v2318_v28, %s5969_s27 }
 0x26a   : > { %2977 = vst.msk [vmem:[#allocation3 + $0x27] sm:$0xff] %vm2975_vm9, %v2786_v11  ;;  %2978 = vst.msk [vmem:[#allocation3 + $0x2f] sm:$0xff] %vm2975_vm9, %v5799_v21  ;;  %v5849_v11 = vunpack.i.l.bf16 %v7071_v45 }
 0x26b   : > { %2459 = vst.msk [vmem:[#allocation3 + $0x209] sm:$0xff] %vm2397_vm6, %v2319_v30  ;;  %v2792_v50 = vpop.permute.xlu1 %2791  ;;  %v2535_v31 = vpop.permute.xlu0 %2534 }
 0x26c   : > { %2723 = vst.msk [vmem:[#allocation3 + $0x40] sm:$0xff] %vm2718_vm7, %v2535_v31  ;;  %v3043_v15 = vld [vmem:[#allocation3 + $0x18] sm:$0xff] }
 0x26d   : > { %2980 = vst.msk [vmem:[#allocation3 + $0x3f] sm:$0xff] %vm2975_vm9, %v2792_v50  ;;  %5937 = vrot.lane.b32.xlu0 %v5970_v55, %s5971_s7  ;;  %5942 = vrot.lane.b32.xlu1 %v5970_v55, %s5969_s27  ;;  %v3105_v22 = vpack.c.bf16 %v3043_v15, %v3042_v2 }
 0x26f   : > { %v2794_v48 = vpop.permute.xlu1 %2793  ;;  %v2537_v12 = vpop.permute.xlu0 %2536  ;;  %5512 = vmatmul.mubr.msk.bf16.vlgmr.msra.gmra.mrb[64].mxu1 %vm2386_vm5, %v3105_v22 }
 0x270   : > { %2724 = vst.msk [vmem:[#allocation3 + $0x48] sm:$0xff] %vm2718_vm7, %v2537_v12  ;;  %5576 = vmatpush3.bf16.msra.mxu1 %v7004_v38 }
 0x271   : > { %v3044_v35 = vld [vmem:[#allocation3 + $0x20] sm:$0xff]  ;;  %v3045_v24 = vld [vmem:[#allocation3 + $0x28] sm:$0xff]  ;;  %2981 = vst.msk [vmem:[#allocation3 + $0x47] sm:$0xff] %vm2975_vm9, %v2794_v48  ;;  %2982 = vst.msk [vmem:[#allocation3 + $0x4f] sm:$0xff] %vm2975_vm9, %v5809_v16  ;;  %2648 = vrot.lane.b32.xlu0 %v2319_v30, %s5969_s27  ;;  %5947 = vrot.lane.b32.xlu1 %v5970_v55, %s5971_s7  ;;  %v5859_v48 = vunpack.i.l.bf16 %v7087_v25  ;;  %s7578_s27 = scalar_lea.vmem %s7822_s5, %s5778_s24 }
 0x272   : > { %v3106_v7 = vpack.c.bf16 %v3045_v24, %v3044_v35  ;;  %5776 = vmatprep.subr.msk.bf16.mxu1 %vm3254_vm8, %v5959_v51  ;;  %v3046_v38 = vld [vmem:[#allocation3 + $0x30] sm:$0xff]  ;;  %4701 = vst.msk [vmem:[%s7578_s27] sm:$0xff] %vm2397_vm6, %v5970_v55  ;;  %4702 = vst.msk [vmem:[%s7578_s27 + $0x8] sm:$0xff] %vm2397_vm6, %v5970_v55 }
 0x273   : > { %v2800_v44 = vpop.permute.xlu1 %2799  ;;  %v2543_v43 = vpop.permute.xlu0 %2542  ;;  %5010 = vst.msk [vmem:[%s7578_s27 + $0x90] sm:$0xff] %vm2397_vm6, %v5970_v55  ;;  %5011 = vst.msk [vmem:[%s7578_s27 + $0x98] sm:$0xff] %vm2397_vm6, %v5970_v55 }
 0x274   : > { %5443 = vmatprep.mubr.msk.bf16.mxu0 %vm2386_vm5, %v3106_v7  ;;  %5515 = vmatprep.mubr.msk.bf16.mxu1 %vm2386_vm5, %v3106_v7  ;;  %2727 = vst.msk [vmem:[#allocation3 + $0x60] sm:$0xff] %vm2718_vm7, %v2543_v43  ;;  %v3047_v34 = vld [vmem:[#allocation3 + $0x38] sm:$0xff] }
 0x275   : > { %5578 = vmatpush3.bf16.msra.mxu1 %v4060_v49  ;;  %2984 = vst.msk [vmem:[#allocation3 + $0x5f] sm:$0xff] %vm2975_vm9, %v2800_v44  ;;  %2905 = vrot.lane.b32.xlu0 %v2319_v30, %s5971_s7  ;;  %v3107_v54 = vpack.c.bf16 %v3047_v34, %v3046_v38 }
 0x276   : > { %5012 = vst.msk [vmem:[%s7578_s27 + $0xa0] sm:$0xff] %vm2397_vm6, %v5970_v55  ;;  %5013 = vst.msk [vmem:[%s7578_s27 + $0xa8] sm:$0xff] %vm2397_vm6, %v5970_v55 }
 0x277   : > { %v2802_v1 = vpop.permute.xlu1 %2801  ;;  %v2545_v23 = vpop.permute.xlu0 %2544  ;;  %5444 = vmatmul.mubr.msk.bf16.vlgmr.msra.gmra.mrb[128].mxu0 %vm2386_vm5, %v3107_v54  ;;  %5516 = vmatmul.mubr.msk.bf16.gmra.mrb[68].mxu1 %vm2386_vm5, %v3107_v54  ;;  %v5869_v54 = vunpack.i.l.bf16 %v7103_v32  ;;  %5014 = vst.msk [vmem:[%s7578_s27 + $0x10] sm:$0x1] %vm4709_vm10, %v5970_v55  ;;  %5015 = vst.msk [vmem:[%s7578_s27 + $0x20] sm:$0x1] %vm4709_vm10, %v5970_v55 }
 0x278   : > { %2728 = vst.msk [vmem:[#allocation3 + $0x68] sm:$0xff] %vm2718_vm7, %v2545_v23  ;;  %v3048_v8 = vld [vmem:[#allocation3 + $0x40] sm:$0xff]  ;;  %v3049_v29 = vld [vmem:[#allocation3 + $0x48] sm:$0xff]  ;;  %v3050_v20 = vld [vmem:[#allocation3 + $0x50] sm:$0xff] }
 0x279   : > { %2985 = vst.msk [vmem:[#allocation3 + $0x67] sm:$0xff] %vm2975_vm9, %v2802_v1  ;;  %2986 = vst.msk [vmem:[#allocation3 + $0x6f] sm:$0xff] %vm2975_vm9, %v5819_v17  ;;  %v7269_v52 = vpack.c.bf16 %v3049_v29, %v3048_v8 }
 0x27a   : > { %5016 = vst.msk [vmem:[%s7578_s27 + $0x30] sm:$0x1] %vm4709_vm10, %v5970_v55  ;;  %5017 = vst.msk [vmem:[%s7578_s27 + $0x40] sm:$0x1] %vm4709_vm10, %v5970_v55 }
 0x27b   : > { %v2808_v47 = vpop.permute.xlu1 %2807  ;;  %v2551_v0 = vpop.permute.xlu0 %2550  ;;  %5447 = vmatprep.mubr.msk.bf16.mxu0 %vm2386_vm5, %v7269_v52  ;;  %5519 = vmatprep.mubr.msk.bf16.mxu1 %vm2386_vm5, %v7269_v52  ;;  %5018 = vst.msk [vmem:[%s7578_s27 + $0x50] sm:$0x1] %vm4709_vm10, %v5970_v55  ;;  %5019 = vst.msk [vmem:[%s7578_s27 + $0x60] sm:$0x1] %vm4709_vm10, %v5970_v55 }
 0x27c   : > { %2731 = vst.msk [vmem:[#allocation3 + $0x80] sm:$0xff] %vm2718_vm7, %v2551_v0  ;;  %v3051_v41 = vld [vmem:[#allocation3 + $0x58] sm:$0xff] }
 0x27d   : > { %2988 = vst.msk [vmem:[#allocation3 + $0x7f] sm:$0xff] %vm2975_vm9, %v2808_v47  ;;  %v7277_v27 = vpack.c.bf16 %v3051_v41, %v3050_v20 }
 0x27e   : > { %5020 = vst.msk [vmem:[%s7578_s27 + $0x70] sm:$0x1] %vm4709_vm10, %v5970_v55  ;;  %5021 = vst.msk [vmem:[%s7578_s27 + $0x80] sm:$0x1] %vm4709_vm10, %v5970_v55 }
 0x27f   : > { %v2810_v36 = vpop.permute.xlu1 %2809  ;;  %v2553_v60 = vpop.permute.xlu0 %2552  ;;  %5448 = vmatmul.mubr.msk.bf16.gmra.mrb[132].mxu0 %vm2386_vm5, %v7277_v27  ;;  %5520 = vmatmul.mubr.msk.bf16.gmra.mrb[72].mxu1 %vm2386_vm5, %v7277_v27  ;;  %5022 = vst.msk [vmem:[%s7578_s27 + $0x19] sm:$0x7f] %vm4718_vm11, %v5970_v55  ;;  %5023 = vst.msk [vmem:[%s7578_s27 + $0x29] sm:$0x7f] %vm4718_vm11, %v5970_v55 }
 0x280   : > { %2732 = vst.msk [vmem:[#allocation3 + $0x88] sm:$0xff] %vm2718_vm7, %v2553_v60  ;;  %v3052_v40 = vld [vmem:[#allocation3 + $0x60] sm:$0xff]  ;;  %v3053_v57 = vld [vmem:[#allocation3 + $0x68] sm:$0xff]  ;;  %v3054_v14 = vld [vmem:[#allocation3 + $0x70] sm:$0xff] }
 0x281   : > { %2989 = vst.msk [vmem:[#allocation3 + $0x87] sm:$0xff] %vm2975_vm9, %v2810_v36  ;;  %2990 = vst.msk [vmem:[#allocation3 + $0x8f] sm:$0xff] %vm2975_vm9, %v5829_v53  ;;  %v7287_v39 = vpack.c.bf16 %v3053_v57, %v3052_v40  ;;  %v5879_v53 = vunpack.i.l.bf16 %v7119_v58 }
 0x282   : > { %5024 = vst.msk [vmem:[%s7578_s27 + $0x39] sm:$0x7f] %vm4718_vm11, %v5970_v55  ;;  %5025 = vst.msk [vmem:[%s7578_s27 + $0x49] sm:$0x7f] %vm4718_vm11, %v5970_v55 }
 0x283   : > { %v2816_v61 = vpop.permute.xlu1 %2815  ;;  %v2559_v5 = vpop.permute.xlu0 %2558  ;;  %5451 = vmatprep.mubr.msk.bf16.mxu0 %vm2386_vm5, %v7287_v39  ;;  %5523 = vmatprep.mubr.msk.bf16.mxu1 %vm2386_vm5, %v7287_v39  ;;  %5026 = vst.msk [vmem:[%s7578_s27 + $0x59] sm:$0x7f] %vm4718_vm11, %v5970_v55  ;;  %5027 = vst.msk [vmem:[%s7578_s27 + $0x69] sm:$0x7f] %vm4718_vm11, %v5970_v55 }
 0x284   : > { %2735 = vst.msk [vmem:[#allocation3 + $0xa0] sm:$0xff] %vm2718_vm7, %v2559_v5  ;;  %v3055_v62 = vld [vmem:[#allocation3 + $0x78] sm:$0xff] }
 0x285   : > { %2992 = vst.msk [vmem:[#allocation3 + $0x9f] sm:$0xff] %vm2975_vm9, %v2816_v61  ;;  %v7295_v13 = vpack.c.bf16 %v3055_v62, %v3054_v14 }
 0x286   : > { %5028 = vst.msk [vmem:[%s7578_s27 + $0x79] sm:$0x7f] %vm4718_vm11, %v5970_v55  ;;  %5029 = vst.msk [vmem:[%s7578_s27 + $0x89] sm:$0x7f] %vm4718_vm11, %v5970_v55 }
 0x287   : > { %v2818_v10 = vpop.permute.xlu1 %2817  ;;  %v2561_v4 = vpop.permute.xlu0 %2560  ;;  %5452 = vmatmul.mubr.msk.bf16.gmra.mrb[136].mxu0 %vm2386_vm5, %v7295_v13  ;;  %5524 = vmatmul.mubr.msk.bf16.gmra.mrb[76].mxu1 %vm2386_vm5, %v7295_v13 }
 0x288   : > { %2736 = vst.msk [vmem:[#allocation3 + $0xa8] sm:$0xff] %vm2718_vm7, %v2561_v4  ;;  %v3056_v19 = vld [vmem:[#allocation3 + $0x80] sm:$0xff]  ;;  %v3057_v9 = vld [vmem:[#allocation3 + $0x88] sm:$0xff]  ;;  %v3058_v21 = vld [vmem:[#allocation3 + $0x90] sm:$0xff] }
 0x289   : > { %2993 = vst.msk [vmem:[#allocation3 + $0xa7] sm:$0xff] %vm2975_vm9, %v2818_v10  ;;  %2994 = vst.msk [vmem:[#allocation3 + $0xaf] sm:$0xff] %vm2975_vm9, %v5839_v42  ;;  %v7305_v6 = vpack.c.bf16 %v3057_v9, %v3056_v19  ;;  %v5889_v10 = vunpack.i.l.bf16 %v7135_v33 }
 0x28b   : > { %v2824_v3 = vpop.permute.xlu1 %2823  ;;  %v2567_v46 = vpop.permute.xlu0 %2566  ;;  %5455 = vmatprep.mubr.msk.bf16.mxu0 %vm2386_vm5, %v7305_v6  ;;  %5527 = vmatprep.mubr.msk.bf16.mxu1 %vm2386_vm5, %v7305_v6 }
 0x28c   : > { %2739 = vst.msk [vmem:[#allocation3 + $0xc0] sm:$0xff] %vm2718_vm7, %v2567_v46  ;;  %v3059_v28 = vld [vmem:[#allocation3 + $0x98] sm:$0xff] }
 0x28d   : > { %2996 = vst.msk [vmem:[#allocation3 + $0xbf] sm:$0xff] %vm2975_vm9, %v2824_v3  ;;  %v7313_v37 = vpack.c.bf16 %v3059_v28, %v3058_v21 }
 0x28f   : > { %v2826_v56 = vpop.permute.xlu1 %2825  ;;  %v2569_v30 = vpop.permute.xlu0 %2568  ;;  %5456 = vmatmul.mubr.msk.bf16.gmra.mrb[140].mxu0 %vm2386_vm5, %v7313_v37  ;;  %5528 = vmatmul.mubr.msk.bf16.gmra.mrb[80].mxu1 %vm2386_vm5, %v7313_v37 }
 0x290   : > { %2740 = vst.msk [vmem:[#allocation3 + $0xc8] sm:$0xff] %vm2718_vm7, %v2569_v30  ;;  %v3060_v2 = vld [vmem:[#allocation3 + $0xa0] sm:$0xff]  ;;  %v3061_v50 = vld [vmem:[#allocation3 + $0xa8] sm:$0xff]  ;;  %v3062_v22 = vld [vmem:[#allocation3 + $0xb0] sm:$0xff]  ;;  %v5899_v30 = vunpack.i.l.bf16 %v7151_v18 }
 0x291   : > { %2997 = vst.msk [vmem:[#allocation3 + $0xc7] sm:$0xff] %vm2975_vm9, %v2826_v56  ;;  %2998 = vst.msk [vmem:[#allocation3 + $0xcf] sm:$0xff] %vm2975_vm9, %v5849_v11  ;;  %v7323_v31 = vpack.c.bf16 %v3061_v50, %v3060_v2 }
 0x293   : > { %v2832_v15 = vpop.permute.xlu1 %2831  ;;  %v2575_v45 = vpop.permute.xlu0 %2574  ;;  %5459 = vmatprep.mubr.msk.bf16.mxu0 %vm2386_vm5, %v7323_v31  ;;  %5531 = vmatprep.mubr.msk.bf16.mxu1 %vm2386_vm5, %v7323_v31 }
 0x294   : > { %2743 = vst.msk [vmem:[#allocation3 + $0xe0] sm:$0xff] %vm2718_vm7, %v2575_v45  ;;  %v3063_v51 = vld [vmem:[#allocation3 + $0xb8] sm:$0xff] }
 0x295   : > { %3000 = vst.msk [vmem:[#allocation3 + $0xdf] sm:$0xff] %vm2975_vm9, %v2832_v15  ;;  %v7331_v16 = vpack.c.bf16 %v3063_v51, %v3062_v22 }
 0x297   : > { %v2834_v12 = vpop.permute.xlu1 %2833  ;;  %v2577_v35 = vpop.permute.xlu0 %2576  ;;  %5460 = vmatmul.mubr.msk.bf16.gmra.mrb[144].mxu0 %vm2386_vm5, %v7331_v16  ;;  %5532 = vmatmul.mubr.msk.bf16.gmra.mrb[84].mxu1 %vm2386_vm5, %v7331_v16 }
 0x298   : > { %2744 = vst.msk [vmem:[#allocation3 + $0xe8] sm:$0xff] %vm2718_vm7, %v2577_v35  ;;  %v3064_v24 = vld [vmem:[#allocation3 + $0xc0] sm:$0xff]  ;;  %v3065_v7 = vld [vmem:[#allocation3 + $0xc8] sm:$0xff]  ;;  %v3066_v43 = vld [vmem:[#allocation3 + $0xd0] sm:$0xff] }
 0x299   : > { %3001 = vst.msk [vmem:[#allocation3 + $0xe7] sm:$0xff] %vm2975_vm9, %v2834_v12  ;;  %3002 = vst.msk [vmem:[#allocation3 + $0xef] sm:$0xff] %vm2975_vm9, %v5859_v48  ;;  %v7341_v49 = vpack.c.bf16 %v3065_v7, %v3064_v24  ;;  %v5909_v24 = vunpack.i.l.bf16 %v7167_v63 }
 0x29b   : > { %v2840_v44 = vpop.permute.xlu1 %2839  ;;  %v2583_v25 = vpop.permute.xlu0 %2582  ;;  %5463 = vmatprep.mubr.msk.bf16.mxu0 %vm2386_vm5, %v7341_v49  ;;  %5535 = vmatprep.mubr.msk.bf16.mxu1 %vm2386_vm5, %v7341_v49 }
 0x29c   : > { %2747 = vst.msk [vmem:[#allocation3 + $0x100] sm:$0xff] %vm2718_vm7, %v2583_v25  ;;  %v3067_v38 = vld [vmem:[#allocation3 + $0xd8] sm:$0xff] }
 0x29d   : > { %3004 = vst.msk [vmem:[#allocation3 + $0xff] sm:$0xff] %vm2975_vm9, %v2840_v44  ;;  %v7349_v34 = vpack.c.bf16 %v3067_v38, %v3066_v43 }
 0x29f   : > { %v2842_v17 = vpop.permute.xlu1 %2841  ;;  %v2585_v1 = vpop.permute.xlu0 %2584  ;;  %5464 = vmatmul.mubr.msk.bf16.gmra.mrb[148].mxu0 %vm2386_vm5, %v7349_v34  ;;  %5536 = vmatmul.mubr.msk.bf16.gmra.mrb[88].mxu1 %vm2386_vm5, %v7349_v34 }
 0x2a0   : > { %2748 = vst.msk [vmem:[#allocation3 + $0x108] sm:$0xff] %vm2718_vm7, %v2585_v1  ;;  %v3068_v23 = vld [vmem:[#allocation3 + $0xe0] sm:$0xff]  ;;  %v3069_v8 = vld [vmem:[#allocation3 + $0xe8] sm:$0xff]  ;;  %v3070_v0 = vld [vmem:[#allocation3 + $0xf0] sm:$0xff] }
 0x2a1   : > { %3005 = vst.msk [vmem:[#allocation3 + $0x107] sm:$0xff] %vm2975_vm9, %v2842_v17  ;;  %3006 = vst.msk [vmem:[#allocation3 + $0x10f] sm:$0xff] %vm2975_vm9, %v5869_v54  ;;  %v7359_v29 = vpack.c.bf16 %v3069_v8, %v3068_v23  ;;  %v5919_v8 = vunpack.i.l.bf16 %v7183_v26 }
 0x2a3   : > { %v2848_v47 = vpop.permute.xlu1 %2847  ;;  %v2591_v32 = vpop.permute.xlu0 %2590  ;;  %5467 = vmatprep.mubr.msk.bf16.mxu0 %vm2386_vm5, %v7359_v29  ;;  %5539 = vmatprep.mubr.msk.bf16.mxu1 %vm2386_vm5, %v7359_v29 }
 0x2a4   : > { %2751 = vst.msk [vmem:[#allocation3 + $0x120] sm:$0xff] %vm2718_vm7, %v2591_v32  ;;  %v3071_v20 = vld [vmem:[#allocation3 + $0xf8] sm:$0xff] }
 0x2a5   : > { %3008 = vst.msk [vmem:[#allocation3 + $0x11f] sm:$0xff] %vm2975_vm9, %v2848_v47  ;;  %v7367_v41 = vpack.c.bf16 %v3071_v20, %v3070_v0 }
 0x2a7   : > { %v2850_v36 = vpop.permute.xlu1 %2849  ;;  %v2593_v60 = vpop.permute.xlu0 %2592  ;;  %5468 = vmatmul.mubr.msk.bf16.gmra.mrb[152].mxu0 %vm2386_vm5, %v7367_v41  ;;  %5540 = vmatmul.mubr.msk.bf16.gmra.mrb[92].mxu1 %vm2386_vm5, %v7367_v41 }
 0x2a8   : > { %2752 = vst.msk [vmem:[#allocation3 + $0x128] sm:$0xff] %vm2718_vm7, %v2593_v60  ;;  %v3072_v40 = vld [vmem:[#allocation3 + $0x100] sm:$0xff]  ;;  %v3073_v57 = vld [vmem:[#allocation3 + $0x108] sm:$0xff]  ;;  %v3074_v14 = vld [vmem:[#allocation3 + $0x110] sm:$0xff] }
 0x2a9   : > { %3009 = vst.msk [vmem:[#allocation3 + $0x127] sm:$0xff] %vm2975_vm9, %v2850_v36  ;;  %3010 = vst.msk [vmem:[#allocation3 + $0x12f] sm:$0xff] %vm2975_vm9, %v5879_v53  ;;  %v7377_v61 = vpack.c.bf16 %v3073_v57, %v3072_v40 }
 0x2ab   : > { %v2856_v5 = vpop.permute.xlu1 %2855  ;;  %v2599_v58 = vpop.permute.xlu0 %2598  ;;  %5471 = vmatprep.mubr.msk.bf16.mxu0 %vm2386_vm5, %v7377_v61  ;;  %5543 = vmatprep.mubr.msk.bf16.mxu1 %vm2386_vm5, %v7377_v61 }
 0x2ac   : > { %2755 = vst.msk [vmem:[#allocation3 + $0x140] sm:$0xff] %vm2718_vm7, %v2599_v58  ;;  %v3075_v62 = vld [vmem:[#allocation3 + $0x118] sm:$0xff] }
 0x2ad   : > { %3012 = vst.msk [vmem:[#allocation3 + $0x13f] sm:$0xff] %vm2975_vm9, %v2856_v5  ;;  %v7385_v42 = vpack.c.bf16 %v3075_v62, %v3074_v14  ;;  %v5929_v5 = vunpack.i.l.bf16 %v7199_v59 }
 0x2af   : > { %v2858_v4 = vpop.permute.xlu1 %2857  ;;  %v2601_v19 = vpop.permute.xlu0 %2600  ;;  %5472 = vmatmul.mubr.msk.bf16.gmra.mrb[156].mxu0 %vm2386_vm5, %v7385_v42  ;;  %5544 = vmatmul.mubr.msk.bf16.gmra.mrb[96].mxu1 %vm2386_vm5, %v7385_v42 }
 0x2b0   : > { %2756 = vst.msk [vmem:[#allocation3 + $0x148] sm:$0xff] %vm2718_vm7, %v2601_v19  ;;  %v3076_v9 = vld [vmem:[#allocation3 + $0x120] sm:$0xff]  ;;  %v3077_v3 = vld [vmem:[#allocation3 + $0x128] sm:$0xff]  ;;  %v3078_v28 = vld [vmem:[#allocation3 + $0x130] sm:$0xff] }
 0x2b1   : > { %3013 = vst.msk [vmem:[#allocation3 + $0x147] sm:$0xff] %vm2975_vm9, %v2858_v4  ;;  %3014 = vst.msk [vmem:[#allocation3 + $0x14f] sm:$0xff] %vm2975_vm9, %v5889_v10  ;;  %v7395_v46 = vpack.c.bf16 %v3077_v3, %v3076_v9 }
 0x2b3   : > { %v2864_v21 = vpop.permute.xlu1 %2863  ;;  %v2607_v33 = vpop.permute.xlu0 %2606  ;;  %5475 = vmatprep.mubr.msk.bf16.mxu0 %vm2386_vm5, %v7395_v46  ;;  %5547 = vmatprep.mubr.msk.bf16.mxu1 %vm2386_vm5, %v7395_v46 }
 0x2b4   : > { %2759 = vst.msk [vmem:[#allocation3 + $0x160] sm:$0xff] %vm2718_vm7, %v2607_v33  ;;  %v3079_v11 = vld [vmem:[#allocation3 + $0x138] sm:$0xff] }
 0x2b5   : > { %3016 = vst.msk [vmem:[#allocation3 + $0x15f] sm:$0xff] %vm2975_vm9, %v2864_v21  ;;  %v7403_v56 = vpack.c.bf16 %v3079_v11, %v3078_v28 }
 0x2b7   : > { %v2866_v2 = vpop.permute.xlu1 %2865  ;;  %v2609_v50 = vpop.permute.xlu0 %2608  ;;  %5476 = vmatmul.mubr.msk.bf16.gmra.mrb[160].mxu0 %vm2386_vm5, %v7403_v56  ;;  %5548 = vmatmul.mubr.msk.bf16.gmra.mrb[100].mxu1 %vm2386_vm5, %v7403_v56 }
 0x2b8   : > { %2760 = vst.msk [vmem:[#allocation3 + $0x168] sm:$0xff] %vm2718_vm7, %v2609_v50  ;;  %v3080_v15 = vld [vmem:[#allocation3 + $0x140] sm:$0xff]  ;;  %v3081_v45 = vld [vmem:[#allocation3 + $0x148] sm:$0xff]  ;;  %v3082_v48 = vld [vmem:[#allocation3 + $0x150] sm:$0xff] }
 0x2b9   : > { %3017 = vst.msk [vmem:[#allocation3 + $0x167] sm:$0xff] %vm2975_vm9, %v2866_v2  ;;  %3018 = vst.msk [vmem:[#allocation3 + $0x16f] sm:$0xff] %vm2975_vm9, %v5899_v30  ;;  %v7413_v22 = vpack.c.bf16 %v3081_v45, %v3080_v15 }
 0x2bb   : > { %v2872_v51 = vpop.permute.xlu1 %2871  ;;  %v2615_v18 = vpop.permute.xlu0 %2614  ;;  %5479 = vmatprep.mubr.msk.bf16.mxu0 %vm2386_vm5, %v7413_v22  ;;  %5551 = vmatprep.mubr.msk.bf16.mxu1 %vm2386_vm5, %v7413_v22 }
 0x2bc   : > { %2763 = vst.msk [vmem:[#allocation3 + $0x180] sm:$0xff] %vm2718_vm7, %v2615_v18  ;;  %v3083_v12 = vld [vmem:[#allocation3 + $0x158] sm:$0xff] }
 0x2bd   : > { %3020 = vst.msk [vmem:[#allocation3 + $0x17f] sm:$0xff] %vm2975_vm9, %v2872_v51  ;;  %v7421_v35 = vpack.c.bf16 %v3083_v12, %v3082_v48 }
 0x2bf   : > { %v2874_v7 = vpop.permute.xlu1 %2873  ;;  %v2617_v44 = vpop.permute.xlu0 %2616  ;;  %5480 = vmatmul.mubr.msk.bf16.gmra.mrb[164].mxu0 %vm2386_vm5, %v7421_v35  ;;  %5552 = vmatmul.mubr.msk.bf16.gmra.mrb[104].mxu1 %vm2386_vm5, %v7421_v35 }
 0x2c0   : > { %2764 = vst.msk [vmem:[#allocation3 + $0x188] sm:$0xff] %vm2718_vm7, %v2617_v44  ;;  %v3084_v25 = vld [vmem:[#allocation3 + $0x160] sm:$0xff]  ;;  %v3085_v43 = vld [vmem:[#allocation3 + $0x168] sm:$0xff]  ;;  %v3086_v17 = vld [vmem:[#allocation3 + $0x170] sm:$0xff] }
 0x2c1   : > { %3021 = vst.msk [vmem:[#allocation3 + $0x187] sm:$0xff] %vm2975_vm9, %v2874_v7  ;;  %3022 = vst.msk [vmem:[#allocation3 + $0x18f] sm:$0xff] %vm2975_vm9, %v5909_v24  ;;  %v7431_v38 = vpack.c.bf16 %v3085_v43, %v3084_v25 }
 0x2c3   : > { %v2880_v54 = vpop.permute.xlu1 %2879  ;;  %v2623_v63 = vpop.permute.xlu0 %2622  ;;  %5483 = vmatprep.mubr.msk.bf16.mxu0 %vm2386_vm5, %v7431_v38  ;;  %5555 = vmatprep.mubr.msk.bf16.mxu1 %vm2386_vm5, %v7431_v38 }
 0x2c4   : > { %2767 = vst.msk [vmem:[#allocation3 + $0x1a0] sm:$0xff] %vm2718_vm7, %v2623_v63  ;;  %v3087_v1 = vld [vmem:[#allocation3 + $0x178] sm:$0xff] }
 0x2c5   : > { %3024 = vst.msk [vmem:[#allocation3 + $0x19f] sm:$0xff] %vm2975_vm9, %v2880_v54  ;;  %v7439_v23 = vpack.c.bf16 %v3087_v1, %v3086_v17 }
 0x2c7   : > { %v2882_v47 = vpop.permute.xlu1 %2881  ;;  %v2625_v32 = vpop.permute.xlu0 %2624  ;;  %5484 = vmatmul.mubr.msk.bf16.gmra.mrb[168].mxu0 %vm2386_vm5, %v7439_v23  ;;  %5556 = vmatmul.mubr.msk.bf16.gmra.mrb[108].mxu1 %vm2386_vm5, %v7439_v23 }
 0x2c8   : > { %2768 = vst.msk [vmem:[#allocation3 + $0x1a8] sm:$0xff] %vm2718_vm7, %v2625_v32  ;;  %v3088_v0 = vld [vmem:[#allocation3 + $0x180] sm:$0xff]  ;;  %v3089_v20 = vld [vmem:[#allocation3 + $0x188] sm:$0xff]  ;;  %v3090_v60 = vld [vmem:[#allocation3 + $0x190] sm:$0xff] }
 0x2c9   : > { %3025 = vst.msk [vmem:[#allocation3 + $0x1a7] sm:$0xff] %vm2975_vm9, %v2882_v47  ;;  %3026 = vst.msk [vmem:[#allocation3 + $0x1af] sm:$0xff] %vm2975_vm9, %v5919_v8  ;;  %v7449_v53 = vpack.c.bf16 %v3089_v20, %v3088_v0 }
 0x2cb   : > { %v2888_v36 = vpop.permute.xlu1 %2887  ;;  %v2631_v26 = vpop.permute.xlu0 %2630  ;;  %5487 = vmatprep.mubr.msk.bf16.mxu0 %vm2386_vm5, %v7449_v53  ;;  %5559 = vmatprep.mubr.msk.bf16.mxu1 %vm2386_vm5, %v7449_v53 }
 0x2cc   : > { %2771 = vst.msk [vmem:[#allocation3 + $0x1c0] sm:$0xff] %vm2718_vm7, %v2631_v26  ;;  %v3091_v40 = vld [vmem:[#allocation3 + $0x198] sm:$0xff] }
 0x2cd   : > { %3028 = vst.msk [vmem:[#allocation3 + $0x1bf] sm:$0xff] %vm2975_vm9, %v2888_v36  ;;  %v7457_v57 = vpack.c.bf16 %v3091_v40, %v3090_v60 }
 0x2cf   : > { %v2890_v58 = vpop.permute.xlu1 %2889  ;;  %v2633_v14 = vpop.permute.xlu0 %2632  ;;  %5488 = vmatmul.mubr.msk.bf16.gmra.mrb[172].mxu0 %vm2386_vm5, %v7457_v57  ;;  %5560 = vmatmul.mubr.msk.bf16.gmra.mrb[112].mxu1 %vm2386_vm5, %v7457_v57 }
 0x2d0   : > { %2772 = vst.msk [vmem:[#allocation3 + $0x1c8] sm:$0xff] %vm2718_vm7, %v2633_v14  ;;  %v3092_v62 = vld [vmem:[#allocation3 + $0x1a0] sm:$0xff]  ;;  %v3093_v10 = vld [vmem:[#allocation3 + $0x1a8] sm:$0xff]  ;;  %v3094_v9 = vld [vmem:[#allocation3 + $0x1b0] sm:$0xff] }
 0x2d1   : > { %3029 = vst.msk [vmem:[#allocation3 + $0x1c7] sm:$0xff] %vm2975_vm9, %v2890_v58  ;;  %3030 = vst.msk [vmem:[#allocation3 + $0x1cf] sm:$0xff] %vm2975_vm9, %v5929_v5  ;;  %v7467_v4 = vpack.c.bf16 %v3093_v10, %v3092_v62 }
 0x2d3   : > { %v2896_v19 = vpop.permute.xlu1 %2895  ;;  %v2639_v59 = vpop.permute.xlu0 %2638  ;;  %5491 = vmatprep.mubr.msk.bf16.mxu0 %vm2386_vm5, %v7467_v4  ;;  %5563 = vmatprep.mubr.msk.bf16.mxu1 %vm2386_vm5, %v7467_v4 }
 0x2d4   : > { %2775 = vst.msk [vmem:[#allocation3 + $0x1e0] sm:$0xff] %vm2718_vm7, %v2639_v59  ;;  %v3095_v3 = vld [vmem:[#allocation3 + $0x1b8] sm:$0xff] }
 0x2d5   : > { %3032 = vst.msk [vmem:[#allocation3 + $0x1df] sm:$0xff] %vm2975_vm9, %v2896_v19  ;;  %v7475_v21 = vpack.c.bf16 %v3095_v3, %v3094_v9 }
 0x2d7   : > { %v2898_v33 = vpop.permute.xlu1 %2897  ;;  %v2641_v28 = vpop.permute.xlu0 %2640  ;;  %5492 = vmatmul.mubr.msk.bf16.gmra.mrb[176].mxu0 %vm2386_vm5, %v7475_v21  ;;  %5564 = vmatmul.mubr.msk.bf16.gmra.mrb[116].mxu1 %vm2386_vm5, %v7475_v21 }
 0x2d8   : > { %2776 = vst.msk [vmem:[#allocation3 + $0x1e8] sm:$0xff] %vm2718_vm7, %v2641_v28  ;;  %v3096_v11 = vld [vmem:[#allocation3 + $0x1c0] sm:$0xff]  ;;  %v3097_v30 = vld [vmem:[#allocation3 + $0x1c8] sm:$0xff]  ;;  %v3098_v45 = vld [vmem:[#allocation3 + $0x1d0] sm:$0xff] }
 0x2d9   : > { %3033 = vst.msk [vmem:[#allocation3 + $0x1e7] sm:$0xff] %vm2975_vm9, %v2898_v33  ;;  %v7483_v2 = vpack.c.bf16 %v3097_v30, %v3096_v11 }
 0x2db   : > { %v2904_v50 = vpop.permute.xlu1 %2903  ;;  %v2647_v15 = vpop.permute.xlu0 %2646  ;;  %5495 = vmatprep.mubr.msk.bf16.mxu0 %vm2386_vm5, %v7483_v2  ;;  %5567 = vmatprep.mubr.msk.bf16.mxu1 %vm2386_vm5, %v7483_v2 }
 0x2dc   : > { %2779 = vst.msk [vmem:[#allocation3 + $0x200] sm:$0xff] %vm2718_vm7, %v2647_v15  ;;  %v3099_v51 = vld [vmem:[#allocation3 + $0x1d8] sm:$0xff] }
 0x2dd   : > { %3036 = vst.msk [vmem:[#allocation3 + $0x1ff] sm:$0xff] %vm2975_vm9, %v2904_v50  ;;  %v7491_v18 = vpack.c.bf16 %v3099_v51, %v3098_v45 }
 0x2df   : > { %v5938_v48 = vpop.permute.xlu0 %5937  ;;  %5496 = vmatmul.mubr.msk.bf16.gmra.mrb[180].mxu0 %vm2386_vm5, %v7491_v18  ;;  %5568 = vmatmul.mubr.msk.bf16.gmra.mrb[120].mxu1 %vm2386_vm5, %v7491_v18  ;;  %v5943_v12 = vpop.permute.xlu1 %5942 }
 0x2e0   : > { %v5940_v24 = vunpack.i.h.bf16 %v5938_v48  ;;  %v5939_v7 = vunpack.i.l.bf16 %v5938_v48  ;;  %v5945_v44 = vunpack.i.h.bf16 %v5943_v12  ;;  %v5944_v25 = vunpack.i.l.bf16 %v5943_v12  ;;  %v3100_v8 = vld [vmem:[#allocation3 + $0x1e0] sm:$0xff] }
 0x2e2   : > { %3035 = vst.msk [vmem:[#allocation3 + $0x1f7] sm:$0xff] %vm2975_vm9, %v5940_v24  ;;  %3034 = vst.msk [vmem:[#allocation3 + $0x1ef] sm:$0xff] %vm2975_vm9, %v5939_v7 }
 0x2e3   : > { %2782 = vst.msk [vmem:[#allocation3 + $0x218] sm:$0xff] %vm2718_vm7, %v5945_v44  ;;  %2781 = vst.msk [vmem:[#allocation3 + $0x210] sm:$0xff] %vm2718_vm7, %v5944_v25  ;;  %v2649_v43 = vpop.permute.xlu0 %2648  ;;  %v5948_v54 = vpop.permute.xlu1 %5947 }
 0x2e4   : > { %2780 = vst.msk [vmem:[#allocation3 + $0x208] sm:$0xff] %vm2718_vm7, %v2649_v43  ;;  %v5950_v63 = vunpack.i.h.bf16 %v5948_v54  ;;  %v5949_v17 = vunpack.i.l.bf16 %v5948_v54 }
 0x2e6   : > { %3038 = vst.msk [vmem:[#allocation3 + $0x20f] sm:$0xff] %vm2975_vm9, %v5949_v17  ;;  %3039 = vst.msk [vmem:[#allocation3 + $0x217] sm:$0xff] %vm2975_vm9, %v5950_v63 }
 0x2e7   : > { %v2906_v1 = vpop.permute.xlu0 %2905 }
 0x2e8   : > { %3037 = vst.msk [vmem:[#allocation3 + $0x207] sm:$0xff] %vm2975_vm9, %v2906_v1 }
 0x2e9   : > { %v3101_v47 = vld [vmem:[#allocation3 + $0x1e8] sm:$0xff]  ;;  %v3102_v32 = vld [vmem:[#allocation3 + $0x1f0] sm:$0xff]  ;;  %v3103_v0 = vld [vmem:[#allocation3 + $0x1f8] sm:$0xff] }
 0x2ea   : > { %v3134_v20 = vpack.c.bf16 %v3101_v47, %v3100_v8  ;;  %v3135_v36 = vpack.c.bf16 %v3103_v0, %v3102_v32 }
 0x2ec   : > { %5499 = vmatprep.mubr.msk.bf16.mxu0 %vm2386_vm5, %v3134_v20  ;;  %5571 = vmatprep.mubr.msk.bf16.mxu1 %vm2386_vm5, %v3134_v20 }
 0x2ed   : > { %5500 = vmatmul.mubr.msk.bf16.gmra.mrb[184].mxu0 %vm2386_vm5, %v3135_v36  ;;  %5572 = vmatmul.mubr.msk.bf16.gmra.mrb[124].mxu1 %vm2386_vm5, %v3135_v36  ;;  %v3141_v26 = vld [vmem:[#allocation3 + $0x210] sm:$0xff]  ;;  %v3142_v60 = vld [vmem:[#allocation3 + $0x218] sm:$0xff] }
 0x2ee   : > { %5579 = vmatprep.mubr.msk.bf16.mxu1 %vm2386_vm5, %v7269_v52  ;;  %v3144_v14 = vpack.c.bf16 %v3142_v60, %v3141_v26 }
 0x2ef   : > { %v3139_v40 = vld [vmem:[#allocation3 + $0x200] sm:$0xff]  ;;  %v3140_v5 = vld [vmem:[#allocation3 + $0x208] sm:$0xff] }
 0x2f0   : > { %v3143_v58 = vpack.c.bf16 %v3140_v5, %v3139_v40 }
 0x2f2   : > { %5503 = vmatprep.mubr.msk.bf16.mxu0 %vm2386_vm5, %v3143_v58 }
 0x2f5   : > { %5580 = vmatmul.mubr.msk.bf16.vlgmr.msra.gmra.mrb[64].mxu1 %vm2386_vm5, %v7277_v27  ;;  %5504 = vmatmul.mubr.msk.bf16.gmra.mrb[188].mxu0 %vm2386_vm5, %v3144_v14 }
 0x2f6   : > { %5583 = vmatprep.mubr.msk.bf16.mxu1 %vm2386_vm5, %v7287_v39 }
 0x2fd   : > { %5584 = vmatmul.mubr.msk.bf16.gmra.mrb[68].mxu1 %vm2386_vm5, %v7295_v13 }
 0x2fe   : > { %5587 = vmatprep.mubr.msk.bf16.mxu1 %vm2386_vm5, %v7305_v6 }
 0x305   : > { %5588 = vmatmul.mubr.msk.bf16.gmra.mrb[72].mxu1 %vm2386_vm5, %v7313_v37 }
 0x306   : > { %5591 = vmatprep.mubr.msk.bf16.mxu1 %vm2386_vm5, %v7323_v31 }
 0x30d   : > { %5592 = vmatmul.mubr.msk.bf16.gmra.mrb[76].mxu1 %vm2386_vm5, %v7331_v16 }
 0x30e   : > { %5595 = vmatprep.mubr.msk.bf16.mxu1 %vm2386_vm5, %v7341_v49 }
 0x315   : > { %5596 = vmatmul.mubr.msk.bf16.gmra.mrb[80].mxu1 %vm2386_vm5, %v7349_v34 }
 0x316   : > { %5599 = vmatprep.mubr.msk.bf16.mxu1 %vm2386_vm5, %v7359_v29 }
 0x31d   : > { %5600 = vmatmul.mubr.msk.bf16.gmra.mrb[84].mxu1 %vm2386_vm5, %v7367_v41 }
 0x31e   : > { %5603 = vmatprep.mubr.msk.bf16.mxu1 %vm2386_vm5, %v7377_v61  ;;  %v3914_v61 = vld [vmem:[#allocation3 + $0x220] sm:$0xff] }
 0x325   : > { %5604 = vmatmul.mubr.msk.bf16.gmra.mrb[88].mxu1 %vm2386_vm5, %v7385_v42  ;;  %v3915_v42 = vld [vmem:[#allocation3 + $0x228] sm:$0xff] }
 0x326   : > { %5607 = vmatprep.mubr.msk.bf16.mxu1 %vm2386_vm5, %v7395_v46 }
 0x32d   : > { %5608 = vmatmul.mubr.msk.bf16.gmra.mrb[92].mxu1 %vm2386_vm5, %v7403_v56  ;;  %v3948_v56 = vpack.c.bf16 %v3915_v42, %v3914_v61 }
 0x32e   : > { %5611 = vmatprep.mubr.msk.bf16.mxu1 %vm2386_vm5, %v7413_v22 }
 0x335   : > { %5612 = vmatmul.mubr.msk.bf16.gmra.mrb[96].mxu1 %vm2386_vm5, %v7421_v35 }
 0x336   : > { %5615 = vmatprep.mubr.msk.bf16.mxu1 %vm2386_vm5, %v7431_v38 }
 0x33d   : > { %5616 = vmatmul.mubr.msk.bf16.gmra.mrb[100].mxu1 %vm2386_vm5, %v7439_v23  ;;  %v3916_v23 = vld [vmem:[#allocation3 + $0x230] sm:$0xff] }
 0x33e   : > { %5619 = vmatprep.mubr.msk.bf16.mxu1 %vm2386_vm5, %v7449_v53  ;;  %v3917_v53 = vld [vmem:[#allocation3 + $0x238] sm:$0xff] }
 0x345   : > { %5620 = vmatmul.mubr.msk.bf16.gmra.mrb[104].mxu1 %vm2386_vm5, %v7457_v57  ;;  %v3949_v57 = vpack.c.bf16 %v3917_v53, %v3916_v23 }
 0x346   : > { %5623 = vmatprep.mubr.msk.bf16.mxu1 %vm2386_vm5, %v7467_v4 }
 0x34a   : > { %v5445_v52 = vpop.f32.mrb[128].mxu0 }
 0x34b   : > { %v7557_v27 = vpop.f32.mrb[129].mxu0 }
 0x34c   : > { %v5446_v39 = vpop.f32.mrb[130].mxu0 }
 0x34d   : > { %v7559_v13 = vpop.f32.mrb[131].mxu0  ;;  %5624 = vmatmul.mubr.msk.bf16.gmra.mrb[108].mxu1 %vm2386_vm5, %v7475_v21 }
 0x34e   : > { %5627 = vmatprep.mubr.msk.bf16.mxu1 %vm2386_vm5, %v7483_v2 }
 0x352   : > { %v5449_v6 = vpop.f32.mrb[132].mxu0 }
 0x353   : > { %v7565_v37 = vpop.f32.mrb[133].mxu0 }
 0x354   : > { %v5450_v31 = vpop.f32.mrb[134].mxu0 }
 0x355   : > { %v7567_v16 = vpop.f32.mrb[135].mxu0  ;;  %5628 = vmatmul.mubr.msk.bf16.gmra.mrb[112].mxu1 %vm2386_vm5, %v7491_v18  ;;  %v7696_v31 = vld [vmem:[%s7821_s4] ss:$0 sm:$0xff] }
 0x356   : > { %5631 = vmatprep.mubr.msk.bf16.mxu1 %vm2386_vm5, %v3134_v20 }
 0x35a   : > { %v5453_v49 = vpop.f32.mrb[136].mxu0 }
 0x35b   : > { %v7573_v34 = vpop.f32.mrb[137].mxu0 }
 0x35c   : > { %v5454_v29 = vpop.f32.mrb[138].mxu0 }
 0x35d   : > { %v7580_v41 = vpop.f32.mrb[139].mxu0  ;;  %5632 = vmatmul.mubr.msk.bf16.gmra.mrb[116].mxu1 %vm2386_vm5, %v3135_v36 }
 0x35e   : > { %5635 = vmatprep.mubr.msk.bf16.mxu1 %vm2386_vm5, %v3143_v58 }
 0x362   : > { %v5457_v46 = vpop.f32.mrb[140].mxu0 }
 0x363   : > { %v7602_v22 = vpop.f32.mrb[141].mxu0 }
 0x364   : > { %v5458_v35 = vpop.f32.mrb[142].mxu0 }
 0x365   : > { %v7604_v38 = vpop.f32.mrb[143].mxu0  ;;  %5636 = vmatmul.mubr.msk.bf16.gmra.mrb[120].mxu1 %vm2386_vm5, %v3144_v14 }
 0x366   : > { %5639 = vmatprep.mubr.msk.bf16.mxu1 %vm2386_vm5, %v3948_v56 }
 0x36a   : > { %v5461_v62 = vpop.f32.mrb[144].mxu0 }
 0x36b   : > { %v7648_v10 = vpop.f32.mrb[145].mxu0 }
 0x36c   : > { %v5462_v4 = vpop.f32.mrb[146].mxu0 }
 0x36d   : > { %v7650_v19 = vpop.f32.mrb[147].mxu0  ;;  %5640 = vmatmul.mubr.msk.bf16.gmra.mrb[124].mxu1 %vm2386_vm5, %v3949_v57 }
 0x372   : > { %v5465_v59 = vpop.f32.mrb[148].mxu0 }
 0x373   : > { %v7653_v9 = vpop.f32.mrb[149].mxu0 }
 0x374   : > { %v5466_v3 = vpop.f32.mrb[150].mxu0 }
 0x375   : > { %v7655_v21 = vpop.f32.mrb[151].mxu0 }
 0x37a   : > { %v5469_v55 = vpop.f32.mrb[152].mxu0 }
 0x37b   : > { %v7657_v33 = vpop.f32.mrb[153].mxu0 }
 0x37c   : > { %v5470_v28 = vpop.f32.mrb[154].mxu0 }
 0x37d   : > { %v7659_v11 = vpop.f32.mrb[155].mxu0 }
 0x382   : > { %v5473_v30 = vpop.f32.mrb[156].mxu0 }
 0x383   : > { %v7661_v2 = vpop.f32.mrb[157].mxu0 }
 0x384   : > { %v5474_v50 = vpop.f32.mrb[158].mxu0 }
 0x385   : > { %v7663_v15 = vpop.f32.mrb[159].mxu0 }
 0x38a   : > { %v5477_v45 = vpop.f32.mrb[160].mxu0 }
 0x38b   : > { %v7665_v51 = vpop.f32.mrb[161].mxu0 }
 0x38c   : > { %v5478_v18 = vpop.f32.mrb[162].mxu0 }
 0x38d   : > { %v7667_v48 = vpop.f32.mrb[163].mxu0 }
 0x392   : > { %v5481_v12 = vpop.f32.mrb[164].mxu0 }
 0x393   : > { %v7669_v24 = vpop.f32.mrb[165].mxu0 }
 0x394   : > { %v5482_v7 = vpop.f32.mrb[166].mxu0 }
 0x395   : > { %v7671_v44 = vpop.f32.mrb[167].mxu0 }
 0x39a   : > { %v5485_v25 = vpop.f32.mrb[168].mxu0 }
 0x39b   : > { %v7673_v43 = vpop.f32.mrb[169].mxu0 }
 0x39c   : > { %v5486_v54 = vpop.f32.mrb[170].mxu0 }
 0x39d   : > { %v7675_v63 = vpop.f32.mrb[171].mxu0 }
 0x3a2   : > { %v5489_v17 = vpop.f32.mrb[172].mxu0 }
 0x3a3   : > { %v7677_v1 = vpop.f32.mrb[173].mxu0 }
 0x3a4   : > { %v5490_v8 = vpop.f32.mrb[174].mxu0 }
 0x3a5   : > { %v7679_v47 = vpop.f32.mrb[175].mxu0 }
 0x3aa   : > { %v5493_v32 = vpop.f32.mrb[176].mxu0 }
 0x3ab   : > { %v7681_v0 = vpop.f32.mrb[177].mxu0 }
 0x3ac   : > { %v5494_v20 = vpop.f32.mrb[178].mxu0 }
 0x3ad   : > { %v7683_v36 = vpop.f32.mrb[179].mxu0 }
 0x3b2   : > { %v5497_v26 = vpop.f32.mrb[180].mxu0 }
 0x3b3   : > { %v7685_v60 = vpop.f32.mrb[181].mxu0 }
 0x3b4   : > { %v5498_v40 = vpop.f32.mrb[182].mxu0 }
 0x3b5   : > { %v7687_v5 = vpop.f32.mrb[183].mxu0 }
 0x3c0   : > { %v5501_v58 = vpop.f32.mrb[184].mxu0 }
 0x3c1   : > { %v7689_v14 = vpop.f32.mrb[185].mxu0 }
 0x3c2   : > { %v5502_v52 = vpop.f32.mrb[186].mxu0 }
 0x3c3   : > { %v7691_v39 = vpop.f32.mrb[187].mxu0 }
 0x3c8   : > { %v5581_v6 = vpop.f32.mrb[64].mxu1  ;;  %v5505_v49 = vpop.f32.mrb[188].mxu0 }
 0x3c9   : > { %v4096_v29 = vpop.f32.mrb[65].mxu1  ;;  %v7698_v61 = vpop.f32.mrb[189].mxu0 }
 0x3ca   : > { %v5644_v42 = vadd.f32 %v4096_v29, %v7557_v27  ;;  %v5582_v46 = vpop.f32.mrb[66].mxu1  ;;  %v5506_v56 = vpop.f32.mrb[190].mxu0 }
 0x3cb   : > { %v4099_v35 = vpop.f32.mrb[67].mxu1  ;;  %v7701_v23 = vpop.f32.mrb[191].mxu0 }
 0x3cc   : > { %v4422_v53 = vadd.f32 %v5644_v42, %v7696_v31  ;;  %v5646_v57 = vadd.f32 %v4099_v35, %v7559_v13 }
 0x3ce   : > { %v4486_v62 = vmax.f32 %v4422_v53, 0.0  ;;  %v4423_v4 = vadd.f32 %v5646_v57, %v7696_v31 }
 0x3d0   : > { %4550 = vst.msk [vmem:[#allocation4] sm:$0xff] %vm2397_vm6, %v4486_v62  ;;  %v4487_v59 = vmax.f32 %v4423_v4, 0.0  ;;  %v5585_v3 = vpop.f32.mrb[68].mxu1 }
 0x3d1   : > { %v4112_v55 = vpop.f32.mrb[69].mxu1 }
 0x3d2   : > { %4551 = vst.msk [vmem:[#allocation4 + $0x8] sm:$0xff] %vm2397_vm6, %v4487_v59  ;;  %v5648_v27 = vadd.f32 %v4112_v55, %v7565_v37  ;;  %v5586_v28 = vpop.f32.mrb[70].mxu1 }
 0x3d3   : > { %v4115_v30 = vpop.f32.mrb[71].mxu1 }
 0x3d4   : > { %v4426_v50 = vadd.f32 %v5648_v27, %v7696_v31  ;;  %v5650_v45 = vadd.f32 %v4115_v30, %v7567_v16 }
 0x3d6   : > { %v4490_v18 = vmax.f32 %v4426_v50, 0.0  ;;  %v4427_v13 = vadd.f32 %v5650_v45, %v7696_v31 }
 0x3d8   : > { %4554 = vst.msk [vmem:[#allocation4 + $0x20] sm:$0xff] %vm2397_vm6, %v4490_v18  ;;  %v4491_v12 = vmax.f32 %v4427_v13, 0.0  ;;  %v5589_v7 = vpop.f32.mrb[72].mxu1 }
 0x3d9   : > { %v4128_v25 = vpop.f32.mrb[73].mxu1  ;;  %v4614_v26 = vld [vmem:[#allocation4] ss:$2 sm:$0xff]  ;;  %v4646_v40 = vld [vmem:[#allocation4 + $0x1] ss:$2 sm:$0xff] }
 0x3da   : > { %4555 = vst.msk [vmem:[#allocation4 + $0x28] sm:$0xff] %vm2397_vm6, %v4491_v12  ;;  %v5652_v54 = vadd.f32 %v4128_v25, %v7573_v34  ;;  %v5590_v17 = vpop.f32.mrb[74].mxu1  ;;  %v4677_v34 = vmax.f32 %v4614_v26, %v4646_v40 }
 0x3db   : > { %v4131_v37 = vpop.f32.mrb[75].mxu1 }
 0x3dc   : > { %v4430_v8 = vadd.f32 %v5652_v54, %v7696_v31  ;;  %v5654_v32 = vadd.f32 %v4131_v37, %v7580_v41 }
 0x3de   : > { %v4494_v20 = vmax.f32 %v4430_v8, 0.0  ;;  %v4431_v16 = vadd.f32 %v5654_v32, %v7696_v31 }
 0x3e0   : > { %4558 = vst.msk [vmem:[#allocation4 + $0x40] sm:$0xff] %vm2397_vm6, %v4494_v20  ;;  %v4495_v58 = vmax.f32 %v4431_v16, 0.0  ;;  %v5593_v52 = vpop.f32.mrb[76].mxu1 }
 0x3e1   : > { %v4616_v6 = vld [vmem:[#allocation4 + $0x20] ss:$2 sm:$0xff]  ;;  %v4648_v49 = vld [vmem:[#allocation4 + $0x21] ss:$2 sm:$0xff]  ;;  %v4144_v29 = vpop.f32.mrb[77].mxu1 }
 0x3e2   : > { %v4678_v42 = vmax.f32 %v4616_v6, %v4648_v49  ;;  %4559 = vst.msk [vmem:[#allocation4 + $0x48] sm:$0xff] %vm2397_vm6, %v4495_v58  ;;  %v5656_v46 = vadd.f32 %v4144_v29, %v7602_v22  ;;  %v5594_v41 = vpop.f32.mrb[78].mxu1 }
 0x3e3   : > { %v4147_v56 = vpop.f32.mrb[79].mxu1 }
 0x3e4   : > { %v4693_v35 = vmax.f32 %v4677_v34, %v4678_v42  ;;  %v4434_v53 = vadd.f32 %v5656_v46, %v7696_v31  ;;  %v5658_v57 = vadd.f32 %v4147_v56, %v7604_v38 }
 0x3e6   : > { %5030 = vst.msk [vmem:[%s7578_s27 + $0x11] sm:$0xff] %vm2397_vm6, %v4693_v35  ;;  %v4498_v62 = vmax.f32 %v4434_v53, 0.0  ;;  %v4435_v4 = vadd.f32 %v5658_v57, %v7696_v31 }
 0x3e8   : > { %4562 = vst.msk [vmem:[#allocation4 + $0x60] sm:$0xff] %vm2397_vm6, %v4498_v62  ;;  %v4499_v59 = vmax.f32 %v4435_v4, 0.0  ;;  %v5597_v3 = vpop.f32.mrb[80].mxu1 }
 0x3e9   : > { %v4160_v55 = vpop.f32.mrb[81].mxu1  ;;  %v4618_v18 = vld [vmem:[#allocation4 + $0x40] ss:$2 sm:$0xff]  ;;  %v4650_v13 = vld [vmem:[#allocation4 + $0x41] ss:$2 sm:$0xff] }
 0x3ea   : > { %4563 = vst.msk [vmem:[#allocation4 + $0x68] sm:$0xff] %vm2397_vm6, %v4499_v59  ;;  %v5660_v22 = vadd.f32 %v4160_v55, %v7648_v10  ;;  %v5598_v27 = vpop.f32.mrb[82].mxu1  ;;  %v4679_v10 = vmax.f32 %v4618_v18, %v4650_v13 }
 0x3eb   : > { %v4163_v28 = vpop.f32.mrb[83].mxu1 }
 0x3ec   : > { %v4438_v30 = vadd.f32 %v5660_v22, %v7696_v31  ;;  %v5662_v38 = vadd.f32 %v4163_v28, %v7650_v19 }
 0x3ee   : > { %v4502_v50 = vmax.f32 %v4438_v30, 0.0  ;;  %v4439_v45 = vadd.f32 %v5662_v38, %v7696_v31 }
 0x3f0   : > { %4566 = vst.msk [vmem:[#allocation4 + $0x80] sm:$0xff] %vm2397_vm6, %v4502_v50  ;;  %v4503_v12 = vmax.f32 %v4439_v45, 0.0  ;;  %v5601_v7 = vpop.f32.mrb[84].mxu1 }
 0x3f1   : > { %v4620_v25 = vld [vmem:[#allocation4 + $0x60] ss:$2 sm:$0xff]  ;;  %v4652_v54 = vld [vmem:[#allocation4 + $0x61] ss:$2 sm:$0xff]  ;;  %v4176_v17 = vpop.f32.mrb[85].mxu1 }
 0x3f2   : > { %v4680_v37 = vmax.f32 %v4620_v25, %v4652_v54  ;;  %4567 = vst.msk [vmem:[#allocation4 + $0x88] sm:$0xff] %vm2397_vm6, %v4503_v12  ;;  %v5664_v8 = vadd.f32 %v4176_v17, %v7653_v9  ;;  %v5602_v19 = vpop.f32.mrb[86].mxu1 }
 0x3f3   : > { %v4179_v32 = vpop.f32.mrb[87].mxu1 }
 0x3f4   : > { %v4694_v20 = vmax.f32 %v4679_v10, %v4680_v37  ;;  %v4442_v16 = vadd.f32 %v5664_v8, %v7696_v31  ;;  %v5666_v26 = vadd.f32 %v4179_v32, %v7655_v21 }
 0x3f6   : > { %5031 = vst.msk [vmem:[%s7578_s27 + $0x21] sm:$0xff] %vm2397_vm6, %v4694_v20  ;;  %v4506_v40 = vmax.f32 %v4442_v16, 0.0  ;;  %v4443_v58 = vadd.f32 %v5666_v26, %v7696_v31 }
 0x3f8   : > { %4570 = vst.msk [vmem:[#allocation4 + $0xa0] sm:$0xff] %vm2397_vm6, %v4506_v40  ;;  %v4507_v52 = vmax.f32 %v4443_v58, 0.0  ;;  %v5605_v6 = vpop.f32.mrb[88].mxu1 }
 0x3f9   : > { %v4192_v49 = vpop.f32.mrb[89].mxu1  ;;  %v4622_v56 = vld [vmem:[#allocation4 + $0x80] ss:$2 sm:$0xff]  ;;  %v4654_v35 = vld [vmem:[#allocation4 + $0x81] ss:$2 sm:$0xff] }
 0x3fa   : > { %4571 = vst.msk [vmem:[#allocation4 + $0xa8] sm:$0xff] %vm2397_vm6, %v4507_v52  ;;  %v5668_v9 = vadd.f32 %v4192_v49, %v7657_v33  ;;  %v5606_v29 = vpop.f32.mrb[90].mxu1  ;;  %v4681_v33 = vmax.f32 %v4622_v56, %v4654_v35 }
 0x3fb   : > { %v4195_v34 = vpop.f32.mrb[91].mxu1 }
 0x3fc   : > { %v4446_v42 = vadd.f32 %v5668_v9, %v7696_v31  ;;  %v5670_v21 = vadd.f32 %v4195_v34, %v7659_v11 }
 0x3fe   : > { %v4510_v46 = vmax.f32 %v4446_v42, 0.0  ;;  %v4447_v41 = vadd.f32 %v5670_v21, %v7696_v31 }
 0x400   : > { %4574 = vst.msk [vmem:[#allocation4 + $0xc0] sm:$0xff] %vm2397_vm6, %v4510_v46  ;;  %v4511_v53 = vmax.f32 %v4447_v41, 0.0  ;;  %v5609_v57 = vpop.f32.mrb[92].mxu1 }
 0x401   : > { %v4624_v62 = vld [vmem:[#allocation4 + $0xa0] ss:$2 sm:$0xff]  ;;  %v4656_v4 = vld [vmem:[#allocation4 + $0xa1] ss:$2 sm:$0xff]  ;;  %v4208_v59 = vpop.f32.mrb[93].mxu1 }
 0x402   : > { %v4682_v3 = vmax.f32 %v4624_v62, %v4656_v4  ;;  %4575 = vst.msk [vmem:[#allocation4 + $0xc8] sm:$0xff] %vm2397_vm6, %v4511_v53  ;;  %v5672_v55 = vadd.f32 %v4208_v59, %v7661_v2  ;;  %v5610_v11 = vpop.f32.mrb[94].mxu1 }
 0x403   : > { %v4211_v22 = vpop.f32.mrb[95].mxu1 }
 0x404   : > { %v4695_v27 = vmax.f32 %v4681_v33, %v4682_v3  ;;  %v4450_v28 = vadd.f32 %v5672_v55, %v7696_v31  ;;  %v5674_v30 = vadd.f32 %v4211_v22, %v7663_v15 }
 0x406   : > { %5032 = vst.msk [vmem:[%s7578_s27 + $0x31] sm:$0xff] %vm2397_vm6, %v4695_v27  ;;  %v4514_v38 = vmax.f32 %v4450_v28, 0.0  ;;  %v4451_v50 = vadd.f32 %v5674_v30, %v7696_v31 }
 0x408   : > { %4578 = vst.msk [vmem:[#allocation4 + $0xe0] sm:$0xff] %vm2397_vm6, %v4514_v38  ;;  %v4515_v45 = vmax.f32 %v4451_v50, 0.0  ;;  %v5613_v18 = vpop.f32.mrb[96].mxu1 }
 0x409   : > { %v4224_v13 = vpop.f32.mrb[97].mxu1  ;;  %v4626_v10 = vld [vmem:[#allocation4 + $0xc0] ss:$2 sm:$0xff]  ;;  %v4658_v37 = vld [vmem:[#allocation4 + $0xc1] ss:$2 sm:$0xff] }
 0x40a   : > { %4579 = vst.msk [vmem:[#allocation4 + $0xe8] sm:$0xff] %vm2397_vm6, %v4515_v45  ;;  %v5676_v2 = vadd.f32 %v4224_v13, %v7665_v51  ;;  %v5614_v12 = vpop.f32.mrb[98].mxu1  ;;  %v4683_v51 = vmax.f32 %v4626_v10, %v4658_v37 }
 0x40b   : > { %v4227_v7 = vpop.f32.mrb[99].mxu1 }
 0x40c   : > { %v4454_v25 = vadd.f32 %v5676_v2, %v7696_v31  ;;  %v5678_v15 = vadd.f32 %v4227_v7, %v7667_v48 }
 0x40e   : > { %v4518_v54 = vmax.f32 %v4454_v25, 0.0  ;;  %v4455_v17 = vadd.f32 %v5678_v15, %v7696_v31 }
 0x410   : > { %4582 = vst.msk [vmem:[#allocation4 + $0x100] sm:$0xff] %vm2397_vm6, %v4518_v54  ;;  %v4519_v8 = vmax.f32 %v4455_v17, 0.0  ;;  %v5617_v19 = vpop.f32.mrb[100].mxu1 }
 0x411   : > { %v4628_v32 = vld [vmem:[#allocation4 + $0xe0] ss:$2 sm:$0xff]  ;;  %v4660_v20 = vld [vmem:[#allocation4 + $0xe1] ss:$2 sm:$0xff]  ;;  %v4240_v16 = vpop.f32.mrb[101].mxu1 }
 0x412   : > { %v4684_v26 = vmax.f32 %v4628_v32, %v4660_v20  ;;  %4583 = vst.msk [vmem:[#allocation4 + $0x108] sm:$0xff] %vm2397_vm6, %v4519_v8  ;;  %v5680_v40 = vadd.f32 %v4240_v16, %v7669_v24  ;;  %v5618_v48 = vpop.f32.mrb[102].mxu1 }
 0x413   : > { %v4243_v58 = vpop.f32.mrb[103].mxu1 }
 0x414   : > { %v4696_v52 = vmax.f32 %v4683_v51, %v4684_v26  ;;  %v4458_v6 = vadd.f32 %v5680_v40, %v7696_v31  ;;  %v5682_v49 = vadd.f32 %v4243_v58, %v7671_v44 }
 0x416   : > { %5033 = vst.msk [vmem:[%s7578_s27 + $0x41] sm:$0xff] %vm2397_vm6, %v4696_v52  ;;  %v4522_v9 = vmax.f32 %v4458_v6, 0.0  ;;  %v4459_v29 = vadd.f32 %v5682_v49, %v7696_v31 }
 0x418   : > { %4586 = vst.msk [vmem:[#allocation4 + $0x120] sm:$0xff] %vm2397_vm6, %v4522_v9  ;;  %v4523_v34 = vmax.f32 %v4459_v29, 0.0  ;;  %v5621_v42 = vpop.f32.mrb[104].mxu1 }
 0x419   : > { %v4256_v21 = vpop.f32.mrb[105].mxu1  ;;  %v4630_v57 = vld [vmem:[#allocation4 + $0x100] ss:$2 sm:$0xff]  ;;  %v4662_v62 = vld [vmem:[#allocation4 + $0x101] ss:$2 sm:$0xff] }
 0x41a   : > { %4587 = vst.msk [vmem:[#allocation4 + $0x128] sm:$0xff] %vm2397_vm6, %v4523_v34  ;;  %v5684_v24 = vadd.f32 %v4256_v21, %v7673_v43  ;;  %v5622_v46 = vpop.f32.mrb[106].mxu1  ;;  %v4685_v43 = vmax.f32 %v4630_v57, %v4662_v62 }
 0x41b   : > { %v4259_v41 = vpop.f32.mrb[107].mxu1 }
 0x41c   : > { %v4462_v56 = vadd.f32 %v5684_v24, %v7696_v31  ;;  %v5686_v44 = vadd.f32 %v4259_v41, %v7675_v63 }
 0x41e   : > { %v4526_v35 = vmax.f32 %v4462_v56, 0.0  ;;  %v4463_v53 = vadd.f32 %v5686_v44, %v7696_v31 }
 0x420   : > { %4590 = vst.msk [vmem:[#allocation4 + $0x140] sm:$0xff] %vm2397_vm6, %v4526_v35  ;;  %v4527_v4 = vmax.f32 %v4463_v53, 0.0  ;;  %v5625_v59 = vpop.f32.mrb[108].mxu1 }
 0x421   : > { %v4632_v33 = vld [vmem:[#allocation4 + $0x120] ss:$2 sm:$0xff]  ;;  %v4664_v3 = vld [vmem:[#allocation4 + $0x121] ss:$2 sm:$0xff]  ;;  %v4272_v55 = vpop.f32.mrb[109].mxu1 }
 0x422   : > { %v4686_v11 = vmax.f32 %v4632_v33, %v4664_v3  ;;  %4591 = vst.msk [vmem:[#allocation4 + $0x148] sm:$0xff] %vm2397_vm6, %v4527_v4  ;;  %v5688_v22 = vadd.f32 %v4272_v55, %v7677_v1  ;;  %v5626_v63 = vpop.f32.mrb[110].mxu1 }
 0x423   : > { %v4275_v27 = vpop.f32.mrb[111].mxu1 }
 0x424   : > { %v4697_v28 = vmax.f32 %v4685_v43, %v4686_v11  ;;  %v4466_v30 = vadd.f32 %v5688_v22, %v7696_v31  ;;  %v5690_v38 = vadd.f32 %v4275_v27, %v7679_v47 }
 0x426   : > { %5034 = vst.msk [vmem:[%s7578_s27 + $0x51] sm:$0xff] %vm2397_vm6, %v4697_v28  ;;  %v4530_v50 = vmax.f32 %v4466_v30, 0.0  ;;  %v4467_v45 = vadd.f32 %v5690_v38, %v7696_v31 }
 0x428   : > { %4594 = vst.msk [vmem:[#allocation4 + $0x160] sm:$0xff] %vm2397_vm6, %v4530_v50  ;;  %v4531_v18 = vmax.f32 %v4467_v45, 0.0  ;;  %v5629_v13 = vpop.f32.mrb[112].mxu1 }
 0x429   : > { %v4288_v2 = vpop.f32.mrb[113].mxu1  ;;  %v4634_v17 = vld [vmem:[#allocation4 + $0x140] ss:$2 sm:$0xff]  ;;  %v4666_v10 = vld [vmem:[#allocation4 + $0x141] ss:$2 sm:$0xff] }
 0x42a   : > { %4595 = vst.msk [vmem:[#allocation4 + $0x168] sm:$0xff] %vm2397_vm6, %v4531_v18  ;;  %v5692_v1 = vadd.f32 %v4288_v2, %v7681_v0  ;;  %v5630_v12 = vpop.f32.mrb[114].mxu1  ;;  %v4687_v0 = vmax.f32 %v4634_v17, %v4666_v10 }
 0x42b   : > { %v4291_v7 = vpop.f32.mrb[115].mxu1 }
 0x42c   : > { %v4470_v25 = vadd.f32 %v5692_v1, %v7696_v31  ;;  %v5694_v47 = vadd.f32 %v4291_v7, %v7683_v36 }
 0x42e   : > { %v4534_v15 = vmax.f32 %v4470_v25, 0.0  ;;  %v4471_v54 = vadd.f32 %v5694_v47, %v7696_v31 }
 0x430   : > { %4598 = vst.msk [vmem:[#allocation4 + $0x180] sm:$0xff] %vm2397_vm6, %v4534_v15  ;;  %v4535_v37 = vmax.f32 %v4471_v54, 0.0  ;;  %v5633_v8 = vpop.f32.mrb[116].mxu1 }
 0x431   : > { %v4636_v19 = vld [vmem:[#allocation4 + $0x160] ss:$2 sm:$0xff]  ;;  %v4668_v32 = vld [vmem:[#allocation4 + $0x161] ss:$2 sm:$0xff]  ;;  %v4304_v20 = vpop.f32.mrb[117].mxu1 }
 0x432   : > { %v4688_v16 = vmax.f32 %v4636_v19, %v4668_v32  ;;  %4599 = vst.msk [vmem:[#allocation4 + $0x188] sm:$0xff] %vm2397_vm6, %v4535_v37  ;;  %v5696_v51 = vadd.f32 %v4304_v20, %v7685_v60  ;;  %v5634_v36 = vpop.f32.mrb[118].mxu1 }
 0x433   : > { %v4307_v26 = vpop.f32.mrb[119].mxu1 }
 0x434   : > { %v4698_v40 = vmax.f32 %v4687_v0, %v4688_v16  ;;  %v4474_v48 = vadd.f32 %v5696_v51, %v7696_v31  ;;  %v5698_v58 = vadd.f32 %v4307_v26, %v7687_v5 }
 0x436   : > { %5035 = vst.msk [vmem:[%s7578_s27 + $0x61] sm:$0xff] %vm2397_vm6, %v4698_v40  ;;  %v4538_v52 = vmax.f32 %v4474_v48, 0.0  ;;  %v4475_v6 = vadd.f32 %v5698_v58, %v7696_v31 }
 0x438   : > { %4602 = vst.msk [vmem:[#allocation4 + $0x1a0] sm:$0xff] %vm2397_vm6, %v4538_v52  ;;  %v4539_v49 = vmax.f32 %v4475_v6, 0.0  ;;  %v5637_v9 = vpop.f32.mrb[120].mxu1 }
 0x439   : > { %v4320_v29 = vpop.f32.mrb[121].mxu1  ;;  %v4638_v41 = vld [vmem:[#allocation4 + $0x180] ss:$2 sm:$0xff]  ;;  %v4670_v56 = vld [vmem:[#allocation4 + $0x181] ss:$2 sm:$0xff] }
 0x43a   : > { %4603 = vst.msk [vmem:[#allocation4 + $0x1a8] sm:$0xff] %vm2397_vm6, %v4539_v49  ;;  %v5700_v60 = vadd.f32 %v4320_v29, %v7689_v14  ;;  %v5638_v34 = vpop.f32.mrb[122].mxu1  ;;  %v4689_v14 = vmax.f32 %v4638_v41, %v4670_v56 }
 0x43b   : > { %v4323_v42 = vpop.f32.mrb[123].mxu1 }
 0x43c   : > { %v4478_v21 = vadd.f32 %v5700_v60, %v7696_v31  ;;  %v5702_v5 = vadd.f32 %v4323_v42, %v7691_v39 }
 0x43e   : > { %v4542_v24 = vmax.f32 %v4478_v21, 0.0  ;;  %v4479_v46 = vadd.f32 %v5702_v5, %v7696_v31 }
 0x440   : > { %4606 = vst.msk [vmem:[#allocation4 + $0x1c0] sm:$0xff] %vm2397_vm6, %v4542_v24  ;;  %v4543_v44 = vmax.f32 %v4479_v46, 0.0  ;;  %v5641_v35 = vpop.f32.mrb[124].mxu1 }
 0x441   : > { %v4640_v53 = vld [vmem:[#allocation4 + $0x1a0] ss:$2 sm:$0xff]  ;;  %v4672_v57 = vld [vmem:[#allocation4 + $0x1a1] ss:$2 sm:$0xff]  ;;  %v4336_v62 = vpop.f32.mrb[125].mxu1 }
 0x442   : > { %v4690_v4 = vmax.f32 %v4640_v53, %v4672_v57  ;;  %4607 = vst.msk [vmem:[#allocation4 + $0x1c8] sm:$0xff] %vm2397_vm6, %v4543_v44  ;;  %v5704_v59 = vadd.f32 %v4336_v62, %v7698_v61  ;;  %v5642_v39 = vpop.f32.mrb[126].mxu1 }
 0x443   : > { %v4339_v33 = vpop.f32.mrb[127].mxu1 }
 0x444   : > { %v4699_v3 = vmax.f32 %v4689_v14, %v4690_v4  ;;  %v4482_v55 = vadd.f32 %v5704_v59, %v7696_v31  ;;  %v5706_v43 = vadd.f32 %v4339_v33, %v7701_v23 }
 0x446   : > { %5036 = vst.msk [vmem:[%s7578_s27 + $0x71] sm:$0xff] %vm2397_vm6, %v4699_v3  ;;  %v4546_v11 = vmax.f32 %v4482_v55, 0.0  ;;  %v4483_v22 = vadd.f32 %v5706_v43, %v7696_v31 }
 0x448   : > { %4610 = vst.msk [vmem:[#allocation4 + $0x1e0] sm:$0xff] %vm2397_vm6, %v4546_v11  ;;  %v4547_v63 = vmax.f32 %v4483_v22, 0.0 }
 0x449   : > { %v4642_v27 = vld [vmem:[#allocation4 + $0x1c0] ss:$2 sm:$0xff]  ;;  %v4674_v61 = vld [vmem:[#allocation4 + $0x1c1] ss:$2 sm:$0xff] }
 0x44a   : > { %4611 = vst.msk [vmem:[#allocation4 + $0x1e8] sm:$0xff] %vm2397_vm6, %v4547_v63  ;;  %v4691_v38 = vmax.f32 %v4642_v27, %v4674_v61 }
 0x451   : > { %v4644_v28 = vld [vmem:[#allocation4 + $0x1e0] ss:$2 sm:$0xff]  ;;  %v4676_v30 = vld [vmem:[#allocation4 + $0x1e1] ss:$2 sm:$0xff] }
 0x452   : > { %v4692_v50 = vmax.f32 %v4644_v28, %v4676_v30 }
 0x454   : > { %v4700_v45 = vmax.f32 %v4691_v38, %v4692_v50 }
 0x456   : > { %5037 = vst.msk [vmem:[%s7578_s27 + $0x81] sm:$0xff] %vm2397_vm6, %v4700_v45 }
 0x457 PF: > { %s15_s18 = sadd.s32 1, %s5966_s18  }
 0x458   : > { %p12_p4 = scmp.ge.s32.totalorder %s15_s18, 4  }
 0x45a   :  { %14 = sbr.rel (!%p12_p4) target bundleno = 1 (0x1), region = 107 }

</bundles_post_ra>
